<compile_context>
chip_gen: v7x
topology: tpu7x:2x2x1
jax: 0.10.0
libtpu: 0.0.40
codegen_flags: <defaults>
</compile_context>

<pallas_src>
import functools

import jax
import jax.numpy as jnp
from jax.experimental import pallas as pl
from jax.experimental.pallas import tpu as pltpu

BN_EPS = 1e-5
LEAKY_SLOPE = 0.1


# ----------------------------- kernel helpers ------------------------------


def _maxpool2(acc, nt, h, w, c, stride):
    """MaxPool2d(kernel=2, stride=stride) on conv rows ordered (n, h, w).

    acc: (nt*h*w, c) f32.  Returns (nt, ho, wo, c) f32.
    """
    if stride == 2:
        hh, wh = h // 2, w // 2
        y = jnp.max(acc.reshape(nt * h * w // 2, 2, c), axis=1)      # pool W
        y = jnp.max(y.reshape(nt * hh, 2, wh, c), axis=1)            # pool H
        return y.reshape(nt, hh, wh, c)
    # kernel=2, stride=1 -> (h-1, w-1)
    y = acc.reshape(nt, h, w, c)
    y = jnp.maximum(y[:, :, :w - 1, :], y[:, :, 1:, :])              # pool W
    y = jnp.maximum(y[:, :h - 1, :, :], y[:, 1:, :, :])              # pool H
    return y


def _conv3x3(xp, w_ref, nt, h, w):
    """3x3 'same' conv as 9 whole-slab MXU GEMMs with f32 accumulation.

    xp:    (nt, h+2, w+2, cin) bf16 zero-padded activations (value).
    w_ref: (3, 3, cin, cout)   bf16 BN-folded weights.
    Returns (nt*h*w, cout) f32, rows ordered (n, h, w).
    """
    cin = xp.shape[-1]
    m = nt * h * w
    acc = None
    for kh in range(3):
        for kw in range(3):
            slab = xp[:, kh:kh + h, kw:kw + w, :].reshape(m, cin)
            d = jnp.dot(slab, w_ref[kh, kw],
                        preferred_element_type=jnp.float32)
            acc = d if acc is None else acc + d
    # TODO(synk): fold kw (K = 3*cin) or the full 3x3 into the MXU contraction
    # to cut the 9 dots / 8 f32 accumulate adds further.
    return acc


def _leaky(y):
    return jnp.where(y >= 0, y, LEAKY_SLOPE * y)


# --------------------------------- kernel ----------------------------------


def _r2d2_fused_kernel(x1_ref, w1_ref, w2_ref, w3_ref, w4_ref,
                       s1_ref, s2_ref, s3_ref, s4_ref,
                       b3_ref, b4_ref,
                       p1_ref, p2_ref, p3_ref, *, h0, w0):
    """Fused forward of all four R2D2 conv blocks for one batch tile.

    x1_ref : (nt, h0*w0, 9*cin0) bf16  im2col'd block-1 input
    wX_ref : bf16 BN-folded conv weights, channels zero-padded to x128
    sX_ref : (1, coutX) f32            (bias - running_mean) * bn_scale
    b3_ref : (nt, h3*w3, c3) f32       block-3 pooled activation (NHWC order)
    b4_ref : (nt, h4*w4, c4) f32       block-4 pooled output (NHWC order)
    pX_ref : f32 VMEM scratch holding the zero-padded input of block X+1
    """
    nt = x1_ref.shape[0]
    h1, w1 = h0 // 2, w0 // 2
    h2, w2 = h1 // 2, w1 // 2
    h3, w3 = h2 // 2, w2 // 2

    # Re-zero the padded scratch every step (cheap: a few 100 KB of VMEM
    # stores).  Doing it unconditionally keeps the halos correct when the
    # "parallel" batch axis is split across TensorCores (a program_id==0 init
    # would only ever run on core 0).
    p1_ref[...] = jnp.zeros_like(p1_ref)
    p2_ref[...] = jnp.zeros_like(p2_ref)
    p3_ref[...] = jnp.zeros_like(p3_ref)

    # ---- block 1: single im2col GEMM (K = 9*cin0) + pool/2 + LeakyReLU ----
    k1 = x1_ref.shape[2]
    c1 = w1_ref.shape[1]
    acc = jnp.dot(x1_ref[...].reshape(nt * h0 * w0, k1), w1_ref[...],
                  preferred_element_type=jnp.float32)
    # Per-channel shift (conv bias + BN, folded) commutes with max -> applied
    # after pooling (4x fewer adds).  LeakyReLU follows MaxPool as in torch.
    y = _leaky(_maxpool2(acc, nt, h0, w0, c1, stride=2) + s1_ref[...])
    p1_ref[:, 1:h1 + 1, 1:w1 + 1, :] = y

    # ---- block 2 ----
    c2 = w2_ref.shape[3]
    acc = _conv3x3(p1_ref[...].astype(jnp.bfloat16), w2_ref, nt, h1, w1)
    y = _leaky(_maxpool2(acc, nt, h1, w1, c2, stride=2) + s2_ref[...])
    p2_ref[:, 1:h2 + 1, 1:w2 + 1, :] = y

    # ---- block 3 (its pooled activation is the first half of the embedding) -
    c3 = w3_ref.shape[3]
    acc = _conv3x3(p2_ref[...].astype(jnp.bfloat16), w3_ref, nt, h2, w2)
    y = _leaky(_maxpool2(acc, nt, h2, w2, c3, stride=2) + s3_ref[...])
    b3_ref[...] = y.reshape(nt, h3 * w3, c3)
    p3_ref[:, 1:h3 + 1, 1:w3 + 1, :] = y

    # ---- block 4: MaxPool2d(2, stride=1), no LeakyReLU ----
    c4 = w4_ref.shape[3]
    acc = _conv3x3(p3_ref[...].astype(jnp.bfloat16), w4_ref, nt, h3, w3)
    y = _maxpool2(acc, nt, h3, w3, c4, stride=1) + s4_ref[...]
    b4_ref[...] = y.reshape(nt, (h3 - 1) * (w3 - 1), c4)


# -------------------------------- wrapper -----------------------------------


def _round_up(x, m):
    return (x + m - 1) // m * m


def _pick_batch_tile(n, rows_per_sample, max_rows=4096):
    """Largest divisor nt of n with nt*rows <= max_rows that keeps >= 2 grid
    steps (so the 'parallel' axis can split across v7x's two TensorCores and
    DMA overlaps compute).  max_rows=4096 keeps the fused kernel well inside a
    32 MiB scoped-VMEM budget on every chip (v7x: 64 MiB physical)."""
    best = 1
    for d in range(1, n + 1):
        if n % d:
            continue
        if d * rows_per_sample > max_rows:
            continue
        if n >= 2 and n // d < 2:
            continue
        best = d
    return best


def _fold_bn(p):
    """Fold eval-mode BatchNorm2d(affine=False) into the conv weight / bias."""
    scale = 1.0 / jnp.sqrt(p["var"] + BN_EPS)
    w = (p["w"] * scale).astype(jnp.bfloat16)                    # (3,3,ci,co)
    shift = ((p["b"] - p["mean"]) * scale).astype(jnp.float32)   # (co,)
    return w, shift


def r2d2_embedding_no_affine(x_nchw, params):
    """Forward of R2D2Embedding_no_affine (eval mode). x_nchw: (N, Cin, H, W)."""
    # TODO(synk): train-mode Dropout (keep_prob=0.9, blocks 3/4) and
    # batch-statistics BN are not implemented (eval-mode forward only).
    n, cin0, h0, w0 = x_nchw.shape
    assert h0 % 8 == 0 and w0 % 8 == 0 and h0 >= 16 and w0 >= 16, \
        "fused kernel expects three even stride-2 poolings"
    h3, w3 = h0 // 8, w0 // 8

    couts = [p["w"].shape[3] for p in params]
    cpads = [_round_up(c, 128) for c in couts]   # 96->128, 192->256, 384, 512

    # Block-1 im2col in the wrapper (trivially cheap, fused by XLA with the
    # NCHW->NHWC transpose and the bf16 cast): the kernel's first GEMM is a
    # single K=9*cin0 dot instead of 9 lane-sparse K=cin0 dots.
    x_nhwc = jnp.transpose(x_nchw, (0, 2, 3, 1))
    xpad = jnp.pad(x_nhwc, ((0, 0), (1, 1), (1, 1), (0, 0)))
    cols = [xpad[:, kh:kh + h0, kw:kw + w0, :]
            for kh in range(3) for kw in range(3)]
    x1 = jnp.concatenate(cols, axis=-1).reshape(n, h0 * w0, 9 * cin0)
    x1 = x1.astype(jnp.bfloat16)

    # Fold BN into the weights, zero-pad channels to multiples of 128.
    w1f, s1f = _fold_bn(params[0])
    w1 = jnp.zeros((9 * cin0, cpads[0]), jnp.bfloat16)
    w1 = w1.at[:, :couts[0]].set(w1f.reshape(9 * cin0, couts[0]))
    weights = [w1]
    shifts = [jnp.zeros((1, cpads[0]), jnp.float32).at[:, :couts[0]].set(
        s1f[None])]
    for bi in (1, 2, 3):
        wf, sf = _fold_bn(params[bi])
        ci, co = params[bi]["w"].shape[2], params[bi]["w"].shape[3]
        wp = jnp.zeros((3, 3, cpads[bi - 1], cpads[bi]), jnp.bfloat16)
        weights.append(wp.at[:, :, :ci, :co].set(wf))
        shifts.append(
            jnp.zeros((1, cpads[bi]), jnp.float32).at[:, :co].set(sf[None]))

    nt = _pick_batch_tile(n, h0 * w0)
    p3n, p4n = h3 * w3, (h3 - 1) * (w3 - 1)
    kernel = functools.partial(_r2d2_fused_kernel, h0=h0, w0=w0)

    b3, b4 = pl.pallas_call(
        kernel,
        out_shape=(jax.ShapeDtypeStruct((n, p3n, cpads[2]), jnp.float32),
                   jax.ShapeDtypeStruct((n, p4n, cpads[3]), jnp.float32)),
        grid=(n // nt,),
        in_specs=[
            pl.BlockSpec((nt, h0 * w0, 9 * cin0), lambda i: (i, 0, 0)),
            # Weights / shifts: constant index_map -> fetched once at step 0
            # and resident in VMEM for the whole grid (no per-step re-DMA).
            # TODO(synk): pipeline_mode=pl.Buffered(1) would also drop the
            # second (unused) weight buffer; VMEM fits comfortably either way.
            pl.BlockSpec((9 * cin0, cpads[0]), lambda i: (0, 0)),
            pl.BlockSpec((3, 3, cpads[0], cpads[1]), lambda i: (0, 0, 0, 0)),
            pl.BlockSpec((3, 3, cpads[1], cpads[2]), lambda i: (0, 0, 0, 0)),
            pl.BlockSpec((3, 3, cpads[2], cpads[3]), lambda i: (0, 0, 0, 0)),
            pl.BlockSpec((1, cpads[0]), lambda i: (0, 0)),
            pl.BlockSpec((1, cpads[1]), lambda i: (0, 0)),
            pl.BlockSpec((1, cpads[2]), lambda i: (0, 0)),
            pl.BlockSpec((1, cpads[3]), lambda i: (0, 0)),
        ],
        out_specs=(
            pl.BlockSpec((nt, p3n, cpads[2]), lambda i: (i, 0, 0)),
            pl.BlockSpec((nt, p4n, cpads[3]), lambda i: (i, 0, 0)),
        ),
        scratch_shapes=[
            pltpu.VMEM((nt, h0 // 2 + 2, w0 // 2 + 2, cpads[0]), jnp.float32),
            pltpu.VMEM((nt, h0 // 4 + 2, w0 // 4 + 2, cpads[1]), jnp.float32),
            pltpu.VMEM((nt, h3 + 2, w3 + 2, cpads[2]), jnp.float32),
        ],
        compiler_params=pltpu.CompilerParams(
            dimension_semantics=("parallel",),
            vmem_limit_bytes=32 * 1024 * 1024),
    )(x1, *weights, *shifts)

    # Drop channel padding, flatten in torch's NCHW .view(N, -1) order, concat.
    b3 = jnp.transpose(b3[..., :couts[2]], (0, 2, 1)).reshape(n, -1)
    b4 = jnp.transpose(b4[..., :couts[3]], (0, 2, 1)).reshape(n, -1)
    return jnp.concatenate([b3, b4], axis=1)


# ------------------------------ validation ----------------------------------

# block configs: (pool_stride, retain_activation)
_BLOCK_CFG = [(2, True), (2, True), (2, True), (1, False)]


def _r2d2_block_reference(x_nhwc, w, b, mean, var, *, pool_stride,
                          retain_activation):
    """Pure-JAX f32 reference (same eval-mode semantics) for validation."""
    y = jax.lax.conv_general_dilated(
        x_nhwc, w, window_strides=(1, 1), padding="SAME",
        dimension_numbers=("NHWC", "HWIO", "NHWC"),
        precision=jax.lax.Precision.HIGHEST)
    y = (y + b - mean) / jnp.sqrt(var + BN_EPS)
    y = jax.lax.reduce_window(y, -jnp.inf, jax.lax.max,
                              (1, 2, 2, 1), (1, pool_stride, pool_stride, 1),
                              "VALID")
    if retain_activation:
        y = jnp.where(y >= 0, y, LEAKY_SLOPE * y)
    return y


if __name__ == "__main__":
    key = jax.random.PRNGKey(0)
    N, H0, W0 = 2, 16, 16
    dims = [(3, 96), (96, 192), (192, 384), (384, 512)]  # x_dim,h1,h2,h3,z_dim

    key, kx = jax.random.split(key)
    x_nchw = jax.random.normal(kx, (N, dims[0][0], H0, W0), jnp.float32)

    params = []
    for (ci, co) in dims:
        key, kw_, kb, km, kv = jax.random.split(key, 5)
        params.append(dict(
            w=jax.random.normal(kw_, (3, 3, ci, co), jnp.float32)
              * (1.0 / jnp.sqrt(9.0 * ci)),
            b=jax.random.normal(kb, (co,), jnp.float32) * 0.05,
            mean=jax.random.normal(km, (co,), jnp.float32) * 0.1,
            var=jax.random.uniform(kv, (co,), jnp.float32,
                                   minval=0.5, maxval=1.5),
        ))

    fwd = jax.jit(r2d2_embedding_no_affine)
    emb = jax.block_until_ready(fwd(x_nchw, params))

    # Pure-JAX f32 reference of the same eval-mode forward (the kernel uses
    # bf16 MXU operands with f32 accumulation).
    h = jnp.transpose(x_nchw, (0, 2, 3, 1))
    refs = []
    for p, (ps, ra) in zip(params, _BLOCK_CFG):
        h = _r2d2_block_reference(h, p["w"], p["b"], p["mean"], p["var"],
                                  pool_stride=ps, retain_activation=ra)
        refs.append(h)

    def _flat_nchw(t):
        return jnp.transpose(t, (0, 3, 1, 2)).reshape(t.shape[0], -1)

    emb_ref = jnp.concatenate([_flat_nchw(refs[2]), _flat_nchw(refs[3])],
                              axis=1)

    assert emb.shape == (N, 384 * 2 * 2 + 512 * 1 * 1), emb.shape
    assert bool(jnp.all(jnp.isfinite(emb)))
    assert jnp.allclose(emb, emb_ref, rtol=5e-2, atol=5e-2), float(
        jnp.max(jnp.abs(emb - emb_ref)))
    print("KERNEL_OK")
</pallas_src>

<mosaic_0001>
module attributes {stable_mosaic.version = 11 : i64} {
  func.func @_r2d2_fused_kernel(%arg0: i32, %arg1: memref<1x256x27xbf16, #tpu.memory_space<vmem>>, %arg2: memref<27x128xbf16, #tpu.memory_space<vmem>>, %arg3: memref<3x3x128x256xbf16, #tpu.memory_space<vmem>>, %arg4: memref<3x3x256x384xbf16, #tpu.memory_space<vmem>>, %arg5: memref<3x3x384x512xbf16, #tpu.memory_space<vmem>>, %arg6: memref<1x128xf32, #tpu.memory_space<vmem>>, %arg7: memref<1x256xf32, #tpu.memory_space<vmem>>, %arg8: memref<1x384xf32, #tpu.memory_space<vmem>>, %arg9: memref<1x512xf32, #tpu.memory_space<vmem>>, %arg10: memref<1x4x384xf32, #tpu.memory_space<vmem>>, %arg11: memref<1x1x512xf32, #tpu.memory_space<vmem>>, %arg12: memref<1x10x10x128xf32, #tpu.memory_space<vmem>>, %arg13: memref<1x6x6x256xf32, #tpu.memory_space<vmem>>, %arg14: memref<1x4x4x384xf32, #tpu.memory_space<vmem>>) attributes {dimension_semantics = [#tpu.dimension_semantics<parallel>], iteration_bounds = array<i64: 2>, scalar_prefetch = 0 : i64, scratch_operands = 3 : i64, tpu.core_type = #tpu.core_type<tc>, window_params = [{transform_indices = @transform_0, window_bounds = array<i64: 1, 256, 27>}, {pipeline_mode = #tpu.pipeline_mode<synchronous>, transform_indices = @transform_1, window_bounds = array<i64: 27, 128>}, {pipeline_mode = #tpu.pipeline_mode<synchronous>, transform_indices = @transform_2, window_bounds = array<i64: 3, 3, 128, 256>}, {pipeline_mode = #tpu.pipeline_mode<synchronous>, transform_indices = @transform_3, window_bounds = array<i64: 3, 3, 256, 384>}, {pipeline_mode = #tpu.pipeline_mode<synchronous>, transform_indices = @transform_4, window_bounds = array<i64: 3, 3, 384, 512>}, {pipeline_mode = #tpu.pipeline_mode<synchronous>, transform_indices = @transform_5, window_bounds = array<i64: 1, 128>}, {pipeline_mode = #tpu.pipeline_mode<synchronous>, transform_indices = @transform_6, window_bounds = array<i64: 1, 256>}, {pipeline_mode = #tpu.pipeline_mode<synchronous>, transform_indices = @transform_7, window_bounds = array<i64: 1, 384>}, {pipeline_mode = #tpu.pipeline_mode<synchronous>, transform_indices = @transform_8, window_bounds = array<i64: 1, 512>}, {transform_indices = @transform_9, window_bounds = array<i64: 1, 4, 384>}, {transform_indices = @transform_10, window_bounds = array<i64: 1, 1, 512>}]} {
    %cst = arith.constant 0.000000e+00 : f32
    %0 = vector.broadcast %cst : f32 to vector<1x10x10x128xf32>
    %c0 = arith.constant 0 : index
    %c0_0 = arith.constant 0 : index
    %c0_1 = arith.constant 0 : index
    %c0_2 = arith.constant 0 : index
    %1 = vector.load %arg12[%c0, %c0_0, %c0_1, %c0_2] : memref<1x10x10x128xf32, #tpu.memory_space<vmem>>, vector<1x10x10x128xf32>
    tpu.vector_store %arg12[%c0, %c0_0, %c0_1, %c0_2], %0 {strides = array<i32>} : memref<1x10x10x128xf32, #tpu.memory_space<vmem>>, vector<1x10x10x128xf32>,
    %cst_3 = arith.constant 0.000000e+00 : f32
    %2 = vector.broadcast %cst_3 : f32 to vector<1x6x6x256xf32>
    %c0_4 = arith.constant 0 : index
    %c0_5 = arith.constant 0 : index
    %c0_6 = arith.constant 0 : index
    %c0_7 = arith.constant 0 : index
    %3 = vector.load %arg13[%c0_4, %c0_5, %c0_6, %c0_7] : memref<1x6x6x256xf32, #tpu.memory_space<vmem>>, vector<1x6x6x256xf32>
    tpu.vector_store %arg13[%c0_4, %c0_5, %c0_6, %c0_7], %2 {strides = array<i32>} : memref<1x6x6x256xf32, #tpu.memory_space<vmem>>, vector<1x6x6x256xf32>,
    %cst_8 = arith.constant 0.000000e+00 : f32
    %4 = vector.broadcast %cst_8 : f32 to vector<1x4x4x384xf32>
    %c0_9 = arith.constant 0 : index
    %c0_10 = arith.constant 0 : index
    %c0_11 = arith.constant 0 : index
    %c0_12 = arith.constant 0 : index
    %5 = vector.load %arg14[%c0_9, %c0_10, %c0_11, %c0_12] : memref<1x4x4x384xf32, #tpu.memory_space<vmem>>, vector<1x4x4x384xf32>
    tpu.vector_store %arg14[%c0_9, %c0_10, %c0_11, %c0_12], %4 {strides = array<i32>} : memref<1x4x4x384xf32, #tpu.memory_space<vmem>>, vector<1x4x4x384xf32>,
    %c0_13 = arith.constant 0 : index
    %c0_14 = arith.constant 0 : index
    %c0_15 = arith.constant 0 : index
    %6 = vector.load %arg1[%c0_13, %c0_14, %c0_15] : memref<1x256x27xbf16, #tpu.memory_space<vmem>>, vector<1x256x27xbf16>
    %7 = vector.shape_cast %6 : vector<1x256x27xbf16> to vector<256x27xbf16>
    %c0_16 = arith.constant 0 : index
    %c0_17 = arith.constant 0 : index
    %8 = vector.load %arg2[%c0_16, %c0_17] : memref<27x128xbf16, #tpu.memory_space<vmem>>, vector<27x128xbf16>
    %cst_18 = arith.constant dense<0.000000e+00> : vector<256x128xf32>
    %9 = tpu.matmul %7, %8, %cst_18 {dimension_numbers = #tpu.dot_dimension_numbers<[1], [0], [0], [1], [0, 0, 1, 1], [], []>} : vector<256x27xbf16>, vector<27x128xbf16>, vector<256x128xf32> -> vector<256x128xf32>
    %10 = vector.shape_cast %9 : vector<256x128xf32> to vector<128x2x128xf32>
    %cst_19 = arith.constant dense<0xFF800000> : vector<128x128xf32>
    %11 = vector.multi_reduction <maximumf>, %10, %cst_19 [1] : vector<128x2x128xf32> to vector<128x128xf32>
    %12 = vector.shape_cast %11 : vector<128x128xf32> to vector<8x2x8x128xf32>
    %cst_20 = arith.constant dense<0xFF800000> : vector<8x8x128xf32>
    %13 = vector.multi_reduction <maximumf>, %12, %cst_20 [1] : vector<8x2x8x128xf32> to vector<8x8x128xf32>
    %14 = vector.shape_cast %13 : vector<8x8x128xf32> to vector<1x8x8x128xf32>
    %c0_21 = arith.constant 0 : index
    %c0_22 = arith.constant 0 : index
    %15 = vector.load %arg6[%c0_21, %c0_22] : memref<1x128xf32, #tpu.memory_space<vmem>>, vector<1x128xf32>
    %16 = vector.shape_cast %15 : vector<1x128xf32> to vector<1x1x1x128xf32>
    %17 = vector.broadcast %16 : vector<1x1x1x128xf32> to vector<1x8x8x128xf32>
    %18 = arith.addf %14, %17 : vector<1x8x8x128xf32>
    %cst_23 = arith.constant 0.000000e+00 : f32
    %19 = vector.broadcast %cst_23 : f32 to vector<1x8x8x128xf32>
    %20 = arith.cmpf oge, %18, %19 : vector<1x8x8x128xf32>
    %cst_24 = arith.constant 1.000000e-01 : f32
    %21 = vector.broadcast %cst_24 : f32 to vector<1x8x8x128xf32>
    %22 = arith.mulf %21, %18 : vector<1x8x8x128xf32>
    %23 = arith.select %20, %18, %22 : vector<1x8x8x128xi1>, vector<1x8x8x128xf32>
    %c0_25 = arith.constant 0 : index
    %c1 = arith.constant 1 : index
    %c1_26 = arith.constant 1 : index
    %c0_27 = arith.constant 0 : index
    %24 = vector.load %arg12[%c0_25, %c1, %c1_26, %c0_27] : memref<1x10x10x128xf32, #tpu.memory_space<vmem>>, vector<1x8x8x128xf32>
    tpu.vector_store %arg12[%c0_25, %c1, %c1_26, %c0_27], %23 {strides = array<i32>} : memref<1x10x10x128xf32, #tpu.memory_space<vmem>>, vector<1x8x8x128xf32>,
    %c0_28 = arith.constant 0 : index
    %c0_29 = arith.constant 0 : index
    %c0_30 = arith.constant 0 : index
    %c0_31 = arith.constant 0 : index
    %25 = vector.load %arg12[%c0_28, %c0_29, %c0_30, %c0_31] : memref<1x10x10x128xf32, #tpu.memory_space<vmem>>, vector<1x10x10x128xf32>
    %26 = arith.truncf %25 : vector<1x10x10x128xf32> to vector<1x10x10x128xbf16>
    %27 = vector.extract_strided_slice %26 {offsets = [0, 0, 0, 0], sizes = [1, 8, 8, 128], strides = [1, 1, 1, 1]} : vector<1x10x10x128xbf16> to vector<1x8x8x128xbf16>
    %28 = vector.shape_cast %27 : vector<1x8x8x128xbf16> to vector<64x128xbf16>
    %c0_32 = arith.constant 0 : index
    %c0_33 = arith.constant 0 : index
    %c0_34 = arith.constant 0 : index
    %c0_35 = arith.constant 0 : index
    %29 = vector.load %arg3[%c0_32, %c0_33, %c0_34, %c0_35] : memref<3x3x128x256xbf16, #tpu.memory_space<vmem>>, vector<1x1x128x256xbf16>
    %30 = vector.shape_cast %29 : vector<1x1x128x256xbf16> to vector<128x256xbf16>
    %cst_36 = arith.constant dense<0.000000e+00> : vector<64x256xf32>
    %31 = tpu.matmul %28, %30, %cst_36 {dimension_numbers = #tpu.dot_dimension_numbers<[1], [0], [0], [1], [0, 0, 1, 1], [], []>} : vector<64x128xbf16>, vector<128x256xbf16>, vector<64x256xf32> -> vector<64x256xf32>
    %32 = vector.extract_strided_slice %26 {offsets = [0, 0, 1, 0], sizes = [1, 8, 8, 128], strides = [1, 1, 1, 1]} : vector<1x10x10x128xbf16> to vector<1x8x8x128xbf16>
    %33 = vector.shape_cast %32 : vector<1x8x8x128xbf16> to vector<64x128xbf16>
    %c0_37 = arith.constant 0 : index
    %c1_38 = arith.constant 1 : index
    %c0_39 = arith.constant 0 : index
    %c0_40 = arith.constant 0 : index
    %34 = vector.load %arg3[%c0_37, %c1_38, %c0_39, %c0_40] : memref<3x3x128x256xbf16, #tpu.memory_space<vmem>>, vector<1x1x128x256xbf16>
    %35 = vector.shape_cast %34 : vector<1x1x128x256xbf16> to vector<128x256xbf16>
    %cst_41 = arith.constant dense<0.000000e+00> : vector<64x256xf32>
    %36 = tpu.matmul %33, %35, %cst_41 {dimension_numbers = #tpu.dot_dimension_numbers<[1], [0], [0], [1], [0, 0, 1, 1], [], []>} : vector<64x128xbf16>, vector<128x256xbf16>, vector<64x256xf32> -> vector<64x256xf32>
    %37 = arith.addf %31, %36 : vector<64x256xf32>
    %38 = vector.extract_strided_slice %26 {offsets = [0, 0, 2, 0], sizes = [1, 8, 8, 128], strides = [1, 1, 1, 1]} : vector<1x10x10x128xbf16> to vector<1x8x8x128xbf16>
    %39 = vector.shape_cast %38 : vector<1x8x8x128xbf16> to vector<64x128xbf16>
    %c0_42 = arith.constant 0 : index
    %c2 = arith.constant 2 : index
    %c0_43 = arith.constant 0 : index
    %c0_44 = arith.constant 0 : index
    %40 = vector.load %arg3[%c0_42, %c2, %c0_43, %c0_44] : memref<3x3x128x256xbf16, #tpu.memory_space<vmem>>, vector<1x1x128x256xbf16>
    %41 = vector.shape_cast %40 : vector<1x1x128x256xbf16> to vector<128x256xbf16>
    %cst_45 = arith.constant dense<0.000000e+00> : vector<64x256xf32>
    %42 = tpu.matmul %39, %41, %cst_45 {dimension_numbers = #tpu.dot_dimension_numbers<[1], [0], [0], [1], [0, 0, 1, 1], [], []>} : vector<64x128xbf16>, vector<128x256xbf16>, vector<64x256xf32> -> vector<64x256xf32>
    %43 = arith.addf %37, %42 : vector<64x256xf32>
    %44 = vector.extract_strided_slice %26 {offsets = [0, 1, 0, 0], sizes = [1, 8, 8, 128], strides = [1, 1, 1, 1]} : vector<1x10x10x128xbf16> to vector<1x8x8x128xbf16>
    %45 = vector.shape_cast %44 : vector<1x8x8x128xbf16> to vector<64x128xbf16>
    %c1_46 = arith.constant 1 : index
    %c0_47 = arith.constant 0 : index
    %c0_48 = arith.constant 0 : index
    %c0_49 = arith.constant 0 : index
    %46 = vector.load %arg3[%c1_46, %c0_47, %c0_48, %c0_49] : memref<3x3x128x256xbf16, #tpu.memory_space<vmem>>, vector<1x1x128x256xbf16>
    %47 = vector.shape_cast %46 : vector<1x1x128x256xbf16> to vector<128x256xbf16>
    %cst_50 = arith.constant dense<0.000000e+00> : vector<64x256xf32>
    %48 = tpu.matmul %45, %47, %cst_50 {dimension_numbers = #tpu.dot_dimension_numbers<[1], [0], [0], [1], [0, 0, 1, 1], [], []>} : vector<64x128xbf16>, vector<128x256xbf16>, vector<64x256xf32> -> vector<64x256xf32>
    %49 = arith.addf %43, %48 : vector<64x256xf32>
    %50 = vector.extract_strided_slice %26 {offsets = [0, 1, 1, 0], sizes = [1, 8, 8, 128], strides = [1, 1, 1, 1]} : vector<1x10x10x128xbf16> to vector<1x8x8x128xbf16>
    %51 = vector.shape_cast %50 : vector<1x8x8x128xbf16> to vector<64x128xbf16>
    %c1_51 = arith.constant 1 : index
    %c1_52 = arith.constant 1 : index
    %c0_53 = arith.constant 0 : index
    %c0_54 = arith.constant 0 : index
    %52 = vector.load %arg3[%c1_51, %c1_52, %c0_53, %c0_54] : memref<3x3x128x256xbf16, #tpu.memory_space<vmem>>, vector<1x1x128x256xbf16>
    %53 = vector.shape_cast %52 : vector<1x1x128x256xbf16> to vector<128x256xbf16>
    %cst_55 = arith.constant dense<0.000000e+00> : vector<64x256xf32>
    %54 = tpu.matmul %51, %53, %cst_55 {dimension_numbers = #tpu.dot_dimension_numbers<[1], [0], [0], [1], [0, 0, 1, 1], [], []>} : vector<64x128xbf16>, vector<128x256xbf16>, vector<64x256xf32> -> vector<64x256xf32>
    %55 = arith.addf %49, %54 : vector<64x256xf32>
    %56 = vector.extract_strided_slice %26 {offsets = [0, 1, 2, 0], sizes = [1, 8, 8, 128], strides = [1, 1, 1, 1]} : vector<1x10x10x128xbf16> to vector<1x8x8x128xbf16>
    %57 = vector.shape_cast %56 : vector<1x8x8x128xbf16> to vector<64x128xbf16>
    %c1_56 = arith.constant 1 : index
    %c2_57 = arith.constant 2 : index
    %c0_58 = arith.constant 0 : index
    %c0_59 = arith.constant 0 : index
    %58 = vector.load %arg3[%c1_56, %c2_57, %c0_58, %c0_59] : memref<3x3x128x256xbf16, #tpu.memory_space<vmem>>, vector<1x1x128x256xbf16>
    %59 = vector.shape_cast %58 : vector<1x1x128x256xbf16> to vector<128x256xbf16>
    %cst_60 = arith.constant dense<0.000000e+00> : vector<64x256xf32>
    %60 = tpu.matmul %57, %59, %cst_60 {dimension_numbers = #tpu.dot_dimension_numbers<[1], [0], [0], [1], [0, 0, 1, 1], [], []>} : vector<64x128xbf16>, vector<128x256xbf16>, vector<64x256xf32> -> vector<64x256xf32>
    %61 = arith.addf %55, %60 : vector<64x256xf32>
    %62 = vector.extract_strided_slice %26 {offsets = [0, 2, 0, 0], sizes = [1, 8, 8, 128], strides = [1, 1, 1, 1]} : vector<1x10x10x128xbf16> to vector<1x8x8x128xbf16>
    %63 = vector.shape_cast %62 : vector<1x8x8x128xbf16> to vector<64x128xbf16>
    %c2_61 = arith.constant 2 : index
    %c0_62 = arith.constant 0 : index
    %c0_63 = arith.constant 0 : index
    %c0_64 = arith.constant 0 : index
    %64 = vector.load %arg3[%c2_61, %c0_62, %c0_63, %c0_64] : memref<3x3x128x256xbf16, #tpu.memory_space<vmem>>, vector<1x1x128x256xbf16>
    %65 = vector.shape_cast %64 : vector<1x1x128x256xbf16> to vector<128x256xbf16>
    %cst_65 = arith.constant dense<0.000000e+00> : vector<64x256xf32>
    %66 = tpu.matmul %63, %65, %cst_65 {dimension_numbers = #tpu.dot_dimension_numbers<[1], [0], [0], [1], [0, 0, 1, 1], [], []>} : vector<64x128xbf16>, vector<128x256xbf16>, vector<64x256xf32> -> vector<64x256xf32>
    %67 = arith.addf %61, %66 : vector<64x256xf32>
    %68 = vector.extract_strided_slice %26 {offsets = [0, 2, 1, 0], sizes = [1, 8, 8, 128], strides = [1, 1, 1, 1]} : vector<1x10x10x128xbf16> to vector<1x8x8x128xbf16>
    %69 = vector.shape_cast %68 : vector<1x8x8x128xbf16> to vector<64x128xbf16>
    %c2_66 = arith.constant 2 : index
    %c1_67 = arith.constant 1 : index
    %c0_68 = arith.constant 0 : index
    %c0_69 = arith.constant 0 : index
    %70 = vector.load %arg3[%c2_66, %c1_67, %c0_68, %c0_69] : memref<3x3x128x256xbf16, #tpu.memory_space<vmem>>, vector<1x1x128x256xbf16>
    %71 = vector.shape_cast %70 : vector<1x1x128x256xbf16> to vector<128x256xbf16>
    %cst_70 = arith.constant dense<0.000000e+00> : vector<64x256xf32>
    %72 = tpu.matmul %69, %71, %cst_70 {dimension_numbers = #tpu.dot_dimension_numbers<[1], [0], [0], [1], [0, 0, 1, 1], [], []>} : vector<64x128xbf16>, vector<128x256xbf16>, vector<64x256xf32> -> vector<64x256xf32>
    %73 = arith.addf %67, %72 : vector<64x256xf32>
    %74 = vector.extract_strided_slice %26 {offsets = [0, 2, 2, 0], sizes = [1, 8, 8, 128], strides = [1, 1, 1, 1]} : vector<1x10x10x128xbf16> to vector<1x8x8x128xbf16>
    %75 = vector.shape_cast %74 : vector<1x8x8x128xbf16> to vector<64x128xbf16>
    %c2_71 = arith.constant 2 : index
    %c2_72 = arith.constant 2 : index
    %c0_73 = arith.constant 0 : index
    %c0_74 = arith.constant 0 : index
    %76 = vector.load %arg3[%c2_71, %c2_72, %c0_73, %c0_74] : memref<3x3x128x256xbf16, #tpu.memory_space<vmem>>, vector<1x1x128x256xbf16>
    %77 = vector.shape_cast %76 : vector<1x1x128x256xbf16> to vector<128x256xbf16>
    %cst_75 = arith.constant dense<0.000000e+00> : vector<64x256xf32>
    %78 = tpu.matmul %75, %77, %cst_75 {dimension_numbers = #tpu.dot_dimension_numbers<[1], [0], [0], [1], [0, 0, 1, 1], [], []>} : vector<64x128xbf16>, vector<128x256xbf16>, vector<64x256xf32> -> vector<64x256xf32>
    %79 = arith.addf %73, %78 : vector<64x256xf32>
    %80 = vector.shape_cast %79 : vector<64x256xf32> to vector<32x2x256xf32>
    %cst_76 = arith.constant dense<0xFF800000> : vector<32x256xf32>
    %81 = vector.multi_reduction <maximumf>, %80, %cst_76 [1] : vector<32x2x256xf32> to vector<32x256xf32>
    %82 = vector.shape_cast %81 : vector<32x256xf32> to vector<4x2x4x256xf32>
    %cst_77 = arith.constant dense<0xFF800000> : vector<4x4x256xf32>
    %83 = vector.multi_reduction <maximumf>, %82, %cst_77 [1] : vector<4x2x4x256xf32> to vector<4x4x256xf32>
    %84 = vector.shape_cast %83 : vector<4x4x256xf32> to vector<1x4x4x256xf32>
    %c0_78 = arith.constant 0 : index
    %c0_79 = arith.constant 0 : index
    %85 = vector.load %arg7[%c0_78, %c0_79] : memref<1x256xf32, #tpu.memory_space<vmem>>, vector<1x256xf32>
    %86 = vector.shape_cast %85 : vector<1x256xf32> to vector<1x1x1x256xf32>
    %87 = vector.broadcast %86 : vector<1x1x1x256xf32> to vector<1x4x4x256xf32>
    %88 = arith.addf %84, %87 : vector<1x4x4x256xf32>
    %cst_80 = arith.constant 0.000000e+00 : f32
    %89 = vector.broadcast %cst_80 : f32 to vector<1x4x4x256xf32>
    %90 = arith.cmpf oge, %88, %89 : vector<1x4x4x256xf32>
    %cst_81 = arith.constant 1.000000e-01 : f32
    %91 = vector.broadcast %cst_81 : f32 to vector<1x4x4x256xf32>
    %92 = arith.mulf %91, %88 : vector<1x4x4x256xf32>
    %93 = arith.select %90, %88, %92 : vector<1x4x4x256xi1>, vector<1x4x4x256xf32>
    %c0_82 = arith.constant 0 : index
    %c1_83 = arith.constant 1 : index
    %c1_84 = arith.constant 1 : index
    %c0_85 = arith.constant 0 : index
    %94 = vector.load %arg13[%c0_82, %c1_83, %c1_84, %c0_85] : memref<1x6x6x256xf32, #tpu.memory_space<vmem>>, vector<1x4x4x256xf32>
    tpu.vector_store %arg13[%c0_82, %c1_83, %c1_84, %c0_85], %93 {strides = array<i32>} : memref<1x6x6x256xf32, #tpu.memory_space<vmem>>, vector<1x4x4x256xf32>,
    %c0_86 = arith.constant 0 : index
    %c0_87 = arith.constant 0 : index
    %c0_88 = arith.constant 0 : index
    %c0_89 = arith.constant 0 : index
    %95 = vector.load %arg13[%c0_86, %c0_87, %c0_88, %c0_89] : memref<1x6x6x256xf32, #tpu.memory_space<vmem>>, vector<1x6x6x256xf32>
    %96 = arith.truncf %95 : vector<1x6x6x256xf32> to vector<1x6x6x256xbf16>
    %97 = vector.extract_strided_slice %96 {offsets = [0, 0, 0, 0], sizes = [1, 4, 4, 256], strides = [1, 1, 1, 1]} : vector<1x6x6x256xbf16> to vector<1x4x4x256xbf16>
    %98 = vector.shape_cast %97 : vector<1x4x4x256xbf16> to vector<16x256xbf16>
    %c0_90 = arith.constant 0 : index
    %c0_91 = arith.constant 0 : index
    %c0_92 = arith.constant 0 : index
    %c0_93 = arith.constant 0 : index
    %99 = vector.load %arg4[%c0_90, %c0_91, %c0_92, %c0_93] : memref<3x3x256x384xbf16, #tpu.memory_space<vmem>>, vector<1x1x256x384xbf16>
    %100 = vector.shape_cast %99 : vector<1x1x256x384xbf16> to vector<256x384xbf16>
    %cst_94 = arith.constant dense<0.000000e+00> : vector<16x384xf32>
    %101 = tpu.matmul %98, %100, %cst_94 {dimension_numbers = #tpu.dot_dimension_numbers<[1], [0], [0], [1], [0, 0, 1, 1], [], []>} : vector<16x256xbf16>, vector<256x384xbf16>, vector<16x384xf32> -> vector<16x384xf32>
    %102 = vector.extract_strided_slice %96 {offsets = [0, 0, 1, 0], sizes = [1, 4, 4, 256], strides = [1, 1, 1, 1]} : vector<1x6x6x256xbf16> to vector<1x4x4x256xbf16>
    %103 = vector.shape_cast %102 : vector<1x4x4x256xbf16> to vector<16x256xbf16>
    %c0_95 = arith.constant 0 : index
    %c1_96 = arith.constant 1 : index
    %c0_97 = arith.constant 0 : index
    %c0_98 = arith.constant 0 : index
    %104 = vector.load %arg4[%c0_95, %c1_96, %c0_97, %c0_98] : memref<3x3x256x384xbf16, #tpu.memory_space<vmem>>, vector<1x1x256x384xbf16>
    %105 = vector.shape_cast %104 : vector<1x1x256x384xbf16> to vector<256x384xbf16>
    %cst_99 = arith.constant dense<0.000000e+00> : vector<16x384xf32>
    %106 = tpu.matmul %103, %105, %cst_99 {dimension_numbers = #tpu.dot_dimension_numbers<[1], [0], [0], [1], [0, 0, 1, 1], [], []>} : vector<16x256xbf16>, vector<256x384xbf16>, vector<16x384xf32> -> vector<16x384xf32>
    %107 = arith.addf %101, %106 : vector<16x384xf32>
    %108 = vector.extract_strided_slice %96 {offsets = [0, 0, 2, 0], sizes = [1, 4, 4, 256], strides = [1, 1, 1, 1]} : vector<1x6x6x256xbf16> to vector<1x4x4x256xbf16>
    %109 = vector.shape_cast %108 : vector<1x4x4x256xbf16> to vector<16x256xbf16>
    %c0_100 = arith.constant 0 : index
    %c2_101 = arith.constant 2 : index
    %c0_102 = arith.constant 0 : index
    %c0_103 = arith.constant 0 : index
    %110 = vector.load %arg4[%c0_100, %c2_101, %c0_102, %c0_103] : memref<3x3x256x384xbf16, #tpu.memory_space<vmem>>, vector<1x1x256x384xbf16>
    %111 = vector.shape_cast %110 : vector<1x1x256x384xbf16> to vector<256x384xbf16>
    %cst_104 = arith.constant dense<0.000000e+00> : vector<16x384xf32>
    %112 = tpu.matmul %109, %111, %cst_104 {dimension_numbers = #tpu.dot_dimension_numbers<[1], [0], [0], [1], [0, 0, 1, 1], [], []>} : vector<16x256xbf16>, vector<256x384xbf16>, vector<16x384xf32> -> vector<16x384xf32>
    %113 = arith.addf %107, %112 : vector<16x384xf32>
    %114 = vector.extract_strided_slice %96 {offsets = [0, 1, 0, 0], sizes = [1, 4, 4, 256], strides = [1, 1, 1, 1]} : vector<1x6x6x256xbf16> to vector<1x4x4x256xbf16>
    %115 = vector.shape_cast %114 : vector<1x4x4x256xbf16> to vector<16x256xbf16>
    %c1_105 = arith.constant 1 : index
    %c0_106 = arith.constant 0 : index
    %c0_107 = arith.constant 0 : index
    %c0_108 = arith.constant 0 : index
    %116 = vector.load %arg4[%c1_105, %c0_106, %c0_107, %c0_108] : memref<3x3x256x384xbf16, #tpu.memory_space<vmem>>, vector<1x1x256x384xbf16>
    %117 = vector.shape_cast %116 : vector<1x1x256x384xbf16> to vector<256x384xbf16>
    %cst_109 = arith.constant dense<0.000000e+00> : vector<16x384xf32>
    %118 = tpu.matmul %115, %117, %cst_109 {dimension_numbers = #tpu.dot_dimension_numbers<[1], [0], [0], [1], [0, 0, 1, 1], [], []>} : vector<16x256xbf16>, vector<256x384xbf16>, vector<16x384xf32> -> vector<16x384xf32>
    %119 = arith.addf %113, %118 : vector<16x384xf32>
    %120 = vector.extract_strided_slice %96 {offsets = [0, 1, 1, 0], sizes = [1, 4, 4, 256], strides = [1, 1, 1, 1]} : vector<1x6x6x256xbf16> to vector<1x4x4x256xbf16>
    %121 = vector.shape_cast %120 : vector<1x4x4x256xbf16> to vector<16x256xbf16>
    %c1_110 = arith.constant 1 : index
    %c1_111 = arith.constant 1 : index
    %c0_112 = arith.constant 0 : index
    %c0_113 = arith.constant 0 : index
    %122 = vector.load %arg4[%c1_110, %c1_111, %c0_112, %c0_113] : memref<3x3x256x384xbf16, #tpu.memory_space<vmem>>, vector<1x1x256x384xbf16>
    %123 = vector.shape_cast %122 : vector<1x1x256x384xbf16> to vector<256x384xbf16>
    %cst_114 = arith.constant dense<0.000000e+00> : vector<16x384xf32>
    %124 = tpu.matmul %121, %123, %cst_114 {dimension_numbers = #tpu.dot_dimension_numbers<[1], [0], [0], [1], [0, 0, 1, 1], [], []>} : vector<16x256xbf16>, vector<256x384xbf16>, vector<16x384xf32> -> vector<16x384xf32>
    %125 = arith.addf %119, %124 : vector<16x384xf32>
    %126 = vector.extract_strided_slice %96 {offsets = [0, 1, 2, 0], sizes = [1, 4, 4, 256], strides = [1, 1, 1, 1]} : vector<1x6x6x256xbf16> to vector<1x4x4x256xbf16>
    %127 = vector.shape_cast %126 : vector<1x4x4x256xbf16> to vector<16x256xbf16>
    %c1_115 = arith.constant 1 : index
    %c2_116 = arith.constant 2 : index
    %c0_117 = arith.constant 0 : index
    %c0_118 = arith.constant 0 : index
    %128 = vector.load %arg4[%c1_115, %c2_116, %c0_117, %c0_118] : memref<3x3x256x384xbf16, #tpu.memory_space<vmem>>, vector<1x1x256x384xbf16>
    %129 = vector.shape_cast %128 : vector<1x1x256x384xbf16> to vector<256x384xbf16>
    %cst_119 = arith.constant dense<0.000000e+00> : vector<16x384xf32>
    %130 = tpu.matmul %127, %129, %cst_119 {dimension_numbers = #tpu.dot_dimension_numbers<[1], [0], [0], [1], [0, 0, 1, 1], [], []>} : vector<16x256xbf16>, vector<256x384xbf16>, vector<16x384xf32> -> vector<16x384xf32>
    %131 = arith.addf %125, %130 : vector<16x384xf32>
    %132 = vector.extract_strided_slice %96 {offsets = [0, 2, 0, 0], sizes = [1, 4, 4, 256], strides = [1, 1, 1, 1]} : vector<1x6x6x256xbf16> to vector<1x4x4x256xbf16>
    %133 = vector.shape_cast %132 : vector<1x4x4x256xbf16> to vector<16x256xbf16>
    %c2_120 = arith.constant 2 : index
    %c0_121 = arith.constant 0 : index
    %c0_122 = arith.constant 0 : index
    %c0_123 = arith.constant 0 : index
    %134 = vector.load %arg4[%c2_120, %c0_121, %c0_122, %c0_123] : memref<3x3x256x384xbf16, #tpu.memory_space<vmem>>, vector<1x1x256x384xbf16>
    %135 = vector.shape_cast %134 : vector<1x1x256x384xbf16> to vector<256x384xbf16>
    %cst_124 = arith.constant dense<0.000000e+00> : vector<16x384xf32>
    %136 = tpu.matmul %133, %135, %cst_124 {dimension_numbers = #tpu.dot_dimension_numbers<[1], [0], [0], [1], [0, 0, 1, 1], [], []>} : vector<16x256xbf16>, vector<256x384xbf16>, vector<16x384xf32> -> vector<16x384xf32>
    %137 = arith.addf %131, %136 : vector<16x384xf32>
    %138 = vector.extract_strided_slice %96 {offsets = [0, 2, 1, 0], sizes = [1, 4, 4, 256], strides = [1, 1, 1, 1]} : vector<1x6x6x256xbf16> to vector<1x4x4x256xbf16>
    %139 = vector.shape_cast %138 : vector<1x4x4x256xbf16> to vector<16x256xbf16>
    %c2_125 = arith.constant 2 : index
    %c1_126 = arith.constant 1 : index
    %c0_127 = arith.constant 0 : index
    %c0_128 = arith.constant 0 : index
    %140 = vector.load %arg4[%c2_125, %c1_126, %c0_127, %c0_128] : memref<3x3x256x384xbf16, #tpu.memory_space<vmem>>, vector<1x1x256x384xbf16>
    %141 = vector.shape_cast %140 : vector<1x1x256x384xbf16> to vector<256x384xbf16>
    %cst_129 = arith.constant dense<0.000000e+00> : vector<16x384xf32>
    %142 = tpu.matmul %139, %141, %cst_129 {dimension_numbers = #tpu.dot_dimension_numbers<[1], [0], [0], [1], [0, 0, 1, 1], [], []>} : vector<16x256xbf16>, vector<256x384xbf16>, vector<16x384xf32> -> vector<16x384xf32>
    %143 = arith.addf %137, %142 : vector<16x384xf32>
    %144 = vector.extract_strided_slice %96 {offsets = [0, 2, 2, 0], sizes = [1, 4, 4, 256], strides = [1, 1, 1, 1]} : vector<1x6x6x256xbf16> to vector<1x4x4x256xbf16>
    %145 = vector.shape_cast %144 : vector<1x4x4x256xbf16> to vector<16x256xbf16>
    %c2_130 = arith.constant 2 : index
    %c2_131 = arith.constant 2 : index
    %c0_132 = arith.constant 0 : index
    %c0_133 = arith.constant 0 : index
    %146 = vector.load %arg4[%c2_130, %c2_131, %c0_132, %c0_133] : memref<3x3x256x384xbf16, #tpu.memory_space<vmem>>, vector<1x1x256x384xbf16>
    %147 = vector.shape_cast %146 : vector<1x1x256x384xbf16> to vector<256x384xbf16>
    %cst_134 = arith.constant dense<0.000000e+00> : vector<16x384xf32>
    %148 = tpu.matmul %145, %147, %cst_134 {dimension_numbers = #tpu.dot_dimension_numbers<[1], [0], [0], [1], [0, 0, 1, 1], [], []>} : vector<16x256xbf16>, vector<256x384xbf16>, vector<16x384xf32> -> vector<16x384xf32>
    %149 = arith.addf %143, %148 : vector<16x384xf32>
    %150 = vector.shape_cast %149 : vector<16x384xf32> to vector<8x2x384xf32>
    %cst_135 = arith.constant dense<0xFF800000> : vector<8x384xf32>
    %151 = vector.multi_reduction <maximumf>, %150, %cst_135 [1] : vector<8x2x384xf32> to vector<8x384xf32>
    %152 = vector.shape_cast %151 : vector<8x384xf32> to vector<2x2x2x384xf32>
    %cst_136 = arith.constant dense<0xFF800000> : vector<2x2x384xf32>
    %153 = vector.multi_reduction <maximumf>, %152, %cst_136 [1] : vector<2x2x2x384xf32> to vector<2x2x384xf32>
    %154 = vector.shape_cast %153 : vector<2x2x384xf32> to vector<1x2x2x384xf32>
    %c0_137 = arith.constant 0 : index
    %c0_138 = arith.constant 0 : index
    %155 = vector.load %arg8[%c0_137, %c0_138] : memref<1x384xf32, #tpu.memory_space<vmem>>, vector<1x384xf32>
    %156 = vector.shape_cast %155 : vector<1x384xf32> to vector<1x1x1x384xf32>
    %157 = vector.broadcast %156 : vector<1x1x1x384xf32> to vector<1x2x2x384xf32>
    %158 = arith.addf %154, %157 : vector<1x2x2x384xf32>
    %cst_139 = arith.constant 0.000000e+00 : f32
    %159 = vector.broadcast %cst_139 : f32 to vector<1x2x2x384xf32>
    %160 = arith.cmpf oge, %158, %159 : vector<1x2x2x384xf32>
    %cst_140 = arith.constant 1.000000e-01 : f32
    %161 = vector.broadcast %cst_140 : f32 to vector<1x2x2x384xf32>
    %162 = arith.mulf %161, %158 : vector<1x2x2x384xf32>
    %163 = arith.select %160, %158, %162 : vector<1x2x2x384xi1>, vector<1x2x2x384xf32>
    %164 = vector.shape_cast %163 : vector<1x2x2x384xf32> to vector<1x4x384xf32>
    %c0_141 = arith.constant 0 : index
    %c0_142 = arith.constant 0 : index
    %c0_143 = arith.constant 0 : index
    %165 = vector.load %arg10[%c0_141, %c0_142, %c0_143] : memref<1x4x384xf32, #tpu.memory_space<vmem>>, vector<1x4x384xf32>
    tpu.vector_store %arg10[%c0_141, %c0_142, %c0_143], %164 {strides = array<i32>} : memref<1x4x384xf32, #tpu.memory_space<vmem>>, vector<1x4x384xf32>,
    %c0_144 = arith.constant 0 : index
    %c1_145 = arith.constant 1 : index
    %c1_146 = arith.constant 1 : index
    %c0_147 = arith.constant 0 : index
    %166 = vector.load %arg14[%c0_144, %c1_145, %c1_146, %c0_147] : memref<1x4x4x384xf32, #tpu.memory_space<vmem>>, vector<1x2x2x384xf32>
    tpu.vector_store %arg14[%c0_144, %c1_145, %c1_146, %c0_147], %163 {strides = array<i32>} : memref<1x4x4x384xf32, #tpu.memory_space<vmem>>, vector<1x2x2x384xf32>,
    %c0_148 = arith.constant 0 : index
    %c0_149 = arith.constant 0 : index
    %c0_150 = arith.constant 0 : index
    %c0_151 = arith.constant 0 : index
    %167 = vector.load %arg14[%c0_148, %c0_149, %c0_150, %c0_151] : memref<1x4x4x384xf32, #tpu.memory_space<vmem>>, vector<1x4x4x384xf32>
    %168 = arith.truncf %167 : vector<1x4x4x384xf32> to vector<1x4x4x384xbf16>
    %169 = vector.extract_strided_slice %168 {offsets = [0, 0, 0, 0], sizes = [1, 2, 2, 384], strides = [1, 1, 1, 1]} : vector<1x4x4x384xbf16> to vector<1x2x2x384xbf16>
    %170 = vector.shape_cast %169 : vector<1x2x2x384xbf16> to vector<4x384xbf16>
    %c0_152 = arith.constant 0 : index
    %c0_153 = arith.constant 0 : index
    %c0_154 = arith.constant 0 : index
    %c0_155 = arith.constant 0 : index
    %171 = vector.load %arg5[%c0_152, %c0_153, %c0_154, %c0_155] : memref<3x3x384x512xbf16, #tpu.memory_space<vmem>>, vector<1x1x384x512xbf16>
    %172 = vector.shape_cast %171 : vector<1x1x384x512xbf16> to vector<384x512xbf16>
    %cst_156 = arith.constant dense<0.000000e+00> : vector<4x512xf32>
    %173 = tpu.matmul %170, %172, %cst_156 {dimension_numbers = #tpu.dot_dimension_numbers<[1], [0], [0], [1], [0, 0, 1, 1], [], []>} : vector<4x384xbf16>, vector<384x512xbf16>, vector<4x512xf32> -> vector<4x512xf32>
    %174 = vector.extract_strided_slice %168 {offsets = [0, 0, 1, 0], sizes = [1, 2, 2, 384], strides = [1, 1, 1, 1]} : vector<1x4x4x384xbf16> to vector<1x2x2x384xbf16>
    %175 = vector.shape_cast %174 : vector<1x2x2x384xbf16> to vector<4x384xbf16>
    %c0_157 = arith.constant 0 : index
    %c1_158 = arith.constant 1 : index
    %c0_159 = arith.constant 0 : index
    %c0_160 = arith.constant 0 : index
    %176 = vector.load %arg5[%c0_157, %c1_158, %c0_159, %c0_160] : memref<3x3x384x512xbf16, #tpu.memory_space<vmem>>, vector<1x1x384x512xbf16>
    %177 = vector.shape_cast %176 : vector<1x1x384x512xbf16> to vector<384x512xbf16>
    %cst_161 = arith.constant dense<0.000000e+00> : vector<4x512xf32>
    %178 = tpu.matmul %175, %177, %cst_161 {dimension_numbers = #tpu.dot_dimension_numbers<[1], [0], [0], [1], [0, 0, 1, 1], [], []>} : vector<4x384xbf16>, vector<384x512xbf16>, vector<4x512xf32> -> vector<4x512xf32>
    %179 = arith.addf %173, %178 : vector<4x512xf32>
    %180 = vector.extract_strided_slice %168 {offsets = [0, 0, 2, 0], sizes = [1, 2, 2, 384], strides = [1, 1, 1, 1]} : vector<1x4x4x384xbf16> to vector<1x2x2x384xbf16>
    %181 = vector.shape_cast %180 : vector<1x2x2x384xbf16> to vector<4x384xbf16>
    %c0_162 = arith.constant 0 : index
    %c2_163 = arith.constant 2 : index
    %c0_164 = arith.constant 0 : index
    %c0_165 = arith.constant 0 : index
    %182 = vector.load %arg5[%c0_162, %c2_163, %c0_164, %c0_165] : memref<3x3x384x512xbf16, #tpu.memory_space<vmem>>, vector<1x1x384x512xbf16>
    %183 = vector.shape_cast %182 : vector<1x1x384x512xbf16> to vector<384x512xbf16>
    %cst_166 = arith.constant dense<0.000000e+00> : vector<4x512xf32>
    %184 = tpu.matmul %181, %183, %cst_166 {dimension_numbers = #tpu.dot_dimension_numbers<[1], [0], [0], [1], [0, 0, 1, 1], [], []>} : vector<4x384xbf16>, vector<384x512xbf16>, vector<4x512xf32> -> vector<4x512xf32>
    %185 = arith.addf %179, %184 : vector<4x512xf32>
    %186 = vector.extract_strided_slice %168 {offsets = [0, 1, 0, 0], sizes = [1, 2, 2, 384], strides = [1, 1, 1, 1]} : vector<1x4x4x384xbf16> to vector<1x2x2x384xbf16>
    %187 = vector.shape_cast %186 : vector<1x2x2x384xbf16> to vector<4x384xbf16>
    %c1_167 = arith.constant 1 : index
    %c0_168 = arith.constant 0 : index
    %c0_169 = arith.constant 0 : index
    %c0_170 = arith.constant 0 : index
    %188 = vector.load %arg5[%c1_167, %c0_168, %c0_169, %c0_170] : memref<3x3x384x512xbf16, #tpu.memory_space<vmem>>, vector<1x1x384x512xbf16>
    %189 = vector.shape_cast %188 : vector<1x1x384x512xbf16> to vector<384x512xbf16>
    %cst_171 = arith.constant dense<0.000000e+00> : vector<4x512xf32>
    %190 = tpu.matmul %187, %189, %cst_171 {dimension_numbers = #tpu.dot_dimension_numbers<[1], [0], [0], [1], [0, 0, 1, 1], [], []>} : vector<4x384xbf16>, vector<384x512xbf16>, vector<4x512xf32> -> vector<4x512xf32>
    %191 = arith.addf %185, %190 : vector<4x512xf32>
    %192 = vector.extract_strided_slice %168 {offsets = [0, 1, 1, 0], sizes = [1, 2, 2, 384], strides = [1, 1, 1, 1]} : vector<1x4x4x384xbf16> to vector<1x2x2x384xbf16>
    %193 = vector.shape_cast %192 : vector<1x2x2x384xbf16> to vector<4x384xbf16>
    %c1_172 = arith.constant 1 : index
    %c1_173 = arith.constant 1 : index
    %c0_174 = arith.constant 0 : index
    %c0_175 = arith.constant 0 : index
    %194 = vector.load %arg5[%c1_172, %c1_173, %c0_174, %c0_175] : memref<3x3x384x512xbf16, #tpu.memory_space<vmem>>, vector<1x1x384x512xbf16>
    %195 = vector.shape_cast %194 : vector<1x1x384x512xbf16> to vector<384x512xbf16>
    %cst_176 = arith.constant dense<0.000000e+00> : vector<4x512xf32>
    %196 = tpu.matmul %193, %195, %cst_176 {dimension_numbers = #tpu.dot_dimension_numbers<[1], [0], [0], [1], [0, 0, 1, 1], [], []>} : vector<4x384xbf16>, vector<384x512xbf16>, vector<4x512xf32> -> vector<4x512xf32>
    %197 = arith.addf %191, %196 : vector<4x512xf32>
    %198 = vector.extract_strided_slice %168 {offsets = [0, 1, 2, 0], sizes = [1, 2, 2, 384], strides = [1, 1, 1, 1]} : vector<1x4x4x384xbf16> to vector<1x2x2x384xbf16>
    %199 = vector.shape_cast %198 : vector<1x2x2x384xbf16> to vector<4x384xbf16>
    %c1_177 = arith.constant 1 : index
    %c2_178 = arith.constant 2 : index
    %c0_179 = arith.constant 0 : index
    %c0_180 = arith.constant 0 : index
    %200 = vector.load %arg5[%c1_177, %c2_178, %c0_179, %c0_180] : memref<3x3x384x512xbf16, #tpu.memory_space<vmem>>, vector<1x1x384x512xbf16>
    %201 = vector.shape_cast %200 : vector<1x1x384x512xbf16> to vector<384x512xbf16>
    %cst_181 = arith.constant dense<0.000000e+00> : vector<4x512xf32>
    %202 = tpu.matmul %199, %201, %cst_181 {dimension_numbers = #tpu.dot_dimension_numbers<[1], [0], [0], [1], [0, 0, 1, 1], [], []>} : vector<4x384xbf16>, vector<384x512xbf16>, vector<4x512xf32> -> vector<4x512xf32>
    %203 = arith.addf %197, %202 : vector<4x512xf32>
    %204 = vector.extract_strided_slice %168 {offsets = [0, 2, 0, 0], sizes = [1, 2, 2, 384], strides = [1, 1, 1, 1]} : vector<1x4x4x384xbf16> to vector<1x2x2x384xbf16>
    %205 = vector.shape_cast %204 : vector<1x2x2x384xbf16> to vector<4x384xbf16>
    %c2_182 = arith.constant 2 : index
    %c0_183 = arith.constant 0 : index
    %c0_184 = arith.constant 0 : index
    %c0_185 = arith.constant 0 : index
    %206 = vector.load %arg5[%c2_182, %c0_183, %c0_184, %c0_185] : memref<3x3x384x512xbf16, #tpu.memory_space<vmem>>, vector<1x1x384x512xbf16>
    %207 = vector.shape_cast %206 : vector<1x1x384x512xbf16> to vector<384x512xbf16>
    %cst_186 = arith.constant dense<0.000000e+00> : vector<4x512xf32>
    %208 = tpu.matmul %205, %207, %cst_186 {dimension_numbers = #tpu.dot_dimension_numbers<[1], [0], [0], [1], [0, 0, 1, 1], [], []>} : vector<4x384xbf16>, vector<384x512xbf16>, vector<4x512xf32> -> vector<4x512xf32>
    %209 = arith.addf %203, %208 : vector<4x512xf32>
    %210 = vector.extract_strided_slice %168 {offsets = [0, 2, 1, 0], sizes = [1, 2, 2, 384], strides = [1, 1, 1, 1]} : vector<1x4x4x384xbf16> to vector<1x2x2x384xbf16>
    %211 = vector.shape_cast %210 : vector<1x2x2x384xbf16> to vector<4x384xbf16>
    %c2_187 = arith.constant 2 : index
    %c1_188 = arith.constant 1 : index
    %c0_189 = arith.constant 0 : index
    %c0_190 = arith.constant 0 : index
    %212 = vector.load %arg5[%c2_187, %c1_188, %c0_189, %c0_190] : memref<3x3x384x512xbf16, #tpu.memory_space<vmem>>, vector<1x1x384x512xbf16>
    %213 = vector.shape_cast %212 : vector<1x1x384x512xbf16> to vector<384x512xbf16>
    %cst_191 = arith.constant dense<0.000000e+00> : vector<4x512xf32>
    %214 = tpu.matmul %211, %213, %cst_191 {dimension_numbers = #tpu.dot_dimension_numbers<[1], [0], [0], [1], [0, 0, 1, 1], [], []>} : vector<4x384xbf16>, vector<384x512xbf16>, vector<4x512xf32> -> vector<4x512xf32>
    %215 = arith.addf %209, %214 : vector<4x512xf32>
    %216 = vector.extract_strided_slice %168 {offsets = [0, 2, 2, 0], sizes = [1, 2, 2, 384], strides = [1, 1, 1, 1]} : vector<1x4x4x384xbf16> to vector<1x2x2x384xbf16>
    %217 = vector.shape_cast %216 : vector<1x2x2x384xbf16> to vector<4x384xbf16>
    %c2_192 = arith.constant 2 : index
    %c2_193 = arith.constant 2 : index
    %c0_194 = arith.constant 0 : index
    %c0_195 = arith.constant 0 : index
    %218 = vector.load %arg5[%c2_192, %c2_193, %c0_194, %c0_195] : memref<3x3x384x512xbf16, #tpu.memory_space<vmem>>, vector<1x1x384x512xbf16>
    %219 = vector.shape_cast %218 : vector<1x1x384x512xbf16> to vector<384x512xbf16>
    %cst_196 = arith.constant dense<0.000000e+00> : vector<4x512xf32>
    %220 = tpu.matmul %217, %219, %cst_196 {dimension_numbers = #tpu.dot_dimension_numbers<[1], [0], [0], [1], [0, 0, 1, 1], [], []>} : vector<4x384xbf16>, vector<384x512xbf16>, vector<4x512xf32> -> vector<4x512xf32>
    %221 = arith.addf %215, %220 : vector<4x512xf32>
    %222 = vector.shape_cast %221 : vector<4x512xf32> to vector<1x2x2x512xf32>
    %223 = vector.extract_strided_slice %222 {offsets = [0, 0, 0, 0], sizes = [1, 2, 1, 512], strides = [1, 1, 1, 1]} : vector<1x2x2x512xf32> to vector<1x2x1x512xf32>
    %224 = vector.extract_strided_slice %222 {offsets = [0, 0, 1, 0], sizes = [1, 2, 1, 512], strides = [1, 1, 1, 1]} : vector<1x2x2x512xf32> to vector<1x2x1x512xf32>
    %225 = arith.maximumf %223, %224 : vector<1x2x1x512xf32>
    %226 = vector.extract_strided_slice %225 {offsets = [0, 0, 0, 0], sizes = [1, 1, 1, 512], strides = [1, 1, 1, 1]} : vector<1x2x1x512xf32> to vector<1x1x1x512xf32>
    %227 = vector.extract_strided_slice %225 {offsets = [0, 1, 0, 0], sizes = [1, 1, 1, 512], strides = [1, 1, 1, 1]} : vector<1x2x1x512xf32> to vector<1x1x1x512xf32>
    %228 = arith.maximumf %226, %227 : vector<1x1x1x512xf32>
    %c0_197 = arith.constant 0 : index
    %c0_198 = arith.constant 0 : index
    %229 = vector.load %arg9[%c0_197, %c0_198] : memref<1x512xf32, #tpu.memory_space<vmem>>, vector<1x512xf32>
    %230 = vector.shape_cast %229 : vector<1x512xf32> to vector<1x1x1x512xf32>
    %231 = arith.addf %228, %230 : vector<1x1x1x512xf32>
    %232 = vector.shape_cast %231 : vector<1x1x1x512xf32> to vector<1x1x512xf32>
    %c0_199 = arith.constant 0 : index
    %c0_200 = arith.constant 0 : index
    %c0_201 = arith.constant 0 : index
    %233 = vector.load %arg11[%c0_199, %c0_200, %c0_201] : memref<1x1x512xf32, #tpu.memory_space<vmem>>, vector<1x1x512xf32>
    tpu.vector_store %arg11[%c0_199, %c0_200, %c0_201], %232 {strides = array<i32>} : memref<1x1x512xf32, #tpu.memory_space<vmem>>, vector<1x1x512xf32>,
    return
  }
  func.func @transform_0(%arg0: i32) -> (i32, i32, i32) {
    %c0_i32 = arith.constant 0 : i32
    %c0_i32_0 = arith.constant 0 : i32
    %c0_i32_1 = arith.constant 0 : i32
    return %arg0, %c0_i32, %c0_i32_0 : i32, i32, i32
  }
  func.func @transform_1(%arg0: i32) -> (i32, i32) {
    %c0_i32 = arith.constant 0 : i32
    %c0_i32_0 = arith.constant 0 : i32
    %c0_i32_1 = arith.constant 0 : i32
    return %c0_i32, %c0_i32_0 : i32, i32
  }
  func.func @transform_2(%arg0: i32) -> (i32, i32, i32, i32) {
    %c0_i32 = arith.constant 0 : i32
    %c0_i32_0 = arith.constant 0 : i32
    %c0_i32_1 = arith.constant 0 : i32
    %c0_i32_2 = arith.constant 0 : i32
    %c0_i32_3 = arith.constant 0 : i32
    return %c0_i32, %c0_i32_0, %c0_i32_1, %c0_i32_2 : i32, i32, i32, i32
  }
  func.func @transform_3(%arg0: i32) -> (i32, i32, i32, i32) {
    %c0_i32 = arith.constant 0 : i32
    %c0_i32_0 = arith.constant 0 : i32
    %c0_i32_1 = arith.constant 0 : i32
    %c0_i32_2 = arith.constant 0 : i32
    %c0_i32_3 = arith.constant 0 : i32
    return %c0_i32, %c0_i32_0, %c0_i32_1, %c0_i32_2 : i32, i32, i32, i32
  }
  func.func @transform_4(%arg0: i32) -> (i32, i32, i32, i32) {
    %c0_i32 = arith.constant 0 : i32
    %c0_i32_0 = arith.constant 0 : i32
    %c0_i32_1 = arith.constant 0 : i32
    %c0_i32_2 = arith.constant 0 : i32
    %c0_i32_3 = arith.constant 0 : i32
    return %c0_i32, %c0_i32_0, %c0_i32_1, %c0_i32_2 : i32, i32, i32, i32
  }
  func.func @transform_5(%arg0: i32) -> (i32, i32) {
    %c0_i32 = arith.constant 0 : i32
    %c0_i32_0 = arith.constant 0 : i32
    %c0_i32_1 = arith.constant 0 : i32
    return %c0_i32, %c0_i32_0 : i32, i32
  }
  func.func @transform_6(%arg0: i32) -> (i32, i32) {
    %c0_i32 = arith.constant 0 : i32
    %c0_i32_0 = arith.constant 0 : i32
    %c0_i32_1 = arith.constant 0 : i32
    return %c0_i32, %c0_i32_0 : i32, i32
  }
  func.func @transform_7(%arg0: i32) -> (i32, i32) {
    %c0_i32 = arith.constant 0 : i32
    %c0_i32_0 = arith.constant 0 : i32
    %c0_i32_1 = arith.constant 0 : i32
    return %c0_i32, %c0_i32_0 : i32, i32
  }
  func.func @transform_8(%arg0: i32) -> (i32, i32) {
    %c0_i32 = arith.constant 0 : i32
    %c0_i32_0 = arith.constant 0 : i32
    %c0_i32_1 = arith.constant 0 : i32
    return %c0_i32, %c0_i32_0 : i32, i32
  }
  func.func @transform_9(%arg0: i32) -> (i32, i32, i32) {
    %c0_i32 = arith.constant 0 : i32
    %c0_i32_0 = arith.constant 0 : i32
    %c0_i32_1 = arith.constant 0 : i32
    return %arg0, %c0_i32, %c0_i32_0 : i32, i32, i32
  }
  func.func @transform_10(%arg0: i32) -> (i32, i32, i32) {
    %c0_i32 = arith.constant 0 : i32
    %c0_i32_0 = arith.constant 0 : i32
    %c0_i32_1 = arith.constant 0 : i32
    return %arg0, %c0_i32, %c0_i32_0 : i32, i32, i32
  }
}

</mosaic_0001>

<bundles_post_ra>
// kernel: r2d2_embedding_no_affine.1
= control target key start
LH: loop header
LB: loop body
LE: loop exit
PB: predicated region body
PF: predicated region fallthrough
CT: control target
= control target key end

     0   :  { %s23677_s13 = smov 0   ;;  %s30435_s0 = inlined_call_operand.vmem [shape: bf16[2,256,27], index: 0, kind: input, shape index: {}]   ;;  %s30436_s1 = inlined_call_operand.vmem [shape: bf16[27,128], index: 1, kind: input, shape index: {}]   ;;  %s30437_s2 = inlined_call_operand.vmem [shape: bf16[3,3,128,256], index: 2, kind: input, shape index: {}]   ;;  %s30438_s3 = inlined_call_operand.vmem [shape: bf16[3,3,256,384], index: 3, kind: input, shape index: {}]   ;;  %s30439_s4 = inlined_call_operand.vmem [shape: bf16[3,3,384,512], index: 4, kind: input, shape index: {}]   ;;  %s30440_s5 = inlined_call_operand.vmem [shape: f32[1,128], index: 5, kind: input, shape index: {}]   ;;  %s30441_s6 = inlined_call_operand.vmem [shape: f32[1,256], index: 6, kind: input, shape index: {}]   ;;  %s30442_s7 = inlined_call_operand.vmem [shape: f32[1,384], index: 7, kind: input, shape index: {}]   ;;  %s30443_s8 = inlined_call_operand.vmem [shape: f32[1,512], index: 8, kind: input, shape index: {}]   ;;  %s30444_s9 = inlined_call_operand.vmem [shape: f32[2,4,384], index: 9, kind: output, shape index: {0}]   ;;  %s30445_s10 = inlined_call_operand.vmem [shape: f32[2,1,512], index: 10, kind: output, shape index: {1}]  }
   0x1 LB: > { %s17962_s14 = sadd.s32 4294967295, %s23614_s13   ;;  %p17966_p0 = scmp.ge.s32.totalorder %s23614_s13, 1  ;;  %s23614_s13 = sphi %s23677_s13, %s21_s13  }
   0x2   : > { %p315_p1 = scmp.lt.s32.totalorder %s23614_s13, 3 }
   0x4   : > { %p316_p2 = pnand %p17966_p0, %p315_p1 }
   0x5   : > { %v21492_v0 = vld [vmem:[%s30436_s1] sm:$0xff] (!%p316_p2)   ;;  %vm588_vm0 = vcmask (!%p316_p2), 1044480   ;;  %v21493_v1 = vld [vmem:[%s30436_s1 + $0x8] sm:$0x3f] (!%p316_p2)   ;;  %vm589_vm1 = vcmask (!%p316_p2), 1045504   ;;  %p357_p3 = scmp.lt.s32.totalorder (!%p316_p2), %s17962_s14, 1  ;;  %v792_v25 = vlaneseq (!%p316_p2) }
   0x6   : > { %319 = sbr.rel (%p316_p2) target bundleno = 3354 (0xd1a), region = 56  ;;  %21189 = vmatprep.subr.bf16.mxu0 (!%p316_p2), %v21492_v0  ;;  %v23616_v2 = vmov (!%p316_p2), 65535   ;;  %vm539_vm2 = vcmask (!%p316_p2), 220160   ;;  %v23617_v22 = vmov (!%p316_p2), 0.0   ;;  %v23618_v23 = vmov (!%p316_p2), 1983009808  }
   0x7   : > { %21190 = vmatpush3.bf16.msra.mxu0 (!%p316_p2), %v21492_v0  ;;  %v590_v3 = vsel (!%p316_p2), %vm588_vm0, 4294967295, %v23616_v2  ;;  %374 = vst [vmem:[#allocation2 + $0x10] sm:$0xff] (!%p316_p2), %v23617_v22  ;;  %375 = vst [vmem:[#allocation2 + $0x18] sm:$0x3] (!%p316_p2), %v23617_v22  ;;  %v790_v24 = vunpack.c.l.s4 (!%p316_p2), %v23618_v23  ;;  %v23732_v27 = vshrl.u32 (!%p316_p2), %v792_v25, 7  ;;  %vm1460_vm3 = vcmask (!%p316_p2), 1041408  }
   0x8   : > { %v591_v4 = vsel (!%p316_p2), %vm589_vm1, %v590_v3, 0  ;;  %372 = vst [vmem:[#allocation2] sm:$0xff] (!%p316_p2), %v23617_v22  ;;  %373 = vst [vmem:[#allocation2 + $0x8] sm:$0x3] (!%p316_p2), %v23617_v22  ;;  %v21510_v36 = vld [vmem:[%s30437_s2 + $0x84] ss:$8 sps:$4 sm:$0xff] (!%p316_p2)  }
   0x9   : > { %v593_v5 = vand.u32 (!%p316_p2), %v21493_v1, %v591_v4  ;;  %376 = vst [vmem:[#allocation2 + $0x20] sm:$0xff] (!%p316_p2), %v23617_v22  ;;  %377 = vst [vmem:[#allocation2 + $0x28] sm:$0x3] (!%p316_p2), %v23617_v22  ;;  %v791_v26 = vunpack.c.0.s8 (!%p316_p2), %v790_v24  ;;  %3198 = vmatprep.subr.bf16.mxu1 (!%p316_p2), %v21510_v36  ;;  %vm2749_vm4 = vcmask (!%p316_p2), 1041409   ;;  %vm2752_vm5 = vcmask (!%p316_p2), 1042434  }
   0xa   : > { %378 = vst [vmem:[#allocation2 + $0x30] sm:$0xff] (!%p316_p2), %v23617_v22  ;;  %379 = vst [vmem:[#allocation2 + $0x38] sm:$0x3] (!%p316_p2), %v23617_v22  ;;  %vm2755_vm7 = vcmask (!%p316_p2), 1043459   ;;  %vm2758_vm11 = vcmask (!%p316_p2), 1044484   ;;  %vm2761_vm12 = vcmask (!%p316_p2), 1045509  }
   0xb   : > { %21191 = vmatprep.subr.bf16.mxu0 (!%p316_p2), %v593_v5  ;;  %380 = vst [vmem:[#allocation2 + $0x40] sm:$0xff] (!%p316_p2), %v23617_v22  ;;  %381 = vst [vmem:[#allocation2 + $0x48] sm:$0x3] (!%p316_p2), %v23617_v22  ;;  %v23735_v28 = vsub.s32 (!%p316_p2), %v791_v26, %v23732_v27  ;;  %vm2764_vm13 = vcmask (!%p316_p2), 1046534   ;;  %vm2767_vm14 = vcmask (!%p316_p2), 1047559  }
   0xc   : > { %21192 = vmatpush3.bf16.msra.mxu0 (!%p316_p2), %v593_v5  ;;  %382 = vst [vmem:[#allocation2 + $0x50] sm:$0xff] (!%p316_p2), %v23617_v22  ;;  %383 = vst [vmem:[#allocation2 + $0x58] sm:$0x3] (!%p316_p2), %v23617_v22 }
   0xd   : > { %s30461_s14 = smov (!%p357_p3, %s17962_s14), 1  ;;  %384 = vst [vmem:[#allocation2 + $0x60] sm:$0xff] %v23617_v22  ;;  %385 = vst [vmem:[#allocation2 + $0x68] sm:$0x3] %v23617_v22 }
   0xe   : > { %s20943_s19 = sshll.u32 %s30461_s14, 7  ;;  %386 = vst [vmem:[#allocation2 + $0x70] sm:$0xff] %v23617_v22  ;;  %387 = vst [vmem:[#allocation2 + $0x78] sm:$0x3] %v23617_v22  ;;  %s21477_s15 = smul.u32 12, %s30461_s14 }
   0xf   : > { %s23697_s22 = scalar_lea.vmem %s30435_s0, %s20943_s19  ;;  %388 = vst [vmem:[#allocation2 + $0x80] sm:$0xff] %v23617_v22  ;;  %389 = vst [vmem:[#allocation2 + $0x88] sm:$0x3] %v23617_v22  ;;  %s17970_s18 = sshll.u32 %s30461_s14, 2 }
  0x10   : > { %v21494_v6 = vld [vmem:[%s23697_s22] sm:$0xff]   ;;  %v21495_v7 = vld [vmem:[%s23697_s22 + $0x8] sm:$0xff]   ;;  %v21496_v8 = vld [vmem:[%s23697_s22 + $0x10] sm:$0xff]   ;;  %391 = vst [vmem:[#allocation2 + $0x98] sm:$0x3] %v23617_v22  ;;  %s370_s21 = scalar_lea.vmem %s30445_s10, %s17970_s18 }
  0x11   : > { %21193 = vmatprep.mubr.msk.bf16.mxu0 %vm539_vm2, %v21494_v6  ;;  %v21497_v9 = vld [vmem:[%s23697_s22 + $0x18] sm:$0xff]   ;;  %v21498_v10 = vld [vmem:[%s23697_s22 + $0x20] sm:$0xff]   ;;  %v21499_v11 = vld [vmem:[%s23697_s22 + $0x28] sm:$0xff]   ;;  %392 = vst [vmem:[#allocation3] sm:$0x3f] %v23617_v22 }
  0x12   : > { %21194 = vmatmul.mubr.msk.bf16.vlgmr.msra.gmra.mrb[0].mxu0 %vm539_vm2, %v21495_v7  ;;  %v21500_v12 = vld [vmem:[%s23697_s22 + $0x30] sm:$0xff]   ;;  %v21501_v13 = vld [vmem:[%s23697_s22 + $0x38] sm:$0xff]   ;;  %v21502_v14 = vld [vmem:[%s23697_s22 + $0x40] sm:$0xff]   ;;  %393 = vst [vmem:[#allocation3 + $0x8] sm:$0x3f] %v23617_v22 }
  0x13   : > { %21197 = vmatprep.mubr.msk.bf16.mxu0 %vm539_vm2, %v21496_v8  ;;  %v21503_v15 = vld [vmem:[%s23697_s22 + $0x48] sm:$0xff]   ;;  %v21504_v16 = vld [vmem:[%s23697_s22 + $0x50] sm:$0xff]   ;;  %v21505_v17 = vld [vmem:[%s23697_s22 + $0x58] sm:$0xff]   ;;  %394 = vst [vmem:[#allocation3 + $0x10] sm:$0x3f] %v23617_v22 }
  0x14   : > { %v21506_v18 = vld [vmem:[%s23697_s22 + $0x60] sm:$0xff]   ;;  %v21507_v19 = vld [vmem:[%s23697_s22 + $0x68] sm:$0xff]   ;;  %v21508_v20 = vld [vmem:[%s23697_s22 + $0x70] sm:$0xff]   ;;  %395 = vst [vmem:[#allocation3 + $0x18] sm:$0x3f] %v23617_v22 }
  0x15   : > { %v21509_v21 = vld [vmem:[%s23697_s22 + $0x78] sm:$0xff]   ;;  %396 = vst [vmem:[#allocation3 + $0x20] sm:$0x3f] %v23617_v22  ;;  %397 = vst [vmem:[#allocation3 + $0x28] sm:$0x3f] %v23617_v22  ;;  %s27138_s22 = scalar_lea.vmem %s30444_s9, %s21477_s15 }
  0x16   : > { %398 = vst [vmem:[#allocation3 + $0x30] sm:$0x3f] %v23617_v22  ;;  %399 = vst [vmem:[#allocation3 + $0x38] sm:$0x3f] %v23617_v22 }
  0x17   : > { %400 = vst [vmem:[#allocation3 + $0x40] sm:$0x3f] %v23617_v22  ;;  %401 = vst [vmem:[#allocation3 + $0x48] sm:$0x3f] %v23617_v22 }
  0x18   : > { %402 = vst [vmem:[#allocation3 + $0x50] sm:$0x3f] %v23617_v22  ;;  %403 = vst [vmem:[#allocation3 + $0x58] sm:$0x3f] %v23617_v22 }
  0x19   : > { %405 = vst [vmem:[#allocation4 + $0x8] sm:$0xf] %v23617_v22  ;;  %406 = vst [vmem:[#allocation4 + $0xc] sm:$0xff] %v23617_v22 }
  0x1a   : > { %21198 = vmatmul.mubr.msk.bf16.gmra.mrb[4].mxu0 %vm539_vm2, %v21497_v9  ;;  %407 = vst [vmem:[#allocation4 + $0x14] sm:$0xf] %v23617_v22  ;;  %408 = vst [vmem:[#allocation4 + $0x18] sm:$0xff] %v23617_v22 }
  0x1b   : > { %21201 = vmatprep.mubr.msk.bf16.mxu0 %vm539_vm2, %v21498_v10  ;;  %409 = vst [vmem:[#allocation4 + $0x20] sm:$0xf] %v23617_v22  ;;  %411 = vst [vmem:[#allocation4 + $0x2c] sm:$0xf] %v23617_v22 }
  0x22   : > { %21202 = vmatmul.mubr.msk.bf16.gmra.mrb[8].mxu0 %vm539_vm2, %v21499_v11 }
  0x23   : > { %21205 = vmatprep.mubr.msk.bf16.mxu0 %vm539_vm2, %v21500_v12 }
  0x2a   : > { %21206 = vmatmul.mubr.msk.bf16.gmra.mrb[12].mxu0 %vm539_vm2, %v21501_v13 }
  0x2b   : > { %21209 = vmatprep.mubr.msk.bf16.mxu0 %vm539_vm2, %v21502_v14 }
  0x32   : > { %21210 = vmatmul.mubr.msk.bf16.gmra.mrb[16].mxu0 %vm539_vm2, %v21503_v15 }
  0x33   : > { %21213 = vmatprep.mubr.msk.bf16.mxu0 %vm539_vm2, %v21504_v16 }
  0x3a   : > { %21214 = vmatmul.mubr.msk.bf16.gmra.mrb[20].mxu0 %vm539_vm2, %v21505_v17 }
  0x3b   : > { %21217 = vmatprep.mubr.msk.bf16.mxu0 %vm539_vm2, %v21506_v18 }
  0x42   : > { %21218 = vmatmul.mubr.msk.bf16.gmra.mrb[24].mxu0 %vm539_vm2, %v21507_v19 }
  0x43   : > { %21221 = vmatprep.mubr.msk.bf16.mxu0 %vm539_vm2, %v21508_v20 }
  0x4a   : > { %21222 = vmatmul.mubr.msk.bf16.gmra.mrb[28].mxu0 %vm539_vm2, %v21509_v21 }
  0xe5   : > { %v21195_v29 = vpop.f32.mrb[0].mxu0 }
  0xe6   : > { %v822_v30 = vcombine.high %v21195_v29, %v21195_v29  ;;  %v829_v31 = vrot.slane %v21195_v29, %v23735_v28  ;;  %v629_v32 = vpop.f32.mrb[1].mxu0  ;;  %v23769_v29 = vld [vmem:[%s30440_s5] ss:$0 sm:$0xff] }
  0xe7   : > { %v788_v33 = vcombine.high %v629_v32, %v629_v32  ;;  %v795_v34 = vrot.slane %v629_v32, %v23735_v28  ;;  %v23739_v35 = vpop.f32.mrb[2].mxu0 }
  0xe8   : > { %v836_v37 = vrot.slane %v822_v30, %v23735_v28  ;;  %v837_v38 = vcombine.high %v829_v31, %v829_v31  ;;  %v1517_v39 = vsel %vm1460_vm3, %v829_v31, -inf  ;;  %v839_v40 = vcombine.high %v23739_v35, %v23739_v35  ;;  %v23748_v41 = vpop.f32.mrb[3].mxu0 }
  0xe9   : > { %v1518_v42 = vrot.slane %v1517_v39, 4  ;;  %v802_v43 = vrot.slane %v788_v33, %v23735_v28  ;;  %v803_v44 = vcombine.high %v795_v34, %v795_v34  ;;  %v1461_v45 = vsel %vm1460_vm3, %v795_v34, -inf }
  0xea   : > { %v838_v46 = vcombine.high %v836_v37, %v836_v37  ;;  %v1524_v47 = vsel %vm1460_vm3, %v837_v38, -inf  ;;  %v1531_v48 = vsel %vm1460_vm3, %v836_v37, -inf  ;;  %v1462_v49 = vrot.slane %v1461_v45, 4 }
  0xeb   : > { %v1519_v50 = vmax.f32 %v1517_v39, %v1518_v42  ;;  %v1525_v51 = vrot.slane %v1524_v47, 4  ;;  %v1532_v52 = vrot.slane %v1531_v48, 4  ;;  %v804_v53 = vcombine.high %v802_v43, %v802_v43 }
  0xec   : > { %v1538_v54 = vsel %vm1460_vm3, %v838_v46, -inf  ;;  %v1463_v55 = vmax.f32 %v1461_v45, %v1462_v49  ;;  %v1468_v56 = vsel %vm1460_vm3, %v803_v44, -inf  ;;  %v1475_v57 = vsel %vm1460_vm3, %v802_v43, -inf }
  0xed   : > { %v1520_v58 = vrot.slane %v1519_v50, 2  ;;  %v1526_v59 = vmax.f32 %v1524_v47, %v1525_v51  ;;  %v1533_v60 = vmax.f32 %v1531_v48, %v1532_v52  ;;  %v1539_v61 = vrot.slane %v1538_v54, 4  ;;  %v23757_v62 = vpop.f32.mrb[4].mxu0  ;;  %v21512_v47 = vld [vmem:[%s30437_s2 + $0x80] ss:$8 sps:$4 sm:$0xff]  }
  0xee   : > { %v1464_v63 = vrot.slane %v1463_v55, 2  ;;  %v1469_v0 = vrot.slane %v1468_v56, 4  ;;  %v1476_v1 = vrot.slane %v1475_v57, 4  ;;  %v1482_v2 = vsel %vm1460_vm3, %v804_v53, -inf  ;;  %v23760_v3 = vpop.f32.mrb[5].mxu0  ;;  %3199 = vmatpush1.bf16.msra.mxu1 %v21512_v47 }
  0xef   : > { %v1521_v4 = vmax.f32 %v1519_v50, %v1520_v58  ;;  %v1527_v5 = vrot.slane %v1526_v59, 2  ;;  %v1534_v6 = vrot.slane %v1533_v60, 2  ;;  %v1540_v7 = vmax.f32 %v1538_v54, %v1539_v61  ;;  %v23762_v8 = vpop.f32.mrb[6].mxu0 }
  0xf0   : > { %v1465_v9 = vmax.f32 %v1463_v55, %v1464_v63  ;;  %v1470_v10 = vmax.f32 %v1468_v56, %v1469_v0  ;;  %v1477_v11 = vmax.f32 %v1475_v57, %v1476_v1  ;;  %v1483_v12 = vrot.slane %v1482_v2, 4  ;;  %v23764_v13 = vpop.f32.mrb[7].mxu0 }
  0xf1   : > { %v1522_v14 = vrot.slane %v1521_v4, 1  ;;  %v1528_v15 = vmax.f32 %v1526_v59, %v1527_v5  ;;  %v1535_v16 = vmax.f32 %v1533_v60, %v1534_v6  ;;  %v1541_v17 = vrot.slane %v1540_v7, 2 }
  0xf2   : > { %v1466_v18 = vrot.slane %v1465_v9, 1  ;;  %v1471_v19 = vrot.slane %v1470_v10, 2  ;;  %v1478_v20 = vrot.slane %v1477_v11, 2  ;;  %v1484_v21 = vmax.f32 %v1482_v2, %v1483_v12 }
  0xf3   : > { %v1523_v22 = vmax.f32 %v1521_v4, %v1522_v14  ;;  %v1529_v23 = vrot.slane %v1528_v15, 1  ;;  %v1536_v24 = vrot.slane %v1535_v16, 1  ;;  %v1542_v26 = vmax.f32 %v1540_v7, %v1541_v17 }
  0xf4   : > { %v1467_v30 = vmax.f32 %v1465_v9, %v1466_v18  ;;  %v1472_v31 = vmax.f32 %v1470_v10, %v1471_v19  ;;  %v1479_v32 = vmax.f32 %v1477_v11, %v1478_v20  ;;  %v1485_v33 = vrot.slane %v1484_v21, 2 }
  0xf5   : > { %v1530_v34 = vmax.f32 %v1528_v15, %v1529_v23  ;;  %v1537_v36 = vmax.f32 %v1535_v16, %v1536_v24  ;;  %v1543_v37 = vrot.slane %v1542_v26, 1  ;;  %v846_v38 = vrot.slane %v23739_v35, %v23735_v28  ;;  %v23773_v39 = vpop.f32.mrb[8].mxu0 }
  0xf6   : > { %v1473_v42 = vrot.slane %v1472_v31, 1  ;;  %v1480_v43 = vrot.slane %v1479_v32, 1  ;;  %v1486_v44 = vmax.f32 %v1484_v21, %v1485_v33  ;;  %v2357_v45 = vmax.f32 %v1467_v30, %v1523_v22  ;;  %v23775_v46 = vpop.f32.mrb[9].mxu0 }
  0xf7   : > { %v1544_v48 = vmax.f32 %v1542_v26, %v1543_v37  ;;  %v853_v49 = vrot.slane %v839_v40, %v23735_v28  ;;  %v854_v50 = vcombine.high %v846_v38, %v846_v38  ;;  %v1545_v51 = vsel %vm1460_vm3, %v846_v38, -inf  ;;  %v23785_v52 = vpop.f32.mrb[10].mxu0 }
  0xf8   : > { %v1474_v53 = vmax.f32 %v1472_v31, %v1473_v42  ;;  %v1481_v54 = vmax.f32 %v1479_v32, %v1480_v43  ;;  %v1487_v55 = vrot.slane %v1486_v44, 1  ;;  %v2428_v56 = vadd.f32 %v23769_v29, %v2357_v45  ;;  %v23788_v57 = vpop.f32.mrb[11].mxu0 }
  0xf9   : > { %v855_v58 = vcombine.high %v853_v49, %v853_v49  ;;  %v1546_v59 = vrot.slane %v1545_v51, 4  ;;  %v1552_v35 = vsel %vm1460_vm3, %v854_v50, -inf  ;;  %v1559_v40 = vsel %vm1460_vm3, %v853_v49, -inf }
  0xfa   : > { %v1488_v60 = vmax.f32 %v1486_v44, %v1487_v55  ;;  %v2358_v61 = vmax.f32 %v1474_v53, %v1530_v34  ;;  %v2359_v63 = vmax.f32 %v1481_v54, %v1537_v36  ;;  %vm2492_vm6 = vcmp.ge.f32.partialorder %v2428_v56, 0.0 }
  0xfb   : > { %v2556_v0 = vmul.f32 0.1, %v2428_v56  ;;  %v1547_v1 = vmax.f32 %v1545_v51, %v1546_v59  ;;  %v1553_v2 = vrot.slane %v1552_v35, 4  ;;  %v1560_v4 = vrot.slane %v1559_v40, 4 }
  0xfc   : > { %v2360_v5 = vmax.f32 %v1488_v60, %v1544_v48  ;;  %v2429_v6 = vadd.f32 %v23769_v29, %v2358_v61  ;;  %v2430_v7 = vadd.f32 %v23769_v29, %v2359_v63  ;;  %v1566_v9 = vsel %vm1460_vm3, %v855_v58, -inf }
  0xfd   : > { %v2620_v10 = vsel %vm2492_vm6, %v2428_v56, %v2556_v0  ;;  %v1548_v11 = vrot.slane %v1547_v1, 2  ;;  %v1554_v12 = vmax.f32 %v1552_v35, %v1553_v2  ;;  %v1561_v14 = vmax.f32 %v1559_v40, %v1560_v4  ;;  %v23795_v15 = vpop.f32.mrb[12].mxu0 }
  0xfe   : > { %v2431_v16 = vadd.f32 %v23769_v29, %v2360_v5  ;;  %vm2493_vm8 = vcmp.ge.f32.partialorder %v2429_v6, 0.0  ;;  %vm2494_vm9 = vcmp.ge.f32.partialorder %v2430_v7, 0.0  ;;  %v2557_v17 = vmul.f32 0.1, %v2429_v6  ;;  %v23798_v18 = vpop.f32.mrb[13].mxu0 }
  0xff   : > { %v2558_v19 = vmul.f32 0.1, %v2430_v7  ;;  %v1549_v20 = vmax.f32 %v1547_v1, %v1548_v11  ;;  %v1555_v21 = vrot.slane %v1554_v12, 2  ;;  %v1562_v22 = vrot.slane %v1561_v14, 2  ;;  %v23800_v23 = vpop.f32.mrb[14].mxu0 }
 0x100   : > { %vm2495_vm10 = vcmp.ge.f32.partialorder %v2431_v16, 0.0  ;;  %v2559_v24 = vmul.f32 0.1, %v2431_v16  ;;  %v2621_v26 = vsel %vm2493_vm8, %v2429_v6, %v2557_v17  ;;  %v1567_v30 = vrot.slane %v1566_v9, 4  ;;  %v23802_v31 = vpop.f32.mrb[15].mxu0 }
 0x101   : > { %v2622_v32 = vsel %vm2494_vm9, %v2430_v7, %v2558_v19  ;;  %v2748_v33 = vrot.slane %v2621_v26, 7  ;;  %v1550_v34 = vrot.slane %v1549_v20, 1  ;;  %v1556_v36 = vmax.f32 %v1554_v12, %v1555_v21 }
 0x102   : > { %v2623_v37 = vsel %vm2495_vm10, %v2431_v16, %v2559_v24  ;;  %v2751_v38 = vrot.slane %v2622_v32, 6  ;;  %v1563_v42 = vmax.f32 %v1561_v14, %v1562_v22  ;;  %v1568_v43 = vmax.f32 %v1566_v9, %v1567_v30 }
 0x103   : > { %v2750_v44 = vsel %vm2749_vm4, %v2748_v33, %v2620_v10  ;;  %v2754_v45 = vrot.slane %v2623_v37, 5  ;;  %v1557_v47 = vrot.slane %v1556_v36, 1  ;;  %v805_v51 = vcombine.high %v23748_v41, %v23748_v41 }
 0x104   : > { %v2753_v48 = vsel %vm2752_vm5, %v2751_v38, %v2750_v44  ;;  %v1564_v49 = vrot.slane %v1563_v42, 1  ;;  %v1569_v50 = vrot.slane %v1568_v43, 2  ;;  %v23811_v54 = vmax.f32 %v1549_v20, %v1550_v34 }
 0x105   : > { %v23809_v53 = vsel %vm2755_vm7, %v2754_v45, %v2753_v48  ;;  %v812_v55 = vrot.slane %v23748_v41, %v23735_v28  ;;  %v890_v56 = vcombine.high %v23757_v62, %v23757_v62  ;;  %v23817_v58 = vmax.f32 %v1556_v36, %v1557_v47  ;;  %v21515_v48 = vld [vmem:[%s30437_s2 + $0x90] ss:$8 sps:$4 sm:$0xff]  }
 0x106   : > { %v1570_v59 = vmax.f32 %v1568_v43, %v1569_v50  ;;  %v819_v35 = vrot.slane %v805_v51, %v23735_v28  ;;  %v897_v40 = vrot.slane %v23757_v62, %v23735_v28  ;;  %v23822_v60 = vmax.f32 %v1563_v42, %v1564_v49  ;;  %v21513_v42 = vld [vmem:[%s30437_s2 + $0x94] ss:$8 sps:$4 sm:$0xff]  }
 0x107   : > { %v820_v61 = vcombine.high %v812_v55, %v812_v55  ;;  %v1489_v63 = vsel %vm1460_vm3, %v812_v55, -inf  ;;  %v904_v0 = vrot.slane %v890_v56, %v23735_v28  ;;  %3200 = vmatprep.subr.bf16.mxu1 %v21513_v42 }
 0x108   : > { %v1571_v1 = vrot.slane %v1570_v59, 1  ;;  %v821_v41 = vcombine.high %v819_v35, %v819_v35  ;;  %v1490_v2 = vrot.slane %v1489_v63, 4  ;;  %v1503_v4 = vsel %vm1460_vm3, %v819_v35, -inf  ;;  %3201 = vmatpush1.bf16.msra.mxu1 %v21515_v48 }
 0x109   : > { %v1496_v5 = vsel %vm1460_vm3, %v820_v61, -inf  ;;  %v1504_v6 = vrot.slane %v1503_v4, 4  ;;  %v905_v7 = vcombine.high %v897_v40, %v897_v40  ;;  %v906_v9 = vcombine.high %v904_v0, %v904_v0 }
 0x10a   : > { %v23828_v10 = vmax.f32 %v1570_v59, %v1571_v1  ;;  %v1491_v62 = vmax.f32 %v1489_v63, %v1490_v2  ;;  %v1497_v11 = vrot.slane %v1496_v5, 4  ;;  %v1510_v12 = vsel %vm1460_vm3, %v821_v41, -inf }
 0x10b   : > { %v1505_v14 = vmax.f32 %v1503_v4, %v1504_v6  ;;  %v1511_v16 = vrot.slane %v1510_v12, 4  ;;  %v1629_v17 = vsel %vm1460_vm3, %v897_v40, -inf  ;;  %v1636_v19 = vsel %vm1460_vm3, %v905_v7, -inf  ;;  %v21516_v6 = vld [vmem:[%s30437_s2 + $0xa4] ss:$8 sps:$4 sm:$0xff]  }
 0x10c   : > { %v1492_v20 = vrot.slane %v1491_v62, 2  ;;  %v1498_v21 = vmax.f32 %v1496_v5, %v1497_v11  ;;  %v1630_v22 = vrot.slane %v1629_v17, 4  ;;  %v1637_v24 = vrot.slane %v1636_v19, 4  ;;  %3202 = vmatprep.subr.bf16.mxu1 %v21516_v6 }
 0x10d   : > { %v1506_v26 = vrot.slane %v1505_v14, 2  ;;  %v1512_v30 = vmax.f32 %v1510_v12, %v1511_v16  ;;  %v1643_v32 = vsel %vm1460_vm3, %v904_v0, -inf  ;;  %v1650_v33 = vsel %vm1460_vm3, %v906_v9, -inf  ;;  %v23845_v12 = vpop.f32.mrb[16].mxu0 }
 0x10e   : > { %v1493_v34 = vmax.f32 %v1491_v62, %v1492_v20  ;;  %v1499_v36 = vrot.slane %v1498_v21, 2  ;;  %v1631_v37 = vmax.f32 %v1629_v17, %v1630_v22  ;;  %v1638_v38 = vmax.f32 %v1636_v19, %v1637_v24  ;;  %v23854_v24 = vpop.f32.mrb[17].mxu0 }
 0x10f   : > { %v1507_v43 = vmax.f32 %v1505_v14, %v1506_v26  ;;  %v1513_v44 = vrot.slane %v1512_v30, 2  ;;  %v1644_v45 = vrot.slane %v1643_v32, 4  ;;  %v1651_v47 = vrot.slane %v1650_v33, 4 }
 0x110   : > { %v1494_v49 = vrot.slane %v1493_v34, 1  ;;  %v1500_v50 = vmax.f32 %v1498_v21, %v1499_v36  ;;  %v1632_v51 = vrot.slane %v1631_v37, 2  ;;  %v1639_v55 = vrot.slane %v1638_v38, 2 }
 0x111   : > { %v1508_v56 = vrot.slane %v1507_v43, 1  ;;  %v1514_v59 = vmax.f32 %v1512_v30, %v1513_v44  ;;  %v1645_v35 = vmax.f32 %v1643_v32, %v1644_v45  ;;  %v1652_v40 = vmax.f32 %v1650_v33, %v1651_v47 }
 0x112   : > { %v1495_v61 = vmax.f32 %v1493_v34, %v1494_v49  ;;  %v1501_v63 = vrot.slane %v1500_v50, 1  ;;  %v1633_v0 = vmax.f32 %v1631_v37, %v1632_v51  ;;  %v1640_v1 = vmax.f32 %v1638_v38, %v1639_v55 }
 0x113   : > { %v1509_v41 = vmax.f32 %v1507_v43, %v1508_v56  ;;  %v1515_v2 = vrot.slane %v1514_v59, 1  ;;  %v1646_v4 = vrot.slane %v1645_v35, 2  ;;  %v1653_v5 = vrot.slane %v1652_v40, 2 }
 0x114   : > { %v1502_v7 = vmax.f32 %v1500_v50, %v1501_v63  ;;  %v2361_v9 = vmax.f32 %v1495_v61, %v23811_v54  ;;  %v1634_v62 = vrot.slane %v1633_v0, 1  ;;  %v1641_v11 = vrot.slane %v1640_v1, 1 }
 0x115   : > { %v1516_v14 = vmax.f32 %v1514_v59, %v1515_v2  ;;  %v2363_v16 = vmax.f32 %v1509_v41, %v23822_v60  ;;  %v1647_v17 = vmax.f32 %v1645_v35, %v1646_v4  ;;  %v1654_v19 = vmax.f32 %v1652_v40, %v1653_v5 }
 0x116   : > { %v2362_v20 = vmax.f32 %v1502_v7, %v23817_v58  ;;  %v2432_v21 = vadd.f32 %v23769_v29, %v2361_v9  ;;  %v23850_v22 = vmax.f32 %v1633_v0, %v1634_v62  ;;  %v856_v54 = vcombine.high %v23760_v3, %v23760_v3 }
 0x117   : > { %v2364_v26 = vmax.f32 %v1516_v14, %v23828_v10  ;;  %v2434_v60 = vadd.f32 %v23769_v29, %v2363_v16  ;;  %v1648_v30 = vrot.slane %v1647_v17, 1  ;;  %v1655_v32 = vrot.slane %v1654_v19, 1 }
 0x118   : > { %v2433_v33 = vadd.f32 %v23769_v29, %v2362_v20  ;;  %vm2496_vm15 = vcmp.ge.f32.partialorder %v2432_v21, 0.0  ;;  %v2560_v58 = vmul.f32 0.1, %v2432_v21  ;;  %v863_v34 = vrot.slane %v23760_v3, %v23735_v28 }
 0x119   : > { %v2435_v36 = vadd.f32 %v23769_v29, %v2364_v26  ;;  %vm2498_vm0 = vcmp.ge.f32.partialorder %v2434_v60, 0.0  ;;  %v2562_v37 = vmul.f32 0.1, %v2434_v60  ;;  %v23862_v38 = vmax.f32 %v1640_v1, %v1641_v11 }
 0x11a   : > { %vm2497_vm1 = vcmp.ge.f32.partialorder %v2433_v33, 0.0  ;;  %v2561_v42 = vmul.f32 0.1, %v2433_v33  ;;  %v2624_v10 = vsel %vm2496_vm15, %v2432_v21, %v2560_v58  ;;  %v23864_v43 = vmax.f32 %v1647_v17, %v1648_v30 }
 0x11b   : > { %vm2499_vm2 = vcmp.ge.f32.partialorder %v2435_v36, 0.0  ;;  %v2563_v44 = vmul.f32 0.1, %v2435_v36  ;;  %v2626_v45 = vsel %vm2498_vm0, %v2434_v60, %v2562_v37  ;;  %v2757_v47 = vrot.slane %v2624_v10, 4 }
 0x11c   : > { %v2625_v48 = vsel %vm2497_vm1, %v2433_v33, %v2561_v42  ;;  %v2763_v49 = vrot.slane %v2626_v45, 2  ;;  %v870_v50 = vrot.slane %v856_v54, %v23735_v28  ;;  %v871_v3 = vcombine.high %v863_v34, %v863_v34 }
 0x11d   : > { %v2627_v51 = vsel %vm2499_vm2, %v2435_v36, %v2563_v44  ;;  %v2759_v55 = vsel %vm2758_vm11, %v2757_v47, %v23809_v53  ;;  %v2760_v56 = vrot.slane %v2625_v48, 3  ;;  %v1573_v59 = vsel %vm1460_vm3, %v863_v34, -inf  ;;  %v21518_v36 = vld [vmem:[%s30437_s2 + $0xa0] ss:$8 sps:$4 sm:$0xff]  }
 0x11e   : > { %v2766_v35 = vrot.slane %v2627_v51, 1  ;;  %v872_v40 = vcombine.high %v870_v50, %v870_v50  ;;  %v1574_v61 = vrot.slane %v1573_v59, 4  ;;  %v1580_v63 = vsel %vm1460_vm3, %v871_v3, -inf  ;;  %3203 = vmatpush1.bf16.msra.mxu1 %v21518_v36  ;;  %v23888_v3 = vpop.f32.mrb[18].mxu0 }
 0x11f   : > { %v2762_v0 = vsel %vm2761_vm12, %v2760_v56, %v2759_v55  ;;  %v1581_v1 = vrot.slane %v1580_v63, 4  ;;  %v1587_v41 = vsel %vm1460_vm3, %v870_v50, -inf  ;;  %v907_v2 = vcombine.high %v23762_v8, %v23762_v8 }
 0x120   : > { %v2765_v4 = vsel %vm2764_vm13, %v2763_v49, %v2762_v0  ;;  %v1575_v5 = vmax.f32 %v1573_v59, %v1574_v61  ;;  %v1588_v53 = vrot.slane %v1587_v41, 4  ;;  %v1594_v6 = vsel %vm1460_vm3, %v872_v40, -inf }
 0x121   : > { %v2768_v7 = vsel %vm2767_vm14, %v2766_v35, %v2765_v4  ;;  %v1582_v9 = vmax.f32 %v1580_v63, %v1581_v1  ;;  %v1595_v62 = vrot.slane %v1594_v6, 4  ;;  %v914_v11 = vrot.slane %v23762_v8, %v23735_v28 }
 0x122   : > { %2876 = vst [vmem:[#allocation2 + $0x11] sm:$0xff] %v2768_v7  ;;  %v1656_v14 = vmax.f32 %v1654_v19, %v1655_v32  ;;  %v1576_v16 = vrot.slane %v1575_v5, 2  ;;  %v1589_v17 = vmax.f32 %v1587_v41, %v1588_v53  ;;  %v921_v20 = vrot.slane %v907_v2, %v23735_v28 }
 0x123   : > { %v1583_v21 = vrot.slane %v1582_v9, 2  ;;  %v1596_v54 = vmax.f32 %v1594_v6, %v1595_v62  ;;  %v922_v26 = vcombine.high %v914_v11, %v914_v11  ;;  %v1657_v60 = vsel %vm1460_vm3, %v914_v11, -inf }
 0x124   : > { %v1577_v30 = vmax.f32 %v1575_v5, %v1576_v16  ;;  %v1590_v33 = vrot.slane %v1589_v17, 2  ;;  %v923_v58 = vcombine.high %v921_v20, %v921_v20  ;;  %v1658_v34 = vrot.slane %v1657_v60, 4 }
 0x125   : > { %v1584_v8 = vmax.f32 %v1582_v9, %v1583_v21  ;;  %v1597_v37 = vrot.slane %v1596_v54, 2  ;;  %v1664_v19 = vsel %vm1460_vm3, %v922_v26, -inf  ;;  %v1671_v32 = vsel %vm1460_vm3, %v921_v20, -inf }
 0x126   : > { %v1578_v42 = vrot.slane %v1577_v30, 1  ;;  %v1591_v10 = vmax.f32 %v1589_v17, %v1590_v33  ;;  %v1659_v44 = vmax.f32 %v1657_v60, %v1658_v34  ;;  %v1665_v45 = vrot.slane %v1664_v19, 4 }
 0x127   : > { %v1585_v47 = vrot.slane %v1584_v8, 1  ;;  %v1598_v48 = vmax.f32 %v1596_v54, %v1597_v37  ;;  %v1672_v49 = vrot.slane %v1671_v32, 4  ;;  %v1678_v50 = vsel %vm1460_vm3, %v923_v58, -inf  ;;  %v23901_v58 = vpop.f32.mrb[19].mxu0 }
 0x128   : > { %v1579_v51 = vmax.f32 %v1577_v30, %v1578_v42  ;;  %v1592_v55 = vrot.slane %v1591_v10, 1  ;;  %v1660_v56 = vrot.slane %v1659_v44, 2  ;;  %v1666_v59 = vmax.f32 %v1664_v19, %v1665_v45 }
 0x129   : > { %v1586_v35 = vmax.f32 %v1584_v8, %v1585_v47  ;;  %v1599_v40 = vrot.slane %v1598_v48, 1  ;;  %v1673_v61 = vmax.f32 %v1671_v32, %v1672_v49  ;;  %v1679_v63 = vrot.slane %v1678_v50, 4 }
 0x12a   : > { %v1593_v0 = vmax.f32 %v1591_v10, %v1592_v55  ;;  %v2365_v1 = vmax.f32 %v1579_v51, %v23850_v22  ;;  %v1661_v41 = vmax.f32 %v1659_v44, %v1660_v56  ;;  %v1667_v2 = vrot.slane %v1666_v59, 2 }
 0x12b   : > { %v1600_v4 = vmax.f32 %v1598_v48, %v1599_v40  ;;  %v2366_v5 = vmax.f32 %v1586_v35, %v23862_v38  ;;  %v1674_v53 = vrot.slane %v1673_v61, 2  ;;  %v1680_v6 = vmax.f32 %v1678_v50, %v1679_v63 }
 0x12c   : > { %v2367_v7 = vmax.f32 %v1593_v0, %v23864_v43  ;;  %v2436_v9 = vadd.f32 %v23769_v29, %v2365_v1  ;;  %v1662_v62 = vrot.slane %v1661_v41, 1  ;;  %v1668_v11 = vmax.f32 %v1666_v59, %v1667_v2 }
 0x12d   : > { %v2368_v16 = vmax.f32 %v1600_v4, %v1656_v14  ;;  %v2437_v17 = vadd.f32 %v23769_v29, %v2366_v5  ;;  %v1675_v20 = vmax.f32 %v1673_v61, %v1674_v53  ;;  %v1681_v21 = vrot.slane %v1680_v6, 2 }
 0x12e   : > { %v2438_v22 = vadd.f32 %v23769_v29, %v2367_v7  ;;  %vm2500_vm6 = vcmp.ge.f32.partialorder %v2436_v9, 0.0  ;;  %v2564_v54 = vmul.f32 0.1, %v2436_v9  ;;  %v873_v38 = vcombine.high %v23764_v13, %v23764_v13 }
 0x12f   : > { %v2439_v26 = vadd.f32 %v23769_v29, %v2368_v16  ;;  %vm2501_vm8 = vcmp.ge.f32.partialorder %v2437_v17, 0.0  ;;  %v2565_v43 = vmul.f32 0.1, %v2437_v17  ;;  %v1669_v60 = vrot.slane %v1668_v11, 1 }
 0x130   : > { %vm2502_vm9 = vcmp.ge.f32.partialorder %v2438_v22, 0.0  ;;  %v2566_v30 = vmul.f32 0.1, %v2438_v22  ;;  %v23899_v33 = vmax.f32 %v1661_v41, %v1662_v62  ;;  %v1676_v14 = vrot.slane %v1675_v20, 1 }
 0x131   : > { %vm2503_vm10 = vcmp.ge.f32.partialorder %v2439_v26, 0.0  ;;  %v2567_v34 = vmul.f32 0.1, %v2439_v26  ;;  %v2628_v36 = vsel %vm2500_vm6, %v2436_v9, %v2564_v54  ;;  %v2629_v8 = vsel %vm2501_vm8, %v2437_v17, %v2565_v43 }
 0x132   : > { %v2630_v37 = vsel %vm2502_vm9, %v2438_v22, %v2566_v30  ;;  %v2769_v19 = vrot.slane %v2629_v8, 7  ;;  %v23903_v32 = vmax.f32 %v1668_v11, %v1669_v60  ;;  %v1682_v42 = vmax.f32 %v1680_v6, %v1681_v21  ;;  %v21519_v8 = vld [vmem:[%s30437_s2 + $0xb4] ss:$8 sps:$4 sm:$0xff]  }
 0x133   : > { %v2631_v29 = vsel %vm2503_vm10, %v2439_v26, %v2567_v34  ;;  %v2771_v10 = vrot.slane %v2630_v37, 6  ;;  %v880_v44 = vrot.slane %v23764_v13, %v23735_v28  ;;  %v887_v45 = vrot.slane %v873_v38, %v23735_v28  ;;  %3204 = vmatprep.subr.bf16.mxu1 %v21519_v8 }
 0x134   : > { %v2770_v47 = vsel %vm2749_vm4, %v2769_v19, %v2628_v36  ;;  %v2773_v48 = vrot.slane %v2631_v29, 5  ;;  %v1683_v49 = vrot.slane %v1682_v42, 1  ;;  %v958_v50 = vcombine.high %v23773_v39, %v23773_v39 }
 0x135   : > { %v2772_v51 = vsel %vm2752_vm5, %v2771_v10, %v2770_v47  ;;  %v888_v55 = vcombine.high %v880_v44, %v880_v44  ;;  %v889_v56 = vcombine.high %v887_v45, %v887_v45  ;;  %v1601_v59 = vsel %vm1460_vm3, %v880_v44, -inf  ;;  %v21521_v10 = vld [vmem:[%s30437_s2 + $0xb0] ss:$8 sps:$4 sm:$0xff]  }
 0x136   : > { %v23914_v35 = vsel %vm2755_vm7, %v2773_v48, %v2772_v51  ;;  %v23916_v40 = vmax.f32 %v1675_v20, %v1676_v14  ;;  %v1602_v13 = vrot.slane %v1601_v59, 4  ;;  %v1615_v61 = vsel %vm1460_vm3, %v887_v45, -inf  ;;  %3205 = vmatpush1.bf16.msra.mxu1 %v21521_v10 }
 0x137   : > { %v1608_v63 = vsel %vm1460_vm3, %v888_v55, -inf  ;;  %v1616_v0 = vrot.slane %v1615_v61, 4  ;;  %v1622_v1 = vsel %vm1460_vm3, %v889_v56, -inf  ;;  %v965_v41 = vrot.slane %v23773_v39, %v23735_v28 }
 0x138   : > { %v1603_v2 = vmax.f32 %v1601_v59, %v1602_v13  ;;  %v1609_v4 = vrot.slane %v1608_v63, 4  ;;  %v1623_v5 = vrot.slane %v1622_v1, 4  ;;  %v972_v53 = vrot.slane %v958_v50, %v23735_v28 }
 0x139   : > { %v1684_v6 = vmax.f32 %v1682_v42, %v1683_v49  ;;  %v1617_v7 = vmax.f32 %v1615_v61, %v1616_v0  ;;  %v973_v9 = vcombine.high %v965_v41, %v965_v41  ;;  %v1741_v62 = vsel %vm1460_vm3, %v965_v41, -inf }
 0x13a   : > { %v1604_v11 = vrot.slane %v1603_v2, 2  ;;  %v1610_v16 = vmax.f32 %v1608_v63, %v1609_v4  ;;  %v1624_v17 = vmax.f32 %v1622_v1, %v1623_v5  ;;  %v974_v20 = vcombine.high %v972_v53, %v972_v53 }
 0x13b   : > { %v1618_v21 = vrot.slane %v1617_v7, 2  ;;  %v1742_v22 = vrot.slane %v1741_v62, 4  ;;  %v1748_v54 = vsel %vm1460_vm3, %v973_v9, -inf  ;;  %v1755_v39 = vsel %vm1460_vm3, %v972_v53, -inf }
 0x13c   : > { %v1605_v38 = vmax.f32 %v1603_v2, %v1604_v11  ;;  %v1611_v26 = vrot.slane %v1610_v16, 2  ;;  %v1625_v43 = vrot.slane %v1624_v17, 2  ;;  %v1749_v60 = vrot.slane %v1748_v54, 4  ;;  %v23942_v11 = vld [vmem:[%s30440_s5] ss:$0 sm:$0xff] }
 0x13d   : > { %v1619_v30 = vmax.f32 %v1617_v7, %v1618_v21  ;;  %v1743_v14 = vmax.f32 %v1741_v62, %v1742_v22  ;;  %v1756_v34 = vrot.slane %v1755_v39, 4  ;;  %v1762_v36 = vsel %vm1460_vm3, %v974_v20, -inf  ;;  %v23936_v7 = vpop.f32.mrb[20].mxu0 }
 0x13e   : > { %v1606_v37 = vrot.slane %v1605_v38, 1  ;;  %v1612_v19 = vmax.f32 %v1610_v16, %v1611_v26  ;;  %v1626_v42 = vmax.f32 %v1624_v17, %v1625_v43  ;;  %v1750_v29 = vmax.f32 %v1748_v54, %v1749_v60  ;;  %v23957_v43 = vpop.f32.mrb[21].mxu0 }
 0x13f   : > { %v1620_v44 = vrot.slane %v1619_v30, 1  ;;  %v1744_v45 = vrot.slane %v1743_v14, 2  ;;  %v1757_v47 = vmax.f32 %v1755_v39, %v1756_v34  ;;  %v1763_v48 = vrot.slane %v1762_v36, 4 }
 0x140   : > { %v1607_v49 = vmax.f32 %v1605_v38, %v1606_v37  ;;  %v1613_v50 = vrot.slane %v1612_v19, 1  ;;  %v1627_v51 = vrot.slane %v1626_v42, 1  ;;  %v1751_v55 = vrot.slane %v1750_v29, 2 }
 0x141   : > { %v1621_v56 = vmax.f32 %v1619_v30, %v1620_v44  ;;  %v1745_v59 = vmax.f32 %v1743_v14, %v1744_v45  ;;  %v1758_v13 = vrot.slane %v1757_v47, 2  ;;  %v1764_v61 = vmax.f32 %v1762_v36, %v1763_v48 }
 0x142   : > { %v1614_v63 = vmax.f32 %v1612_v19, %v1613_v50  ;;  %v1628_v0 = vmax.f32 %v1626_v42, %v1627_v51  ;;  %v2369_v1 = vmax.f32 %v1607_v49, %v23899_v33  ;;  %v1752_v41 = vmax.f32 %v1750_v29, %v1751_v55  ;;  %v21522_v33 = vld [vmem:[%s30437_s2 + $0xc4] ss:$8 sps:$4 sm:$0xff]  }
 0x143   : > { %v2371_v2 = vmax.f32 %v1621_v56, %v23916_v40  ;;  %v1746_v4 = vrot.slane %v1745_v59, 1  ;;  %v1759_v5 = vmax.f32 %v1757_v47, %v1758_v13  ;;  %v1765_v53 = vrot.slane %v1764_v61, 2  ;;  %3206 = vmatprep.subr.bf16.mxu1 %v21522_v33 }
 0x144   : > { %v2370_v9 = vmax.f32 %v1614_v63, %v23903_v32  ;;  %v2372_v62 = vmax.f32 %v1628_v0, %v1684_v6  ;;  %v2440_v16 = vadd.f32 %v23942_v11, %v2369_v1  ;;  %v1753_v17 = vrot.slane %v1752_v41, 1 }
 0x145   : > { %v2442_v40 = vadd.f32 %v23942_v11, %v2371_v2  ;;  %v1760_v20 = vrot.slane %v1759_v5, 1  ;;  %v1766_v21 = vmax.f32 %v1764_v61, %v1765_v53  ;;  %v924_v32 = vcombine.high %v23775_v46, %v23775_v46 }
 0x146   : > { %v2441_v6 = vadd.f32 %v23942_v11, %v2370_v9  ;;  %v2443_v22 = vadd.f32 %v23942_v11, %v2372_v62  ;;  %vm2504_vm15 = vcmp.ge.f32.partialorder %v2440_v16, 0.0  ;;  %v2568_v54 = vmul.f32 0.1, %v2440_v16 }
 0x147   : > { %vm2506_vm0 = vcmp.ge.f32.partialorder %v2442_v40, 0.0  ;;  %v2570_v39 = vmul.f32 0.1, %v2442_v40  ;;  %v23953_v38 = vmax.f32 %v1745_v59, %v1746_v4  ;;  %v23955_v26 = vmax.f32 %v1752_v41, %v1753_v17 }
 0x148   : > { %vm2505_vm1 = vcmp.ge.f32.partialorder %v2441_v6, 0.0  ;;  %vm2507_vm2 = vcmp.ge.f32.partialorder %v2443_v22, 0.0  ;;  %v2569_v60 = vmul.f32 0.1, %v2441_v6  ;;  %v2571_v30 = vmul.f32 0.1, %v2443_v22 }
 0x149   : > { %v2632_v14 = vsel %vm2504_vm15, %v2440_v16, %v2568_v54  ;;  %v2634_v34 = vsel %vm2506_vm0, %v2442_v40, %v2570_v39  ;;  %v23959_v36 = vmax.f32 %v1759_v5, %v1760_v20  ;;  %v931_v8 = vrot.slane %v23775_v46, %v23735_v28 }
 0x14a   : > { %v2633_v37 = vsel %vm2505_vm1, %v2441_v6, %v2569_v60  ;;  %v2635_v19 = vsel %vm2507_vm2, %v2443_v22, %v2571_v30  ;;  %v2775_v42 = vrot.slane %v2632_v14, 4  ;;  %v1767_v29 = vrot.slane %v1766_v21, 1  ;;  %v21524_v60 = vld [vmem:[%s30437_s2 + $0xc0] ss:$8 sps:$4 sm:$0xff]  }
 0x14b   : > { %v2777_v10 = vrot.slane %v2633_v37, 3  ;;  %v2779_v44 = vrot.slane %v2634_v34, 2  ;;  %v2781_v45 = vrot.slane %v2635_v19, 1  ;;  %v938_v47 = vrot.slane %v924_v32, %v23735_v28  ;;  %3207 = vmatpush1.bf16.msra.mxu1 %v21524_v60 }
 0x14c   : > { %v2776_v48 = vsel %vm2758_vm11, %v2775_v42, %v23914_v35  ;;  %v939_v49 = vcombine.high %v931_v8, %v931_v8  ;;  %v1685_v50 = vsel %vm1460_vm3, %v931_v8, -inf  ;;  %v975_v51 = vcombine.high %v23785_v52, %v23785_v52 }
 0x14d   : > { %v2778_v46 = vsel %vm2761_vm12, %v2777_v10, %v2776_v48  ;;  %v940_v55 = vcombine.high %v938_v47, %v938_v47  ;;  %v1686_v56 = vrot.slane %v1685_v50, 4  ;;  %v1699_v59 = vsel %vm1460_vm3, %v938_v47, -inf  ;;  %v23985_v47 = vpop.f32.mrb[22].mxu0 }
 0x14e   : > { %v2780_v13 = vsel %vm2764_vm13, %v2779_v44, %v2778_v46  ;;  %v1692_v61 = vsel %vm1460_vm3, %v939_v49, -inf  ;;  %v1700_v63 = vrot.slane %v1699_v59, 4  ;;  %v982_v35 = vrot.slane %v23785_v52, %v23735_v28 }
 0x14f   : > { %v2782_v0 = vsel %vm2767_vm14, %v2781_v45, %v2780_v13  ;;  %v1687_v1 = vmax.f32 %v1685_v50, %v1686_v56  ;;  %v1693_v41 = vrot.slane %v1692_v61, 4  ;;  %v1706_v2 = vsel %vm1460_vm3, %v940_v55, -inf }
 0x150   : > { %2877 = vst [vmem:[#allocation2 + $0x21] sm:$0xff] %v2782_v0  ;;  %v1701_v4 = vmax.f32 %v1699_v59, %v1700_v63  ;;  %v1707_v5 = vrot.slane %v1706_v2, 4  ;;  %v989_v53 = vrot.slane %v975_v51, %v23735_v28  ;;  %v990_v9 = vcombine.high %v982_v35, %v982_v35 }
 0x151   : > { %v1768_v62 = vmax.f32 %v1766_v21, %v1767_v29  ;;  %v1688_v16 = vrot.slane %v1687_v1, 2  ;;  %v1694_v17 = vmax.f32 %v1692_v61, %v1693_v41  ;;  %v1769_v33 = vsel %vm1460_vm3, %v982_v35, -inf }
 0x152   : > { %v1702_v40 = vrot.slane %v1701_v4, 2  ;;  %v1708_v20 = vmax.f32 %v1706_v2, %v1707_v5  ;;  %v991_v52 = vcombine.high %v989_v53, %v989_v53  ;;  %v1770_v32 = vrot.slane %v1769_v33, 4 }
 0x153   : > { %v1689_v6 = vmax.f32 %v1687_v1, %v1688_v16  ;;  %v1695_v22 = vrot.slane %v1694_v17, 2  ;;  %v1776_v54 = vsel %vm1460_vm3, %v990_v9, -inf  ;;  %v1783_v39 = vsel %vm1460_vm3, %v989_v53, -inf }
 0x154   : > { %v1703_v30 = vmax.f32 %v1701_v4, %v1702_v40  ;;  %v1709_v21 = vrot.slane %v1708_v20, 2  ;;  %v1771_v14 = vmax.f32 %v1769_v33, %v1770_v32  ;;  %v1777_v34 = vrot.slane %v1776_v54, 4  ;;  %v23994_v40 = vpop.f32.mrb[23].mxu0 }
 0x155   : > { %v1690_v8 = vrot.slane %v1689_v6, 1  ;;  %v1696_v37 = vmax.f32 %v1694_v17, %v1695_v22  ;;  %v1784_v19 = vrot.slane %v1783_v39, 4  ;;  %v1790_v42 = vsel %vm1460_vm3, %v991_v52, -inf }
 0x156   : > { %v1704_v29 = vrot.slane %v1703_v30, 1  ;;  %v1710_v10 = vmax.f32 %v1708_v20, %v1709_v21  ;;  %v1772_v44 = vrot.slane %v1771_v14, 2  ;;  %v1778_v45 = vmax.f32 %v1776_v54, %v1777_v34 }
 0x157   : > { %v1691_v48 = vmax.f32 %v1689_v6, %v1690_v8  ;;  %v1697_v49 = vrot.slane %v1696_v37, 1  ;;  %v1785_v50 = vmax.f32 %v1783_v39, %v1784_v19  ;;  %v1791_v51 = vrot.slane %v1790_v42, 4 }
 0x158   : > { %v1705_v46 = vmax.f32 %v1703_v30, %v1704_v29  ;;  %v1711_v55 = vrot.slane %v1710_v10, 1  ;;  %v1773_v56 = vmax.f32 %v1771_v14, %v1772_v44  ;;  %v1779_v59 = vrot.slane %v1778_v45, 2 }
 0x159   : > { %v1698_v13 = vmax.f32 %v1696_v37, %v1697_v49  ;;  %v2373_v61 = vmax.f32 %v1691_v48, %v23953_v38  ;;  %v1786_v63 = vrot.slane %v1785_v50, 2  ;;  %v1792_v35 = vmax.f32 %v1790_v42, %v1791_v51 }
 0x15a   : > { %v1712_v0 = vmax.f32 %v1710_v10, %v1711_v55  ;;  %v2375_v1 = vmax.f32 %v1705_v46, %v23959_v36  ;;  %v1774_v41 = vrot.slane %v1773_v56, 1  ;;  %v1780_v2 = vmax.f32 %v1778_v45, %v1779_v59 }
 0x15b   : > { %v2374_v4 = vmax.f32 %v1698_v13, %v23955_v26  ;;  %v2444_v5 = vadd.f32 %v23942_v11, %v2373_v61  ;;  %v1787_v53 = vmax.f32 %v1785_v50, %v1786_v63  ;;  %v941_v9 = vcombine.high %v23788_v57, %v23788_v57 }
 0x15c   : > { %v2376_v16 = vmax.f32 %v1712_v0, %v1768_v62  ;;  %v2446_v17 = vadd.f32 %v23942_v11, %v2375_v1  ;;  %v1781_v33 = vrot.slane %v1780_v2, 1  ;;  %v1793_v38 = vrot.slane %v1792_v35, 2 }
 0x15d   : > { %v2445_v20 = vadd.f32 %v23942_v11, %v2374_v4  ;;  %vm2508_vm6 = vcmp.ge.f32.partialorder %v2444_v5, 0.0  ;;  %v2572_v36 = vmul.f32 0.1, %v2444_v5  ;;  %v1788_v52 = vrot.slane %v1787_v53, 1 }
 0x15e   : > { %v2447_v26 = vadd.f32 %v23942_v11, %v2376_v16  ;;  %vm2510_vm8 = vcmp.ge.f32.partialorder %v2446_v17, 0.0  ;;  %v2574_v32 = vmul.f32 0.1, %v2446_v17  ;;  %v23998_v6 = vmax.f32 %v1773_v56, %v1774_v41 }
 0x15f   : > { %vm2509_vm9 = vcmp.ge.f32.partialorder %v2445_v20, 0.0  ;;  %v2573_v22 = vmul.f32 0.1, %v2445_v20  ;;  %v2636_v62 = vsel %vm2508_vm6, %v2444_v5, %v2572_v36  ;;  %v24000_v54 = vmax.f32 %v1780_v2, %v1781_v33 }
 0x160   : > { %vm2511_vm10 = vcmp.ge.f32.partialorder %v2447_v26, 0.0  ;;  %v2575_v39 = vmul.f32 0.1, %v2447_v26  ;;  %v2638_v60 = vsel %vm2510_vm8, %v2446_v17, %v2574_v32  ;;  %v1794_v30 = vmax.f32 %v1792_v35, %v1793_v38 }
 0x161   : > { %v2637_v21 = vsel %vm2509_vm9, %v2445_v20, %v2573_v22  ;;  %v2785_v14 = vrot.slane %v2638_v60, 6  ;;  %v948_v34 = vrot.slane %v23788_v57, %v23735_v28  ;;  %v955_v8 = vrot.slane %v941_v9, %v23735_v28 }
 0x162   : > { %v2639_v37 = vsel %vm2511_vm10, %v2447_v26, %v2575_v39  ;;  %v2783_v19 = vrot.slane %v2637_v21, 7  ;;  %v1795_v42 = vrot.slane %v1794_v30, 1  ;;  %v1026_v29 = vcombine.high %v23795_v15, %v23795_v15  ;;  %v21525_v39 = vld [vmem:[%s30437_s2 + $0xd4] ss:$8 sps:$4 sm:$0xff]  }
 0x163   : > { %v2787_v10 = vrot.slane %v2639_v37, 5  ;;  %v956_v44 = vcombine.high %v948_v34, %v948_v34  ;;  %v957_v45 = vcombine.high %v955_v8, %v955_v8  ;;  %v1713_v48 = vsel %vm1460_vm3, %v948_v34, -inf  ;;  %v21527_v34 = vld [vmem:[%s30437_s2 + $0xd0] ss:$8 sps:$4 sm:$0xff]   ;;  %3208 = vmatprep.subr.bf16.mxu1 %v21525_v39 }
 0x164   : > { %v2784_v49 = vsel %vm2749_vm4, %v2783_v19, %v2636_v62  ;;  %v24009_v50 = vmax.f32 %v1787_v53, %v1788_v52  ;;  %v1714_v51 = vrot.slane %v1713_v48, 4  ;;  %v1727_v57 = vsel %vm1460_vm3, %v955_v8, -inf  ;;  %3209 = vmatpush1.bf16.msra.mxu1 %v21527_v34 }
 0x165   : > { %v2786_v46 = vsel %vm2752_vm5, %v2785_v14, %v2784_v49  ;;  %v1720_v55 = vsel %vm1460_vm3, %v956_v44, -inf  ;;  %v1728_v56 = vrot.slane %v1727_v57, 4  ;;  %v1734_v59 = vsel %vm1460_vm3, %v957_v45, -inf }
 0x166   : > { %v24016_v13 = vsel %vm2755_vm7, %v2787_v10, %v2786_v46  ;;  %v1715_v61 = vmax.f32 %v1713_v48, %v1714_v51  ;;  %v1721_v63 = vrot.slane %v1720_v55, 4  ;;  %v1735_v35 = vrot.slane %v1734_v59, 4 }
 0x167   : > { %v1796_v0 = vmax.f32 %v1794_v30, %v1795_v42  ;;  %v1729_v1 = vmax.f32 %v1727_v57, %v1728_v56  ;;  %v1033_v41 = vrot.slane %v23795_v15, %v23735_v28  ;;  %v1040_v2 = vrot.slane %v1026_v29, %v23735_v28 }
 0x168   : > { %v1716_v4 = vrot.slane %v1715_v61, 2  ;;  %v1722_v5 = vmax.f32 %v1720_v55, %v1721_v63  ;;  %v1736_v53 = vmax.f32 %v1734_v59, %v1735_v35  ;;  %v992_v9 = vcombine.high %v23798_v18, %v23798_v18 }
 0x169   : > { %v1730_v16 = vrot.slane %v1729_v1, 2  ;;  %v1041_v17 = vcombine.high %v1033_v41, %v1033_v41  ;;  %v1042_v33 = vcombine.high %v1040_v2, %v1040_v2  ;;  %v1853_v38 = vsel %vm1460_vm3, %v1033_v41, -inf }
 0x16a   : > { %v1717_v20 = vmax.f32 %v1715_v61, %v1716_v4  ;;  %v1723_v36 = vrot.slane %v1722_v5, 2  ;;  %v1737_v52 = vrot.slane %v1736_v53, 2  ;;  %v1854_v26 = vrot.slane %v1853_v38, 4  ;;  %v21528_v61 = vld [vmem:[%s30437_s2 + $0xe4] ss:$8 sps:$4 sm:$0xff]  }
 0x16b   : > { %v1731_v32 = vmax.f32 %v1729_v1, %v1730_v16  ;;  %v1860_v15 = vsel %vm1460_vm3, %v1041_v17, -inf  ;;  %v1867_v22 = vsel %vm1460_vm3, %v1040_v2, -inf  ;;  %v1874_v62 = vsel %vm1460_vm3, %v1042_v33, -inf  ;;  %v24038_v2 = vpop.f32.mrb[24].mxu0  ;;  %3210 = vmatprep.subr.bf16.mxu1 %v21528_v61 }
 0x16c   : > { %v1718_v60 = vrot.slane %v1717_v20, 1  ;;  %v1724_v30 = vmax.f32 %v1722_v5, %v1723_v36  ;;  %v1738_v21 = vmax.f32 %v1736_v53, %v1737_v52  ;;  %v1855_v14 = vmax.f32 %v1853_v38, %v1854_v26 }
 0x16d   : > { %v1732_v8 = vrot.slane %v1731_v32, 1  ;;  %v1861_v37 = vrot.slane %v1860_v15, 4  ;;  %v1868_v19 = vrot.slane %v1867_v22, 4  ;;  %v1875_v42 = vrot.slane %v1874_v62, 4 }
 0x16e   : > { %v1719_v29 = vmax.f32 %v1717_v20, %v1718_v60  ;;  %v1725_v10 = vrot.slane %v1724_v30, 1  ;;  %v1739_v44 = vrot.slane %v1738_v21, 1  ;;  %v1856_v45 = vrot.slane %v1855_v14, 2 }
 0x16f   : > { %v1733_v48 = vmax.f32 %v1731_v32, %v1732_v8  ;;  %v1862_v49 = vmax.f32 %v1860_v15, %v1861_v37  ;;  %v1869_v51 = vmax.f32 %v1867_v22, %v1868_v19  ;;  %v1876_v57 = vmax.f32 %v1874_v62, %v1875_v42 }
 0x170   : > { %v1726_v46 = vmax.f32 %v1724_v30, %v1725_v10  ;;  %v1740_v55 = vmax.f32 %v1738_v21, %v1739_v44  ;;  %v2377_v56 = vmax.f32 %v1719_v29, %v23998_v6  ;;  %v1857_v59 = vmax.f32 %v1855_v14, %v1856_v45 }
 0x171   : > { %v2379_v63 = vmax.f32 %v1733_v48, %v24009_v50  ;;  %v1863_v35 = vrot.slane %v1862_v49, 2  ;;  %v1870_v1 = vrot.slane %v1869_v51, 2  ;;  %v1877_v41 = vrot.slane %v1876_v57, 2  ;;  %v24045_v50 = vpop.f32.mrb[25].mxu0 }
 0x172   : > { %v2378_v4 = vmax.f32 %v1726_v46, %v24000_v54  ;;  %v2380_v5 = vmax.f32 %v1740_v55, %v1796_v0  ;;  %v2448_v53 = vadd.f32 %v23942_v11, %v2377_v56  ;;  %v999_v6 = vrot.slane %v23798_v18, %v23735_v28 }
 0x173   : > { %v2450_v16 = vadd.f32 %v23942_v11, %v2379_v63  ;;  %v1858_v17 = vrot.slane %v1857_v59, 1  ;;  %v1864_v33 = vmax.f32 %v1862_v49, %v1863_v35  ;;  %v1871_v38 = vmax.f32 %v1869_v51, %v1870_v1 }
 0x174   : > { %v2449_v20 = vadd.f32 %v23942_v11, %v2378_v4  ;;  %v2451_v36 = vadd.f32 %v23942_v11, %v2380_v5  ;;  %vm2512_vm15 = vcmp.ge.f32.partialorder %v2448_v53, 0.0  ;;  %v2576_v54 = vmul.f32 0.1, %v2448_v53 }
 0x175   : > { %vm2514_vm0 = vcmp.ge.f32.partialorder %v2450_v16, 0.0  ;;  %v2578_v0 = vmul.f32 0.1, %v2450_v16  ;;  %v1865_v52 = vrot.slane %v1864_v33, 1  ;;  %v1878_v26 = vmax.f32 %v1876_v57, %v1877_v41 }
 0x176   : > { %vm2513_vm1 = vcmp.ge.f32.partialorder %v2449_v20, 0.0  ;;  %vm2515_vm2 = vcmp.ge.f32.partialorder %v2451_v36, 0.0  ;;  %v2577_v32 = vmul.f32 0.1, %v2449_v20  ;;  %v2579_v15 = vmul.f32 0.1, %v2451_v36 }
 0x177   : > { %v2640_v22 = vsel %vm2512_vm15, %v2448_v53, %v2576_v54  ;;  %v2642_v62 = vsel %vm2514_vm0, %v2450_v16, %v2578_v0  ;;  %v24049_v39 = vmax.f32 %v1857_v59, %v1858_v17  ;;  %v1872_v60 = vrot.slane %v1871_v38, 1 }
 0x178   : > { %v2641_v30 = vsel %vm2513_vm1, %v2449_v20, %v2577_v32  ;;  %v2643_v21 = vsel %vm2515_vm2, %v2451_v36, %v2579_v15  ;;  %v2789_v14 = vrot.slane %v2640_v22, 4  ;;  %v2793_v34 = vrot.slane %v2642_v62, 2 }
 0x179   : > { %v2791_v8 = vrot.slane %v2641_v30, 3  ;;  %v2795_v37 = vrot.slane %v2643_v21, 1  ;;  %v24051_v19 = vmax.f32 %v1864_v33, %v1865_v52  ;;  %v1879_v42 = vrot.slane %v1878_v26, 1 }
 0x17a   : > { %v2790_v29 = vsel %vm2758_vm11, %v2789_v14, %v24016_v13  ;;  %v1006_v10 = vrot.slane %v992_v9, %v23735_v28  ;;  %v1007_v44 = vcombine.high %v999_v6, %v999_v6  ;;  %v1797_v45 = vsel %vm1460_vm3, %v999_v6, -inf }
 0x17b   : > { %v2792_v48 = vsel %vm2761_vm12, %v2791_v8, %v2790_v29  ;;  %v24061_v49 = vmax.f32 %v1871_v38, %v1872_v60  ;;  %v1798_v51 = vrot.slane %v1797_v45, 4  ;;  %v1043_v57 = vcombine.high %v23800_v23, %v23800_v23 }
 0x17c   : > { %v2794_v46 = vsel %vm2764_vm13, %v2793_v34, %v2792_v48  ;;  %v1008_v55 = vcombine.high %v1006_v10, %v1006_v10  ;;  %v1804_v13 = vsel %vm1460_vm3, %v1007_v44, -inf  ;;  %v1811_v56 = vsel %vm1460_vm3, %v1006_v10, -inf }
 0x17d   : > { %v2796_v18 = vsel %vm2767_vm14, %v2795_v37, %v2794_v46  ;;  %v1799_v9 = vmax.f32 %v1797_v45, %v1798_v51  ;;  %v1805_v59 = vrot.slane %v1804_v13, 4  ;;  %v1812_v61 = vrot.slane %v1811_v56, 4  ;;  %v24082_v37 = vpop.f32.mrb[26].mxu0 }
 0x17e   : > { %2878 = vst [vmem:[#allocation2 + $0x31] sm:$0xff] %v2796_v18  ;;  %v24069_v63 = vmax.f32 %v1878_v26, %v1879_v42  ;;  %v1818_v35 = vsel %vm1460_vm3, %v1008_v55, -inf  ;;  %v1050_v1 = vrot.slane %v23800_v23, %v23735_v28  ;;  %v1057_v41 = vrot.slane %v1043_v57, %v23735_v28  ;;  %v21530_v23 = vld [vmem:[%s30437_s2 + $0xe0] ss:$8 sps:$4 sm:$0xff]  }
 0x17f   : > { %v1800_v4 = vrot.slane %v1799_v9, 2  ;;  %v1806_v5 = vmax.f32 %v1804_v13, %v1805_v59  ;;  %v1813_v53 = vmax.f32 %v1811_v56, %v1812_v61  ;;  %v1819_v6 = vrot.slane %v1818_v35, 4  ;;  %3211 = vmatpush1.bf16.msra.mxu1 %v21530_v23 }
 0x180   : > { %v1058_v16 = vcombine.high %v1050_v1, %v1050_v1  ;;  %v1059_v17 = vcombine.high %v1057_v41, %v1057_v41  ;;  %v1881_v33 = vsel %vm1460_vm3, %v1050_v1, -inf  ;;  %v1895_v38 = vsel %vm1460_vm3, %v1057_v41, -inf }
 0x181   : > { %v1801_v20 = vmax.f32 %v1799_v9, %v1800_v4  ;;  %v1807_v36 = vrot.slane %v1806_v5, 2  ;;  %v1814_v54 = vrot.slane %v1813_v53, 2  ;;  %v1820_v0 = vmax.f32 %v1818_v35, %v1819_v6 }
 0x182   : > { %v1882_v52 = vrot.slane %v1881_v33, 4  ;;  %v1888_v26 = vsel %vm1460_vm3, %v1058_v16, -inf  ;;  %v1896_v32 = vrot.slane %v1895_v38, 4  ;;  %v1902_v15 = vsel %vm1460_vm3, %v1059_v17, -inf }
 0x183   : > { %v1802_v22 = vrot.slane %v1801_v20, 1  ;;  %v1808_v62 = vmax.f32 %v1806_v5, %v1807_v36  ;;  %v1815_v60 = vmax.f32 %v1813_v53, %v1814_v54  ;;  %v1821_v30 = vrot.slane %v1820_v0, 2 }
 0x184   : > { %v1883_v21 = vmax.f32 %v1881_v33, %v1882_v52  ;;  %v1889_v14 = vrot.slane %v1888_v26, 4  ;;  %v1897_v34 = vmax.f32 %v1895_v38, %v1896_v32  ;;  %v1903_v8 = vrot.slane %v1902_v15, 4 }
 0x185   : > { %v1803_v42 = vmax.f32 %v1801_v20, %v1802_v22  ;;  %v1809_v29 = vrot.slane %v1808_v62, 1  ;;  %v1816_v10 = vrot.slane %v1815_v60, 1  ;;  %v1822_v44 = vmax.f32 %v1820_v0, %v1821_v30  ;;  %v24096_v0 = vpop.f32.mrb[27].mxu0 }
 0x186   : > { %v1884_v45 = vrot.slane %v1883_v21, 2  ;;  %v1890_v48 = vmax.f32 %v1888_v26, %v1889_v14  ;;  %v1898_v51 = vrot.slane %v1897_v34, 2  ;;  %v1904_v57 = vmax.f32 %v1902_v15, %v1903_v8 }
 0x187   : > { %v1810_v46 = vmax.f32 %v1808_v62, %v1809_v29  ;;  %v1817_v55 = vmax.f32 %v1815_v60, %v1816_v10  ;;  %v1823_v13 = vrot.slane %v1822_v44, 1  ;;  %v2381_v56 = vmax.f32 %v1803_v42, %v24049_v39 }
 0x188   : > { %v1885_v18 = vmax.f32 %v1883_v21, %v1884_v45  ;;  %v1891_v9 = vrot.slane %v1890_v48, 2  ;;  %v1899_v59 = vmax.f32 %v1897_v34, %v1898_v51  ;;  %v1905_v61 = vrot.slane %v1904_v57, 2 }
 0x189   : > { %v1824_v35 = vmax.f32 %v1822_v44, %v1823_v13  ;;  %v2382_v1 = vmax.f32 %v1810_v46, %v24051_v19  ;;  %v2383_v41 = vmax.f32 %v1817_v55, %v24061_v49  ;;  %v2452_v4 = vadd.f32 %v23942_v11, %v2381_v56 }
 0x18a   : > { %v1886_v5 = vrot.slane %v1885_v18, 1  ;;  %v1892_v53 = vmax.f32 %v1890_v48, %v1891_v9  ;;  %v1900_v6 = vrot.slane %v1899_v59, 1  ;;  %v1009_v16 = vcombine.high %v23802_v31, %v23802_v31 }
 0x18b   : > { %v2384_v17 = vmax.f32 %v1824_v35, %v24069_v63  ;;  %v2453_v39 = vadd.f32 %v23942_v11, %v2382_v1  ;;  %v2454_v33 = vadd.f32 %v23942_v11, %v2383_v41  ;;  %vm2516_vm6 = vcmp.ge.f32.partialorder %v2452_v4, 0.0 }
 0x18c   : > { %v2580_v38 = vmul.f32 0.1, %v2452_v4  ;;  %v24093_v20 = vmax.f32 %v1885_v18, %v1886_v5  ;;  %v1893_v19 = vrot.slane %v1892_v53, 1  ;;  %v1906_v49 = vmax.f32 %v1904_v57, %v1905_v61 }
 0x18d   : > { %v2455_v36 = vadd.f32 %v23942_v11, %v2384_v17  ;;  %vm2517_vm8 = vcmp.ge.f32.partialorder %v2453_v39, 0.0  ;;  %vm2518_vm9 = vcmp.ge.f32.partialorder %v2454_v33, 0.0  ;;  %v2581_v54 = vmul.f32 0.1, %v2453_v39 }
 0x18e   : > { %v2582_v23 = vmul.f32 0.1, %v2454_v33  ;;  %v2644_v52 = vsel %vm2516_vm6, %v2452_v4, %v2580_v38  ;;  %v24098_v63 = vmax.f32 %v1892_v53, %v1893_v19  ;;  %v24100_v26 = vmax.f32 %v1899_v59, %v1900_v6 }
 0x18f   : > { %vm2519_vm10 = vcmp.ge.f32.partialorder %v2455_v36, 0.0  ;;  %v2583_v32 = vmul.f32 0.1, %v2455_v36  ;;  %v2645_v15 = vsel %vm2517_vm8, %v2453_v39, %v2581_v54  ;;  %v1016_v22 = vrot.slane %v23802_v31, %v23735_v28 }
 0x190   : > { %v2646_v62 = vsel %vm2518_vm9, %v2454_v33, %v2582_v23  ;;  %v2797_v60 = vrot.slane %v2645_v15, 7  ;;  %v1907_v11 = vrot.slane %v1906_v49, 1  ;;  %v1023_v30 = vrot.slane %v1009_v16, %v23735_v28 }
 0x191   : > { %v2647_v21 = vsel %vm2519_vm10, %v2455_v36, %v2583_v32  ;;  %v2799_v14 = vrot.slane %v2646_v62, 6  ;;  %v1024_v34 = vcombine.high %v1016_v22, %v1016_v22  ;;  %v1825_v8 = vsel %vm1460_vm3, %v1016_v22, -inf  ;;  %v21531_v32 = vld [vmem:[%s30437_s2 + $0xf4] ss:$8 sps:$4 sm:$0xff]  }
 0x192   : > { %v2798_v42 = vsel %vm2749_vm4, %v2797_v60, %v2644_v52  ;;  %v2801_v29 = vrot.slane %v2647_v21, 5  ;;  %v1025_v10 = vcombine.high %v1023_v30, %v1023_v30  ;;  %v1826_v44 = vrot.slane %v1825_v8, 4  ;;  %3212 = vmatprep.subr.bf16.mxu1 %v21531_v32 }
 0x193   : > { %v2800_v45 = vsel %vm2752_vm5, %v2799_v14, %v2798_v42  ;;  %v1832_v48 = vsel %vm1460_vm3, %v1024_v34, -inf  ;;  %v1839_v31 = vsel %vm1460_vm3, %v1023_v30, -inf  ;;  %v1094_v51 = vcombine.high %v23845_v12, %v23845_v12 }
 0x194   : > { %v24113_v57 = vsel %vm2755_vm7, %v2801_v29, %v2800_v45  ;;  %v1827_v46 = vmax.f32 %v1825_v8, %v1826_v44  ;;  %v1833_v55 = vrot.slane %v1832_v48, 4  ;;  %v1840_v13 = vrot.slane %v1839_v31, 4 }
 0x195   : > { %v24115_v56 = vmax.f32 %v1906_v49, %v1907_v11  ;;  %v1846_v18 = vsel %vm1460_vm3, %v1025_v10, -inf  ;;  %v1101_v9 = vrot.slane %v23845_v12, %v23735_v28  ;;  %v1108_v59 = vrot.slane %v1094_v51, %v23735_v28  ;;  %v21533_v11 = vld [vmem:[%s30437_s2 + $0xf0] ss:$8 sps:$4 sm:$0xff]  }
 0x196   : > { %v1828_v61 = vrot.slane %v1827_v46, 2  ;;  %v1834_v35 = vmax.f32 %v1832_v48, %v1833_v55  ;;  %v1841_v1 = vmax.f32 %v1839_v31, %v1840_v13  ;;  %v1847_v41 = vrot.slane %v1846_v18, 4  ;;  %3213 = vmatpush1.bf16.msra.mxu1 %v21533_v11 }
 0x197   : > { %v1109_v4 = vcombine.high %v1101_v9, %v1101_v9  ;;  %v1110_v5 = vcombine.high %v1108_v59, %v1108_v59  ;;  %v1965_v53 = vsel %vm1460_vm3, %v1101_v9, -inf  ;;  %v1979_v6 = vsel %vm1460_vm3, %v1108_v59, -inf }
 0x198   : > { %v1829_v16 = vmax.f32 %v1827_v46, %v1828_v61  ;;  %v1835_v17 = vrot.slane %v1834_v35, 2  ;;  %v1842_v39 = vrot.slane %v1841_v1, 2  ;;  %v1848_v33 = vmax.f32 %v1846_v18, %v1847_v41  ;;  %v24137_v61 = vld [vmem:[%s30440_s5] ss:$0 sm:$0xff] }
 0x199   : > { %v1966_v38 = vrot.slane %v1965_v53, 4  ;;  %v1972_v19 = vsel %vm1460_vm3, %v1109_v4, -inf  ;;  %v1980_v12 = vrot.slane %v1979_v6, 4  ;;  %v1986_v49 = vsel %vm1460_vm3, %v1110_v5, -inf }
 0x19a   : > { %v1830_v36 = vrot.slane %v1829_v16, 1  ;;  %v1836_v54 = vmax.f32 %v1834_v35, %v1835_v17  ;;  %v1843_v23 = vmax.f32 %v1841_v1, %v1842_v39  ;;  %v1849_v52 = vrot.slane %v1848_v33, 2  ;;  %v24140_v1 = vpop.f32.mrb[28].mxu0 }
 0x19b   : > { %v1967_v15 = vmax.f32 %v1965_v53, %v1966_v38  ;;  %v1973_v22 = vrot.slane %v1972_v19, 4  ;;  %v1981_v62 = vmax.f32 %v1979_v6, %v1980_v12  ;;  %v1987_v60 = vrot.slane %v1986_v49, 4 }
 0x19c   : > { %v1831_v30 = vmax.f32 %v1829_v16, %v1830_v36  ;;  %v1837_v21 = vrot.slane %v1836_v54, 1  ;;  %v1844_v14 = vrot.slane %v1843_v23, 1  ;;  %v1850_v34 = vmax.f32 %v1848_v33, %v1849_v52 }
 0x19d   : > { %v1968_v8 = vrot.slane %v1967_v15, 2  ;;  %v1974_v42 = vmax.f32 %v1972_v19, %v1973_v22  ;;  %v1982_v29 = vrot.slane %v1981_v62, 2  ;;  %v1988_v10 = vmax.f32 %v1986_v49, %v1987_v60 }
 0x19e   : > { %v1838_v44 = vmax.f32 %v1836_v54, %v1837_v21  ;;  %v1845_v45 = vmax.f32 %v1843_v23, %v1844_v14  ;;  %v1851_v48 = vrot.slane %v1850_v34, 1  ;;  %v2385_v31 = vmax.f32 %v1831_v30, %v24093_v20 }
 0x19f   : > { %v1969_v51 = vmax.f32 %v1967_v15, %v1968_v8  ;;  %v1975_v46 = vrot.slane %v1974_v42, 2  ;;  %v1983_v55 = vmax.f32 %v1981_v62, %v1982_v29  ;;  %v1989_v13 = vrot.slane %v1988_v10, 2 }
 0x1a0   : > { %v1852_v18 = vmax.f32 %v1850_v34, %v1851_v48  ;;  %v2386_v9 = vmax.f32 %v1838_v44, %v24098_v63  ;;  %v2387_v59 = vmax.f32 %v1845_v45, %v24100_v26  ;;  %v2456_v35 = vadd.f32 %v24137_v61, %v2385_v31 }
 0x1a1   : > { %v1970_v41 = vrot.slane %v1969_v51, 1  ;;  %v1976_v20 = vmax.f32 %v1974_v42, %v1975_v46  ;;  %v1984_v4 = vrot.slane %v1983_v55, 1  ;;  %v1060_v5 = vcombine.high %v23854_v24, %v23854_v24 }
 0x1a2   : > { %v2388_v53 = vmax.f32 %v1852_v18, %v24115_v56  ;;  %v2457_v63 = vadd.f32 %v24137_v61, %v2386_v9  ;;  %v2458_v26 = vadd.f32 %v24137_v61, %v2387_v59  ;;  %vm2520_vm15 = vcmp.ge.f32.partialorder %v2456_v35, 0.0 }
 0x1a3   : > { %v2584_v6 = vmul.f32 0.1, %v2456_v35  ;;  %v24147_v16 = vmax.f32 %v1969_v51, %v1970_v41  ;;  %v1977_v17 = vrot.slane %v1976_v20, 1  ;;  %v1990_v39 = vmax.f32 %v1988_v10, %v1989_v13 }
 0x1a4   : > { %v2459_v33 = vadd.f32 %v24137_v61, %v2388_v53  ;;  %vm2521_vm0 = vcmp.ge.f32.partialorder %v2457_v63, 0.0  ;;  %vm2522_vm1 = vcmp.ge.f32.partialorder %v2458_v26, 0.0  ;;  %v2585_v38 = vmul.f32 0.1, %v2457_v63 }
 0x1a5   : > { %v2586_v19 = vmul.f32 0.1, %v2458_v26  ;;  %v2648_v12 = vsel %vm2520_vm15, %v2456_v35, %v2584_v6  ;;  %v24150_v49 = vmax.f32 %v1976_v20, %v1977_v17  ;;  %v24152_v56 = vmax.f32 %v1983_v55, %v1984_v4 }
 0x1a6   : > { %vm2523_vm2 = vcmp.ge.f32.partialorder %v2459_v33, 0.0  ;;  %v2587_v36 = vmul.f32 0.1, %v2459_v33  ;;  %v2649_v54 = vsel %vm2521_vm0, %v2457_v63, %v2585_v38  ;;  %v2803_v23 = vrot.slane %v2648_v12, 4 }
 0x1a7   : > { %v2650_v52 = vsel %vm2522_vm1, %v2458_v26, %v2586_v19  ;;  %v2805_v32 = vrot.slane %v2649_v54, 3  ;;  %v1991_v15 = vrot.slane %v1990_v39, 1  ;;  %v1067_v22 = vrot.slane %v23854_v24, %v23735_v28 }
 0x1a8   : > { %v2651_v62 = vsel %vm2523_vm2, %v2459_v33, %v2587_v36  ;;  %v2804_v60 = vsel %vm2758_vm11, %v2803_v23, %v24113_v57  ;;  %v2807_v11 = vrot.slane %v2650_v52, 2  ;;  %v1074_v30 = vrot.slane %v1060_v5, %v23735_v28 }
 0x1a9   : > { %v2806_v21 = vsel %vm2761_vm12, %v2805_v32, %v2804_v60  ;;  %v2809_v14 = vrot.slane %v2651_v62, 1  ;;  %v1075_v34 = vcombine.high %v1067_v22, %v1067_v22  ;;  %v1909_v8 = vsel %vm1460_vm3, %v1067_v22, -inf }
 0x1aa   : > { %v2808_v42 = vsel %vm2764_vm13, %v2807_v11, %v2806_v21  ;;  %v1076_v29 = vcombine.high %v1074_v30, %v1074_v30  ;;  %v1910_v10 = vrot.slane %v1909_v8, 4  ;;  %v1923_v44 = vsel %vm1460_vm3, %v1074_v30, -inf }
 0x1ab   : > { %v2810_v24 = vsel %vm2767_vm14, %v2809_v14, %v2808_v42  ;;  %v1916_v45 = vsel %vm1460_vm3, %v1075_v34, -inf  ;;  %v1924_v57 = vrot.slane %v1923_v44, 4  ;;  %v1111_v48 = vcombine.high %v23888_v3, %v23888_v3 }
 0x1ac   : > { %2879 = vst [vmem:[#allocation2 + $0x41] sm:$0xff] %v2810_v24  ;;  %v1911_v31 = vmax.f32 %v1909_v8, %v1910_v10  ;;  %v1917_v51 = vrot.slane %v1916_v45, 4  ;;  %v1930_v46 = vsel %vm1460_vm3, %v1076_v29, -inf  ;;  %v1118_v55 = vrot.slane %v23888_v3, %v23735_v28 }
 0x1ad   : > { %v1992_v13 = vmax.f32 %v1990_v39, %v1991_v15  ;;  %v1925_v18 = vmax.f32 %v1923_v44, %v1924_v57  ;;  %v1931_v9 = vrot.slane %v1930_v46, 4  ;;  %v1125_v59 = vrot.slane %v1111_v48, %v23735_v28 }
 0x1ae   : > { %v1912_v35 = vrot.slane %v1911_v31, 2  ;;  %v1918_v41 = vmax.f32 %v1916_v45, %v1917_v51  ;;  %v1126_v20 = vcombine.high %v1118_v55, %v1118_v55  ;;  %v1993_v4 = vsel %vm1460_vm3, %v1118_v55, -inf }
 0x1af   : > { %v1926_v5 = vrot.slane %v1925_v18, 2  ;;  %v1932_v53 = vmax.f32 %v1930_v46, %v1931_v9  ;;  %v1127_v63 = vcombine.high %v1125_v59, %v1125_v59  ;;  %v1994_v26 = vrot.slane %v1993_v4, 4 }
 0x1b0   : > { %v1913_v6 = vmax.f32 %v1911_v31, %v1912_v35  ;;  %v1919_v17 = vrot.slane %v1918_v41, 2  ;;  %v2000_v33 = vsel %vm1460_vm3, %v1126_v20, -inf  ;;  %v2007_v3 = vsel %vm1460_vm3, %v1125_v59, -inf }
 0x1b1   : > { %v1927_v39 = vmax.f32 %v1925_v18, %v1926_v5  ;;  %v1933_v38 = vrot.slane %v1932_v53, 2  ;;  %v1995_v19 = vmax.f32 %v1993_v4, %v1994_v26  ;;  %v2001_v12 = vrot.slane %v2000_v33, 4 }
 0x1b2   : > { %v1914_v36 = vrot.slane %v1913_v6, 1  ;;  %v1920_v54 = vmax.f32 %v1918_v41, %v1919_v17  ;;  %v2008_v23 = vrot.slane %v2007_v3, 4  ;;  %v2014_v52 = vsel %vm1460_vm3, %v1127_v63, -inf }
 0x1b3   : > { %v1928_v32 = vrot.slane %v1927_v39, 1  ;;  %v1934_v15 = vmax.f32 %v1932_v53, %v1933_v38  ;;  %v1996_v22 = vrot.slane %v1995_v19, 2  ;;  %v2002_v62 = vmax.f32 %v2000_v33, %v2001_v12 }
 0x1b4   : > { %v1915_v60 = vmax.f32 %v1913_v6, %v1914_v36  ;;  %v1921_v11 = vrot.slane %v1920_v54, 1  ;;  %v2009_v30 = vmax.f32 %v2007_v3, %v2008_v23  ;;  %v2015_v21 = vrot.slane %v2014_v52, 4 }
 0x1b5   : > { %v1929_v14 = vmax.f32 %v1927_v39, %v1928_v32  ;;  %v1935_v34 = vrot.slane %v1934_v15, 1  ;;  %v1997_v8 = vmax.f32 %v1995_v19, %v1996_v22  ;;  %v2003_v42 = vrot.slane %v2002_v62, 2 }
 0x1b6   : > { %v1922_v29 = vmax.f32 %v1920_v54, %v1921_v11  ;;  %v2389_v10 = vmax.f32 %v1915_v60, %v24147_v16  ;;  %v2010_v44 = vrot.slane %v2009_v30, 2  ;;  %v2016_v24 = vmax.f32 %v2014_v52, %v2015_v21 }
 0x1b7   : > { %v1936_v45 = vmax.f32 %v1934_v15, %v1935_v34  ;;  %v2391_v57 = vmax.f32 %v1929_v14, %v24152_v56  ;;  %v1998_v48 = vrot.slane %v1997_v8, 1  ;;  %v2004_v31 = vmax.f32 %v2002_v62, %v2003_v42  ;;  %v24201_v34 = vpop.f32.mrb[29].mxu0 }
 0x1b8   : > { %v2390_v51 = vmax.f32 %v1922_v29, %v24150_v49  ;;  %v2460_v46 = vadd.f32 %v24137_v61, %v2389_v10  ;;  %v2011_v55 = vmax.f32 %v2009_v30, %v2010_v44  ;;  %v1077_v18 = vcombine.high %v23901_v58, %v23901_v58 }
 0x1b9   : > { %v2392_v9 = vmax.f32 %v1936_v45, %v1992_v13  ;;  %v2462_v59 = vadd.f32 %v24137_v61, %v2391_v57  ;;  %v2005_v35 = vrot.slane %v2004_v31, 1  ;;  %v2017_v16 = vrot.slane %v2016_v24, 2 }
 0x1ba   : > { %v2461_v41 = vadd.f32 %v24137_v61, %v2390_v51  ;;  %vm2524_vm6 = vcmp.ge.f32.partialorder %v2460_v46, 0.0  ;;  %v2588_v20 = vmul.f32 0.1, %v2460_v46  ;;  %v2012_v56 = vrot.slane %v2011_v55, 1 }
 0x1bb   : > { %v2463_v4 = vadd.f32 %v24137_v61, %v2392_v9  ;;  %vm2526_vm8 = vcmp.ge.f32.partialorder %v2462_v59, 0.0  ;;  %v2590_v49 = vmul.f32 0.1, %v2462_v59  ;;  %v24184_v5 = vmax.f32 %v1997_v8, %v1998_v48 }
 0x1bc   : > { %vm2525_vm9 = vcmp.ge.f32.partialorder %v2461_v41, 0.0  ;;  %v2589_v53 = vmul.f32 0.1, %v2461_v41  ;;  %v2652_v63 = vsel %vm2524_vm6, %v2460_v46, %v2588_v20  ;;  %v24186_v26 = vmax.f32 %v2004_v31, %v2005_v35 }
 0x1bd   : > { %vm2527_vm10 = vcmp.ge.f32.partialorder %v2463_v4, 0.0  ;;  %v2591_v13 = vmul.f32 0.1, %v2463_v4  ;;  %v2654_v6 = vsel %vm2526_vm8, %v2462_v59, %v2590_v49  ;;  %v2018_v17 = vmax.f32 %v2016_v24, %v2017_v16 }
 0x1be   : > { %v2653_v33 = vsel %vm2525_vm9, %v2461_v41, %v2589_v53  ;;  %v2813_v3 = vrot.slane %v2654_v6, 6  ;;  %v1084_v39 = vrot.slane %v23901_v58, %v23735_v28  ;;  %v1091_v38 = vrot.slane %v1077_v18, %v23735_v28  ;;  %v24215_v53 = vpop.f32.mrb[30].mxu0 }
 0x1bf   : > { %v2655_v19 = vsel %vm2527_vm10, %v2463_v4, %v2591_v13  ;;  %v2811_v12 = vrot.slane %v2653_v33, 7  ;;  %v2019_v36 = vrot.slane %v2018_v17, 1  ;;  %v1162_v54 = vcombine.high %v23936_v7, %v23936_v7  ;;  %v24217_v33 = vpop.f32.mrb[31].mxu0 }
 0x1c0   : > { %v2815_v23 = vrot.slane %v2655_v19, 5  ;;  %v1092_v52 = vcombine.high %v1084_v39, %v1084_v39  ;;  %v1093_v32 = vcombine.high %v1091_v38, %v1091_v38  ;;  %v1937_v15 = vsel %vm1460_vm3, %v1084_v39, -inf }
 0x1c1   : > { %v2812_v22 = vsel %vm2749_vm4, %v2811_v12, %v2652_v63  ;;  %v24195_v62 = vmax.f32 %v2011_v55, %v2012_v56  ;;  %v1938_v60 = vrot.slane %v1937_v15, 4  ;;  %v1951_v58 = vsel %vm1460_vm3, %v1091_v38, -inf }
 0x1c2   : > { %v2814_v11 = vsel %vm2752_vm5, %v2813_v3, %v2812_v22  ;;  %v1944_v30 = vsel %vm1460_vm3, %v1092_v52, -inf  ;;  %v1952_v21 = vrot.slane %v1951_v58, 4  ;;  %v1958_v14 = vsel %vm1460_vm3, %v1093_v32, -inf }
 0x1c3   : > { %v24204_v8 = vsel %vm2755_vm7, %v2815_v23, %v2814_v11  ;;  %v1939_v42 = vmax.f32 %v1937_v15, %v1938_v60  ;;  %v1945_v29 = vrot.slane %v1944_v30, 4  ;;  %v1959_v10 = vrot.slane %v1958_v14, 4 }
 0x1c4   : > { %v2020_v44 = vmax.f32 %v2018_v17, %v2019_v36  ;;  %v1953_v24 = vmax.f32 %v1951_v58, %v1952_v21  ;;  %v1169_v45 = vrot.slane %v23936_v7, %v23735_v28  ;;  %v1176_v57 = vrot.slane %v1162_v54, %v23735_v28 }
 0x1c5   : > { %v1940_v48 = vrot.slane %v1939_v42, 2  ;;  %v1946_v31 = vmax.f32 %v1944_v30, %v1945_v29  ;;  %v1960_v51 = vmax.f32 %v1958_v14, %v1959_v10  ;;  %v1128_v46 = vcombine.high %v23957_v43, %v23957_v43 }
 0x1c6   : > { %v1954_v55 = vrot.slane %v1953_v24, 2  ;;  %v1177_v18 = vcombine.high %v1169_v45, %v1169_v45  ;;  %v1178_v9 = vcombine.high %v1176_v57, %v1176_v57  ;;  %v2077_v59 = vsel %vm1460_vm3, %v1169_v45, -inf }
 0x1c7   : > { %v1941_v35 = vmax.f32 %v1939_v42, %v1940_v48  ;;  %v1947_v16 = vrot.slane %v1946_v31, 2  ;;  %v1961_v41 = vrot.slane %v1960_v51, 2  ;;  %v2078_v20 = vrot.slane %v2077_v59, 4 }
 0x1c8   : > { %v1955_v56 = vmax.f32 %v1953_v24, %v1954_v55  ;;  %v2084_v7 = vsel %vm1460_vm3, %v1177_v18, -inf  ;;  %v2091_v4 = vsel %vm1460_vm3, %v1176_v57, -inf  ;;  %v2098_v49 = vsel %vm1460_vm3, %v1178_v9, -inf }
 0x1c9   : > { %v1942_v63 = vrot.slane %v1941_v35, 1  ;;  %v1948_v13 = vmax.f32 %v1946_v31, %v1947_v16  ;;  %v1962_v6 = vmax.f32 %v1960_v51, %v1961_v41  ;;  %v2079_v17 = vmax.f32 %v2077_v59, %v2078_v20 }
 0x1ca   : > { %v1956_v3 = vrot.slane %v1955_v56, 1  ;;  %v2085_v39 = vrot.slane %v2084_v7, 4  ;;  %v2092_v38 = vrot.slane %v2091_v4, 4  ;;  %v2099_v19 = vrot.slane %v2098_v49, 4 }
 0x1cb   : > { %v1943_v12 = vmax.f32 %v1941_v35, %v1942_v63  ;;  %v1949_v36 = vrot.slane %v1948_v13, 1  ;;  %v1963_v54 = vrot.slane %v1962_v6, 1  ;;  %v2080_v23 = vrot.slane %v2079_v17, 2 }
 0x1cc   : > { %v1957_v52 = vmax.f32 %v1955_v56, %v1956_v3  ;;  %v2086_v32 = vmax.f32 %v2084_v7, %v2085_v39  ;;  %v2093_v15 = vmax.f32 %v2091_v4, %v2092_v38  ;;  %v2100_v22 = vmax.f32 %v2098_v49, %v2099_v19 }
 0x1cd   : > { %v1950_v60 = vmax.f32 %v1948_v13, %v1949_v36  ;;  %v1964_v58 = vmax.f32 %v1962_v6, %v1963_v54  ;;  %v2393_v11 = vmax.f32 %v1943_v12, %v24184_v5  ;;  %v2081_v30 = vmax.f32 %v2079_v17, %v2080_v23 }
 0x1ce   : > { %v2395_v21 = vmax.f32 %v1957_v52, %v24195_v62  ;;  %v2087_v14 = vrot.slane %v2086_v32, 2  ;;  %v2094_v42 = vrot.slane %v2093_v15, 2  ;;  %v2101_v29 = vrot.slane %v2100_v22, 2 }
 0x1cf   : > { %v2394_v10 = vmax.f32 %v1950_v60, %v24186_v26  ;;  %v2396_v24 = vmax.f32 %v1964_v58, %v2020_v44  ;;  %v2464_v45 = vadd.f32 %v24137_v61, %v2393_v11  ;;  %v1135_v57 = vrot.slane %v23957_v43, %v23735_v28 }
 0x1d0   : > { %v2466_v48 = vadd.f32 %v24137_v61, %v2395_v21  ;;  %v2082_v31 = vrot.slane %v2081_v30, 1  ;;  %v2088_v51 = vmax.f32 %v2086_v32, %v2087_v14  ;;  %v2095_v55 = vmax.f32 %v2093_v15, %v2094_v42 }
 0x1d1   : > { %v2465_v5 = vadd.f32 %v24137_v61, %v2394_v10  ;;  %v2467_v62 = vadd.f32 %v24137_v61, %v2396_v24  ;;  %vm2528_vm15 = vcmp.ge.f32.partialorder %v2464_v45, 0.0  ;;  %v2592_v18 = vmul.f32 0.1, %v2464_v45 }
 0x1d2   : > { %vm2530_vm0 = vcmp.ge.f32.partialorder %v2466_v48, 0.0  ;;  %v2594_v9 = vmul.f32 0.1, %v2466_v48  ;;  %v2089_v26 = vrot.slane %v2088_v51, 1  ;;  %v2102_v44 = vmax.f32 %v2100_v22, %v2101_v29 }
 0x1d3   : > { %vm2529_vm1 = vcmp.ge.f32.partialorder %v2465_v5, 0.0  ;;  %vm2531_vm2 = vcmp.ge.f32.partialorder %v2467_v62, 0.0  ;;  %v2593_v59 = vmul.f32 0.1, %v2465_v5  ;;  %v2595_v35 = vmul.f32 0.1, %v2467_v62 }
 0x1d4   : > { %v2656_v16 = vsel %vm2528_vm15, %v2464_v45, %v2592_v18  ;;  %v2658_v41 = vsel %vm2530_vm0, %v2466_v48, %v2594_v9  ;;  %v24228_v20 = vmax.f32 %v2081_v30, %v2082_v31  ;;  %v2096_v56 = vrot.slane %v2095_v55, 1 }
 0x1d5   : > { %v2657_v7 = vsel %vm2529_vm1, %v2465_v5, %v2593_v59  ;;  %v2659_v4 = vsel %vm2531_vm2, %v2467_v62, %v2595_v35  ;;  %v2817_v49 = vrot.slane %v2656_v16, 4  ;;  %v2821_v63 = vrot.slane %v2658_v41, 2 }
 0x1d6   : > { %v2819_v13 = vrot.slane %v2657_v7, 3  ;;  %v2823_v6 = vrot.slane %v2659_v4, 1  ;;  %v24230_v17 = vmax.f32 %v2088_v51, %v2089_v26  ;;  %v2103_v3 = vrot.slane %v2102_v44, 1 }
 0x1d7   : > { %v2818_v39 = vsel %vm2758_vm11, %v2817_v49, %v24204_v8  ;;  %v1142_v38 = vrot.slane %v1128_v46, %v23735_v28  ;;  %v1143_v19 = vcombine.high %v1135_v57, %v1135_v57  ;;  %v2021_v12 = vsel %vm1460_vm3, %v1135_v57, -inf }
 0x1d8   : > { %v2820_v36 = vsel %vm2761_vm12, %v2819_v13, %v2818_v39  ;;  %v24240_v54 = vmax.f32 %v2095_v55, %v2096_v56  ;;  %v2022_v23 = vrot.slane %v2021_v12, 4  ;;  %v1179_v52 = vcombine.high %v23985_v47, %v23985_v47 }
 0x1d9   : > { %v2822_v32 = vsel %vm2764_vm13, %v2821_v63, %v2820_v36  ;;  %v1144_v15 = vcombine.high %v1142_v38, %v1142_v38  ;;  %v2028_v8 = vsel %vm1460_vm3, %v1143_v19, -inf  ;;  %v2035_v22 = vsel %vm1460_vm3, %v1142_v38, -inf }
 0x1da   : > { %v2824_v43 = vsel %vm2767_vm14, %v2823_v6, %v2822_v32  ;;  %v2023_v46 = vmax.f32 %v2021_v12, %v2022_v23  ;;  %v2029_v60 = vrot.slane %v2028_v8, 4  ;;  %v2036_v58 = vrot.slane %v2035_v22, 4 }
 0x1db   : > { %2880 = vst [vmem:[#allocation2 + $0x51] sm:$0xff] %v2824_v43  ;;  %v2104_v11 = vmax.f32 %v2102_v44, %v2103_v3  ;;  %v2042_v30 = vsel %vm1460_vm3, %v1144_v15, -inf  ;;  %v1186_v21 = vrot.slane %v23985_v47, %v23735_v28  ;;  %v1193_v14 = vrot.slane %v1179_v52, %v23735_v28 }
 0x1dc   : > { %v2024_v42 = vrot.slane %v2023_v46, 2  ;;  %v2030_v29 = vmax.f32 %v2028_v8, %v2029_v60  ;;  %v2037_v10 = vmax.f32 %v2035_v22, %v2036_v58  ;;  %v2043_v24 = vrot.slane %v2042_v30, 4 }
 0x1dd   : > { %v1194_v45 = vcombine.high %v1186_v21, %v1186_v21  ;;  %v1195_v57 = vcombine.high %v1193_v14, %v1193_v14  ;;  %v2105_v48 = vsel %vm1460_vm3, %v1186_v21, -inf  ;;  %v2119_v31 = vsel %vm1460_vm3, %v1193_v14, -inf }
 0x1de   : > { %v2025_v51 = vmax.f32 %v2023_v46, %v2024_v42  ;;  %v2031_v55 = vrot.slane %v2030_v29, 2  ;;  %v2038_v5 = vrot.slane %v2037_v10, 2  ;;  %v2044_v62 = vmax.f32 %v2042_v30, %v2043_v24 }
 0x1df   : > { %v2106_v18 = vrot.slane %v2105_v48, 4  ;;  %v2112_v9 = vsel %vm1460_vm3, %v1194_v45, -inf  ;;  %v2120_v47 = vrot.slane %v2119_v31, 4  ;;  %v2126_v26 = vsel %vm1460_vm3, %v1195_v57, -inf }
 0x1e0   : > { %v2026_v44 = vrot.slane %v2025_v51, 1  ;;  %v2032_v59 = vmax.f32 %v2030_v29, %v2031_v55  ;;  %v2039_v35 = vmax.f32 %v2037_v10, %v2038_v5  ;;  %v2045_v16 = vrot.slane %v2044_v62, 2 }
 0x1e1   : > { %v2107_v41 = vmax.f32 %v2105_v48, %v2106_v18  ;;  %v2113_v56 = vrot.slane %v2112_v9, 4  ;;  %v2121_v7 = vmax.f32 %v2119_v31, %v2120_v47  ;;  %v2127_v4 = vrot.slane %v2126_v26, 4 }
 0x1e2   : > { %v2027_v49 = vmax.f32 %v2025_v51, %v2026_v44  ;;  %v2033_v63 = vrot.slane %v2032_v59, 1  ;;  %v2040_v13 = vrot.slane %v2039_v35, 1  ;;  %v2046_v6 = vmax.f32 %v2044_v62, %v2045_v16 }
 0x1e3   : > { %v2108_v3 = vrot.slane %v2107_v41, 2  ;;  %v2114_v39 = vmax.f32 %v2112_v9, %v2113_v56  ;;  %v2122_v38 = vrot.slane %v2121_v7, 2  ;;  %v2128_v19 = vmax.f32 %v2126_v26, %v2127_v4 }
 0x1e4   : > { %v2034_v12 = vmax.f32 %v2032_v59, %v2033_v63  ;;  %v2041_v36 = vmax.f32 %v2039_v35, %v2040_v13  ;;  %v2047_v23 = vrot.slane %v2046_v6, 1  ;;  %v2397_v52 = vmax.f32 %v2027_v49, %v24228_v20 }
 0x1e5   : > { %v2109_v32 = vmax.f32 %v2107_v41, %v2108_v3  ;;  %v2115_v15 = vrot.slane %v2114_v39, 2  ;;  %v2123_v8 = vmax.f32 %v2121_v7, %v2122_v38  ;;  %v2129_v22 = vrot.slane %v2128_v19, 2  ;;  %v21536_v41 = vld [vmem:[%s30437_s2 + $0x4] ss:$8 sps:$4 sm:$0xff]  }
 0x1e6   : > { %v2048_v43 = vmax.f32 %v2046_v6, %v2047_v23  ;;  %v2398_v46 = vmax.f32 %v2034_v12, %v24230_v17  ;;  %v2399_v60 = vmax.f32 %v2041_v36, %v24240_v54  ;;  %v2468_v58 = vadd.f32 %v24137_v61, %v2397_v52  ;;  %3359 = vmatprep.subr.bf16.mxu1 %v21536_v41 }
 0x1e7   : > { %v2110_v30 = vrot.slane %v2109_v32, 1  ;;  %v2116_v21 = vmax.f32 %v2114_v39, %v2115_v15  ;;  %v2124_v14 = vrot.slane %v2123_v8, 1  ;;  %v1145_v42 = vcombine.high %v23994_v40, %v23994_v40 }
 0x1e8   : > { %v2400_v29 = vmax.f32 %v2048_v43, %v2104_v11  ;;  %v2469_v20 = vadd.f32 %v24137_v61, %v2398_v46  ;;  %v2470_v10 = vadd.f32 %v24137_v61, %v2399_v60  ;;  %vm2532_vm6 = vcmp.ge.f32.partialorder %v2468_v58, 0.0 }
 0x1e9   : > { %v2596_v24 = vmul.f32 0.1, %v2468_v58  ;;  %v24264_v45 = vmax.f32 %v2109_v32, %v2110_v30  ;;  %v2117_v17 = vrot.slane %v2116_v21, 1  ;;  %v2130_v57 = vmax.f32 %v2128_v19, %v2129_v22 }
 0x1ea   : > { %v2471_v54 = vadd.f32 %v24137_v61, %v2400_v29  ;;  %vm2533_vm8 = vcmp.ge.f32.partialorder %v2469_v20, 0.0  ;;  %vm2534_vm9 = vcmp.ge.f32.partialorder %v2470_v10, 0.0  ;;  %v2597_v48 = vmul.f32 0.1, %v2469_v20 }
 0x1eb   : > { %v2598_v31 = vmul.f32 0.1, %v2470_v10  ;;  %v2660_v51 = vsel %vm2532_vm6, %v2468_v58, %v2596_v24  ;;  %v24267_v55 = vmax.f32 %v2116_v21, %v2117_v17  ;;  %v24269_v11 = vmax.f32 %v2123_v8, %v2124_v14 }
 0x1ec   : > { %vm2535_vm10 = vcmp.ge.f32.partialorder %v2471_v54, 0.0  ;;  %v2599_v5 = vmul.f32 0.1, %v2471_v54  ;;  %v2661_v62 = vsel %vm2533_vm8, %v2469_v20, %v2597_v48  ;;  %v1152_v18 = vrot.slane %v23994_v40, %v23735_v28 }
 0x1ed   : > { %v2662_v9 = vsel %vm2534_vm9, %v2470_v10, %v2598_v31  ;;  %v2825_v47 = vrot.slane %v2661_v62, 7  ;;  %v2131_v26 = vrot.slane %v2130_v57, 1  ;;  %v1159_v61 = vrot.slane %v1145_v42, %v23735_v28 }
 0x1ee   : > { %v2663_v44 = vsel %vm2535_vm10, %v2471_v54, %v2599_v5  ;;  %v2827_v59 = vrot.slane %v2662_v9, 6  ;;  %v1160_v35 = vcombine.high %v1152_v18, %v1152_v18  ;;  %v2049_v16 = vsel %vm1460_vm3, %v1152_v18, -inf }
 0x1ef   : > { %v2826_v56 = vsel %vm2749_vm4, %v2825_v47, %v2660_v51  ;;  %v2829_v7 = vrot.slane %v2663_v44, 5  ;;  %v1161_v4 = vcombine.high %v1159_v61, %v1159_v61  ;;  %v2050_v49 = vrot.slane %v2049_v16, 4 }
 0x1f0   : > { %v2828_v40 = vsel %vm2752_vm5, %v2827_v59, %v2826_v56  ;;  %v2056_v63 = vsel %vm1460_vm3, %v1160_v35, -inf  ;;  %v2063_v13 = vsel %vm1460_vm3, %v1159_v61, -inf  ;;  %v1230_v6 = vcombine.high %v24038_v2, %v24038_v2 }
 0x1f1   : > { %v24285_v3 = vsel %vm2755_vm7, %v2829_v7, %v2828_v40  ;;  %v2051_v39 = vmax.f32 %v2049_v16, %v2050_v49  ;;  %v2057_v38 = vrot.slane %v2056_v63, 4  ;;  %v2064_v19 = vrot.slane %v2063_v13, 4 }
 0x1f2   : > { %v2132_v12 = vmax.f32 %v2130_v57, %v2131_v26  ;;  %v2070_v36 = vsel %vm1460_vm3, %v1161_v4, -inf  ;;  %v1237_v23 = vrot.slane %v24038_v2, %v23735_v28  ;;  %v1244_v52 = vrot.slane %v1230_v6, %v23735_v28 }
 0x1f3   : > { %v2052_v32 = vrot.slane %v2051_v39, 2  ;;  %v2058_v15 = vmax.f32 %v2056_v63, %v2057_v38  ;;  %v2065_v8 = vmax.f32 %v2063_v13, %v2064_v19  ;;  %v2071_v22 = vrot.slane %v2070_v36, 4 }
 0x1f4   : > { %v1245_v43 = vcombine.high %v1237_v23, %v1237_v23  ;;  %v1246_v46 = vcombine.high %v1244_v52, %v1244_v52  ;;  %v2189_v60 = vsel %vm1460_vm3, %v1237_v23, -inf  ;;  %v2203_v58 = vsel %vm1460_vm3, %v1244_v52, -inf }
 0x1f5   : > { %v2053_v30 = vmax.f32 %v2051_v39, %v2052_v32  ;;  %v2059_v21 = vrot.slane %v2058_v15, 2  ;;  %v2066_v14 = vrot.slane %v2065_v8, 2  ;;  %v2072_v42 = vmax.f32 %v2070_v36, %v2071_v22  ;;  %v24301_v39 = vld [vmem:[%s30440_s5] ss:$0 sm:$0xff] }
 0x1f6   : > { %v2190_v29 = vrot.slane %v2189_v60, 4  ;;  %v2196_v20 = vsel %vm1460_vm3, %v1245_v43, -inf  ;;  %v2204_v2 = vrot.slane %v2203_v58, 4  ;;  %v2210_v10 = vsel %vm1460_vm3, %v1246_v46, -inf }
 0x1f7   : > { %v2054_v24 = vrot.slane %v2053_v30, 1  ;;  %v2060_v17 = vmax.f32 %v2058_v15, %v2059_v21  ;;  %v2067_v57 = vmax.f32 %v2065_v8, %v2066_v14  ;;  %v2073_v54 = vrot.slane %v2072_v42, 2 }
 0x1f8   : > { %v2191_v48 = vmax.f32 %v2189_v60, %v2190_v29  ;;  %v2197_v31 = vrot.slane %v2196_v20, 4  ;;  %v2205_v51 = vmax.f32 %v2203_v58, %v2204_v2  ;;  %v2211_v5 = vrot.slane %v2210_v10, 4 }
 0x1f9   : > { %v2055_v62 = vmax.f32 %v2053_v30, %v2054_v24  ;;  %v2061_v18 = vrot.slane %v2060_v17, 1  ;;  %v2068_v9 = vrot.slane %v2067_v57, 1  ;;  %v2074_v47 = vmax.f32 %v2072_v42, %v2073_v54 }
 0x1fa   : > { %v2192_v26 = vrot.slane %v2191_v48, 2  ;;  %v2198_v61 = vmax.f32 %v2196_v20, %v2197_v31  ;;  %v2206_v44 = vrot.slane %v2205_v51, 2  ;;  %v2212_v59 = vmax.f32 %v2210_v10, %v2211_v5 }
 0x1fb   : > { %v2062_v35 = vmax.f32 %v2060_v17, %v2061_v18  ;;  %v2069_v16 = vmax.f32 %v2067_v57, %v2068_v9  ;;  %v2075_v41 = vrot.slane %v2074_v47, 1  ;;  %v2401_v56 = vmax.f32 %v2055_v62, %v24264_v45 }
 0x1fc   : > { %v2193_v7 = vmax.f32 %v2191_v48, %v2192_v26  ;;  %v2199_v4 = vrot.slane %v2198_v61, 2  ;;  %v2207_v49 = vmax.f32 %v2205_v51, %v2206_v44  ;;  %v2213_v40 = vrot.slane %v2212_v59, 2 }
 0x1fd   : > { %v2076_v63 = vmax.f32 %v2074_v47, %v2075_v41  ;;  %v2402_v13 = vmax.f32 %v2062_v35, %v24267_v55  ;;  %v2403_v6 = vmax.f32 %v2069_v16, %v24269_v11  ;;  %v2472_v38 = vadd.f32 %v24301_v39, %v2401_v56 }
 0x1fe   : > { %v2194_v19 = vrot.slane %v2193_v7, 1  ;;  %v2200_v36 = vmax.f32 %v2198_v61, %v2199_v4  ;;  %v2208_v23 = vrot.slane %v2207_v49, 1  ;;  %v1196_v45 = vcombine.high %v24045_v50, %v24045_v50 }
 0x1ff   : > { %v2404_v52 = vmax.f32 %v2076_v63, %v2132_v12  ;;  %v2473_v32 = vadd.f32 %v24301_v39, %v2402_v13  ;;  %v2474_v55 = vadd.f32 %v24301_v39, %v2403_v6  ;;  %vm2536_vm15 = vcmp.ge.f32.partialorder %v2472_v38, 0.0 }
 0x200   : > { %v2600_v11 = vmul.f32 0.1, %v2472_v38  ;;  %v24308_v15 = vmax.f32 %v2193_v7, %v2194_v19  ;;  %v2201_v8 = vrot.slane %v2200_v36, 1  ;;  %v2214_v22 = vmax.f32 %v2212_v59, %v2213_v40 }
 0x201   : > { %v2475_v43 = vadd.f32 %v24301_v39, %v2404_v52  ;;  %vm2537_vm0 = vcmp.ge.f32.partialorder %v2473_v32, 0.0  ;;  %vm2538_vm1 = vcmp.ge.f32.partialorder %v2474_v55, 0.0  ;;  %v2601_v46 = vmul.f32 0.1, %v2473_v32 }
 0x202   : > { %v2602_v60 = vmul.f32 0.1, %v2474_v55  ;;  %v2664_v58 = vsel %vm2536_vm15, %v2472_v38, %v2600_v11  ;;  %v24311_v30 = vmax.f32 %v2200_v36, %v2201_v8  ;;  %v24313_v12 = vmax.f32 %v2207_v49, %v2208_v23 }
 0x203   : > { %vm2539_vm2 = vcmp.ge.f32.partialorder %v2475_v43, 0.0  ;;  %v2603_v21 = vmul.f32 0.1, %v2475_v43  ;;  %v2665_v14 = vsel %vm2537_vm0, %v2473_v32, %v2601_v46  ;;  %v2831_v42 = vrot.slane %v2664_v58, 4 }
 0x204   : > { %v2666_v29 = vsel %vm2538_vm1, %v2474_v55, %v2602_v60  ;;  %v2833_v20 = vrot.slane %v2665_v14, 3  ;;  %v2215_v2 = vrot.slane %v2214_v22, 1  ;;  %v1203_v10 = vrot.slane %v24045_v50, %v23735_v28 }
 0x205   : > { %v2667_v24 = vsel %vm2539_vm2, %v2475_v43, %v2603_v21  ;;  %v2832_v17 = vsel %vm2758_vm11, %v2831_v42, %v24285_v3  ;;  %v2835_v57 = vrot.slane %v2666_v29, 2  ;;  %v1210_v54 = vrot.slane %v1196_v45, %v23735_v28 }
 0x206   : > { %v2834_v48 = vsel %vm2761_vm12, %v2833_v20, %v2832_v17  ;;  %v2837_v31 = vrot.slane %v2667_v24, 1  ;;  %v1211_v51 = vcombine.high %v1203_v10, %v1203_v10  ;;  %v2133_v5 = vsel %vm1460_vm3, %v1203_v10, -inf }
 0x207   : > { %v2836_v62 = vsel %vm2764_vm13, %v2835_v57, %v2834_v48  ;;  %v1212_v18 = vcombine.high %v1210_v54, %v1210_v54  ;;  %v2134_v9 = vrot.slane %v2133_v5, 4  ;;  %v2147_v47 = vsel %vm1460_vm3, %v1210_v54, -inf }
 0x208   : > { %v2838_v50 = vsel %vm2767_vm14, %v2837_v31, %v2836_v62  ;;  %v2140_v26 = vsel %vm1460_vm3, %v1211_v51, -inf  ;;  %v2148_v3 = vrot.slane %v2147_v47, 4  ;;  %v1247_v61 = vcombine.high %v24082_v37, %v24082_v37 }
 0x209   : > { %2881 = vst [vmem:[#allocation2 + $0x61] sm:$0xff] %v2838_v50  ;;  %v2135_v44 = vmax.f32 %v2133_v5, %v2134_v9  ;;  %v2141_v59 = vrot.slane %v2140_v26, 4  ;;  %v2154_v35 = vsel %vm1460_vm3, %v1212_v18, -inf  ;;  %v1254_v16 = vrot.slane %v24082_v37, %v23735_v28 }
 0x20a   : > { %v2216_v41 = vmax.f32 %v2214_v22, %v2215_v2  ;;  %v2149_v56 = vmax.f32 %v2147_v47, %v2148_v3  ;;  %v2155_v7 = vrot.slane %v2154_v35, 4  ;;  %v1261_v4 = vrot.slane %v1247_v61, %v23735_v28 }
 0x20b   : > { %v2136_v49 = vrot.slane %v2135_v44, 2  ;;  %v2142_v40 = vmax.f32 %v2140_v26, %v2141_v59  ;;  %v1262_v63 = vcombine.high %v1254_v16, %v1254_v16  ;;  %v2217_v13 = vsel %vm1460_vm3, %v1254_v16, -inf }
 0x20c   : > { %v2150_v6 = vrot.slane %v2149_v56, 2  ;;  %v2156_v38 = vmax.f32 %v2154_v35, %v2155_v7  ;;  %v1263_v19 = vcombine.high %v1261_v4, %v1261_v4  ;;  %v2218_v36 = vrot.slane %v2217_v13, 4 }
 0x20d   : > { %v2137_v23 = vmax.f32 %v2135_v44, %v2136_v49  ;;  %v2143_v45 = vrot.slane %v2142_v40, 2  ;;  %v2224_v52 = vsel %vm1460_vm3, %v1262_v63, -inf  ;;  %v2231_v37 = vsel %vm1460_vm3, %v1261_v4, -inf }
 0x20e   : > { %v2151_v32 = vmax.f32 %v2149_v56, %v2150_v6  ;;  %v2157_v55 = vrot.slane %v2156_v38, 2  ;;  %v2219_v11 = vmax.f32 %v2217_v13, %v2218_v36  ;;  %v2225_v8 = vrot.slane %v2224_v52, 4 }
 0x20f   : > { %v2138_v22 = vrot.slane %v2137_v23, 1  ;;  %v2144_v43 = vmax.f32 %v2142_v40, %v2143_v45  ;;  %v2232_v46 = vrot.slane %v2231_v37, 4  ;;  %v2238_v60 = vsel %vm1460_vm3, %v1263_v19, -inf }
 0x210   : > { %v2152_v58 = vrot.slane %v2151_v32, 1  ;;  %v2158_v21 = vmax.f32 %v2156_v38, %v2157_v55  ;;  %v2220_v14 = vrot.slane %v2219_v11, 2  ;;  %v2226_v42 = vmax.f32 %v2224_v52, %v2225_v8 }
 0x211   : > { %v2139_v29 = vmax.f32 %v2137_v23, %v2138_v22  ;;  %v2145_v20 = vrot.slane %v2144_v43, 1  ;;  %v2233_v2 = vmax.f32 %v2231_v37, %v2232_v46  ;;  %v2239_v10 = vrot.slane %v2238_v60, 4 }
 0x212   : > { %v2153_v24 = vmax.f32 %v2151_v32, %v2152_v58  ;;  %v2159_v17 = vrot.slane %v2158_v21, 1  ;;  %v2221_v57 = vmax.f32 %v2219_v11, %v2220_v14  ;;  %v2227_v54 = vrot.slane %v2226_v42, 2 }
 0x213   : > { %v2146_v48 = vmax.f32 %v2144_v43, %v2145_v20  ;;  %v2405_v31 = vmax.f32 %v2139_v29, %v24308_v15  ;;  %v2234_v51 = vrot.slane %v2233_v2, 2  ;;  %v2240_v5 = vmax.f32 %v2238_v60, %v2239_v10 }
 0x214   : > { %v2160_v62 = vmax.f32 %v2158_v21, %v2159_v17  ;;  %v2407_v18 = vmax.f32 %v2153_v24, %v24313_v12  ;;  %v2228_v9 = vmax.f32 %v2226_v42, %v2227_v54  ;;  %v1213_v47 = vcombine.high %v24096_v0, %v24096_v0 }
 0x215   : > { %v2406_v50 = vmax.f32 %v2146_v48, %v24311_v30  ;;  %v2476_v26 = vadd.f32 %v24301_v39, %v2405_v31  ;;  %v2222_v3 = vrot.slane %v2221_v57, 1  ;;  %v2235_v61 = vmax.f32 %v2233_v2, %v2234_v51 }
 0x216   : > { %v2408_v44 = vmax.f32 %v2160_v62, %v2216_v41  ;;  %v2478_v59 = vadd.f32 %v24301_v39, %v2407_v18  ;;  %v2229_v35 = vrot.slane %v2228_v9, 1  ;;  %v2241_v15 = vrot.slane %v2240_v5, 2 }
 0x217   : > { %v2477_v16 = vadd.f32 %v24301_v39, %v2406_v50  ;;  %vm2540_vm6 = vcmp.ge.f32.partialorder %v2476_v26, 0.0  ;;  %v2604_v56 = vmul.f32 0.1, %v2476_v26  ;;  %v2236_v12 = vrot.slane %v2235_v61, 1 }
 0x218   : > { %v2479_v7 = vadd.f32 %v24301_v39, %v2408_v44  ;;  %vm2542_vm8 = vcmp.ge.f32.partialorder %v2478_v59, 0.0  ;;  %v2606_v4 = vmul.f32 0.1, %v2478_v59  ;;  %v24345_v49 = vmax.f32 %v2221_v57, %v2222_v3 }
 0x219   : > { %vm2541_vm9 = vcmp.ge.f32.partialorder %v2477_v16, 0.0  ;;  %v2605_v30 = vmul.f32 0.1, %v2477_v16  ;;  %v24347_v40 = vmax.f32 %v2228_v9, %v2229_v35  ;;  %v2242_v13 = vmax.f32 %v2240_v5, %v2241_v15 }
 0x21a   : > { %vm2543_vm10 = vcmp.ge.f32.partialorder %v2479_v7, 0.0  ;;  %v2607_v41 = vmul.f32 0.1, %v2479_v7  ;;  %v2670_v63 = vsel %vm2542_vm8, %v2478_v59, %v2606_v4  ;;  %v1220_v19 = vrot.slane %v24096_v0, %v23735_v28 }
 0x21b   : > { %v2669_v6 = vsel %vm2541_vm9, %v2477_v16, %v2605_v30  ;;  %v2841_v38 = vrot.slane %v2670_v63, 6  ;;  %v1227_v36 = vrot.slane %v1213_v47, %v23735_v28  ;;  %v2668_v23 = vsel %vm2540_vm6, %v2476_v26, %v2604_v56 }
 0x21c   : > { %v2671_v45 = vsel %vm2543_vm10, %v2479_v7, %v2607_v41  ;;  %v2839_v52 = vrot.slane %v2669_v6, 7  ;;  %v1228_v32 = vcombine.high %v1220_v19, %v1220_v19  ;;  %v2161_v11 = vsel %vm1460_vm3, %v1220_v19, -inf }
 0x21d   : > { %v2843_v37 = vrot.slane %v2671_v45, 5  ;;  %v1229_v55 = vcombine.high %v1227_v36, %v1227_v36  ;;  %v23619_v8 = vmov 0   ;;  %v2243_v43 = vrot.slane %v2242_v13, 1 }
 0x21e   : > { %3230 = vmatprep.mubr.bf16.mxu1 %v23619_v8  ;;  %v2840_v22 = vsel %vm2749_vm4, %v2839_v52, %v2668_v23  ;;  %v2162_v46 = vrot.slane %v2161_v11, 4  ;;  %v2175_v0 = vsel %vm1460_vm3, %v1227_v36, -inf  ;;  %v2168_v58 = vsel %vm1460_vm3, %v1228_v32, -inf }
 0x21f   : > { %v2842_v60 = vsel %vm2752_vm5, %v2841_v38, %v2840_v22  ;;  %v2176_v21 = vrot.slane %v2175_v0, 4  ;;  %v2182_v14 = vsel %vm1460_vm3, %v1229_v55, -inf  ;;  %v2169_v20 = vrot.slane %v2168_v58, 4 }
 0x220   : > { %v24361_v42 = vsel %vm2755_vm7, %v2843_v37, %v2842_v60  ;;  %v2163_v29 = vmax.f32 %v2161_v11, %v2162_v46  ;;  %v2183_v2 = vrot.slane %v2182_v14, 4  ;;  %v2237_v10 = vmax.f32 %v2235_v61, %v2236_v12 }
 0x221   : > { %v2177_v24 = vmax.f32 %v2175_v0, %v2176_v21  ;;  %v1298_v17 = vcombine.high %v24140_v1, %v24140_v1  ;;  %v1305_v57 = vrot.slane %v24140_v1, %v23735_v28  ;;  %v2244_v54 = vmax.f32 %v2242_v13, %v2243_v43 }
 0x222   : > { %v2164_v48 = vrot.slane %v2163_v29, 2  ;;  %v2170_v31 = vmax.f32 %v2168_v58, %v2169_v20  ;;  %v2184_v51 = vmax.f32 %v2182_v14, %v2183_v2  ;;  %vm2970_vm6 = vsmask.f32 3328 }
 0x223   : > { %v2178_v5 = vrot.slane %v2177_v24, 2  ;;  %v1312_v62 = vrot.slane %v1298_v17, %v23735_v28  ;;  %v1313_v18 = vcombine.high %v1305_v57, %v1305_v57  ;;  %v2301_v9 = vsel %vm1460_vm3, %v1305_v57, -inf }
 0x224   : > { %v2165_v47 = vmax.f32 %v2163_v29, %v2164_v48  ;;  %v2171_v50 = vrot.slane %v2170_v31, 2  ;;  %v2185_v26 = vrot.slane %v2184_v51, 2  ;;  %v2302_v3 = vrot.slane %v2301_v9, 4  ;;  %v23603_v29 = vld [vmem:[#allocation2] sm:$0xff]  ;;  %v2887_v48 = vld [vmem:[#allocation2 + $0x18] sm:$0x3] }
 0x225   : > { %v2179_v61 = vmax.f32 %v2177_v24, %v2178_v5  ;;  %v1314_v44 = vcombine.high %v1312_v62, %v1312_v62  ;;  %v2308_v59 = vsel %vm1460_vm3, %v1313_v18, -inf  ;;  %v2315_v1 = vsel %vm1460_vm3, %v1312_v62, -inf  ;;  %v2885_v24 = vld [vmem:[#allocation2 + $0x8] sm:$0x3] }
 0x226   : > { %v2166_v35 = vrot.slane %v2165_v47, 1  ;;  %v2172_v15 = vmax.f32 %v2170_v31, %v2171_v50  ;;  %v2186_v16 = vmax.f32 %v2184_v51, %v2185_v26  ;;  %v2303_v56 = vmax.f32 %v2301_v9, %v2302_v3 }
 0x227   : > { %v2180_v12 = vrot.slane %v2179_v61, 1  ;;  %v2309_v7 = vrot.slane %v2308_v59, 4  ;;  %v2316_v4 = vrot.slane %v2315_v1, 4  ;;  %v2322_v30 = vsel %vm1460_vm3, %v1314_v44, -inf }
 0x228   : > { %v2167_v41 = vmax.f32 %v2165_v47, %v2166_v35  ;;  %v2173_v63 = vrot.slane %v2172_v15, 1  ;;  %v2187_v13 = vrot.slane %v2186_v16, 1  ;;  %v2304_v6 = vrot.slane %v2303_v56, 2 }
 0x229   : > { %v2181_v38 = vmax.f32 %v2179_v61, %v2180_v12  ;;  %v2310_v19 = vmax.f32 %v2308_v59, %v2309_v7  ;;  %v2317_v36 = vmax.f32 %v2315_v1, %v2316_v4  ;;  %v2323_v23 = vrot.slane %v2322_v30, 4 }
 0x22a   : > { %v2174_v45 = vmax.f32 %v2172_v15, %v2173_v63  ;;  %v2188_v52 = vmax.f32 %v2186_v16, %v2187_v13  ;;  %v2409_v37 = vmax.f32 %v2167_v41, %v24345_v49  ;;  %v2305_v32 = vmax.f32 %v2303_v56, %v2304_v6 }
 0x22b   : > { %v2411_v55 = vmax.f32 %v2181_v38, %v2237_v10  ;;  %v2311_v11 = vrot.slane %v2310_v19, 2  ;;  %v2318_v22 = vrot.slane %v2317_v36, 2  ;;  %v2324_v43 = vmax.f32 %v2322_v30, %v2323_v23 }
 0x22c   : > { %v2410_v46 = vmax.f32 %v2174_v45, %v24347_v40  ;;  %v2412_v0 = vmax.f32 %v2188_v52, %v2244_v54  ;;  %v2480_v60 = vadd.f32 %v24301_v39, %v2409_v37  ;;  %v2306_v21 = vrot.slane %v2305_v32, 1  ;;  %v24380_v54 = vld [vmem:[#allocation2 + $0x10] sm:$0xff] }
 0x22d   : > { %v2482_v58 = vadd.f32 %v24301_v39, %v2411_v55  ;;  %v2312_v14 = vmax.f32 %v2310_v19, %v2311_v11  ;;  %v24376_v20 = vpack.c.bf16 %v23603_v29, %v23603_v29  ;;  %v2319_v40 = vmax.f32 %v2317_v36, %v2318_v22  ;;  %v21728_v11 = vld [vmem:[%s30438_s3 + $0x184] ss:$12 sps:$4 sm:$0xff]  }
 0x22e   : > { %v2481_v2 = vadd.f32 %v24301_v39, %v2410_v46  ;;  %v2483_v49 = vadd.f32 %v24301_v39, %v2412_v0  ;;  %vm2544_vm15 = vcmp.ge.f32.partialorder %v2480_v60, 0.0  ;;  %v2608_v10 = vmul.f32 0.1, %v2480_v60  ;;  %6606 = vmatprep.subr.bf16.mxu0 %v21728_v11 }
 0x22f   : > { %vm2546_vm0 = vcmp.ge.f32.partialorder %v2482_v58, 0.0  ;;  %v2610_v17 = vmul.f32 0.1, %v2482_v58  ;;  %v2325_v57 = vrot.slane %v2324_v43, 2  ;;  %v24382_v18 = vmax.f32 %v2305_v32, %v2306_v21 }
 0x230   : > { %vm2545_vm1 = vcmp.ge.f32.partialorder %v2481_v2, 0.0  ;;  %vm2547_vm2 = vcmp.ge.f32.partialorder %v2483_v49, 0.0  ;;  %v2609_v31 = vmul.f32 0.1, %v2481_v2  ;;  %v2611_v51 = vmul.f32 0.1, %v2483_v49 }
 0x231   : > { %v2672_v5 = vsel %vm2544_vm15, %v2480_v60, %v2608_v10  ;;  %v2674_v62 = vsel %vm2546_vm0, %v2482_v58, %v2610_v17  ;;  %v24384_v9 = vpack.c.bf16 %v2885_v24, %v2885_v24  ;;  %v2313_v3 = vrot.slane %v2312_v14, 1 }
 0x232   : > { %v2673_v47 = vsel %vm2545_vm1, %v2481_v2, %v2609_v31  ;;  %v2675_v50 = vsel %vm2547_vm2, %v2483_v49, %v2611_v51  ;;  %v2845_v26 = vrot.slane %v2672_v5, 4  ;;  %v2849_v44 = vrot.slane %v2674_v62, 2  ;;  %v21534_v51 = vld [vmem:[%s30437_s2] ss:$8 sps:$4 sm:$0xff]  }
 0x233   : > { %v2847_v61 = vrot.slane %v2673_v47, 3  ;;  %v2320_v59 = vrot.slane %v2319_v40, 1  ;;  %v2326_v1 = vmax.f32 %v2324_v43, %v2325_v57  ;;  %v2851_v15 = vrot.slane %v2675_v50, 1 }
 0x234   : > { %v2846_v35 = vsel %vm2758_vm11, %v2845_v26, %v24361_v42  ;;  %v24390_v16 = vpack.c.bf16 %v24380_v54, %v24380_v54  ;;  %v24392_v56 = vpack.c.bf16 %v2887_v48, %v2887_v48  ;;  %v2974_v4 = vshrl.u32 %v24376_v20, 16  ;;  %v21539_v26 = vld [vmem:[%s30437_s2 + $0x14] ss:$8 sps:$4 sm:$0xff]  }
 0x235   : > { %v2848_v12 = vsel %vm2761_vm12, %v2847_v61, %v2846_v35  ;;  %v2327_v7 = vrot.slane %v2326_v1, 1  ;;  %v2977_v41 = vshll.u32 %v24376_v20, 16  ;;  %v2983_v63 = vshll.u32 %v24384_v9, 16 }
 0x236   : > { %v2850_v30 = vsel %vm2764_vm13, %v2849_v44, %v2848_v12  ;;  %v2988_v42 = vshrl.u32 %v24390_v16, 16  ;;  %vm2971_vm8 = vsmask.f32 7440  ;;  %v2976_v6 = vrot.slane %v2974_v4, 4 }
 0x237   : > { %v2852_v13 = vsel %vm2767_vm14, %v2851_v15, %v2850_v30  ;;  %v2991_v38 = vshll.u32 %v24390_v16, 16  ;;  %v24402_v19 = vmax.f32 %v2312_v14, %v2313_v3  ;;  %v2979_v36 = vrot.slane %v2977_v41, 5  ;;  %vm24412_vm9 = vmor %vm2970_vm6, %vm2971_vm8 }
 0x238   : > { %2882 = vst [vmem:[#allocation2 + $0x71] sm:$0xff] %v2852_v13  ;;  %v2990_v23 = vrot.slane %v2988_v42, 4  ;;  %v2997_v45 = vshll.u32 %v24392_v56, 16  ;;  %v24405_v52 = vmax.f32 %v2319_v40, %v2320_v59  ;;  %v24407_v37 = vmax.f32 %v2326_v1, %v2327_v7 }
 0x239   : > { %v2993_v32 = vrot.slane %v2991_v38, 5  ;;  %v1264_v55 = vcombine.high %v24201_v34, %v24201_v34  ;;  %v2980_v22 = vor.u32 %v2979_v36, %v2976_v6  ;;  %v2985_v43 = vrot.slane %v2983_v63, 5  ;;  %v21537_v63 = vld [vmem:[%s30437_s2 + $0x10] ss:$8 sps:$4 sm:$0xff]   ;;  %v21542_v36 = vld [vmem:[%s30437_s2 + $0x24] ss:$8 sps:$4 sm:$0xff]  }
 0x23a   : > { %v1271_v46 = vrot.slane %v24201_v34, %v23735_v28  ;;  %v1315_v0 = vcombine.high %v24215_v53, %v24215_v53  ;;  %v2999_v58 = vrot.slane %v2997_v45, 5  ;;  %v1322_v14 = vrot.slane %v24215_v53, %v23735_v28 }
 0x23b   : > { %v2994_v60 = vor.u32 %v2993_v32, %v2990_v23  ;;  %v1278_v21 = vrot.slane %v1264_v55, %v23735_v28  ;;  %v24423_v29 = vrot.slane %v2980_v22, 4 }
 0x23c   : > { %v1279_v2 = vcombine.high %v1271_v46, %v1271_v46  ;;  %v2245_v49 = vsel %vm1460_vm3, %v1271_v46, -inf  ;;  %v1329_v10 = vrot.slane %v1315_v0, %v23735_v28  ;;  %v1330_v53 = vcombine.high %v1322_v14, %v1322_v14 }
 0x23d   : > { %v2995_v24 = vrot.slane %v2994_v60, 4  ;;  %v1280_v17 = vcombine.high %v1278_v21, %v1278_v21  ;;  %v2246_v34 = vrot.slane %v2245_v49, 4  ;;  %v2259_v40 = vsel %vm1460_vm3, %v1278_v21, -inf }
 0x23e   : > { %v2986_v57 = vsel %vm24412_vm9, %v24423_v29, %v2985_v43  ;;  %v2252_v48 = vsel %vm1460_vm3, %v1279_v2, -inf  ;;  %v2260_v31 = vrot.slane %v2259_v40, 4  ;;  %v1331_v59 = vcombine.high %v1329_v10, %v1329_v10  ;;  %v21540_v2 = vld [vmem:[%s30437_s2 + $0x20] ss:$8 sps:$4 sm:$0xff]  }
 0x23f   : > { %v24437_v5 = vsel %vm24412_vm9, %v2995_v24, %v2999_v58  ;;  %v2247_v62 = vmax.f32 %v2245_v49, %v2246_v34  ;;  %v2253_v47 = vrot.slane %v2252_v48, 4  ;;  %v2266_v50 = vsel %vm1460_vm3, %v1280_v17, -inf  ;;  %v21545_v34 = vld [vmem:[%s30437_s2 + $0x34] ss:$8 sps:$4 sm:$0xff]  }
 0x240   : > { %v18038_v3 = vcombine.low %v2986_v57, %v24437_v5  ;;  %v2261_v61 = vmax.f32 %v2259_v40, %v2260_v31  ;;  %v2267_v44 = vrot.slane %v2266_v50, 4  ;;  %v2329_v15 = vsel %vm1460_vm3, %v1322_v14, -inf }
 0x241   : > { %v2248_v1 = vrot.slane %v2247_v62, 2  ;;  %v2254_v35 = vmax.f32 %v2252_v48, %v2253_v47  ;;  %v2336_v12 = vsel %vm1460_vm3, %v1330_v53, -inf  ;;  %v2330_v30 = vrot.slane %v2329_v15, 4 }
 0x242   : > { %3231 = vmatmul.mubr.bf16.vlgmr.msra.gmra.mrb[0].mxu1 %v18038_v3  ;;  %v2262_v7 = vrot.slane %v2261_v61, 2  ;;  %v2268_v4 = vmax.f32 %v2266_v50, %v2267_v44  ;;  %v2337_v41 = vrot.slane %v2336_v12, 4  ;;  %v2343_v6 = vsel %vm1460_vm3, %v1329_v10, -inf  ;;  %v21543_v44 = vld [vmem:[%s30437_s2 + $0x30] ss:$8 sps:$4 sm:$0xff]  }
 0x243   : > { %v2249_v42 = vmax.f32 %v2247_v62, %v2248_v1  ;;  %v2255_v13 = vrot.slane %v2254_v35, 2  ;;  %v2350_v38 = vsel %vm1460_vm3, %v1331_v59, -inf  ;;  %3240 = vmatprep.mubr.bf16.mxu1 %v23619_v8  ;;  %3360 = vmatpush1.bf16.msra.mxu1 %v21534_v51  ;;  %v2331_v32 = vmax.f32 %v2329_v15, %v2330_v30  ;;  %v21548_v59 = vld [vmem:[%s30437_s2 + $0x44] ss:$8 sps:$4 sm:$0xff]  }
 0x244   : > { %v2263_v23 = vmax.f32 %v2261_v61, %v2262_v7  ;;  %v2269_v45 = vrot.slane %v2268_v4, 2  ;;  %v2338_v55 = vmax.f32 %v2336_v12, %v2337_v41  ;;  %3361 = vmatprep.subr.bf16.mxu1 %v21539_v26  ;;  %v2344_v46 = vrot.slane %v2343_v6, 4 }
 0x245   : > { %v2250_v22 = vrot.slane %v2249_v42, 1  ;;  %v2256_v43 = vmax.f32 %v2254_v35, %v2255_v13  ;;  %v2351_v0 = vrot.slane %v2350_v38, 4  ;;  %v2332_v21 = vrot.slane %v2331_v32, 2 }
 0x246   : > { %v2264_v60 = vrot.slane %v2263_v23, 1  ;;  %v2270_v58 = vmax.f32 %v2268_v4, %v2269_v45  ;;  %v2339_v14 = vrot.slane %v2338_v55, 2  ;;  %v2345_v24 = vmax.f32 %v2343_v6, %v2344_v46 }
 0x247   : > { %v2251_v49 = vmax.f32 %v2249_v42, %v2250_v22  ;;  %v2257_v10 = vrot.slane %v2256_v43, 1  ;;  %v2352_v17 = vmax.f32 %v2350_v38, %v2351_v0  ;;  %3362 = vmatpush1.bf16.msra.mxu1 %v21537_v63  ;;  %v2333_v48 = vmax.f32 %v2331_v32, %v2332_v21  ;;  %v2889_v63 = vld [vmem:[#allocation2 + $0x28] sm:$0x3] }
 0x248   : > { %v2265_v40 = vmax.f32 %v2263_v23, %v2264_v60  ;;  %v2271_v57 = vrot.slane %v2270_v58, 1  ;;  %v2340_v31 = vmax.f32 %v2338_v55, %v2339_v14  ;;  %3363 = vmatprep.subr.bf16.mxu1 %v21542_v36  ;;  %v2346_v62 = vrot.slane %v2345_v24, 2  ;;  %v21546_v42 = vld [vmem:[%s30437_s2 + $0x40] ss:$8 sps:$4 sm:$0xff]   ;;  %v21551_v36 = vld [vmem:[%s30437_s2 + $0x54] ss:$8 sps:$4 sm:$0xff]  }
 0x249   : > { %v2258_v53 = vmax.f32 %v2256_v43, %v2257_v10  ;;  %v2413_v51 = vmax.f32 %v2251_v49, %v24382_v18  ;;  %v2353_v47 = vrot.slane %v2352_v17, 2  ;;  %v2334_v3 = vrot.slane %v2333_v48, 1  ;;  %v24497_v55 = vld [vmem:[#allocation2 + $0x30] sm:$0xff]  ;;  %v2891_v49 = vld [vmem:[#allocation2 + $0x38] sm:$0x3] }
 0x24a   : > { %v2272_v50 = vmax.f32 %v2270_v58, %v2271_v57  ;;  %v2415_v26 = vmax.f32 %v2265_v40, %v24405_v52  ;;  %v2341_v61 = vrot.slane %v2340_v31, 1  ;;  %v2347_v18 = vmax.f32 %v2345_v24, %v2346_v62 }
 0x24b   : > { %v2414_v1 = vmax.f32 %v2258_v53, %v24402_v19  ;;  %v2484_v35 = vadd.f32 %v24301_v39, %v2413_v51  ;;  %v24471_v15 = vmax.f32 %v2352_v17, %v2353_v47  ;;  %3364 = vmatpush1.bf16.msra.mxu1 %v21540_v2  ;;  %v24475_v7 = vmax.f32 %v2333_v48, %v2334_v3  ;;  %v21549_v17 = vld [vmem:[%s30437_s2 + $0x50] ss:$8 sps:$4 sm:$0xff]  }
 0x24c   : > { %v2416_v52 = vmax.f32 %v2272_v50, %v24407_v37  ;;  %v2486_v12 = vadd.f32 %v24301_v39, %v2415_v26  ;;  %v1281_v4 = vcombine.high %v24217_v33, %v24217_v33  ;;  %3365 = vmatprep.subr.bf16.mxu1 %v21545_v34  ;;  %v2348_v41 = vrot.slane %v2347_v18, 1  ;;  %v24486_v37 = vld [vmem:[%s30440_s5] ss:$0 sm:$0xff]  ;;  %v21554_v34 = vld [vmem:[%s30437_s2 + $0x64] ss:$8 sps:$4 sm:$0xff]  }
 0x24d   : > { %v2485_v30 = vadd.f32 %v24301_v39, %v2414_v1  ;;  %vm2548_vm10 = vcmp.ge.f32.partialorder %v2484_v35, 0.0  ;;  %v2612_v19 = vmul.f32 0.1, %v2484_v35  ;;  %v24489_v38 = vmax.f32 %v2340_v31, %v2341_v61  ;;  %v24491_v39 = vld [vmem:[#allocation2 + $0x20] sm:$0xff] }
 0x24e   : > { %v2487_v13 = vadd.f32 %v24486_v37, %v2416_v52  ;;  %vm2550_vm15 = vcmp.ge.f32.partialorder %v2486_v12, 0.0  ;;  %v2614_v6 = vmul.f32 0.1, %v2486_v12  ;;  %v2355_v32 = vrot.slane %v24471_v15, 1 }
 0x24f   : > { %vm2549_vm0 = vcmp.ge.f32.partialorder %v2485_v30, 0.0  ;;  %v2613_v23 = vmul.f32 0.1, %v2485_v30  ;;  %v2676_v45 = vsel %vm2548_vm10, %v2484_v35, %v2612_v19  ;;  %3366 = vmatpush1.bf16.msra.mxu1 %v21543_v44  ;;  %v24499_v46 = vmax.f32 %v2347_v18, %v2348_v41  ;;  %v21552_v35 = vld [vmem:[%s30437_s2 + $0x60] ss:$8 sps:$4 sm:$0xff]  }
 0x250   : > { %vm2551_vm1 = vcmp.ge.f32.partialorder %v2487_v13, 0.0  ;;  %v2615_v22 = vmul.f32 0.1, %v2487_v13  ;;  %v2678_v43 = vsel %vm2550_vm15, %v2486_v12, %v2614_v6  ;;  %3367 = vmatprep.subr.bf16.mxu1 %v21548_v59  ;;  %v1288_v58 = vrot.slane %v24217_v33, %v23735_v28  ;;  %v21557_v18 = vld [vmem:[%s30437_s2 + $0x74] ss:$8 sps:$4 sm:$0xff]  }
 0x251   : > { %v2677_v0 = vsel %vm2549_vm0, %v2485_v30, %v2613_v23  ;;  %v2855_v60 = vrot.slane %v2678_v43, 6  ;;  %v1295_v21 = vrot.slane %v1281_v4, %v23735_v28  ;;  %v24506_v10 = vpack.c.bf16 %v24491_v39, %v24491_v39 }
 0x252   : > { %v2679_v14 = vsel %vm2551_vm1, %v2487_v13, %v2615_v22  ;;  %v2853_v2 = vrot.slane %v2677_v0, 7  ;;  %v24508_v24 = vpack.c.bf16 %v2889_v63, %v2889_v63  ;;  %v1296_v40 = vcombine.high %v1288_v58, %v1288_v58 }
 0x253   : > { %v2857_v33 = vrot.slane %v2679_v14, 5  ;;  %v1297_v57 = vcombine.high %v1295_v21, %v1295_v21  ;;  %v2273_v48 = vsel %vm1460_vm3, %v1288_v58, -inf  ;;  %3368 = vmatpush1.bf16.msra.mxu1 %v21546_v42  ;;  %v2287_v51 = vsel %vm1460_vm3, %v1295_v21, -inf  ;;  %v21555_v58 = vld [vmem:[%s30437_s2 + $0x70] ss:$8 sps:$4 sm:$0xff]  }
 0x254   : > { %v2854_v31 = vsel %vm2749_vm4, %v2853_v2, %v2676_v45  ;;  %v2274_v53 = vrot.slane %v2273_v48, 4  ;;  %v24521_v62 = vpack.c.bf16 %v24497_v55, %v24497_v55  ;;  %3369 = vmatprep.subr.bf16.mxu1 %v21551_v36  ;;  %v2280_v50 = vsel %vm1460_vm3, %v1296_v40, -inf  ;;  %v24541_v45 = vld [vmem:[#allocation2 + $0x40] sm:$0xff] }
 0x255   : > { %v2856_v47 = vsel %vm2752_vm5, %v2855_v60, %v2854_v31  ;;  %v2288_v26 = vrot.slane %v2287_v51, 4  ;;  %v2294_v3 = vsel %vm1460_vm3, %v1297_v57, -inf  ;;  %v2281_v59 = vrot.slane %v2280_v50, 4 }
 0x256   : > { %v24527_v61 = vsel %vm2755_vm7, %v2857_v33, %v2856_v47  ;;  %v2275_v44 = vmax.f32 %v2273_v48, %v2274_v53  ;;  %v2295_v1 = vrot.slane %v2294_v3, 4  ;;  %v24535_v12 = vpack.c.bf16 %v2891_v49, %v2891_v49 }
 0x257   : > { %v2289_v52 = vmax.f32 %v2287_v51, %v2288_v26  ;;  %v3002_v4 = vshrl.u32 %v24506_v10, 16  ;;  %v3005_v30 = vshll.u32 %v24506_v10, 16  ;;  %3370 = vmatpush1.bf16.msra.mxu1 %v21549_v17  ;;  %v2282_v41 = vmax.f32 %v2280_v50, %v2281_v59  ;;  %v21560_v17 = vld [vmem:[%s30437_s2 + $0x104] ss:$8 sps:$4 sm:$0xff]  }
 0x258   : > { %v2276_v19 = vrot.slane %v2275_v44, 2  ;;  %v2296_v63 = vmax.f32 %v2294_v3, %v2295_v1  ;;  %v3011_v42 = vshll.u32 %v24508_v24, 16  ;;  %3371 = vmatprep.subr.bf16.mxu1 %v21554_v34  ;;  %v3016_v23 = vshrl.u32 %v24521_v62, 16  ;;  %v2893_v3 = vld [vmem:[#allocation2 + $0x48] sm:$0x3] }
 0x259   : > { %v2290_v13 = vrot.slane %v2289_v52, 2  ;;  %v3004_v6 = vrot.slane %v3002_v4, 4  ;;  %v3007_v36 = vrot.slane %v3005_v30, 5  ;;  %v2283_v43 = vrot.slane %v2282_v41, 2 }
 0x25a   : > { %v2277_v22 = vmax.f32 %v2275_v44, %v2276_v19  ;;  %v2297_v0 = vrot.slane %v2296_v63, 2  ;;  %v3013_v60 = vrot.slane %v3011_v42, 5  ;;  %v3018_v2 = vrot.slane %v3016_v23, 4 }
 0x25b   : > { %v2291_v21 = vmax.f32 %v2289_v52, %v2290_v13  ;;  %v3008_v14 = vor.u32 %v3007_v36, %v3004_v6  ;;  %v3019_v49 = vshll.u32 %v24521_v62, 16  ;;  %3372 = vmatpush1.bf16.msra.mxu1 %v21552_v35  ;;  %v2284_v33 = vmax.f32 %v2282_v41, %v2283_v43  ;;  %v2895_v36 = vld [vmem:[#allocation2 + $0x58] sm:$0x3] }
 0x25c   : > { %v2278_v34 = vrot.slane %v2277_v22, 1  ;;  %v2298_v40 = vmax.f32 %v2296_v63, %v2297_v0  ;;  %v3025_v57 = vshll.u32 %v24535_v12, 16  ;;  %3373 = vmatprep.subr.bf16.mxu1 %v21557_v18  ;;  %v2356_v48 = vmax.f32 %v24471_v15, %v2355_v32  ;;  %v24562_v18 = vld [vmem:[#allocation2 + $0x50] sm:$0xff] }
 0x25d   : > { %v2292_v31 = vrot.slane %v2291_v21, 1  ;;  %v3009_v53 = vrot.slane %v3008_v14, 4  ;;  %v3021_v51 = vrot.slane %v3019_v49, 5  ;;  %v2285_v50 = vrot.slane %v2284_v33, 1 }
 0x25e   : > { %v2279_v47 = vmax.f32 %v2277_v22, %v2278_v34  ;;  %v2299_v26 = vrot.slane %v2298_v40, 1  ;;  %v24556_v44 = vpack.c.bf16 %v24541_v45, %v24541_v45  ;;  %v3027_v41 = vrot.slane %v3025_v57, 5  ;;  %v2897_v57 = vld [vmem:[#allocation2 + $0x68] sm:$0x3] }
 0x25f   : > { %v2293_v59 = vmax.f32 %v2291_v21, %v2292_v31  ;;  %v24560_v1 = vsel %vm24412_vm9, %v3009_v53, %v3013_v60  ;;  %v3022_v35 = vor.u32 %v3021_v51, %v3018_v2  ;;  %3374 = vmatpush1.bf16.msra.mxu1 %v21555_v58  ;;  %v2286_v15 = vmax.f32 %v2284_v33, %v2285_v50 }
 0x260   : > { %v2300_v32 = vmax.f32 %v2298_v40, %v2299_v26  ;;  %v2417_v52 = vmax.f32 %v2279_v47, %v24475_v7  ;;  %v18176_v4 = vcombine.low %v24437_v5, %v24560_v1  ;;  %3580 = vmatprep.subr.bf16.mxu1 %v21560_v17  ;;  %v24568_v63 = vpack.c.bf16 %v2893_v3, %v2893_v3  ;;  %v24592_v40 = vld [vmem:[#allocation2 + $0x60] sm:$0xff] }
 0x261   : > { %v2419_v30 = vmax.f32 %v2293_v59, %v24499_v46  ;;  %v3023_v19 = vrot.slane %v3022_v35, 4  ;;  %v2418_v42 = vmax.f32 %v2286_v15, %v24489_v38  ;;  %v3030_v23 = vshrl.u32 %v24556_v44, 16  ;;  %v21636_v5 = vld [vmem:[%s30437_s2 + $0x2a0] ss:$8 sps:$4 sm:$0xff]  }
 0x262   : > { %v2420_v13 = vmax.f32 %v2300_v32, %v2356_v48  ;;  %v2488_v6 = vadd.f32 %v24486_v37, %v2417_v52  ;;  %v24580_v46 = vpack.c.bf16 %v24562_v18, %v24562_v18  ;;  %v3033_v43 = vshll.u32 %v24556_v44, 16  ;;  %v24594_v48 = vld [vmem:[#allocation2 + $0x70] sm:$0xff]  ;;  %v2899_v52 = vld [vmem:[#allocation2 + $0x78] sm:$0x3] }
 0x263   : > { %v2490_v7 = vadd.f32 %v24486_v37, %v2419_v30  ;;  %v24576_v22 = vsel %vm24412_vm9, %v3023_v19, %v3027_v41  ;;  %v2489_v38 = vadd.f32 %v24486_v37, %v2418_v42  ;;  %v3032_v14 = vrot.slane %v3030_v23, 4 }
 0x264   : > { %v2491_v0 = vadd.f32 %v24486_v37, %v2420_v13  ;;  %vm2552_vm2 = vcmp.ge.f32.partialorder %v2488_v6, 0.0  ;;  %v2616_v60 = vmul.f32 0.1, %v2488_v6  ;;  %v24587_v21 = vcombine.low %v24560_v1, %v24576_v22  ;;  %v21641_v1 = vld [vmem:[%s30437_s2 + $0x2b4] ss:$8 sps:$4 sm:$0xff]  }
 0x265   : > { %vm2554_vm6 = vcmp.ge.f32.partialorder %v2490_v7, 0.0  ;;  %v2618_v58 = vmul.f32 0.1, %v2490_v7  ;;  %vm2553_vm8 = vcmp.ge.f32.partialorder %v2489_v38, 0.0  ;;  %v2617_v2 = vmul.f32 0.1, %v2489_v38 }
 0x266   : > { %vm2555_vm10 = vcmp.ge.f32.partialorder %v2491_v0, 0.0  ;;  %v2619_v49 = vmul.f32 0.1, %v2491_v0  ;;  %v2680_v17 = vsel %vm2552_vm2, %v2488_v6, %v2616_v60  ;;  %3241 = vmatmul.mubr.bf16.gmra.mrb[4].mxu1 %v24587_v21  ;;  %v24590_v33 = vpack.c.bf16 %v2895_v36, %v2895_v36 }
 0x267   : > { %v2682_v34 = vsel %vm2554_vm6, %v2490_v7, %v2618_v58  ;;  %v3035_v37 = vrot.slane %v3033_v43, 5  ;;  %v2681_v31 = vsel %vm2553_vm8, %v2489_v38, %v2617_v2  ;;  %v2859_v51 = vrot.slane %v2680_v17, 4  ;;  %3250 = vmatprep.mubr.bf16.mxu1 %v23619_v8 }
 0x268   : > { %v2683_v53 = vsel %vm2555_vm10, %v2491_v0, %v2619_v49  ;;  %v2863_v47 = vrot.slane %v2682_v34, 2  ;;  %v2861_v50 = vrot.slane %v2681_v31, 3  ;;  %v3044_v59 = vshrl.u32 %v24580_v46, 16 }
 0x269   : > { %v2865_v26 = vrot.slane %v2683_v53, 1  ;;  %v3036_v3 = vor.u32 %v3035_v37, %v3032_v14  ;;  %v3437_v35 = vrot.slane %v24384_v9, 5  ;;  %v2860_v15 = vsel %vm2758_vm11, %v2859_v51, %v24527_v61 }
 0x26a   : > { %v3047_v32 = vshll.u32 %v24580_v46, 16  ;;  %v24604_v30 = vpack.c.bf16 %v24592_v40, %v24592_v40  ;;  %v2862_v19 = vsel %vm2761_vm12, %v2861_v50, %v2860_v15  ;;  %v3039_v41 = vshll.u32 %v24568_v63, 16 }
 0x26b   : > { %v3046_v42 = vrot.slane %v3044_v59, 4  ;;  %v24608_v13 = vpack.c.bf16 %v2897_v57, %v2897_v57  ;;  %v2864_v6 = vsel %vm2764_vm13, %v2863_v47, %v2862_v19  ;;  %v3053_v36 = vshll.u32 %v24590_v33, 16 }
 0x26c   : > { %v3049_v9 = vrot.slane %v3047_v32, 5  ;;  %v24614_v61 = vpack.c.bf16 %v24594_v48, %v24594_v48  ;;  %v2866_v23 = vsel %vm2767_vm14, %v2865_v26, %v2864_v6  ;;  %v3037_v7 = vrot.slane %v3036_v3, 4 }
 0x26d   : > { %v24617_v43 = vpack.c.bf16 %v2899_v52, %v2899_v52  ;;  %v3058_v38 = vshrl.u32 %v24604_v30, 16  ;;  %2883 = vst [vmem:[#allocation2 + $0x81] sm:$0xff] %v2866_v23  ;;  %v3061_v60 = vshll.u32 %v24604_v30, 16  ;;  %v3067_v58 = vshll.u32 %v24608_v13, 16 }
 0x26e   : > { %v3050_v0 = vor.u32 %v3049_v9, %v3046_v42  ;;  %v3072_v14 = vshrl.u32 %v24614_v61, 16  ;;  %v3041_v2 = vrot.slane %v3039_v41, 5  ;;  %v3075_v17 = vshll.u32 %v24614_v61, 16 }
 0x26f   : > { %v3060_v49 = vrot.slane %v3058_v38, 4  ;;  %v3081_v34 = vshll.u32 %v24617_v43, 16  ;;  %v3055_v57 = vrot.slane %v3053_v36, 5  ;;  %v3063_v31 = vrot.slane %v3061_v60, 5 }
 0x270   : > { %v3051_v37 = vrot.slane %v3050_v0, 4  ;;  %v3074_v53 = vrot.slane %v3072_v14, 4  ;;  %v3441_v51 = vrot.slane %v24392_v56, 5  ;;  %v24628_v47 = vsel %vm24412_vm9, %v3037_v7, %v3041_v2 }
 0x271   : > { %v3069_v50 = vrot.slane %v3067_v58, 5  ;;  %v3077_v26 = vrot.slane %v3075_v17, 5  ;;  %v3064_v59 = vor.u32 %v3063_v31, %v3060_v49  ;;  %v3083_v15 = vrot.slane %v3081_v34, 5 }
 0x272   : > { %v24632_v3 = vsel %vm24412_vm9, %v3051_v37, %v3055_v57  ;;  %vm3432_vm15 = vcmask 1042432   ;;  %vm3433_vm0 = vcmask 1046532   ;;  %v18078_v56 = vrot.slane %v24376_v20, 9 }
 0x273   : > { %v24636_v32 = vcombine.low %v24628_v47, %v24632_v3  ;;  %v3078_v52 = vor.u32 %v3077_v26, %v3074_v53  ;;  %v3065_v19 = vrot.slane %v3064_v59, 4  ;;  %vm24639_vm1 = vmor %vm3432_vm15, %vm3433_vm0  ;;  %v18079_v42 = vrot.slane %v24390_v16, 9 }
 0x274   : > { %v18080_v6 = vrot.slane %v24506_v10, 9  ;;  %v3445_v9 = vrot.slane %v24508_v24, 5  ;;  %v24649_v23 = vsel %vm24639_vm1, %v18078_v56, %v3437_v35  ;;  %v18081_v20 = vrot.slane %v24521_v62, 9  ;;  %v24693_v37 = vld [vmem:[#allocation2 + $0x80] sm:$0xff] }
 0x275   : > { %3251 = vmatmul.mubr.bf16.gmra.mrb[8].mxu1 %v24636_v32  ;;  %v3079_v36 = vrot.slane %v3078_v52, 4  ;;  %v3449_v7 = vrot.slane %v24535_v12, 5  ;;  %v24656_v16 = vsel %vm24412_vm9, %v3065_v19, %v3069_v50  ;;  %v24660_v10 = vsel %vm24639_vm1, %v18079_v42, %v3441_v51 }
 0x276   : > { %3260 = vmatprep.mubr.bf16.mxu1 %v23619_v8  ;;  %v24664_v24 = vsel %vm24639_vm1, %v18080_v6, %v3445_v9  ;;  %v18082_v35 = vrot.slane %v24556_v44, 9  ;;  %v18102_v12 = vcombine.low %v24649_v23, %v24660_v10  ;;  %v3453_v58 = vrot.slane %v24568_v63, 5  ;;  %v2903_v6 = vld [vmem:[#allocation2 + $0x98] sm:$0x3]  ;;  %v21593_v23 = vld [vmem:[%s30437_s2 + $0x1b4] ss:$8 sps:$4 sm:$0xff]  }
 0x277   : > { %v24669_v62 = vsel %vm24412_vm9, %v3079_v36, %v3083_v15  ;;  %v24675_v38 = vsel %vm24639_vm1, %v18081_v20, %v3449_v7  ;;  %v18213_v0 = vcombine.low %v24660_v10, %v24664_v24  ;;  %v18083_v14 = vrot.slane %v24580_v46, 9  ;;  %v2901_v46 = vld [vmem:[#allocation2 + $0x88] sm:$0x3]  ;;  %v21665_v10 = vld [vmem:[%s30437_s2 + $0x334] ss:$8 sps:$4 sm:$0xff]  }
 0x278   : > { %v24681_v60 = vcombine.low %v24656_v16, %v24669_v62  ;;  %v24685_v44 = vcombine.low %v24664_v24, %v24675_v38  ;;  %v3457_v2 = vrot.slane %v24590_v33, 5  ;;  %v18084_v49 = vrot.slane %v24604_v30, 9  ;;  %v21558_v20 = vld [vmem:[%s30437_s2 + $0x100] ss:$8 sps:$4 sm:$0xff]   ;;  %v21663_v24 = vld [vmem:[%s30437_s2 + $0x330] ss:$8 sps:$4 sm:$0xff]  }
 0x279   : > { %v3461_v17 = vrot.slane %v24608_v13, 5  ;;  %v18085_v34 = vrot.slane %v24614_v61, 9  ;;  %v24697_v57 = vsel %vm24639_vm1, %v18082_v35, %v3453_v58  ;;  %v3465_v31 = vrot.slane %v24617_v43, 5  ;;  %v24753_v35 = vld [vmem:[#allocation2] sm:$0xff] }
 0x27a   : > { %v20965_v63 = vpack.c.bf16 %v24541_v45, %v24497_v55  ;;  %v24704_v33 = vsel %vm24639_vm1, %v18083_v14, %v3457_v2  ;;  %v20966_v13 = vpack.c.bf16 %v24592_v40, %v24562_v18  ;;  %v24722_v53 = vpack.c.bf16 %v24693_v37, %v24693_v37  ;;  %v21563_v14 = vld [vmem:[%s30437_s2 + $0x114] ss:$8 sps:$4 sm:$0xff]  }
 0x27b   : > { %v24708_v30 = vsel %vm24639_vm1, %v18084_v49, %v3461_v17  ;;  %v24714_v61 = vcombine.low %v24697_v57, %v24704_v33  ;;  %v24718_v43 = vsel %vm24639_vm1, %v18085_v34, %v3465_v31  ;;  %v18177_v51 = vcombine.low %v24576_v22, %v24628_v47  ;;  %v21561_v17 = vld [vmem:[%s30437_s2 + $0x110] ss:$8 sps:$4 sm:$0xff]   ;;  %v21566_v34 = vld [vmem:[%s30437_s2 + $0x124] ss:$8 sps:$4 sm:$0xff]   ;;  %v21569_v31 = vld [vmem:[%s30437_s2 + $0x134] ss:$8 sps:$4 sm:$0xff]  }
 0x27c   : > { %v24729_v50 = vcombine.low %v24708_v30, %v24718_v43  ;;  %v18178_v26 = vcombine.low %v24632_v3, %v24656_v16  ;;  %v24733_v59 = vpack.c.bf16 %v2901_v46, %v2901_v46  ;;  %v18214_v15 = vcombine.low %v24675_v38, %v24697_v57  ;;  %v21567_v46 = vld [vmem:[%s30437_s2 + $0x130] ss:$8 sps:$4 sm:$0xff]   ;;  %v21642_v22 = vld [vmem:[%s30437_s2 + $0x2c0] ss:$8 sps:$4 sm:$0xff]   ;;  %v21647_v47 = vld [vmem:[%s30437_s2 + $0x2d4] ss:$8 sps:$4 sm:$0xff]  }
 0x27d   : > { %3261 = vmatmul.mubr.bf16.gmra.mrb[12].mxu1 %v24681_v60  ;;  %v18215_v52 = vcombine.low %v24704_v33, %v24708_v30  ;;  %v18196_v19 = vrot.slane %v24722_v53, 9  ;;  %v24746_v36 = vpack.c.bf16 %v2903_v6, %v2903_v6  ;;  %v20960_v58 = vpack.c.bf16 %v24380_v54, %v24753_v35  ;;  %v21648_v3 = vld [vmem:[%s30437_s2 + $0x2e0] ss:$8 sps:$4 sm:$0xff]   ;;  %v21671_v38 = vld [vmem:[%s30437_s2 + $0x354] ss:$8 sps:$4 sm:$0xff]  }
 0x27e   : > { %3391 = vmatprep.mubr.bf16.mxu1 %v23619_v8  ;;  %v4079_v42 = vrot.slane %v24733_v59, 5  ;;  %v24779_v41 = vpack.c.bf16 %v24497_v55, %v24491_v39  ;;  %v24797_v6 = vpack.c.bf16 %v24562_v18, %v24541_v45  ;;  %v21623_v55 = vld [vmem:[%s30437_s2 + $0x254] ss:$8 sps:$4 sm:$0xff]   ;;  %v21621_v45 = vld [vmem:[%s30437_s2 + $0x250] ss:$8 sps:$4 sm:$0xff]   ;;  %v20967_v18 = vpack.c.bf16 %v24693_v37, %v24594_v48 }
 0x27f   : > { %v4674_v2 = vrot.slane %v24746_v36, 5  ;;  %v21669_v57 = vld [vmem:[%s30437_s2 + $0x350] ss:$8 sps:$4 sm:$0xff]   ;;  %v21677_v33 = vld [vmem:[%s30437_s2 + $0x374] ss:$8 sps:$4 sm:$0xff]  }
 0x280   : > { %v24744_v9 = vsel %vm24639_vm1, %v18196_v19, %v4079_v42  ;;  %v21572_v19 = vld [vmem:[%s30437_s2 + $0x144] ss:$8 sps:$4 sm:$0xff]   ;;  %v21570_v42 = vld [vmem:[%s30437_s2 + $0x140] ss:$8 sps:$4 sm:$0xff]   ;;  %v21675_v30 = vld [vmem:[%s30437_s2 + $0x370] ss:$8 sps:$4 sm:$0xff]  }
 0x281   : > { %v18216_v7 = vcombine.low %v24718_v43, %v24744_v9  ;;  %v24763_v49 = vsel %vm24639_vm1, %v18078_v56, %v4674_v2  ;;  %v21564_v56 = vld [vmem:[%s30437_s2 + $0x120] ss:$8 sps:$4 sm:$0xff]   ;;  %v21683_v43 = vld [vmem:[%s30437_s2 + $0x394] ss:$8 sps:$4 sm:$0xff]  }
 0x282   : > { %v18318_v54 = vcombine.low %v24744_v9, %v24763_v49  ;;  %v21576_v2 = vld [vmem:[%s30437_s2 + $0x160] ss:$8 sps:$4 sm:$0xff]  }
 0x285   : > { %3392 = vmatmul.mubr.bf16.vlgmr.msra.gmra.mrb[0].mxu1 %v20960_v58  ;;  %v21573_v58 = vld [vmem:[%s30437_s2 + $0x150] ss:$8 sps:$4 sm:$0xff]  }
 0x286   : > { %3581 = vmatpush1.bf16.msra.mxu1 %v21558_v20  ;;  %3401 = vmatprep.mubr.bf16.mxu1 %v23619_v8  ;;  %v21575_v20 = vld [vmem:[%s30437_s2 + $0x154] ss:$8 sps:$4 sm:$0xff]  }
 0x287   : > { %3582 = vmatprep.subr.bf16.mxu1 %v21563_v14  ;;  %v21578_v14 = vld [vmem:[%s30437_s2 + $0x164] ss:$8 sps:$4 sm:$0xff]  }
 0x28a   : > { %3583 = vmatpush1.bf16.msra.mxu1 %v21561_v17  ;;  %v24815_v17 = vpack.c.bf16 %v24594_v48, %v24592_v40  ;;  %v21629_v40 = vld [vmem:[%s30437_s2 + $0x274] ss:$8 sps:$4 sm:$0xff]   ;;  %v21630_v48 = vld [vmem:[%s30437_s2 + $0x280] ss:$8 sps:$4 sm:$0xff]  }
 0x28b   : > { %3584 = vmatprep.subr.bf16.mxu1 %v21566_v34  ;;  %v21581_v34 = vld [vmem:[%s30437_s2 + $0x174] ss:$8 sps:$4 sm:$0xff]  }
 0x28d   : > { %3402 = vmatmul.mubr.bf16.gmra.mrb[4].mxu1 %v24779_v41 }
 0x28e   : > { %3585 = vmatpush1.bf16.msra.mxu1 %v21564_v56  ;;  %3411 = vmatprep.mubr.bf16.mxu1 %v23619_v8  ;;  %v21579_v56 = vld [vmem:[%s30437_s2 + $0x170] ss:$8 sps:$4 sm:$0xff]  }
 0x28f   : > { %3586 = vmatprep.subr.bf16.mxu1 %v21569_v31  ;;  %v21584_v31 = vld [vmem:[%s30437_s2 + $0x184] ss:$8 sps:$4 sm:$0xff]  }
 0x292   : > { %3587 = vmatpush1.bf16.msra.mxu1 %v21567_v46  ;;  %v21582_v46 = vld [vmem:[%s30437_s2 + $0x180] ss:$8 sps:$4 sm:$0xff]  }
 0x293   : > { %3588 = vmatprep.subr.bf16.mxu1 %v21572_v19  ;;  %v21587_v19 = vld [vmem:[%s30437_s2 + $0x194] ss:$8 sps:$4 sm:$0xff]  }
 0x295   : > { %3412 = vmatmul.mubr.bf16.gmra.mrb[8].mxu1 %v24797_v6 }
 0x296   : > { %3589 = vmatpush1.bf16.msra.mxu1 %v21570_v42  ;;  %3421 = vmatprep.mubr.bf16.mxu1 %v23619_v8  ;;  %v21585_v42 = vld [vmem:[%s30437_s2 + $0x190] ss:$8 sps:$4 sm:$0xff]  }
 0x297   : > { %3590 = vmatprep.subr.bf16.mxu1 %v21575_v20  ;;  %v21590_v20 = vld [vmem:[%s30437_s2 + $0x1a4] ss:$8 sps:$4 sm:$0xff]  }
 0x29a   : > { %3591 = vmatpush1.bf16.msra.mxu1 %v21573_v58  ;;  %v21588_v58 = vld [vmem:[%s30437_s2 + $0x1a0] ss:$8 sps:$4 sm:$0xff]  }
 0x29b   : > { %3592 = vmatprep.subr.bf16.mxu1 %v21578_v14  ;;  %v21596_v14 = vld [vmem:[%s30437_s2 + $0x1c4] ss:$8 sps:$4 sm:$0xff]  }
 0x29d   : > { %3422 = vmatmul.mubr.bf16.gmra.mrb[12].mxu1 %v24815_v17 }
 0x29e   : > { %3593 = vmatpush1.bf16.msra.mxu1 %v21576_v2  ;;  %3612 = vmatprep.mubr.bf16.mxu1 %v23619_v8  ;;  %v21594_v2 = vld [vmem:[%s30437_s2 + $0x1c0] ss:$8 sps:$4 sm:$0xff]  }
 0x29f   : > { %3594 = vmatprep.subr.bf16.mxu1 %v21581_v34  ;;  %v21599_v34 = vld [vmem:[%s30437_s2 + $0x1d4] ss:$8 sps:$4 sm:$0xff]  }
 0x2a2   : > { %3595 = vmatpush1.bf16.msra.mxu1 %v21579_v56  ;;  %v21597_v56 = vld [vmem:[%s30437_s2 + $0x1d0] ss:$8 sps:$4 sm:$0xff]  }
 0x2a3   : > { %3776 = vmatprep.subr.bf16.mxu1 %v21584_v31  ;;  %v21602_v31 = vld [vmem:[%s30437_s2 + $0x1e4] ss:$8 sps:$4 sm:$0xff]  }
 0x2a5   : > { %3613 = vmatmul.mubr.bf16.vlgmr.msra.gmra.mrb[0].mxu1 %v18102_v12  ;;  %v21591_v12 = vld [vmem:[%s30437_s2 + $0x1b0] ss:$8 sps:$4 sm:$0xff]  }
 0x2a6   : > { %3777 = vmatpush1.bf16.msra.mxu1 %v21582_v46  ;;  %3622 = vmatprep.mubr.bf16.mxu1 %v23619_v8  ;;  %v21600_v46 = vld [vmem:[%s30437_s2 + $0x1e0] ss:$8 sps:$4 sm:$0xff]  }
 0x2a7   : > { %3778 = vmatprep.subr.bf16.mxu1 %v21587_v19  ;;  %v21605_v19 = vld [vmem:[%s30437_s2 + $0x1f4] ss:$8 sps:$4 sm:$0xff]  }
 0x2aa   : > { %3779 = vmatpush1.bf16.msra.mxu1 %v21585_v42  ;;  %v21603_v42 = vld [vmem:[%s30437_s2 + $0x1f0] ss:$8 sps:$4 sm:$0xff]  }
 0x2ab   : > { %3780 = vmatprep.subr.bf16.mxu1 %v21590_v20  ;;  %v21608_v20 = vld [vmem:[%s30437_s2 + $0x204] ss:$8 sps:$4 sm:$0xff]  }
 0x2ad   : > { %3623 = vmatmul.mubr.bf16.gmra.mrb[4].mxu1 %v24685_v44 }
 0x2ae   : > { %3781 = vmatpush1.bf16.msra.mxu1 %v21588_v58  ;;  %3632 = vmatprep.mubr.bf16.mxu1 %v23619_v8  ;;  %v21606_v58 = vld [vmem:[%s30437_s2 + $0x200] ss:$8 sps:$4 sm:$0xff]  }
 0x2af   : > { %3782 = vmatprep.subr.bf16.mxu1 %v21593_v23  ;;  %v23606_v23 = vld [vmem:[#allocation2 + $0x10] sm:$0xff] }
 0x2b2   : > { %3783 = vmatpush1.bf16.msra.mxu1 %v21591_v12  ;;  %v20964_v12 = vpack.c.bf16 %v24491_v39, %v23606_v23  ;;  %v21612_v39 = vld [vmem:[%s30437_s2 + $0x220] ss:$8 sps:$4 sm:$0xff]   ;;  %v21633_v23 = vld [vmem:[%s30437_s2 + $0x290] ss:$8 sps:$4 sm:$0xff]  }
 0x2b3   : > { %3784 = vmatprep.subr.bf16.mxu1 %v21596_v14  ;;  %v21611_v14 = vld [vmem:[%s30437_s2 + $0x214] ss:$8 sps:$4 sm:$0xff]  }
 0x2b5   : > { %3633 = vmatmul.mubr.bf16.gmra.mrb[8].mxu1 %v24714_v61 }
 0x2b6   : > { %3785 = vmatpush1.bf16.msra.mxu1 %v21594_v2  ;;  %3642 = vmatprep.mubr.bf16.mxu1 %v23619_v8  ;;  %v21609_v2 = vld [vmem:[%s30437_s2 + $0x210] ss:$8 sps:$4 sm:$0xff]  }
 0x2b7   : > { %3786 = vmatprep.subr.bf16.mxu1 %v21599_v34  ;;  %v21614_v34 = vld [vmem:[%s30437_s2 + $0x224] ss:$8 sps:$4 sm:$0xff]  }
 0x2ba   : > { %3787 = vmatpush1.bf16.msra.mxu1 %v21597_v56  ;;  %v21617_v56 = vld [vmem:[%s30437_s2 + $0x234] ss:$8 sps:$4 sm:$0xff]  }
 0x2bb   : > { %3788 = vmatprep.subr.bf16.mxu1 %v21602_v31  ;;  %v21615_v31 = vld [vmem:[%s30437_s2 + $0x230] ss:$8 sps:$4 sm:$0xff]  }
 0x2bd   : > { %3643 = vmatmul.mubr.bf16.gmra.mrb[12].mxu1 %v24729_v50 }
 0x2be   : > { %3789 = vmatpush1.bf16.msra.mxu1 %v21600_v46  ;;  %3808 = vmatprep.mubr.bf16.mxu1 %v23619_v8  ;;  %v21620_v46 = vld [vmem:[%s30437_s2 + $0x244] ss:$8 sps:$4 sm:$0xff]  }
 0x2bf   : > { %3790 = vmatprep.subr.bf16.mxu1 %v21605_v19  ;;  %v21618_v19 = vld [vmem:[%s30437_s2 + $0x240] ss:$8 sps:$4 sm:$0xff]  }
 0x2c2   : > { %3791 = vmatpush1.bf16.msra.mxu1 %v21603_v42  ;;  %v21624_v42 = vld [vmem:[%s30437_s2 + $0x260] ss:$8 sps:$4 sm:$0xff]  }
 0x2c3   : > { %3988 = vmatprep.subr.bf16.mxu1 %v21608_v20  ;;  %v21632_v20 = vld [vmem:[%s30437_s2 + $0x284] ss:$8 sps:$4 sm:$0xff]  }
 0x2c5   : > { %3809 = vmatmul.mubr.bf16.vlgmr.msra.gmra.mrb[0].mxu1 %v20964_v12  ;;  %v21638_v12 = vld [vmem:[%s30437_s2 + $0x2a4] ss:$8 sps:$4 sm:$0xff]  }
 0x2c6   : > { %3989 = vmatpush1.bf16.msra.mxu1 %v21606_v58  ;;  %3818 = vmatprep.mubr.bf16.mxu1 %v23619_v8  ;;  %v21635_v58 = vld [vmem:[%s30437_s2 + $0x294] ss:$8 sps:$4 sm:$0xff]  }
 0x2c7   : > { %3990 = vmatprep.subr.bf16.mxu1 %v21611_v14  ;;  %v3869_v14 = vshrl.u32 %v24722_v53, 16 }
 0x2ca   : > { %3991 = vmatpush1.bf16.msra.mxu1 %v21609_v2  ;;  %v3872_v2 = vshll.u32 %v24722_v53, 16  ;;  %v21639_v53 = vld [vmem:[%s30437_s2 + $0x2b0] ss:$8 sps:$4 sm:$0xff]  }
 0x2cb   : > { %3992 = vmatprep.subr.bf16.mxu1 %v21614_v34 }
 0x2cc   : > { %v3874_v34 = vrot.slane %v3872_v2, 5  ;;  %v21692_v2 = vld [vmem:[%s30437_s2 + $0x3c4] ss:$8 sps:$4 sm:$0xff]  }
 0x2cd   : > { %3819 = vmatmul.mubr.bf16.gmra.mrb[4].mxu1 %v20965_v63  ;;  %v21626_v63 = vld [vmem:[%s30437_s2 + $0x264] ss:$8 sps:$4 sm:$0xff]  }
 0x2ce   : > { %3993 = vmatpush1.bf16.msra.mxu1 %v21612_v39  ;;  %3828 = vmatprep.mubr.bf16.mxu1 %v23619_v8  ;;  %v21644_v39 = vld [vmem:[%s30437_s2 + $0x2c4] ss:$8 sps:$4 sm:$0xff]  }
 0x2cf   : > { %3994 = vmatprep.subr.bf16.mxu1 %v21617_v56 }
 0x2d2   : > { %3995 = vmatpush1.bf16.msra.mxu1 %v21615_v31  ;;  %v3878_v31 = vshll.u32 %v24733_v59, 16  ;;  %v21645_v59 = vld [vmem:[%s30437_s2 + $0x2d0] ss:$8 sps:$4 sm:$0xff]  }
 0x2d3   : > { %3996 = vmatprep.subr.bf16.mxu1 %v21620_v46 }
 0x2d4   : > { %v3880_v46 = vrot.slane %v3878_v31, 5  ;;  %v21705_v31 = vld [vmem:[%s30437_s2 + $0x410] ss:$8 sps:$4 sm:$0xff]  }
 0x2d5   : > { %3829 = vmatmul.mubr.bf16.gmra.mrb[8].mxu1 %v20966_v13  ;;  %v21627_v13 = vld [vmem:[%s30437_s2 + $0x270] ss:$8 sps:$4 sm:$0xff]  }
 0x2d6   : > { %3997 = vmatpush1.bf16.msra.mxu1 %v21618_v19  ;;  %3838 = vmatprep.mubr.bf16.mxu1 %v23619_v8  ;;  %v21650_v19 = vld [vmem:[%s30437_s2 + $0x2e4] ss:$8 sps:$4 sm:$0xff]  }
 0x2d7   : > { %3998 = vmatprep.subr.bf16.mxu1 %v21623_v55 }
 0x2da   : > { %3999 = vmatpush1.bf16.msra.mxu1 %v21621_v45  ;;  %v21651_v45 = vld [vmem:[%s30437_s2 + $0x2f0] ss:$8 sps:$4 sm:$0xff]  }
 0x2db   : > { %4000 = vmatprep.subr.bf16.mxu1 %v21626_v63  ;;  %v21656_v63 = vld [vmem:[%s30437_s2 + $0x304] ss:$8 sps:$4 sm:$0xff]  }
 0x2dd   : > { %3839 = vmatmul.mubr.bf16.gmra.mrb[12].mxu1 %v20967_v18  ;;  %v21657_v18 = vld [vmem:[%s30437_s2 + $0x310] ss:$8 sps:$4 sm:$0xff]  }
 0x2de   : > { %4001 = vmatpush1.bf16.msra.mxu1 %v21624_v42  ;;  %4020 = vmatprep.mubr.bf16.mxu1 %v23619_v8  ;;  %v21659_v42 = vld [vmem:[%s30437_s2 + $0x314] ss:$8 sps:$4 sm:$0xff]  }
 0x2df   : > { %4002 = vmatprep.subr.bf16.mxu1 %v21629_v40  ;;  %v21662_v40 = vld [vmem:[%s30437_s2 + $0x324] ss:$8 sps:$4 sm:$0xff]  }
 0x2e2   : > { %4003 = vmatpush1.bf16.msra.mxu1 %v21627_v13  ;;  %v21660_v13 = vld [vmem:[%s30437_s2 + $0x320] ss:$8 sps:$4 sm:$0xff]  }
 0x2e3   : > { %4187 = vmatprep.subr.bf16.mxu1 %v21632_v20  ;;  %v21666_v20 = vld [vmem:[%s30437_s2 + $0x340] ss:$8 sps:$4 sm:$0xff]  }
 0x2e5   : > { %4021 = vmatmul.mubr.bf16.vlgmr.msra.gmra.mrb[0].mxu1 %v18176_v4  ;;  %v3871_v4 = vrot.slane %v3869_v14, 4  ;;  %v21687_v14 = vld [vmem:[%s30437_s2 + $0x3b0] ss:$8 sps:$4 sm:$0xff]  }
 0x2e6   : > { %4188 = vmatpush1.bf16.msra.mxu1 %v21630_v48  ;;  %4030 = vmatprep.mubr.bf16.mxu1 %v23619_v8  ;;  %v21672_v48 = vld [vmem:[%s30437_s2 + $0x360] ss:$8 sps:$4 sm:$0xff]  }
 0x2e7   : > { %4189 = vmatprep.subr.bf16.mxu1 %v21635_v58  ;;  %v3875_v56 = vor.u32 %v3874_v34, %v3871_v4  ;;  %v21678_v58 = vld [vmem:[%s30437_s2 + $0x380] ss:$8 sps:$4 sm:$0xff]   ;;  %v21698_v4 = vld [vmem:[%s30437_s2 + $0x3e4] ss:$8 sps:$4 sm:$0xff]  }
 0x2e8   : > { %v21696_v34 = vld [vmem:[%s30437_s2 + $0x3e0] ss:$8 sps:$4 sm:$0xff]  }
 0x2ea   : > { %4190 = vmatpush1.bf16.msra.mxu1 %v21633_v23  ;;  %v21686_v23 = vld [vmem:[%s30437_s2 + $0x3a4] ss:$8 sps:$4 sm:$0xff]  }
 0x2eb   : > { %4191 = vmatprep.subr.bf16.mxu1 %v21638_v12  ;;  %v21684_v12 = vld [vmem:[%s30437_s2 + $0x3a0] ss:$8 sps:$4 sm:$0xff]  }
 0x2ed   : > { %4031 = vmatmul.mubr.bf16.gmra.mrb[4].mxu1 %v18177_v51  ;;  %v3876_v51 = vrot.slane %v3875_v56, 4  ;;  %v21704_v56 = vld [vmem:[%s30437_s2 + $0x404] ss:$8 sps:$4 sm:$0xff]  }
 0x2ee   : > { %4192 = vmatpush1.bf16.msra.mxu1 %v21636_v5  ;;  %4040 = vmatprep.mubr.bf16.mxu1 %v23619_v8  ;;  %v21690_v5 = vld [vmem:[%s30437_s2 + $0x3c0] ss:$8 sps:$4 sm:$0xff]  }
 0x2ef   : > { %4193 = vmatprep.subr.bf16.mxu1 %v21641_v1  ;;  %v25000_v55 = vsel %vm24412_vm9, %v3876_v51, %v3880_v46  ;;  %v21693_v1 = vld [vmem:[%s30437_s2 + $0x3d0] ss:$8 sps:$4 sm:$0xff]   ;;  %v21716_v46 = vld [vmem:[%s30437_s2 + $0x444] ss:$8 sps:$4 sm:$0xff]  }
 0x2f0   : > { %v18179_v16 = vcombine.low %v24669_v62, %v25000_v55  ;;  %v21654_v62 = vld [vmem:[%s30437_s2 + $0x300] ss:$8 sps:$4 sm:$0xff]   ;;  %v21711_v51 = vld [vmem:[%s30437_s2 + $0x430] ss:$8 sps:$4 sm:$0xff]  }
 0x2f2   : > { %4194 = vmatpush1.bf16.msra.mxu1 %v21639_v53  ;;  %v21701_v53 = vld [vmem:[%s30437_s2 + $0x3f4] ss:$8 sps:$4 sm:$0xff]  }
 0x2f3   : > { %4195 = vmatprep.subr.bf16.mxu1 %v21644_v39  ;;  %v21699_v39 = vld [vmem:[%s30437_s2 + $0x3f0] ss:$8 sps:$4 sm:$0xff]  }
 0x2f5   : > { %4041 = vmatmul.mubr.bf16.gmra.mrb[8].mxu1 %v18178_v26  ;;  %v21653_v26 = vld [vmem:[%s30437_s2 + $0x2f4] ss:$8 sps:$4 sm:$0xff]  }
 0x2f6   : > { %4196 = vmatpush1.bf16.msra.mxu1 %v21642_v22  ;;  %4050 = vmatprep.mubr.bf16.mxu1 %v23619_v8  ;;  %v21710_v22 = vld [vmem:[%s30437_s2 + $0x424] ss:$8 sps:$4 sm:$0xff]  }
 0x2f7   : > { %4197 = vmatprep.subr.bf16.mxu1 %v21647_v47  ;;  %v21708_v47 = vld [vmem:[%s30437_s2 + $0x420] ss:$8 sps:$4 sm:$0xff]  }
 0x2fa   : > { %4198 = vmatpush1.bf16.msra.mxu1 %v21645_v59  ;;  %v4479_v59 = vshll.u32 %v24746_v36, 16  ;;  %v21722_v36 = vld [vmem:[%s30437_s2 + $0x464] ss:$8 sps:$4 sm:$0xff]  }
 0x2fb   : > { %4199 = vmatprep.subr.bf16.mxu1 %v21650_v19  ;;  %v21714_v19 = vld [vmem:[%s30437_s2 + $0x440] ss:$8 sps:$4 sm:$0xff]  }
 0x2fd   : > { %4051 = vmatmul.mubr.bf16.gmra.mrb[12].mxu1 %v18179_v16  ;;  %v21717_v16 = vld [vmem:[%s30437_s2 + $0x450] ss:$8 sps:$4 sm:$0xff]  }
 0x2fe   : > { %4200 = vmatpush1.bf16.msra.mxu1 %v21648_v3  ;;  %4219 = vmatprep.mubr.bf16.mxu1 %v23619_v8  ;;  %v4481_v3 = vrot.slane %v4479_v59, 5 }
 0x2ff   : > { %4201 = vmatprep.subr.bf16.mxu1 %v21653_v26 }
 0x300   : > { %v4482_v26 = vsel %vm24412_vm9, %v24423_v29, %v4481_v3  ;;  %v21726_v29 = vld [vmem:[%s30438_s3 + $0x180] ss:$12 sps:$4 sm:$0xff]  }
 0x301   : > { %6607 = vmatpush1.bf16.msra.mxu0 %v21726_v29 }
 0x302   : > { %4202 = vmatpush1.bf16.msra.mxu1 %v21651_v45  ;;  %v18284_v45 = vcombine.low %v25000_v55, %v4482_v26 }
 0x303   : > { %4377 = vmatprep.subr.bf16.mxu1 %v21656_v63  ;;  %v21725_v63 = vld [vmem:[%s30437_s2 + $0x474] ss:$8 sps:$4 sm:$0xff]  }
 0x305   : > { %4220 = vmatmul.mubr.bf16.vlgmr.msra.gmra.mrb[0].mxu1 %v18213_v0  ;;  %v21668_v0 = vld [vmem:[%s30437_s2 + $0x344] ss:$8 sps:$4 sm:$0xff]  }
 0x306   : > { %4378 = vmatpush1.bf16.msra.mxu1 %v21654_v62  ;;  %4229 = vmatprep.mubr.bf16.mxu1 %v23619_v8  ;;  %v21723_v62 = vld [vmem:[%s30437_s2 + $0x470] ss:$8 sps:$4 sm:$0xff]  }
 0x307   : > { %4379 = vmatprep.subr.bf16.mxu1 %v21659_v42 }
 0x30a   : > { %4380 = vmatpush1.bf16.msra.mxu1 %v21657_v18  ;;  %v5829_v18 = vsub.s32 0, %v23732_v27 }
 0x30b   : > { %4381 = vmatprep.subr.bf16.mxu1 %v21662_v40  ;;  %v5833_v40 = vsub.s32 1, %v23732_v27 }
 0x30d   : > { %4230 = vmatmul.mubr.bf16.gmra.mrb[4].mxu1 %v18214_v15  ;;  %v21674_v15 = vld [vmem:[%s30437_s2 + $0x364] ss:$8 sps:$4 sm:$0xff]  }
 0x30e   : > { %4382 = vmatpush1.bf16.msra.mxu1 %v21660_v13  ;;  %4239 = vmatprep.mubr.bf16.mxu1 %v23619_v8 }
 0x30f   : > { %4383 = vmatprep.subr.bf16.mxu1 %v21665_v10 }
 0x312   : > { %4384 = vmatpush1.bf16.msra.mxu1 %v21663_v24 }
 0x313   : > { %4385 = vmatprep.subr.bf16.mxu1 %v21668_v0 }
 0x315   : > { %4240 = vmatmul.mubr.bf16.gmra.mrb[8].mxu1 %v18215_v52  ;;  %v21680_v52 = vld [vmem:[%s30437_s2 + $0x384] ss:$8 sps:$4 sm:$0xff]  }
 0x316   : > { %4386 = vmatpush1.bf16.msra.mxu1 %v21666_v20  ;;  %4249 = vmatprep.mubr.bf16.mxu1 %v23619_v8  ;;  %v5825_v20 = vld [vmem:[%s30441_s6] sm:$0x3] }
 0x317   : > { %4387 = vmatprep.subr.bf16.mxu1 %v21671_v38 }
 0x31a   : > { %4388 = vmatpush1.bf16.msra.mxu1 %v21669_v57 }
 0x31b   : > { %4389 = vmatprep.subr.bf16.mxu1 %v21674_v15 }
 0x31d   : > { %4250 = vmatmul.mubr.bf16.gmra.mrb[12].mxu1 %v18216_v7  ;;  %v21681_v7 = vld [vmem:[%s30437_s2 + $0x390] ss:$8 sps:$4 sm:$0xff]  }
 0x31e   : > { %4390 = vmatpush1.bf16.msra.mxu1 %v21672_v48  ;;  %4409 = vmatprep.mubr.bf16.mxu1 %v23619_v8 }
 0x31f   : > { %4391 = vmatprep.subr.bf16.mxu1 %v21677_v33 }
 0x322   : > { %4392 = vmatpush1.bf16.msra.mxu1 %v21675_v30 }
 0x323   : > { %4583 = vmatprep.subr.bf16.mxu1 %v21680_v52  ;;  %v25233_v52 = vrot.slane %v5825_v20, %v5829_v18 }
 0x325   : > { %4410 = vmatmul.mubr.bf16.vlgmr.msra.gmra.mrb[0].mxu1 %v24779_v41  ;;  %v21689_v41 = vld [vmem:[%s30437_s2 + $0x3b4] ss:$8 sps:$4 sm:$0xff]  }
 0x326   : > { %4584 = vmatpush1.bf16.msra.mxu1 %v21678_v58  ;;  %4419 = vmatprep.mubr.bf16.mxu1 %v23619_v8  ;;  %v25237_v58 = vrot.slane %v5825_v20, %v5833_v40 }
 0x327   : > { %4585 = vmatprep.subr.bf16.mxu1 %v21683_v43 }
 0x32a   : > { %4586 = vmatpush1.bf16.msra.mxu1 %v21681_v7 }
 0x32b   : > { %4587 = vmatprep.subr.bf16.mxu1 %v21686_v23 }
 0x32d   : > { %4420 = vmatmul.mubr.bf16.gmra.mrb[4].mxu1 %v24797_v6  ;;  %v21695_v6 = vld [vmem:[%s30437_s2 + $0x3d4] ss:$8 sps:$4 sm:$0xff]  }
 0x32e   : > { %4588 = vmatpush1.bf16.msra.mxu1 %v21684_v12  ;;  %4429 = vmatprep.mubr.bf16.mxu1 %v23619_v8 }
 0x32f   : > { %4589 = vmatprep.subr.bf16.mxu1 %v21689_v41 }
 0x332   : > { %4590 = vmatpush1.bf16.msra.mxu1 %v21687_v14 }
 0x333   : > { %4591 = vmatprep.subr.bf16.mxu1 %v21692_v2 }
 0x335   : > { %4430 = vmatmul.mubr.bf16.gmra.mrb[8].mxu1 %v24815_v17  ;;  %v20970_v17 = vpack.c.bf16 %v24753_v35, %v24693_v37  ;;  %v21702_v37 = vld [vmem:[%s30437_s2 + $0x400] ss:$8 sps:$4 sm:$0xff]   ;;  %v21707_v35 = vld [vmem:[%s30437_s2 + $0x414] ss:$8 sps:$4 sm:$0xff]  }
 0x336   : > { %4592 = vmatpush1.bf16.msra.mxu1 %v21690_v5  ;;  %4439 = vmatprep.mubr.bf16.mxu1 %v23619_v8 }
 0x337   : > { %4593 = vmatprep.subr.bf16.mxu1 %v21695_v6 }
 0x33a   : > { %4594 = vmatpush1.bf16.msra.mxu1 %v21693_v1 }
 0x33b   : > { %4595 = vmatprep.subr.bf16.mxu1 %v21698_v4 }
 0x33d   : > { %4440 = vmatmul.mubr.bf16.gmra.mrb[12].mxu1 %v20970_v17 }
 0x33e   : > { %4596 = vmatpush1.bf16.msra.mxu1 %v21696_v34  ;;  %4615 = vmatprep.mubr.bf16.mxu1 %v23619_v8 }
 0x33f   : > { %4597 = vmatprep.subr.bf16.mxu1 %v21701_v53 }
 0x342   : > { %4598 = vmatpush1.bf16.msra.mxu1 %v21699_v39 }
 0x343   : > { %4776 = vmatprep.subr.bf16.mxu1 %v21704_v56 }
 0x345   : > { %4616 = vmatmul.mubr.bf16.vlgmr.msra.gmra.mrb[0].mxu1 %v24587_v21  ;;  %v21713_v21 = vld [vmem:[%s30437_s2 + $0x434] ss:$8 sps:$4 sm:$0xff]  }
 0x346   : > { %4777 = vmatpush1.bf16.msra.mxu1 %v21702_v37  ;;  %4625 = vmatprep.mubr.bf16.mxu1 %v23619_v8 }
 0x347   : > { %4778 = vmatprep.subr.bf16.mxu1 %v21707_v35 }
 0x34a   : > { %4779 = vmatpush1.bf16.msra.mxu1 %v21705_v31 }
 0x34b   : > { %4780 = vmatprep.subr.bf16.mxu1 %v21710_v22 }
 0x34d   : > { %4626 = vmatmul.mubr.bf16.gmra.mrb[4].mxu1 %v24636_v32  ;;  %v21719_v32 = vld [vmem:[%s30437_s2 + $0x454] ss:$8 sps:$4 sm:$0xff]  }
 0x34e   : > { %4781 = vmatpush1.bf16.msra.mxu1 %v21708_v47  ;;  %4635 = vmatprep.mubr.bf16.mxu1 %v23619_v8 }
 0x34f   : > { %4782 = vmatprep.subr.bf16.mxu1 %v21713_v21 }
 0x352   : > { %4783 = vmatpush1.bf16.msra.mxu1 %v21711_v51 }
 0x353   : > { %4784 = vmatprep.subr.bf16.mxu1 %v21716_v46 }
 0x355   : > { %4636 = vmatmul.mubr.bf16.gmra.mrb[8].mxu1 %v24681_v60  ;;  %v21720_v60 = vld [vmem:[%s30437_s2 + $0x460] ss:$8 sps:$4 sm:$0xff]  }
 0x356   : > { %4785 = vmatpush1.bf16.msra.mxu1 %v21714_v19  ;;  %4645 = vmatprep.mubr.bf16.mxu1 %v23619_v8 }
 0x357   : > { %4786 = vmatprep.subr.bf16.mxu1 %v21719_v32 }
 0x35a   : > { %4787 = vmatpush1.bf16.msra.mxu1 %v21717_v16 }
 0x35b   : > { %4788 = vmatprep.subr.bf16.mxu1 %v21722_v36 }
 0x35d   : > { %4646 = vmatmul.mubr.bf16.gmra.mrb[12].mxu1 %v18284_v45 }
 0x35e   : > { %4789 = vmatpush1.bf16.msra.mxu1 %v21720_v60  ;;  %4808 = vmatprep.mubr.bf16.mxu1 %v23619_v8 }
 0x35f   : > { %4790 = vmatprep.subr.bf16.mxu1 %v21725_v63 }
 0x362   : > { %4791 = vmatpush1.bf16.msra.mxu1 %v21723_v62 }
 0x365   : > { %4809 = vmatmul.mubr.bf16.vlgmr.msra.gmra.mrb[0].mxu1 %v24685_v44  ;;  %v21731_v44 = vld [vmem:[%s30438_s3 + $0x19c] ss:$12 sps:$4 sm:$0xff]  }
 0x366   : > { %4818 = vmatprep.mubr.bf16.mxu1 %v23619_v8  ;;  %6608 = vmatprep.subr.bf16.mxu0 %v21731_v44 }
 0x36d   : > { %4819 = vmatmul.mubr.bf16.gmra.mrb[4].mxu1 %v24714_v61  ;;  %v21729_v61 = vld [vmem:[%s30438_s3 + $0x198] ss:$12 sps:$4 sm:$0xff]  }
 0x36e   : > { %4828 = vmatprep.mubr.bf16.mxu1 %v23619_v8  ;;  %6609 = vmatpush1.bf16.msra.mxu0 %v21729_v61 }
 0x375   : > { %4829 = vmatmul.mubr.bf16.gmra.mrb[8].mxu1 %v24729_v50 }
 0x376   : > { %4838 = vmatprep.mubr.bf16.mxu1 %v23619_v8 }
 0x37d   : > { %4839 = vmatmul.mubr.bf16.gmra.mrb[12].mxu1 %v18318_v54 }
 0x438   : > { %v4810_v50 = vpop.f32.mrb[0].mxu1 }
 0x439   : > { %v4812_v9 = vpop.f32.mrb[1].mxu1 }
 0x43a   : > { %v4881_v49 = vcombine.low %v4810_v50, %v4812_v9  ;;  %v4882_v54 = vcombine.high %v4810_v50, %v4812_v9  ;;  %v4814_v55 = vpop.f32.mrb[2].mxu1 }
 0x43b   : > { %v4816_v42 = vpop.f32.mrb[3].mxu1 }
 0x43c   : > { %v4889_v13 = vrot.slane %v4881_v49, %v23735_v28  ;;  %v4896_v10 = vrot.slane %v4882_v54, %v23735_v28  ;;  %v4899_v24 = vcombine.low %v4814_v55, %v4816_v42  ;;  %v4900_v0 = vcombine.high %v4814_v55, %v4816_v42 }
 0x43e   : > { %v4897_v38 = vcombine.high %v4889_v13, %v4889_v13  ;;  %v4898_v57 = vcombine.high %v4896_v10, %v4896_v10  ;;  %v5031_v15 = vrot.slane %v4889_v13, %v23735_v28  ;;  %v5047_v48 = vrot.slane %v4896_v10, %v23735_v28 }
 0x43f   : > { %v25226_v33 = vrot.slane %v4899_v24, %v23735_v28  ;;  %v25229_v30 = vrot.slane %v4900_v0, %v23735_v28 }
 0x440   : > { %v5032_v43 = vcombine.high %v5031_v15, %v5031_v15  ;;  %v5039_v7 = vrot.slane %v4897_v38, %v23735_v28  ;;  %v5048_v23 = vcombine.high %v5047_v48, %v5047_v48  ;;  %v5055_v12 = vrot.slane %v4898_v57, %v23735_v28  ;;  %v25241_v41 = vpop.f32.mrb[4].mxu1 }
 0x441   : > { %v5345_v14 = vsel %vm1460_vm3, %v5031_v15, -inf  ;;  %v5373_v2 = vsel %vm1460_vm3, %v5047_v48, -inf  ;;  %v4915_v5 = vcombine.high %v25226_v33, %v25226_v33  ;;  %v4916_v6 = vcombine.high %v25229_v30, %v25229_v30  ;;  %v25249_v1 = vpop.f32.mrb[5].mxu1 }
 0x442   : > { %v5040_v4 = vcombine.high %v5039_v7, %v5039_v7  ;;  %v5056_v34 = vcombine.high %v5055_v12, %v5055_v12  ;;  %v5346_v17 = vrot.slane %v5345_v14, 4  ;;  %v5352_v53 = vsel %vm1460_vm3, %v5032_v43, -inf  ;;  %v25252_v39 = vpop.f32.mrb[6].mxu1 }
 0x443   : > { %v5353_v56 = vrot.slane %v5352_v53, 4  ;;  %v5359_v37 = vsel %vm1460_vm3, %v5039_v7, -inf  ;;  %v5374_v35 = vrot.slane %v5373_v2, 4  ;;  %v5380_v31 = vsel %vm1460_vm3, %v5048_v23, -inf  ;;  %v25256_v22 = vpop.f32.mrb[7].mxu1 }
 0x444   : > { %v5347_v47 = vmax.f32 %v5345_v14, %v5346_v17  ;;  %v5360_v21 = vrot.slane %v5359_v37, 4  ;;  %v5366_v51 = vsel %vm1460_vm3, %v5040_v4, -inf  ;;  %v5381_v46 = vrot.slane %v5380_v31, 4  ;;  %v21734_v4 = vld [vmem:[%s30438_s3 + $0x1b4] ss:$12 sps:$4 sm:$0xff]  }
 0x445   : > { %v5354_v59 = vmax.f32 %v5352_v53, %v5353_v56  ;;  %v5367_v19 = vrot.slane %v5366_v51, 4  ;;  %v5375_v32 = vmax.f32 %v5373_v2, %v5374_v35  ;;  %v5387_v3 = vsel %vm1460_vm3, %v5055_v12, -inf  ;;  %6610 = vmatprep.subr.bf16.mxu0 %v21734_v4 }
 0x446   : > { %v5348_v16 = vrot.slane %v5347_v47, 2  ;;  %v5361_v36 = vmax.f32 %v5359_v37, %v5360_v21  ;;  %v5382_v26 = vmax.f32 %v5380_v31, %v5381_v46  ;;  %v5388_v60 = vrot.slane %v5387_v3, 4  ;;  %v21732_v37 = vld [vmem:[%s30438_s3 + $0x1b0] ss:$12 sps:$4 sm:$0xff]  }
 0x447   : > { %v5355_v45 = vrot.slane %v5354_v59, 2  ;;  %v5368_v63 = vmax.f32 %v5366_v51, %v5367_v19  ;;  %v5376_v62 = vrot.slane %v5375_v32, 2  ;;  %v5394_v11 = vsel %vm1460_vm3, %v5056_v34, -inf  ;;  %6611 = vmatpush1.bf16.msra.mxu0 %v21732_v37 }
 0x448   : > { %v5349_v29 = vmax.f32 %v5347_v47, %v5348_v16  ;;  %v5362_v44 = vrot.slane %v5361_v36, 2  ;;  %v5383_v61 = vrot.slane %v5382_v26, 2  ;;  %v5389_v50 = vmax.f32 %v5387_v3, %v5388_v60  ;;  %v25261_v9 = vpop.f32.mrb[8].mxu1 }
 0x449   : > { %v5356_v49 = vmax.f32 %v5354_v59, %v5355_v45  ;;  %v5369_v54 = vrot.slane %v5368_v63, 2  ;;  %v5377_v55 = vmax.f32 %v5375_v32, %v5376_v62  ;;  %v5395_v42 = vrot.slane %v5394_v11, 4  ;;  %v25263_v13 = vpop.f32.mrb[9].mxu1 }
 0x44a   : > { %v5350_v10 = vrot.slane %v5349_v29, 1  ;;  %v5363_v24 = vmax.f32 %v5361_v36, %v5362_v44  ;;  %v5384_v0 = vmax.f32 %v5382_v26, %v5383_v61  ;;  %v5390_v20 = vrot.slane %v5389_v50, 2  ;;  %v25265_v38 = vpop.f32.mrb[10].mxu1 }
 0x44b   : > { %v5357_v57 = vrot.slane %v5356_v49, 1  ;;  %v5370_v15 = vmax.f32 %v5368_v63, %v5369_v54  ;;  %v5378_v48 = vrot.slane %v5377_v55, 1  ;;  %v5396_v43 = vmax.f32 %v5394_v11, %v5395_v42  ;;  %v25267_v7 = vpop.f32.mrb[11].mxu1 }
 0x44c   : > { %v25269_v23 = vmax.f32 %v5349_v29, %v5350_v10  ;;  %v5364_v12 = vrot.slane %v5363_v24, 1  ;;  %v5385_v14 = vrot.slane %v5384_v0, 1  ;;  %v5391_v2 = vmax.f32 %v5389_v50, %v5390_v20 }
 0x44d   : > { %v25274_v34 = vmax.f32 %v5356_v49, %v5357_v57  ;;  %v5371_v17 = vrot.slane %v5370_v15, 1  ;;  %v25276_v53 = vmax.f32 %v5377_v55, %v5378_v48  ;;  %v5397_v56 = vrot.slane %v5396_v43, 2 }
 0x44e   : > { %v25281_v35 = vmax.f32 %v5363_v24, %v5364_v12  ;;  %v25283_v31 = vmax.f32 %v5384_v0, %v5385_v14  ;;  %v5392_v47 = vrot.slane %v5391_v2, 1  ;;  %v5063_v21 = vrot.slane %v25226_v33, %v23735_v28 }
 0x44f   : > { %v25287_v51 = vmax.f32 %v5370_v15, %v5371_v17  ;;  %v5398_v46 = vmax.f32 %v5396_v43, %v5397_v56  ;;  %v5071_v59 = vrot.slane %v4915_v5, %v23735_v28  ;;  %v5079_v19 = vrot.slane %v25229_v30, %v23735_v28 }
 0x450   : > { %v25295_v32 = vmax.f32 %v5391_v2, %v5392_v47  ;;  %v5064_v3 = vcombine.high %v5063_v21, %v5063_v21  ;;  %v5087_v16 = vrot.slane %v4916_v6, %v23735_v28  ;;  %v5401_v36 = vsel %vm1460_vm3, %v5063_v21, -inf  ;;  %v25302_v26 = vpop.f32.mrb[12].mxu1 }
 0x451   : > { %v5399_v60 = vrot.slane %v5398_v46, 1  ;;  %v5072_v45 = vcombine.high %v5071_v59, %v5071_v59  ;;  %v5080_v33 = vcombine.high %v5079_v19, %v5079_v19  ;;  %v5402_v5 = vrot.slane %v5401_v36, 4  ;;  %v25304_v63 = vpop.f32.mrb[13].mxu1 }
 0x452   : > { %v5088_v62 = vcombine.high %v5087_v16, %v5087_v16  ;;  %v5408_v11 = vsel %vm1460_vm3, %v5064_v3, -inf  ;;  %v5415_v29 = vsel %vm1460_vm3, %v5071_v59, -inf  ;;  %v5429_v44 = vsel %vm1460_vm3, %v5079_v19, -inf  ;;  %v25309_v61 = vpop.f32.mrb[14].mxu1 }
 0x453   : > { %v25311_v30 = vmax.f32 %v5398_v46, %v5399_v60  ;;  %v5403_v6 = vmax.f32 %v5401_v36, %v5402_v5  ;;  %v5409_v50 = vrot.slane %v5408_v11, 4  ;;  %v5416_v49 = vrot.slane %v5415_v29, 4  ;;  %v25313_v54 = vpop.f32.mrb[15].mxu1 }
 0x454   : > { %v5422_v55 = vsel %vm1460_vm3, %v5072_v45, -inf  ;;  %v5430_v42 = vrot.slane %v5429_v44, 4  ;;  %v5436_v10 = vsel %vm1460_vm3, %v5080_v33, -inf  ;;  %v5443_v24 = vsel %vm1460_vm3, %v5087_v16, -inf }
 0x455   : > { %v5404_v0 = vrot.slane %v5403_v6, 2  ;;  %v5410_v20 = vmax.f32 %v5408_v11, %v5409_v50  ;;  %v5417_v57 = vmax.f32 %v5415_v29, %v5416_v49  ;;  %v5423_v15 = vrot.slane %v5422_v55, 4 }
 0x456   : > { %v5431_v48 = vmax.f32 %v5429_v44, %v5430_v42  ;;  %v5437_v43 = vrot.slane %v5436_v10, 4  ;;  %v5444_v12 = vrot.slane %v5443_v24, 4  ;;  %v5450_v14 = vsel %vm1460_vm3, %v5088_v62, -inf }
 0x457   : > { %v5405_v2 = vmax.f32 %v5403_v6, %v5404_v0  ;;  %v5411_v4 = vrot.slane %v5410_v20, 2  ;;  %v5418_v17 = vrot.slane %v5417_v57, 2  ;;  %v5424_v56 = vmax.f32 %v5422_v55, %v5423_v15 }
 0x458   : > { %v5432_v37 = vrot.slane %v5431_v48, 2  ;;  %v5438_v47 = vmax.f32 %v5436_v10, %v5437_v43  ;;  %v5445_v21 = vmax.f32 %v5443_v24, %v5444_v12  ;;  %v5451_v46 = vrot.slane %v5450_v14, 4 }
 0x459   : > { %v5406_v59 = vrot.slane %v5405_v2, 1  ;;  %v5412_v19 = vmax.f32 %v5410_v20, %v5411_v4  ;;  %v5419_v3 = vmax.f32 %v5417_v57, %v5418_v17  ;;  %v5425_v16 = vrot.slane %v5424_v56, 2 }
 0x45a   : > { %v5433_v36 = vmax.f32 %v5431_v48, %v5432_v37  ;;  %v5439_v60 = vrot.slane %v5438_v47, 2  ;;  %v5446_v45 = vrot.slane %v5445_v21, 2  ;;  %v5452_v33 = vmax.f32 %v5450_v14, %v5451_v46 }
 0x45b   : > { %v5407_v5 = vmax.f32 %v5405_v2, %v5406_v59  ;;  %v5413_v11 = vrot.slane %v5412_v19, 1  ;;  %v5420_v29 = vrot.slane %v5419_v3, 1  ;;  %v5426_v62 = vmax.f32 %v5424_v56, %v5425_v16 }
 0x45c   : > { %v5434_v44 = vrot.slane %v5433_v36, 1  ;;  %v5440_v6 = vmax.f32 %v5438_v47, %v5439_v60  ;;  %v5447_v50 = vmax.f32 %v5445_v21, %v5446_v45  ;;  %v5453_v49 = vrot.slane %v5452_v33, 2 }
 0x45d   : > { %v5414_v55 = vmax.f32 %v5412_v19, %v5413_v11  ;;  %v5421_v42 = vmax.f32 %v5419_v3, %v5420_v29  ;;  %v5427_v10 = vrot.slane %v5426_v62, 1  ;;  %v5793_v24 = vmax.f32 %v25269_v23, %v5407_v5 }
 0x45e   : > { %v5435_v0 = vmax.f32 %v5433_v36, %v5434_v44  ;;  %v5441_v20 = vrot.slane %v5440_v6, 1  ;;  %v5448_v57 = vrot.slane %v5447_v50, 1  ;;  %v5454_v15 = vmax.f32 %v5452_v33, %v5453_v49 }
 0x45f   : > { %v5428_v48 = vmax.f32 %v5426_v62, %v5427_v10  ;;  %v5794_v43 = vmax.f32 %v25274_v34, %v5414_v55  ;;  %v5795_v12 = vmax.f32 %v25281_v35, %v5421_v42  ;;  %v5837_v14 = vadd.f32 %v25233_v52, %v5793_v24  ;;  %v21740_v24 = vld [vmem:[%s30438_s3 + $0x1e4] ss:$12 sps:$4 sm:$0xff]  }
 0x460   : > { %v5442_v2 = vmax.f32 %v5440_v6, %v5441_v20  ;;  %v5449_v4 = vmax.f32 %v5447_v50, %v5448_v57  ;;  %v5455_v17 = vrot.slane %v5454_v15, 1  ;;  %v5797_v56 = vmax.f32 %v25276_v53, %v5435_v0  ;;  %v21737_v53 = vld [vmem:[%s30438_s3 + $0x1cc] ss:$12 sps:$4 sm:$0xff]  }
 0x461   : > { %v5796_v37 = vmax.f32 %v25287_v51, %v5428_v48  ;;  %v5838_v23 = vadd.f32 %v25237_v58, %v5794_v43  ;;  %v5839_v47 = vadd.f32 %v25233_v52, %v5795_v12  ;;  %vm5869_vm9 = vcmp.ge.f32.partialorder %v5837_v14, 0.0  ;;  %6612 = vmatprep.subr.bf16.mxu0 %v21737_v53  ;;  %v21738_v50 = vld [vmem:[%s30438_s3 + $0x1e0] ss:$12 sps:$4 sm:$0xff]  }
 0x462   : > { %v5456_v21 = vmax.f32 %v5454_v15, %v5455_v17  ;;  %v5798_v46 = vmax.f32 %v25283_v31, %v5442_v2  ;;  %v5799_v34 = vmax.f32 %v25295_v32, %v5449_v4  ;;  %v5841_v35 = vadd.f32 %v25233_v52, %v5797_v56  ;;  %v21735_v31 = vld [vmem:[%s30438_s3 + $0x1c8] ss:$12 sps:$4 sm:$0xff]  }
 0x463   : > { %v5840_v59 = vadd.f32 %v25237_v58, %v5796_v37  ;;  %vm5870_vm2 = vcmp.ge.f32.partialorder %v5838_v23, 0.0  ;;  %vm5871_vm6 = vcmp.ge.f32.partialorder %v5839_v47, 0.0  ;;  %v5901_v19 = vmul.f32 0.1, %v5837_v14  ;;  %6613 = vmatpush1.bf16.msra.mxu0 %v21735_v31  ;;  %v21743_v2 = vld [vmem:[%s30438_s3 + $0x1fc] ss:$12 sps:$4 sm:$0xff]  }
 0x464   : > { %v5800_v51 = vmax.f32 %v25311_v30, %v5456_v21  ;;  %v5842_v3 = vadd.f32 %v25237_v58, %v5798_v46  ;;  %v5843_v16 = vadd.f32 %v25233_v52, %v5799_v34  ;;  %vm5873_vm8 = vcmp.ge.f32.partialorder %v5841_v35, 0.0  ;;  %6614 = vmatprep.subr.bf16.mxu0 %v21740_v24 }
 0x465   : > { %vm5872_vm10 = vcmp.ge.f32.partialorder %v5840_v59, 0.0  ;;  %v5902_v32 = vmul.f32 0.1, %v5838_v23  ;;  %v5903_v36 = vmul.f32 0.1, %v5839_v47  ;;  %v5933_v60 = vsel %vm5869_vm9, %v5837_v14, %v5901_v19 }
 0x466   : > { %v5844_v45 = vadd.f32 %v25237_v58, %v5800_v51  ;;  %vm5874_vm15 = vcmp.ge.f32.partialorder %v5842_v3, 0.0  ;;  %vm5875_vm0 = vcmp.ge.f32.partialorder %v5843_v16, 0.0  ;;  %v5904_v30 = vmul.f32 0.1, %v5840_v59 }
 0x467   : > { %v5905_v33 = vmul.f32 0.1, %v5841_v35  ;;  %v5906_v5 = vmul.f32 0.1, %v5842_v3  ;;  %v5907_v11 = vmul.f32 0.1, %v5843_v16  ;;  %v5934_v29 = vsel %vm5870_vm2, %v5838_v23, %v5902_v32  ;;  %6615 = vmatpush1.bf16.msra.mxu0 %v21738_v50 }
 0x468   : > { %vm5876_vm1 = vcmp.ge.f32.partialorder %v5844_v45, 0.0  ;;  %v5908_v62 = vmul.f32 0.1, %v5844_v45  ;;  %v5935_v44 = vsel %vm5871_vm6, %v5839_v47, %v5903_v36  ;;  %v5936_v6 = vsel %vm5872_vm10, %v5840_v59, %v5904_v30  ;;  %v21741_v23 = vld [vmem:[%s30438_s3 + $0x1f8] ss:$12 sps:$4 sm:$0xff]   ;;  %6616 = vmatprep.subr.bf16.mxu0 %v21743_v2 }
 0x469   : > { %v5937_v49 = vsel %vm5873_vm8, %v5841_v35, %v5905_v33  ;;  %v5938_v55 = vsel %vm5874_vm15, %v5842_v3, %v5906_v5  ;;  %v5939_v42 = vsel %vm5875_vm0, %v5843_v16, %v5907_v11  ;;  %v5997_v10 = vrot.slane %v5933_v60, 7  ;;  %v21744_v36 = vld [vmem:[%s30438_s3 + $0x210] ss:$12 sps:$4 sm:$0xff]  }
 0x46a   : > { %v5940_v0 = vsel %vm5876_vm1, %v5844_v45, %v5908_v62  ;;  %v5998_v20 = vrot.slane %v5935_v44, 6  ;;  %v6000_v57 = vrot.slane %v5937_v49, 5  ;;  %v6002_v15 = vrot.slane %v5939_v42, 4 }
 0x46b   : > { %v6004_v48 = vrot.slane %v5934_v29, 7  ;;  %v6005_v43 = vrot.slane %v5936_v6, 6  ;;  %v6007_v12 = vrot.slane %v5938_v55, 5  ;;  %v6009_v14 = vrot.slane %v5940_v0, 4  ;;  %6617 = vmatpush1.bf16.msra.mxu0 %v21741_v23  ;;  %v21749_v55 = vld [vmem:[%s30438_s3 + $0x22c] ss:$12 sps:$4 sm:$0xff]  }
 0x46c   : > { %v5999_v4 = vsel %vm2752_vm5, %v5998_v20, %v5997_v10  ;;  %v4917_v17 = vcombine.low %v25241_v41, %v25249_v1  ;;  %v4918_v56 = vcombine.high %v25241_v41, %v25249_v1  ;;  %v4935_v37 = vcombine.low %v25252_v39, %v25256_v22  ;;  %v21747_v20 = vld [vmem:[%s30438_s3 + $0x228] ss:$12 sps:$4 sm:$0xff]  }
 0x46d   : > { %v6001_v47 = vsel %vm2755_vm7, %v6000_v57, %v5999_v4  ;;  %v6006_v21 = vsel %vm2752_vm5, %v6005_v43, %v6004_v48  ;;  %v4936_v46 = vcombine.high %v25252_v39, %v25256_v22  ;;  %v4953_v34 = vcombine.low %v25261_v9, %v25263_v13  ;;  %v21746_v22 = vld [vmem:[%s30438_s3 + $0x214] ss:$12 sps:$4 sm:$0xff]  }
 0x46e   : > { %v6003_v41 = vsel %vm2758_vm11, %v6002_v15, %v6001_v47  ;;  %v6008_v1 = vsel %vm2755_vm7, %v6007_v12, %v6006_v21  ;;  %v4925_v35 = vrot.slane %v4917_v17, %v23735_v28  ;;  %v4932_v59 = vrot.slane %v4918_v56, %v23735_v28  ;;  %6618 = vmatprep.subr.bf16.mxu0 %v21746_v22  ;;  %v21750_v17 = vld [vmem:[%s30438_s3 + $0x548] ss:$12 sps:$4 sm:$0xff]   ;;  %v21753_v21 = vld [vmem:[%s30438_s3 + $0x244] ss:$12 sps:$4 sm:$0xff]  }
 0x46f   : > { %v6010_v19 = vsel %vm2758_vm11, %v6009_v14, %v6008_v1  ;;  %6062 = vst [vmem:[#allocation3 + $0x10] sm:$0x1e] %v6003_v41  ;;  %v4943_v53 = vrot.slane %v4935_v37, %v23735_v28  ;;  %v25378_v51 = vrot.slane %v4936_v46, %v23735_v28  ;;  %v4954_v39 = vcombine.high %v25261_v9, %v25263_v13  ;;  %v21754_v46 = vld [vmem:[%s30438_s3 + $0x488] ss:$12 sps:$4 sm:$0xff]  }
 0x470   : > { %6063 = vst [vmem:[#allocation3 + $0x18] sm:$0x1e] %v6010_v19  ;;  %v4933_v3 = vcombine.high %v4925_v35, %v4925_v35  ;;  %v4934_v16 = vcombine.high %v4932_v59, %v4932_v59  ;;  %v5095_v31 = vrot.slane %v4925_v35, %v23735_v28  ;;  %v5111_v32 = vrot.slane %v4932_v59, %v23735_v28  ;;  %v21751_v19 = vld [vmem:[%s30438_s3 + $0x240] ss:$12 sps:$4 sm:$0xff]  }
 0x471   : > { %v4951_v60 = vcombine.high %v4943_v53, %v4943_v53  ;;  %v4952_v45 = vcombine.high %v25378_v51, %v25378_v51  ;;  %v25393_v30 = vrot.slane %v4943_v53, %v23735_v28  ;;  %v25397_v33 = vrot.slane %v25378_v51, %v23735_v28  ;;  %6619 = vmatpush1.bf16.msra.mxu0 %v21744_v36  ;;  %v21765_v51 = vld [vmem:[%s30438_s3 + $0x590] ss:$12 sps:$4 sm:$0xff]  }
 0x472   : > { %v5096_v5 = vcombine.high %v5095_v31, %v5095_v31  ;;  %v5103_v11 = vrot.slane %v4933_v3, %v23735_v28  ;;  %v5112_v29 = vcombine.high %v5111_v32, %v5111_v32  ;;  %v5119_v62 = vrot.slane %v4934_v16, %v23735_v28  ;;  %6620 = vmatprep.subr.bf16.mxu0 %v21749_v55  ;;  %v21759_v55 = vld [vmem:[%s30438_s3 + $0x4a0] ss:$12 sps:$4 sm:$0xff]  }
 0x473   : > { %v5457_v44 = vsel %vm1460_vm3, %v5095_v31, -inf  ;;  %v5485_v6 = vsel %vm1460_vm3, %v5111_v32, -inf  ;;  %v5128_v50 = vcombine.high %v25393_v30, %v25393_v30  ;;  %v25406_v49 = vrot.slane %v4951_v60, %v23735_v28  ;;  %21057 = vmatprep.subr.bf16.mxu1 %v21750_v17  ;;  %v21760_v17 = vld [vmem:[%s30438_s3 + $0x578] ss:$12 sps:$4 sm:$0xff]  }
 0x474   : > { %v5104_v42 = vcombine.high %v5103_v11, %v5103_v11  ;;  %v5120_v10 = vcombine.high %v5119_v62, %v5119_v62  ;;  %v5458_v24 = vrot.slane %v5457_v44, 4  ;;  %v5464_v0 = vsel %vm1460_vm3, %v5096_v5, -inf  ;;  %21058 = vmatpush3.bf16.msra.mxu1 %v21754_v46  ;;  %v21755_v5 = vld [vmem:[%s30438_s3 + $0x560] ss:$12 sps:$4 sm:$0xff]   ;;  %v21764_v46 = vld [vmem:[%s30438_s3 + $0x4b8] ss:$12 sps:$4 sm:$0xff]  }
 0x475   : > { %v5465_v57 = vrot.slane %v5464_v0, 4  ;;  %v5471_v15 = vsel %vm1460_vm3, %v5103_v11, -inf  ;;  %v5486_v48 = vrot.slane %v5485_v6, 4  ;;  %v5492_v43 = vsel %vm1460_vm3, %v5112_v29, -inf  ;;  %6621 = vmatpush1.bf16.msra.mxu0 %v21747_v20  ;;  %21059 = vmatprep.subr.bf16.mxu1 %v21755_v5  ;;  %v21756_v20 = vld [vmem:[%s30438_s3 + $0x258] ss:$12 sps:$4 sm:$0xff]  }
 0x476   : > { %v5459_v12 = vmax.f32 %v5457_v44, %v5458_v24  ;;  %v5472_v14 = vrot.slane %v5471_v15, 4  ;;  %v5478_v2 = vsel %vm1460_vm3, %v5104_v42, -inf  ;;  %v5493_v4 = vrot.slane %v5492_v43, 4  ;;  %6622 = vmatprep.subr.bf16.mxu0 %v21753_v21  ;;  %v21763_v21 = vld [vmem:[%s30438_s3 + $0x274] ss:$12 sps:$4 sm:$0xff]  }
 0x477   : > { %v5466_v56 = vmax.f32 %v5464_v0, %v5465_v57  ;;  %v5479_v37 = vrot.slane %v5478_v2, 4  ;;  %v5487_v23 = vmax.f32 %v5485_v6, %v5486_v48  ;;  %v5499_v47 = vsel %vm1460_vm3, %v5119_v62, -inf  ;;  %v21758_v6 = vld [vmem:[%s30438_s3 + $0x25c] ss:$12 sps:$4 sm:$0xff]  }
 0x478   : > { %v5460_v41 = vrot.slane %v5459_v12, 2  ;;  %v5473_v1 = vmax.f32 %v5471_v15, %v5472_v14  ;;  %v5494_v35 = vmax.f32 %v5492_v43, %v5493_v4  ;;  %v5500_v59 = vrot.slane %v5499_v47, 4  ;;  %21060 = vmatpush3.bf16.msra.mxu1 %v21759_v55 }
 0x479   : > { %v5467_v53 = vrot.slane %v5466_v56, 2  ;;  %v5480_v22 = vmax.f32 %v5478_v2, %v5479_v37  ;;  %v5488_v3 = vrot.slane %v5487_v23, 2  ;;  %v5506_v16 = vsel %vm1460_vm3, %v5120_v10, -inf  ;;  %6623 = vmatpush1.bf16.msra.mxu0 %v21751_v19  ;;  %21061 = vmatprep.subr.bf16.mxu1 %v21760_v17  ;;  %v21761_v19 = vld [vmem:[%s30438_s3 + $0x270] ss:$12 sps:$4 sm:$0xff]  }
 0x47a   : > { %v5461_v31 = vmax.f32 %v5459_v12, %v5460_v41  ;;  %v5474_v32 = vrot.slane %v5473_v1, 2  ;;  %v5495_v36 = vrot.slane %v5494_v35, 2  ;;  %v5501_v60 = vmax.f32 %v5499_v47, %v5500_v59  ;;  %6624 = vmatprep.subr.bf16.mxu0 %v21758_v6  ;;  %v21768_v6 = vld [vmem:[%s30438_s3 + $0x28c] ss:$12 sps:$4 sm:$0xff]  }
 0x47b   : > { %v5468_v11 = vmax.f32 %v5466_v56, %v5467_v53  ;;  %v5481_v29 = vrot.slane %v5480_v22, 2  ;;  %v5489_v62 = vmax.f32 %v5487_v23, %v5488_v3  ;;  %v5507_v44 = vrot.slane %v5506_v16, 4 }
 0x47c   : > { %v5462_v42 = vrot.slane %v5461_v31, 1  ;;  %v5475_v10 = vmax.f32 %v5473_v1, %v5474_v32  ;;  %v5496_v24 = vmax.f32 %v5494_v35, %v5495_v36  ;;  %v5502_v0 = vrot.slane %v5501_v60, 2  ;;  %21062 = vmatpush3.bf16.msra.mxu1 %v21764_v46 }
 0x47d   : > { %v5469_v57 = vrot.slane %v5468_v11, 1  ;;  %v5482_v15 = vmax.f32 %v5480_v22, %v5481_v29  ;;  %v5490_v48 = vrot.slane %v5489_v62, 1  ;;  %v5508_v43 = vmax.f32 %v5506_v16, %v5507_v44  ;;  %6625 = vmatpush1.bf16.msra.mxu0 %v21756_v20  ;;  %21063 = vmatprep.subr.bf16.mxu1 %v21765_v51 }
 0x47e   : > { %v25444_v12 = vmax.f32 %v5461_v31, %v5462_v42  ;;  %v5476_v14 = vrot.slane %v5475_v10, 1  ;;  %v5497_v2 = vrot.slane %v5496_v24, 1  ;;  %v5503_v4 = vmax.f32 %v5501_v60, %v5502_v0  ;;  %6626 = vmatprep.subr.bf16.mxu0 %v21763_v21  ;;  %v21769_v0 = vld [vmem:[%s30438_s3 + $0x4d0] ss:$12 sps:$4 sm:$0xff]  }
 0x47f   : > { %v25449_v56 = vmax.f32 %v5468_v11, %v5469_v57  ;;  %v5483_v37 = vrot.slane %v5482_v15, 1  ;;  %v25451_v23 = vmax.f32 %v5489_v62, %v5490_v48  ;;  %v5509_v47 = vrot.slane %v5508_v43, 2  ;;  %v21766_v62 = vld [vmem:[%s30438_s3 + $0x288] ss:$12 sps:$4 sm:$0xff]  }
 0x480   : > { %v25459_v41 = vmax.f32 %v5475_v10, %v5476_v14  ;;  %v25461_v1 = vmax.f32 %v5496_v24, %v5497_v2  ;;  %v5504_v35 = vrot.slane %v5503_v4, 1  ;;  %v5136_v59 = vcombine.high %v25406_v49, %v25406_v49  ;;  %21064 = vmatpush3.bf16.msra.mxu1 %v21769_v0 }
 0x481   : > { %v25468_v53 = vmax.f32 %v5482_v15, %v5483_v37  ;;  %v5510_v22 = vmax.f32 %v5508_v43, %v5509_v47  ;;  %v5144_v3 = vcombine.high %v25397_v33, %v25397_v33  ;;  %v5151_v16 = vrot.slane %v4952_v45, %v23735_v28  ;;  %6627 = vmatpush1.bf16.msra.mxu0 %v21761_v19  ;;  %v21771_v43 = vld [vmem:[%s30438_s3 + $0x2a0] ss:$12 sps:$4 sm:$0xff]   ;;  %v21773_v37 = vld [vmem:[%s30438_s3 + $0x2a4] ss:$12 sps:$4 sm:$0xff]  }
 0x482   : > { %v25476_v31 = vmax.f32 %v5503_v4, %v5504_v35  ;;  %v5513_v32 = vsel %vm1460_vm3, %v25393_v30, -inf  ;;  %v5520_v36 = vsel %vm1460_vm3, %v5128_v50, -inf  ;;  %v5527_v60 = vsel %vm1460_vm3, %v25406_v49, -inf  ;;  %6628 = vmatprep.subr.bf16.mxu0 %v21768_v6  ;;  %v21775_v19 = vld [vmem:[%s30438_s3 + $0x5c0] ss:$12 sps:$4 sm:$0xff]  }
 0x483   : > { %v5511_v45 = vrot.slane %v5510_v22, 1  ;;  %v5152_v5 = vcombine.high %v5151_v16, %v5151_v16  ;;  %v5514_v11 = vrot.slane %v5513_v32, 4  ;;  %v5521_v29 = vrot.slane %v5520_v36, 4 }
 0x484   : > { %v5528_v44 = vrot.slane %v5527_v60, 4  ;;  %v5534_v30 = vsel %vm1460_vm3, %v5136_v59, -inf  ;;  %v5541_v50 = vsel %vm1460_vm3, %v25397_v33, -inf  ;;  %v5548_v49 = vsel %vm1460_vm3, %v5144_v3, -inf  ;;  %v21770_v33 = vld [vmem:[%s30438_s3 + $0x5a8] ss:$12 sps:$4 sm:$0xff]  }
 0x485   : > { %v25499_v55 = vmax.f32 %v5510_v22, %v5511_v45  ;;  %v5515_v42 = vmax.f32 %v5513_v32, %v5514_v11  ;;  %v5522_v10 = vmax.f32 %v5520_v36, %v5521_v29  ;;  %v5535_v24 = vrot.slane %v5534_v30, 4  ;;  %6629 = vmatpush1.bf16.msra.mxu0 %v21766_v62  ;;  %21065 = vmatprep.subr.bf16.mxu1 %v21770_v33  ;;  %v21774_v59 = vld [vmem:[%s30438_s3 + $0x4e8] ss:$12 sps:$4 sm:$0xff]  }
 0x486   : > { %v5529_v20 = vmax.f32 %v5527_v60, %v5528_v44  ;;  %v5542_v57 = vrot.slane %v5541_v50, 4  ;;  %v5549_v15 = vrot.slane %v5548_v49, 4  ;;  %v5555_v48 = vsel %vm1460_vm3, %v5151_v16, -inf  ;;  %6630 = vmatprep.subr.bf16.mxu0 %v21773_v37  ;;  %v21778_v36 = vld [vmem:[%s30438_s3 + $0x2bc] ss:$12 sps:$4 sm:$0xff]   ;;  %21066 = vmatpush3.bf16.msra.mxu1 %v21774_v59 }
 0x487   : > { %v5516_v14 = vrot.slane %v5515_v42, 2  ;;  %v5523_v2 = vrot.slane %v5522_v10, 2  ;;  %v5536_v4 = vmax.f32 %v5534_v30, %v5535_v24  ;;  %v5556_v17 = vrot.slane %v5555_v48, 4  ;;  %v21779_v30 = vld [vmem:[%s30438_s3 + $0x500] ss:$12 sps:$4 sm:$0xff]   ;;  %21067 = vmatprep.subr.bf16.mxu1 %v21775_v19 }
 0x488   : > { %v5530_v47 = vrot.slane %v5529_v20, 2  ;;  %v5543_v21 = vmax.f32 %v5541_v50, %v5542_v57  ;;  %v5550_v46 = vmax.f32 %v5548_v49, %v5549_v15  ;;  %v5562_v35 = vsel %vm1460_vm3, %v5152_v5, -inf  ;;  %v21780_v57 = vld [vmem:[%s30438_s3 + $0x5d8] ss:$12 sps:$4 sm:$0xff]  }
 0x489   : > { %v5517_v22 = vmax.f32 %v5515_v42, %v5516_v14  ;;  %v5524_v3 = vmax.f32 %v5522_v10, %v5523_v2  ;;  %v5537_v16 = vrot.slane %v5536_v4, 2  ;;  %v5557_v32 = vmax.f32 %v5555_v48, %v5556_v17  ;;  %6631 = vmatpush1.bf16.msra.mxu0 %v21771_v43  ;;  %v21776_v10 = vld [vmem:[%s30438_s3 + $0x2b8] ss:$12 sps:$4 sm:$0xff]   ;;  %v21783_v43 = vld [vmem:[%s30438_s3 + $0x2d4] ss:$12 sps:$4 sm:$0xff]  }
 0x48a   : > { %v5531_v60 = vmax.f32 %v5529_v20, %v5530_v47  ;;  %v5544_v51 = vrot.slane %v5543_v21, 2  ;;  %v5551_v45 = vrot.slane %v5550_v46, 2  ;;  %v5563_v5 = vrot.slane %v5562_v35, 4  ;;  %6632 = vmatprep.subr.bf16.mxu0 %v21778_v36  ;;  %21068 = vmatpush3.bf16.msra.mxu1 %v21779_v30 }
 0x48b   : > { %v5518_v11 = vrot.slane %v5517_v22, 1  ;;  %v5525_v29 = vrot.slane %v5524_v3, 1  ;;  %v5538_v62 = vmax.f32 %v5536_v4, %v5537_v16  ;;  %v5558_v44 = vrot.slane %v5557_v32, 2  ;;  %21069 = vmatprep.subr.bf16.mxu1 %v21780_v57 }
 0x48c   : > { %v5532_v50 = vrot.slane %v5531_v60, 1  ;;  %v5545_v49 = vmax.f32 %v5543_v21, %v5544_v51  ;;  %v5552_v6 = vmax.f32 %v5550_v46, %v5551_v45  ;;  %v5564_v42 = vmax.f32 %v5562_v35, %v5563_v5  ;;  %v21784_v21 = vld [vmem:[%s30438_s3 + $0x518] ss:$12 sps:$4 sm:$0xff]  }
 0x48d   : > { %v5519_v24 = vmax.f32 %v5517_v22, %v5518_v11  ;;  %v5526_v0 = vmax.f32 %v5524_v3, %v5525_v29  ;;  %v5539_v33 = vrot.slane %v5538_v62, 1  ;;  %v5559_v20 = vmax.f32 %v5557_v32, %v5558_v44  ;;  %6633 = vmatpush1.bf16.msra.mxu0 %v21776_v10  ;;  %v21781_v22 = vld [vmem:[%s30438_s3 + $0x2d0] ss:$12 sps:$4 sm:$0xff]  }
 0x48e   : > { %v5533_v15 = vmax.f32 %v5531_v60, %v5532_v50  ;;  %v5546_v48 = vrot.slane %v5545_v49, 1  ;;  %v5553_v14 = vrot.slane %v5552_v6, 1  ;;  %v5565_v2 = vrot.slane %v5564_v42, 2  ;;  %6634 = vmatprep.subr.bf16.mxu0 %v21783_v43  ;;  %21070 = vmatpush3.bf16.msra.mxu1 %v21784_v21  ;;  %v21789_v11 = vld [vmem:[%s30438_s3 + $0x530] ss:$12 sps:$4 sm:$0xff]  }
 0x48f   : > { %v5540_v4 = vmax.f32 %v5538_v62, %v5539_v33  ;;  %v5560_v17 = vrot.slane %v5559_v20, 1  ;;  %v5801_v37 = vmax.f32 %v25444_v12, %v5519_v24  ;;  %v5802_v47 = vmax.f32 %v25449_v56, %v5526_v0  ;;  %v21785_v12 = vld [vmem:[%s30438_s3 + $0x5f0] ss:$12 sps:$4 sm:$0xff]  }
 0x490   : > { %v5547_v46 = vmax.f32 %v5545_v49, %v5546_v48  ;;  %v5554_v35 = vmax.f32 %v5552_v6, %v5553_v14  ;;  %v5566_v59 = vmax.f32 %v5564_v42, %v5565_v2  ;;  %v5803_v19 = vmax.f32 %v25459_v41, %v5533_v15  ;;  %v21788_v41 = vld [vmem:[%s30438_s3 + $0x2ec] ss:$12 sps:$4 sm:$0xff]   ;;  %21071 = vmatprep.subr.bf16.mxu1 %v21785_v12  ;;  %v21790_v6 = vld [vmem:[%s30438_s3 + $0x6c8] ss:$12 sps:$4 sm:$0xff]  }
 0x491   : > { %v5561_v56 = vmax.f32 %v5559_v20, %v5560_v17  ;;  %v5804_v3 = vmax.f32 %v25468_v53, %v5540_v4  ;;  %v5845_v16 = vadd.f32 %v25233_v52, %v5801_v37  ;;  %v5846_v32 = vadd.f32 %v25237_v58, %v5802_v47  ;;  %6635 = vmatpush1.bf16.msra.mxu0 %v21781_v22 }
 0x492   : > { %v5567_v36 = vrot.slane %v5566_v59, 1  ;;  %v5805_v60 = vmax.f32 %v25451_v23, %v5547_v46  ;;  %v5806_v51 = vmax.f32 %v25461_v1, %v5554_v35  ;;  %v5847_v45 = vadd.f32 %v25233_v52, %v5803_v19  ;;  %v21786_v1 = vld [vmem:[%s30438_s3 + $0x2e8] ss:$12 sps:$4 sm:$0xff]   ;;  %6636 = vmatprep.subr.bf16.mxu0 %v21788_v41  ;;  %21072 = vmatpush3.bf16.msra.mxu1 %v21789_v11 }
 0x493   : > { %v5807_v5 = vmax.f32 %v25476_v31, %v5561_v56  ;;  %v5848_v53 = vadd.f32 %v25237_v58, %v5804_v3  ;;  %vm5877_vm9 = vcmp.ge.f32.partialorder %v5845_v16, 0.0  ;;  %vm5878_vm2 = vcmp.ge.f32.partialorder %v5846_v32, 0.0  ;;  %21079 = vmatprep.subr.bf16.mxu1 %v21790_v6 }
 0x494   : > { %v5568_v29 = vmax.f32 %v5566_v59, %v5567_v36  ;;  %v5849_v62 = vadd.f32 %v25233_v52, %v5805_v60  ;;  %v5850_v23 = vadd.f32 %v25237_v58, %v5806_v51  ;;  %vm5879_vm6 = vcmp.ge.f32.partialorder %v5847_v45, 0.0 }
 0x495   : > { %v5851_v31 = vadd.f32 %v25233_v52, %v5807_v5  ;;  %vm5880_vm8 = vcmp.ge.f32.partialorder %v5848_v53, 0.0  ;;  %v5909_v44 = vmul.f32 0.1, %v5845_v16  ;;  %v5910_v30 = vmul.f32 0.1, %v5846_v32  ;;  %6637 = vmatpush1.bf16.msra.mxu0 %v21786_v1 }
 0x496   : > { %v5808_v50 = vmax.f32 %v25499_v55, %v5568_v29  ;;  %vm5881_vm10 = vcmp.ge.f32.partialorder %v5849_v62, 0.0  ;;  %vm5882_vm15 = vcmp.ge.f32.partialorder %v5850_v23, 0.0  ;;  %v5911_v49 = vmul.f32 0.1, %v5847_v45  ;;  %v21791_v55 = vld [vmem:[%s30438_s3 + $0x248] ss:$12 sps:$4 sm:$0xff]  }
 0x497   : > { %vm5883_vm0 = vcmp.ge.f32.partialorder %v5851_v31, 0.0  ;;  %v5912_v42 = vmul.f32 0.1, %v5848_v53  ;;  %v5913_v10 = vmul.f32 0.1, %v5849_v62  ;;  %v5941_v24 = vsel %vm5877_vm9, %v5845_v16, %v5909_v44  ;;  %20991 = vmatprep.subr.bf16.mxu0 %v21791_v55 }
 0x498   : > { %v5852_v0 = vadd.f32 %v25237_v58, %v5808_v50  ;;  %v5914_v33 = vmul.f32 0.1, %v5850_v23  ;;  %v5915_v20 = vmul.f32 0.1, %v5851_v31  ;;  %v5942_v57 = vsel %vm5878_vm2, %v5846_v32, %v5910_v30 }
 0x499   : > { %v5943_v15 = vsel %vm5879_vm6, %v5847_v45, %v5911_v49  ;;  %v5944_v48 = vsel %vm5880_vm8, %v5848_v53, %v5912_v42  ;;  %v5945_v14 = vsel %vm5881_vm10, %v5849_v62, %v5913_v10  ;;  %v6011_v2 = vrot.slane %v5941_v24, 7 }
 0x49a   : > { %vm5884_vm1 = vcmp.ge.f32.partialorder %v5852_v0, 0.0  ;;  %v5916_v43 = vmul.f32 0.1, %v5852_v0  ;;  %v5946_v4 = vsel %vm5882_vm15, %v5850_v23, %v5914_v33  ;;  %v5947_v17 = vsel %vm5883_vm0, %v5851_v31, %v5915_v20 }
 0x49b   : > { %v6012_v37 = vrot.slane %v5943_v15, 6  ;;  %v6014_v47 = vrot.slane %v5945_v14, 5  ;;  %v6016_v21 = vrot.slane %v5947_v17, 4  ;;  %v6018_v46 = vrot.slane %v5942_v57, 7 }
 0x49c   : > { %v5948_v35 = vsel %vm5884_vm1, %v5852_v0, %v5916_v43  ;;  %v6019_v59 = vrot.slane %v5944_v48, 6  ;;  %v6021_v19 = vrot.slane %v5946_v4, 5  ;;  %v4961_v22 = vrot.slane %v4953_v34, %v23735_v28 }
 0x49d   : > { %v6013_v12 = vsel %vm2752_vm5, %v6012_v37, %v6011_v2  ;;  %v6023_v56 = vrot.slane %v5948_v35, 4  ;;  %v4968_v3 = vrot.slane %v4954_v39, %v23735_v28  ;;  %v4971_v16 = vcombine.low %v25265_v38, %v25267_v7 }
 0x49e   : > { %v6015_v32 = vsel %vm2755_vm7, %v6014_v47, %v6013_v12  ;;  %v6020_v41 = vsel %vm2752_vm5, %v6019_v59, %v6018_v46  ;;  %v4969_v36 = vcombine.high %v4961_v22, %v4961_v22  ;;  %v5159_v60 = vrot.slane %v4961_v22, %v23735_v28 }
 0x49f   : > { %v6017_v34 = vsel %vm2758_vm11, %v6016_v21, %v6015_v32  ;;  %v6022_v51 = vsel %vm2755_vm7, %v6021_v19, %v6020_v41  ;;  %v4970_v45 = vcombine.high %v4968_v3, %v4968_v3  ;;  %v5175_v5 = vrot.slane %v4968_v3, %v23735_v28 }
 0x4a0   : > { %v6024_v9 = vsel %vm2758_vm11, %v6023_v56, %v6022_v51  ;;  %6064 = vst [vmem:[#allocation3 + $0x20] sm:$0x1e] %v6017_v34  ;;  %v5160_v13 = vcombine.high %v5159_v60, %v5159_v60  ;;  %v5167_v39 = vrot.slane %v4969_v36, %v23735_v28  ;;  %v5569_v53 = vsel %vm1460_vm3, %v5159_v60, -inf }
 0x4a1   : > { %6065 = vst [vmem:[#allocation3 + $0x28] sm:$0x1e] %v6024_v9  ;;  %v5176_v11 = vcombine.high %v5175_v5, %v5175_v5  ;;  %v5183_v29 = vrot.slane %v4970_v45, %v23735_v28  ;;  %v5570_v62 = vrot.slane %v5569_v53, 4  ;;  %v5597_v23 = vsel %vm1460_vm3, %v5175_v5, -inf }
 0x4a2   : > { %v5168_v1 = vcombine.high %v5167_v39, %v5167_v39  ;;  %v5576_v31 = vsel %vm1460_vm3, %v5160_v13, -inf  ;;  %v5583_v44 = vsel %vm1460_vm3, %v5167_v39, -inf  ;;  %v5598_v30 = vrot.slane %v5597_v23, 4 }
 0x4a3   : > { %v5184_v50 = vcombine.high %v5183_v29, %v5183_v29  ;;  %v5571_v49 = vmax.f32 %v5569_v53, %v5570_v62  ;;  %v5577_v6 = vrot.slane %v5576_v31, 4  ;;  %v5584_v42 = vrot.slane %v5583_v44, 4 }
 0x4a4   : > { %v5590_v10 = vsel %vm1460_vm3, %v5168_v1, -inf  ;;  %v5599_v24 = vmax.f32 %v5597_v23, %v5598_v30  ;;  %v5604_v0 = vsel %vm1460_vm3, %v5176_v11, -inf  ;;  %v5611_v33 = vsel %vm1460_vm3, %v5183_v29, -inf }
 0x4a5   : > { %v5572_v20 = vrot.slane %v5571_v49, 2  ;;  %v5578_v57 = vmax.f32 %v5576_v31, %v5577_v6  ;;  %v5585_v55 = vmax.f32 %v5583_v44, %v5584_v42  ;;  %v5591_v15 = vrot.slane %v5590_v10, 4 }
 0x4a6   : > { %v5600_v48 = vrot.slane %v5599_v24, 2  ;;  %v5605_v14 = vrot.slane %v5604_v0, 4  ;;  %v5612_v2 = vrot.slane %v5611_v33, 4  ;;  %v5618_v43 = vsel %vm1460_vm3, %v5184_v50, -inf }
 0x4a7   : > { %v5573_v4 = vmax.f32 %v5571_v49, %v5572_v20  ;;  %v5579_v17 = vrot.slane %v5578_v57, 2  ;;  %v5586_v37 = vrot.slane %v5585_v55, 2  ;;  %v5592_v47 = vmax.f32 %v5590_v10, %v5591_v15 }
 0x4a8   : > { %v5601_v21 = vmax.f32 %v5599_v24, %v5600_v48  ;;  %v5606_v46 = vmax.f32 %v5604_v0, %v5605_v14  ;;  %v5613_v35 = vmax.f32 %v5611_v33, %v5612_v2  ;;  %v5619_v59 = vrot.slane %v5618_v43, 4 }
 0x4a9   : > { %v5574_v19 = vrot.slane %v5573_v4, 1  ;;  %v5580_v22 = vmax.f32 %v5578_v57, %v5579_v17  ;;  %v5587_v12 = vmax.f32 %v5585_v55, %v5586_v37  ;;  %v5593_v56 = vrot.slane %v5592_v47, 2 }
 0x4aa   : > { %v5602_v3 = vrot.slane %v5601_v21, 1  ;;  %v5607_v32 = vrot.slane %v5606_v46, 2  ;;  %v5614_v41 = vrot.slane %v5613_v35, 2  ;;  %v5620_v36 = vmax.f32 %v5618_v43, %v5619_v59 }
 0x4ab   : > { %v25611_v60 = vmax.f32 %v5573_v4, %v5574_v19  ;;  %v5581_v34 = vrot.slane %v5580_v22, 1  ;;  %v5588_v51 = vrot.slane %v5587_v12, 1  ;;  %v5594_v45 = vmax.f32 %v5592_v47, %v5593_v56 }
 0x4ac   : > { %v25613_v5 = vmax.f32 %v5601_v21, %v5602_v3  ;;  %v5608_v9 = vmax.f32 %v5606_v46, %v5607_v32  ;;  %v5615_v13 = vmax.f32 %v5613_v35, %v5614_v41  ;;  %v5621_v39 = vrot.slane %v5620_v36, 2 }
 0x4ad   : > { %v25615_v53 = vmax.f32 %v5580_v22, %v5581_v34  ;;  %v25617_v11 = vmax.f32 %v5587_v12, %v5588_v51  ;;  %v5595_v29 = vrot.slane %v5594_v45, 1  ;;  %v4972_v62 = vcombine.high %v25265_v38, %v25267_v7 }
 0x4ae   : > { %v5609_v23 = vrot.slane %v5608_v9, 1  ;;  %v5616_v1 = vrot.slane %v5615_v13, 1  ;;  %v5622_v31 = vmax.f32 %v5620_v36, %v5621_v39  ;;  %v4979_v44 = vrot.slane %v4971_v16, %v23735_v28 }
 0x4af   : > { %v25625_v30 = vmax.f32 %v5594_v45, %v5595_v29  ;;  %v4986_v50 = vrot.slane %v4972_v62, %v23735_v28  ;;  %v4989_v49 = vcombine.low %v25302_v26, %v25304_v63  ;;  %v4990_v6 = vcombine.high %v25302_v26, %v25304_v63 }
 0x4b0   : > { %v25632_v42 = vmax.f32 %v5608_v9, %v5609_v23  ;;  %v25634_v10 = vmax.f32 %v5615_v13, %v5616_v1  ;;  %v5623_v24 = vrot.slane %v5622_v31, 1  ;;  %v4987_v0 = vcombine.high %v4979_v44, %v4979_v44 }
 0x4b1   : > { %v4988_v33 = vcombine.high %v4986_v50, %v4986_v50  ;;  %v5191_v38 = vrot.slane %v4979_v44, %v23735_v28  ;;  %v5207_v7 = vrot.slane %v4986_v50, %v23735_v28  ;;  %v25639_v16 = vrot.slane %v4989_v49, %v23735_v28 }
 0x4b2   : > { %v25641_v20 = vmax.f32 %v5622_v31, %v5623_v24  ;;  %v5199_v57 = vrot.slane %v4987_v0, %v23735_v28  ;;  %v25645_v26 = vrot.slane %v4990_v6, %v23735_v28  ;;  %v5007_v63 = vcombine.low %v25309_v61, %v25313_v54 }
 0x4b3   : > { %v5192_v55 = vcombine.high %v5191_v38, %v5191_v38  ;;  %v5208_v15 = vcombine.high %v5207_v7, %v5207_v7  ;;  %v5215_v48 = vrot.slane %v4988_v33, %v23735_v28  ;;  %v5625_v14 = vsel %vm1460_vm3, %v5191_v38, -inf }
 0x4b4   : > { %v5200_v2 = vcombine.high %v5199_v57, %v5199_v57  ;;  %v5626_v43 = vrot.slane %v5625_v14, 4  ;;  %v5639_v4 = vsel %vm1460_vm3, %v5199_v57, -inf  ;;  %v5653_v17 = vsel %vm1460_vm3, %v5207_v7, -inf }
 0x4b5   : > { %v5216_v37 = vcombine.high %v5215_v48, %v5215_v48  ;;  %v5632_v47 = vsel %vm1460_vm3, %v5192_v55, -inf  ;;  %v5640_v21 = vrot.slane %v5639_v4, 4  ;;  %v5654_v46 = vrot.slane %v5653_v17, 4 }
 0x4b6   : > { %v5627_v35 = vmax.f32 %v5625_v14, %v5626_v43  ;;  %v5633_v59 = vrot.slane %v5632_v47, 4  ;;  %v5646_v19 = vsel %vm1460_vm3, %v5200_v2, -inf  ;;  %v5660_v22 = vsel %vm1460_vm3, %v5208_v15, -inf }
 0x4b7   : > { %v5641_v12 = vmax.f32 %v5639_v4, %v5640_v21  ;;  %v5647_v56 = vrot.slane %v5646_v19, 4  ;;  %v5655_v3 = vmax.f32 %v5653_v17, %v5654_v46  ;;  %v5661_v32 = vrot.slane %v5660_v22, 4 }
 0x4b8   : > { %v5628_v41 = vrot.slane %v5627_v35, 2  ;;  %v5634_v36 = vmax.f32 %v5632_v47, %v5633_v59  ;;  %v5667_v34 = vsel %vm1460_vm3, %v5215_v48, -inf  ;;  %v5674_v51 = vsel %vm1460_vm3, %v5216_v37, -inf }
 0x4b9   : > { %v5642_v45 = vrot.slane %v5641_v12, 2  ;;  %v5648_v9 = vmax.f32 %v5646_v19, %v5647_v56  ;;  %v5656_v13 = vrot.slane %v5655_v3, 2  ;;  %v5662_v39 = vmax.f32 %v5660_v22, %v5661_v32 }
 0x4ba   : > { %v5629_v29 = vmax.f32 %v5627_v35, %v5628_v41  ;;  %v5635_v62 = vrot.slane %v5634_v36, 2  ;;  %v5668_v23 = vrot.slane %v5667_v34, 4  ;;  %v5675_v1 = vrot.slane %v5674_v51, 4 }
 0x4bb   : > { %v5643_v31 = vmax.f32 %v5641_v12, %v5642_v45  ;;  %v5649_v44 = vrot.slane %v5648_v9, 2  ;;  %v5657_v50 = vmax.f32 %v5655_v3, %v5656_v13  ;;  %v5663_v49 = vrot.slane %v5662_v39, 2 }
 0x4bc   : > { %v5630_v6 = vrot.slane %v5629_v29, 1  ;;  %v5636_v24 = vmax.f32 %v5634_v36, %v5635_v62  ;;  %v5669_v0 = vmax.f32 %v5667_v34, %v5668_v23  ;;  %v5676_v33 = vmax.f32 %v5674_v51, %v5675_v1 }
 0x4bd   : > { %v5644_v38 = vrot.slane %v5643_v31, 1  ;;  %v5650_v7 = vmax.f32 %v5648_v9, %v5649_v44  ;;  %v5658_v57 = vrot.slane %v5657_v50, 1  ;;  %v5664_v55 = vmax.f32 %v5662_v39, %v5663_v49 }
 0x4be   : > { %v5631_v15 = vmax.f32 %v5629_v29, %v5630_v6  ;;  %v5637_v48 = vrot.slane %v5636_v24, 1  ;;  %v5670_v14 = vrot.slane %v5669_v0, 2  ;;  %v5677_v2 = vrot.slane %v5676_v33, 2 }
 0x4bf   : > { %v5645_v43 = vmax.f32 %v5643_v31, %v5644_v38  ;;  %v5651_v4 = vrot.slane %v5650_v7, 1  ;;  %v5659_v17 = vmax.f32 %v5657_v50, %v5658_v57  ;;  %v5665_v37 = vrot.slane %v5664_v55, 1 }
 0x4c0   : > { %v5638_v47 = vmax.f32 %v5636_v24, %v5637_v48  ;;  %v5671_v21 = vmax.f32 %v5669_v0, %v5670_v14  ;;  %v5678_v46 = vmax.f32 %v5676_v33, %v5677_v2  ;;  %v5809_v35 = vmax.f32 %v25611_v60, %v5631_v15 }
 0x4c1   : > { %v5652_v59 = vmax.f32 %v5650_v7, %v5651_v4  ;;  %v5666_v19 = vmax.f32 %v5664_v55, %v5665_v37  ;;  %v5811_v22 = vmax.f32 %v25617_v11, %v5645_v43  ;;  %v5813_v12 = vmax.f32 %v25613_v5, %v5659_v17 }
 0x4c2   : > { %v5672_v56 = vrot.slane %v5671_v21, 1  ;;  %v5679_v3 = vrot.slane %v5678_v46, 1  ;;  %v5810_v32 = vmax.f32 %v25615_v53, %v5638_v47  ;;  %v5853_v41 = vadd.f32 %v25233_v52, %v5809_v35 }
 0x4c3   : > { %v5812_v36 = vmax.f32 %v25625_v30, %v5652_v59  ;;  %v5814_v34 = vmax.f32 %v25632_v42, %v5666_v19  ;;  %v5855_v51 = vadd.f32 %v25233_v52, %v5811_v22  ;;  %v5857_v60 = vadd.f32 %v25233_v52, %v5813_v12 }
 0x4c4   : > { %v5673_v45 = vmax.f32 %v5671_v21, %v5672_v56  ;;  %v5680_v9 = vmax.f32 %v5678_v46, %v5679_v3  ;;  %v5854_v11 = vadd.f32 %v25237_v58, %v5810_v32  ;;  %vm5885_vm9 = vcmp.ge.f32.partialorder %v5853_v41, 0.0 }
 0x4c5   : > { %v5856_v5 = vadd.f32 %v25237_v58, %v5812_v36  ;;  %v5858_v13 = vadd.f32 %v25237_v58, %v5814_v34  ;;  %vm5887_vm2 = vcmp.ge.f32.partialorder %v5855_v51, 0.0  ;;  %vm5889_vm6 = vcmp.ge.f32.partialorder %v5857_v60, 0.0 }
 0x4c6   : > { %v5815_v53 = vmax.f32 %v25634_v10, %v5673_v45  ;;  %v5816_v30 = vmax.f32 %v25641_v20, %v5680_v9  ;;  %vm5886_vm8 = vcmp.ge.f32.partialorder %v5854_v11, 0.0  ;;  %v5917_v42 = vmul.f32 0.1, %v5853_v41 }
 0x4c7   : > { %vm5888_vm10 = vcmp.ge.f32.partialorder %v5856_v5, 0.0  ;;  %vm5890_vm15 = vcmp.ge.f32.partialorder %v5858_v13, 0.0  ;;  %v5918_v39 = vmul.f32 0.1, %v5854_v11  ;;  %v5919_v29 = vmul.f32 0.1, %v5855_v51 }
 0x4c8   : > { %v5859_v62 = vadd.f32 %v25233_v52, %v5815_v53  ;;  %v5860_v23 = vadd.f32 %v25237_v58, %v5816_v30  ;;  %v5920_v1 = vmul.f32 0.1, %v5856_v5  ;;  %v5921_v31 = vmul.f32 0.1, %v5857_v60 }
 0x4c9   : > { %v5922_v44 = vmul.f32 0.1, %v5858_v13  ;;  %v5949_v50 = vsel %vm5885_vm9, %v5853_v41, %v5917_v42  ;;  %v5950_v49 = vsel %vm5886_vm8, %v5854_v11, %v5918_v39  ;;  %v5951_v10 = vsel %vm5887_vm2, %v5855_v51, %v5919_v29 }
 0x4ca   : > { %vm5891_vm0 = vcmp.ge.f32.partialorder %v5859_v62, 0.0  ;;  %vm5892_vm1 = vcmp.ge.f32.partialorder %v5860_v23, 0.0  ;;  %v5923_v20 = vmul.f32 0.1, %v5859_v62  ;;  %v5924_v6 = vmul.f32 0.1, %v5860_v23 }
 0x4cb   : > { %v5952_v24 = vsel %vm5888_vm10, %v5856_v5, %v5920_v1  ;;  %v5953_v0 = vsel %vm5889_vm6, %v5857_v60, %v5921_v31  ;;  %v5954_v33 = vsel %vm5890_vm15, %v5858_v13, %v5922_v44  ;;  %v6025_v38 = vrot.slane %v5949_v50, 7 }
 0x4cc   : > { %v5955_v7 = vsel %vm5891_vm0, %v5859_v62, %v5923_v20  ;;  %v5956_v57 = vsel %vm5892_vm1, %v5860_v23, %v5924_v6  ;;  %v6026_v55 = vrot.slane %v5951_v10, 6  ;;  %v6028_v15 = vrot.slane %v5953_v0, 5 }
 0x4cd   : > { %v6030_v48 = vrot.slane %v5955_v7, 4  ;;  %v6032_v14 = vrot.slane %v5950_v49, 7  ;;  %v6033_v2 = vrot.slane %v5952_v24, 6  ;;  %v6035_v43 = vrot.slane %v5954_v33, 5 }
 0x4ce   : > { %v6027_v4 = vsel %vm2752_vm5, %v6026_v55, %v6025_v38  ;;  %v6037_v17 = vrot.slane %v5956_v57, 4  ;;  %v5005_v37 = vcombine.high %v25639_v16, %v25639_v16  ;;  %v5006_v47 = vcombine.high %v25645_v26, %v25645_v26 }
 0x4cf   : > { %v6029_v21 = vsel %vm2755_vm7, %v6028_v15, %v6027_v4  ;;  %v6034_v46 = vsel %vm2752_vm5, %v6033_v2, %v6032_v14  ;;  %v5223_v35 = vrot.slane %v25639_v16, %v23735_v28  ;;  %v5239_v59 = vrot.slane %v25645_v26, %v23735_v28 }
 0x4d0   : > { %v6031_v19 = vsel %vm2758_vm11, %v6030_v48, %v6029_v21  ;;  %v6036_v22 = vsel %vm2755_vm7, %v6035_v43, %v6034_v46  ;;  %v5231_v12 = vrot.slane %v5005_v37, %v23735_v28  ;;  %v5247_v56 = vrot.slane %v5006_v47, %v23735_v28 }
 0x4d1   : > { %v6038_v3 = vsel %vm2758_vm11, %v6037_v17, %v6036_v22  ;;  %6066 = vst [vmem:[#allocation3 + $0x30] sm:$0x1e] %v6031_v19  ;;  %v5224_v32 = vcombine.high %v5223_v35, %v5223_v35  ;;  %v5240_v41 = vcombine.high %v5239_v59, %v5239_v59  ;;  %v5681_v36 = vsel %vm1460_vm3, %v5223_v35, -inf }
 0x4d2   : > { %6067 = vst [vmem:[#allocation3 + $0x38] sm:$0x1e] %v6038_v3  ;;  %v5232_v16 = vcombine.high %v5231_v12, %v5231_v12  ;;  %v5248_v34 = vcombine.high %v5247_v56, %v5247_v56  ;;  %v5682_v51 = vrot.slane %v5681_v36, 4  ;;  %v5695_v26 = vsel %vm1460_vm3, %v5231_v12, -inf  ;;  %v6073_v12 = vld [vmem:[#allocation3 + $0x18] sm:$0x3f] }
 0x4d3   : > { %v5688_v60 = vsel %vm1460_vm3, %v5224_v32, -inf  ;;  %v5696_v45 = vrot.slane %v5695_v26, 4  ;;  %v5709_v9 = vsel %vm1460_vm3, %v5239_v59, -inf  ;;  %v5716_v11 = vsel %vm1460_vm3, %v5240_v41, -inf }
 0x4d4   : > { %v5683_v5 = vmax.f32 %v5681_v36, %v5682_v51  ;;  %v5689_v13 = vrot.slane %v5688_v60, 4  ;;  %v5702_v53 = vsel %vm1460_vm3, %v5232_v16, -inf  ;;  %v5710_v30 = vrot.slane %v5709_v9, 4  ;;  %v25711_v36 = vld [vmem:[#allocation3 + $0x28] sm:$0x3f] }
 0x4d5   : > { %v5697_v42 = vmax.f32 %v5695_v26, %v5696_v45  ;;  %v5703_v39 = vrot.slane %v5702_v53, 4  ;;  %v5717_v29 = vrot.slane %v5716_v11, 4  ;;  %v5723_v62 = vsel %vm1460_vm3, %v5247_v56, -inf }
 0x4d6   : > { %v5684_v23 = vrot.slane %v5683_v5, 2  ;;  %v5690_v1 = vmax.f32 %v5688_v60, %v5689_v13  ;;  %v5711_v31 = vmax.f32 %v5709_v9, %v5710_v30  ;;  %v5724_v44 = vrot.slane %v5723_v62, 4  ;;  %v6072_v60 = vld [vmem:[#allocation3 + $0x10] sm:$0x3f]  ;;  %v25728_v13 = vld [vmem:[#allocation3 + $0x20] sm:$0x3f] }
 0x4d7   : > { %v5698_v50 = vrot.slane %v5697_v42, 2  ;;  %v5704_v49 = vmax.f32 %v5702_v53, %v5703_v39  ;;  %v5718_v10 = vmax.f32 %v5716_v11, %v5717_v29  ;;  %v5730_v20 = vsel %vm1460_vm3, %v5248_v34, -inf }
 0x4d8   : > { %v5685_v6 = vmax.f32 %v5683_v5, %v5684_v23  ;;  %v5691_v24 = vrot.slane %v5690_v1, 2  ;;  %v5712_v0 = vrot.slane %v5711_v31, 2  ;;  %v5725_v33 = vmax.f32 %v5723_v62, %v5724_v44  ;;  %v25731_v29 = vld [vmem:[#allocation3 + $0x30] sm:$0x3f] }
 0x4d9   : > { %v5699_v38 = vmax.f32 %v5697_v42, %v5698_v50  ;;  %v5705_v7 = vrot.slane %v5704_v49, 2  ;;  %v5719_v57 = vrot.slane %v5718_v10, 2  ;;  %v5731_v55 = vrot.slane %v5730_v20, 4  ;;  %v25721_v45 = vld [vmem:[#allocation3 + $0x38] sm:$0x3f] }
 0x4da   : > { %v5686_v15 = vrot.slane %v5685_v6, 1  ;;  %v5692_v48 = vmax.f32 %v5690_v1, %v5691_v24  ;;  %v5713_v14 = vmax.f32 %v5711_v31, %v5712_v0  ;;  %v5726_v2 = vrot.slane %v5725_v33, 2 }
 0x4db   : > { %v5700_v43 = vrot.slane %v5699_v38, 1  ;;  %v5706_v4 = vmax.f32 %v5704_v49, %v5705_v7  ;;  %v5720_v17 = vmax.f32 %v5718_v10, %v5719_v57  ;;  %v5732_v37 = vmax.f32 %v5730_v20, %v5731_v55 }
 0x4dc   : > { %v5693_v47 = vrot.slane %v5692_v48, 1  ;;  %v5714_v21 = vrot.slane %v5713_v14, 1  ;;  %v5727_v46 = vmax.f32 %v5725_v33, %v5726_v2  ;;  %v25703_v35 = vmax.f32 %v5685_v6, %v5686_v15 }
 0x4dd   : > { %v5707_v59 = vrot.slane %v5706_v4, 1  ;;  %v5721_v19 = vrot.slane %v5720_v17, 1  ;;  %v5733_v22 = vrot.slane %v5732_v37, 2  ;;  %v25707_v3 = vmax.f32 %v5699_v38, %v5700_v43 }
 0x4de   : > { %v25705_v56 = vmax.f32 %v5692_v48, %v5693_v47  ;;  %v5728_v32 = vrot.slane %v5727_v46, 1  ;;  %v5008_v41 = vcombine.high %v25309_v61, %v25313_v54  ;;  %v25715_v34 = vmax.f32 %v5713_v14, %v5714_v21 }
 0x4df   : > { %v25713_v16 = vmax.f32 %v5706_v4, %v5707_v59  ;;  %v5734_v51 = vmax.f32 %v5732_v37, %v5733_v22  ;;  %v5015_v26 = vrot.slane %v5007_v63, %v23735_v28  ;;  %v25723_v9 = vmax.f32 %v5720_v17, %v5721_v19 }
 0x4e0   : > { %v25725_v11 = vmax.f32 %v5727_v46, %v5728_v32  ;;  %v5022_v5 = vrot.slane %v5008_v41, %v23735_v28  ;;  %v18336_v53 = vpack.c.bf16 %v6073_v12, %v6072_v60  ;;  %v18337_v61 = vpack.c.bf16 %v25711_v36, %v25728_v13 }
 0x4e1   : > { %v5735_v30 = vrot.slane %v5734_v51, 1  ;;  %v5023_v42 = vcombine.high %v5015_v26, %v5015_v26  ;;  %v5255_v39 = vrot.slane %v5015_v26, %v23735_v28  ;;  %v18338_v23 = vpack.c.bf16 %v25721_v45, %v25731_v29 }
 0x4e2   : > { %v5024_v54 = vcombine.high %v5022_v5, %v5022_v5  ;;  %v5271_v63 = vrot.slane %v5022_v5, %v23735_v28  ;;  %v25737_v62 = vrot.slane %v18336_v53, %v23735_v28 }
 0x4e3   : > { %v25741_v1 = vmax.f32 %v5734_v51, %v5735_v30  ;;  %v5256_v31 = vcombine.high %v5255_v39, %v5255_v39  ;;  %v5263_v44 = vrot.slane %v5023_v42, %v23735_v28  ;;  %v5737_v50 = vsel %vm1460_vm3, %v5255_v39, -inf }
 0x4e4   : > { %v5272_v49 = vcombine.high %v5271_v63, %v5271_v63  ;;  %v5279_v10 = vrot.slane %v5024_v54, %v23735_v28  ;;  %v5738_v20 = vrot.slane %v5737_v50, 4  ;;  %v5765_v6 = vsel %vm1460_vm3, %v5271_v63, -inf }
 0x4e5   : > { %v5264_v24 = vcombine.high %v5263_v44, %v5263_v44  ;;  %v5744_v0 = vsel %vm1460_vm3, %v5256_v31, -inf  ;;  %v5751_v33 = vsel %vm1460_vm3, %v5263_v44, -inf  ;;  %v5766_v38 = vrot.slane %v5765_v6, 4 }
 0x4e6   : > { %v5280_v7 = vcombine.high %v5279_v10, %v5279_v10  ;;  %v5739_v57 = vmax.f32 %v5737_v50, %v5738_v20  ;;  %v5745_v55 = vrot.slane %v5744_v0, 4  ;;  %v5752_v15 = vrot.slane %v5751_v33, 4 }
 0x4e7   : > { %v5758_v48 = vsel %vm1460_vm3, %v5264_v24, -inf  ;;  %v5767_v14 = vmax.f32 %v5765_v6, %v5766_v38  ;;  %v5772_v2 = vsel %vm1460_vm3, %v5272_v49, -inf  ;;  %v5779_v43 = vsel %vm1460_vm3, %v5279_v10, -inf }
 0x4e8   : > { %v5740_v4 = vrot.slane %v5739_v57, 2  ;;  %v5746_v17 = vmax.f32 %v5744_v0, %v5745_v55  ;;  %v5753_v37 = vmax.f32 %v5751_v33, %v5752_v15  ;;  %v5759_v47 = vrot.slane %v5758_v48, 4 }
 0x4e9   : > { %v5768_v21 = vrot.slane %v5767_v14, 2  ;;  %v5773_v46 = vrot.slane %v5772_v2, 4  ;;  %v5780_v59 = vrot.slane %v5779_v43, 4  ;;  %v5786_v19 = vsel %vm1460_vm3, %v5280_v7, -inf }
 0x4ea   : > { %v5741_v22 = vmax.f32 %v5739_v57, %v5740_v4  ;;  %v5747_v12 = vrot.slane %v5746_v17, 2  ;;  %v5754_v32 = vrot.slane %v5753_v37, 2  ;;  %v5760_v41 = vmax.f32 %v5758_v48, %v5759_v47 }
 0x4eb   : > { %v5769_v51 = vmax.f32 %v5767_v14, %v5768_v21  ;;  %v5774_v26 = vmax.f32 %v5772_v2, %v5773_v46  ;;  %v5781_v60 = vmax.f32 %v5779_v43, %v5780_v59  ;;  %v5787_v5 = vrot.slane %v5786_v19, 4 }
 0x4ec   : > { %v5742_v53 = vrot.slane %v5741_v22, 1  ;;  %v5748_v30 = vmax.f32 %v5746_v17, %v5747_v12  ;;  %v5755_v42 = vmax.f32 %v5753_v37, %v5754_v32  ;;  %v5761_v39 = vrot.slane %v5760_v41, 2 }
 0x4ed   : > { %v5770_v54 = vrot.slane %v5769_v51, 1  ;;  %v5775_v63 = vrot.slane %v5774_v26, 2  ;;  %v5782_v31 = vrot.slane %v5781_v60, 2  ;;  %v5788_v44 = vmax.f32 %v5786_v19, %v5787_v5 }
 0x4ee   : > { %v5743_v50 = vmax.f32 %v5741_v22, %v5742_v53  ;;  %v5749_v49 = vrot.slane %v5748_v30, 1  ;;  %v5756_v10 = vrot.slane %v5755_v42, 1  ;;  %v5762_v20 = vmax.f32 %v5760_v41, %v5761_v39 }
 0x4ef   : > { %v5771_v6 = vmax.f32 %v5769_v51, %v5770_v54  ;;  %v5776_v24 = vmax.f32 %v5774_v26, %v5775_v63  ;;  %v5783_v0 = vmax.f32 %v5781_v60, %v5782_v31  ;;  %v5789_v33 = vrot.slane %v5788_v44, 2 }
 0x4f0   : > { %v5750_v38 = vmax.f32 %v5748_v30, %v5749_v49  ;;  %v5757_v7 = vmax.f32 %v5755_v42, %v5756_v10  ;;  %v5763_v57 = vrot.slane %v5762_v20, 1  ;;  %v5817_v55 = vmax.f32 %v25703_v35, %v5743_v50  ;;  %v6070_v10 = vld [vmem:[#allocation3] sm:$0x3f] }
 0x4f1   : > { %v5777_v15 = vrot.slane %v5776_v24, 1  ;;  %v5784_v48 = vrot.slane %v5783_v0, 1  ;;  %v5790_v14 = vmax.f32 %v5788_v44, %v5789_v33  ;;  %v5821_v2 = vmax.f32 %v25715_v34, %v5771_v6 }
 0x4f2   : > { %v5764_v43 = vmax.f32 %v5762_v20, %v5763_v57  ;;  %v5818_v4 = vmax.f32 %v25705_v56, %v5750_v38  ;;  %v5819_v17 = vmax.f32 %v25707_v3, %v5757_v7  ;;  %v5861_v37 = vadd.f32 %v25233_v52, %v5817_v55 }
 0x4f3   : > { %v5778_v47 = vmax.f32 %v5776_v24, %v5777_v15  ;;  %v5785_v21 = vmax.f32 %v5783_v0, %v5784_v48  ;;  %v5791_v46 = vrot.slane %v5790_v14, 1  ;;  %v5865_v59 = vadd.f32 %v25233_v52, %v5821_v2 }
 0x4f4   : > { %v5820_v19 = vmax.f32 %v25713_v16, %v5764_v43  ;;  %v5862_v35 = vadd.f32 %v25237_v58, %v5818_v4  ;;  %v5863_v22 = vadd.f32 %v25233_v52, %v5819_v17  ;;  %vm5893_vm9 = vcmp.ge.f32.partialorder %v5861_v37, 0.0 }
 0x4f5   : > { %v5792_v34 = vmax.f32 %v5790_v14, %v5791_v46  ;;  %v5822_v12 = vmax.f32 %v25723_v9, %v5778_v47  ;;  %v5823_v56 = vmax.f32 %v25725_v11, %v5785_v21  ;;  %vm5897_vm2 = vcmp.ge.f32.partialorder %v5865_v59, 0.0 }
 0x4f6   : > { %v5864_v3 = vadd.f32 %v25237_v58, %v5820_v19  ;;  %vm5894_vm6 = vcmp.ge.f32.partialorder %v5862_v35, 0.0  ;;  %vm5895_vm8 = vcmp.ge.f32.partialorder %v5863_v22, 0.0  ;;  %v5925_v32 = vmul.f32 0.1, %v5861_v37 }
 0x4f7   : > { %v5824_v41 = vmax.f32 %v25741_v1, %v5792_v34  ;;  %v5866_v16 = vadd.f32 %v25237_v58, %v5822_v12  ;;  %v5867_v51 = vadd.f32 %v25233_v52, %v5823_v56  ;;  %v5926_v26 = vmul.f32 0.1, %v5862_v35 }
 0x4f8   : > { %vm5896_vm10 = vcmp.ge.f32.partialorder %v5864_v3, 0.0  ;;  %v5927_v60 = vmul.f32 0.1, %v5863_v22  ;;  %v5928_v5 = vmul.f32 0.1, %v5864_v3  ;;  %v5957_v9 = vsel %vm5893_vm9, %v5861_v37, %v5925_v32 }
 0x4f9   : > { %v5868_v11 = vadd.f32 %v25237_v58, %v5824_v41  ;;  %vm5898_vm15 = vcmp.ge.f32.partialorder %v5866_v16, 0.0  ;;  %vm5899_vm0 = vcmp.ge.f32.partialorder %v5867_v51, 0.0  ;;  %v5929_v53 = vmul.f32 0.1, %v5865_v59  ;;  %v6071_v58 = vld [vmem:[#allocation3 + $0x8] sm:$0x3f] }
 0x4fa   : > { %v5930_v30 = vmul.f32 0.1, %v5866_v16  ;;  %v5931_v42 = vmul.f32 0.1, %v5867_v51  ;;  %v5958_v39 = vsel %vm5894_vm6, %v5862_v35, %v5926_v26  ;;  %v5959_v1 = vsel %vm5895_vm8, %v5863_v22, %v5927_v60 }
 0x4fb   : > { %vm5900_vm1 = vcmp.ge.f32.partialorder %v5868_v11, 0.0  ;;  %v5932_v54 = vmul.f32 0.1, %v5868_v11  ;;  %v5960_v52 = vsel %vm5896_vm10, %v5864_v3, %v5928_v5  ;;  %v5961_v63 = vsel %vm5897_vm2, %v5865_v59, %v5929_v53  ;;  %v21812_v53 = vld [vmem:[%s30438_s3 + $0x680] ss:$12 sps:$4 sm:$0xff]  }
 0x4fc   : > { %v5962_v31 = vsel %vm5898_vm15, %v5866_v16, %v5930_v30  ;;  %v5963_v44 = vsel %vm5899_vm0, %v5867_v51, %v5931_v42  ;;  %v6039_v50 = vrot.slane %v5957_v9, 7  ;;  %v6040_v49 = vrot.slane %v5959_v1, 6 }
 0x4fd   : > { %v5964_v20 = vsel %vm5900_vm1, %v5868_v11, %v5932_v54  ;;  %v6042_v6 = vrot.slane %v5961_v63, 5  ;;  %v25777_v24 = vrot.slane %v18337_v61, %v23735_v28  ;;  %v6044_v33 = vrot.slane %v5963_v44, 4 }
 0x4fe   : > { %v6041_v0 = vsel %vm2752_vm5, %v6040_v49, %v6039_v50  ;;  %v6046_v38 = vrot.slane %v5958_v39, 7  ;;  %v6047_v7 = vrot.slane %v5960_v52, 6  ;;  %v6049_v55 = vrot.slane %v5962_v31, 5 }
 0x4ff   : > { %v6043_v57 = vsel %vm2755_vm7, %v6042_v6, %v6041_v0  ;;  %v25785_v15 = vrot.slane %v18338_v23, %v23735_v28  ;;  %v18335_v48 = vpack.c.bf16 %v6071_v58, %v6070_v10  ;;  %v6051_v13 = vrot.slane %v5964_v20, 4 }
 0x500   : > { %v6045_v14 = vsel %vm2758_vm11, %v6044_v33, %v6043_v57  ;;  %v6048_v36 = vsel %vm2752_vm5, %v6047_v7, %v6046_v38  ;;  %v25791_v61 = vcombine.high %v25737_v62, %v25737_v62  ;;  %v25799_v45 = vcombine.high %v25777_v24, %v25777_v24 }
 0x501   : > { %v6050_v2 = vsel %vm2755_vm7, %v6049_v55, %v6048_v36  ;;  %6068 = vst [vmem:[#allocation3 + $0x40] sm:$0x1e] %v6045_v14  ;;  %v25795_v43 = vrot.slane %v18335_v48, %v23735_v28  ;;  %v25804_v23 = vcombine.high %v25785_v15, %v25785_v15  ;;  %vm6202_vm9 = vsmask.f32 1280 }
 0x502   : > { %v6052_v29 = vsel %vm2758_vm11, %v6051_v13, %v6050_v2  ;;  %vm6203_vm2 = vsmask.f32 3336  ;;  %vm6205_vm8 = vsmask.f32 5392  ;;  %v6224_v47 = vshrl.u32 %v25737_v62, 16 }
 0x503   : > { %6069 = vst [vmem:[#allocation3 + $0x48] sm:$0x1e] %v6052_v29  ;;  %v25808_v4 = vcombine.high %v25795_v43, %v25795_v43  ;;  %vm6204_vm6 = vmor %vm6202_vm9, %vm6203_vm2  ;;  %v6210_v17 = vshrl.u32 %v25795_v43, 16  ;;  %v6213_v37 = vshll.u32 %v25795_v43, 16  ;;  %v6227_v21 = vshll.u32 %v25737_v62, 16 }
 0x504   : > { %v6233_v46 = vshll.u32 %v25791_v61, 16  ;;  %v6238_v59 = vshrl.u32 %v25777_v24, 16  ;;  %v6241_v34 = vshll.u32 %v25777_v24, 16  ;;  %vm6206_vm10 = vmor %vm6204_vm6, %vm6205_vm8  ;;  %vm6207_vm15 = vsmask.f32 7448 }
 0x505   : > { %v6212_v19 = vrot.slane %v6210_v17, 6  ;;  %v6215_v35 = vrot.slane %v6213_v37, 7  ;;  %v6219_v22 = vshll.u32 %v25808_v4, 16  ;;  %v6226_v12 = vrot.slane %v6224_v47, 6  ;;  %vm25822_vm0 = vmor %vm6206_vm10, %vm6207_vm15 }
 0x506   : > { %v6229_v56 = vrot.slane %v6227_v21, 7  ;;  %v6240_v3 = vrot.slane %v6238_v59, 6  ;;  %v7579_v32 = vcombine.low %v25737_v62, %v25777_v24  ;;  %v6235_v16 = vrot.slane %v6233_v46, 7 }
 0x507   : > { %v6216_v41 = vor.u32 %v6215_v35, %v6212_v19  ;;  %v6243_v51 = vrot.slane %v6241_v34, 7  ;;  %v6221_v26 = vrot.slane %v6219_v22, 7  ;;  %v6252_v5 = vshrl.u32 %v25785_v15, 16 }
 0x508   : > { %v6230_v60 = vor.u32 %v6229_v56, %v6226_v12  ;;  %v6255_v9 = vshll.u32 %v25785_v15, 16  ;;  %v6078_v11 = vld [vmem:[#allocation3 + $0x40] sm:$0x3f]  ;;  %v6247_v39 = vshll.u32 %v25799_v45, 16  ;;  %v6261_v1 = vshll.u32 %v25804_v23, 16 }
 0x509   : > { %v6217_v30 = vrot.slane %v6216_v41, 2  ;;  %v6244_v42 = vor.u32 %v6243_v51, %v6240_v3  ;;  %v6254_v63 = vrot.slane %v6252_v5, 6  ;;  %vm7050_vm1 = vcmask 1040384   ;;  %v21792_v56 = vld [vmem:[%s30438_s3 + $0x608] ss:$12 sps:$4 sm:$0xff]  }
 0x50a   : > { %v6079_v54 = vld [vmem:[#allocation3 + $0x48] sm:$0x3f]  ;;  %v6231_v52 = vrot.slane %v6230_v60, 2  ;;  %v6257_v31 = vrot.slane %v6255_v9, 7  ;;  %vm7052_vm9 = vmor %vm7050_vm1, %vm2752_vm5  ;;  %v7587_v6 = vrot.slane %v7579_v32, %v23735_v28  ;;  %v6249_v0 = vrot.slane %v6247_v39, 7 }
 0x50b   : > { %v18615_v44 = vpack.c.bf16 %v6079_v54, %v6078_v11  ;;  %v6222_v50 = vsel %vm25822_vm0, %v6217_v30, %v6221_v26  ;;  %v6245_v10 = vrot.slane %v6244_v42, 2  ;;  %v6263_v38 = vrot.slane %v6261_v1, 7  ;;  %vm25857_vm2 = vmor %vm7052_vm9, %vm2758_vm11  ;;  %v6080_v51 = vld [vmem:[#allocation3 + $0x50] sm:$0x3f]  ;;  %v6081_v26 = vld [vmem:[#allocation3 + $0x58] sm:$0x3f] }
 0x50c   : > { %v25832_v49 = vsel %vm25822_vm0, %v6231_v52, %v6235_v16  ;;  %v6258_v58 = vor.u32 %v6257_v31, %v6254_v63  ;;  %v7067_v29 = vrot.slane %v25799_v45, 7  ;;  %v18501_v21 = vrot.slane %v25777_v24, 9  ;;  %vm25883_vm11 = vmor %vm25857_vm2, %vm2764_vm13  ;;  %v21793_v9 = vld [vmem:[%s30438_s3 + $0x188] ss:$12 sps:$4 sm:$0xff]   ;;  %v21795_v42 = vld [vmem:[%s30438_s3 + $0x260] ss:$12 sps:$4 sm:$0xff]  }
 0x50d   : > { %v25835_v20 = vrot.slane %v18615_v44, %v23735_v28  ;;  %v6330_v57 = vcombine.low %v6222_v50, %v25832_v49  ;;  %v25849_v14 = vsel %vm25822_vm0, %v6245_v10, %v6249_v0  ;;  %v18502_v19 = vrot.slane %v25785_v15, 9  ;;  %v21798_v50 = vld [vmem:[%s30438_s3 + $0x6f8] ss:$12 sps:$4 sm:$0xff]   ;;  %v21810_v3 = vld [vmem:[%s30438_s3 + $0x740] ss:$12 sps:$4 sm:$0xff]  }
 0x50e   : > { %v6259_v33 = vrot.slane %v6258_v58, 2  ;;  %v7071_v35 = vrot.slane %v25804_v23, 7  ;;  %v21794_v23 = vld [vmem:[%s30438_s3 + $0x6e0] ss:$12 sps:$4 sm:$0xff]   ;;  %v25892_v41 = vsel %vm25883_vm11, %v18501_v21, %v7067_v29  ;;  %v7063_v11 = vrot.slane %v25791_v61, 7 }
 0x50f   : > { %v7580_v7 = vcombine.low %v25785_v15, %v25835_v20  ;;  %v25844_v55 = vcombine.high %v25835_v20, %v25835_v20  ;;  %v7947_v48 = vshrl.u32 %v25835_v20, 16  ;;  %v7950_v13 = vshll.u32 %v25835_v20, 16  ;;  %v21796_v61 = vld [vmem:[%s30438_s3 + $0x620] ss:$12 sps:$4 sm:$0xff]  }
 0x510   : > { %v25853_v36 = vsel %vm25822_vm0, %v6259_v33, %v6263_v38  ;;  %v6338_v45 = vrot.slane %v6330_v57, %v23735_v28  ;;  %v25896_v16 = vsel %vm25883_vm11, %v18502_v19, %v7071_v35  ;;  %v6690_v54 = vcombine.low %v25795_v43, %v25737_v62 }
 0x511   : > { %v7594_v17 = vrot.slane %v7580_v7, %v23735_v28  ;;  %v6331_v37 = vcombine.low %v25849_v14, %v25853_v36  ;;  %v7949_v47 = vrot.slane %v7947_v48, 6  ;;  %v7952_v46 = vrot.slane %v7950_v13, 7 }
 0x512   : > { %v7956_v59 = vshll.u32 %v25844_v55, 16  ;;  %v7139_v30 = vcombine.low %v25892_v41, %v25896_v16  ;;  %v6691_v52 = vcombine.low %v25777_v24, %v25785_v15  ;;  %v8025_v63 = vcombine.low %v25832_v49, %v25849_v14 }
 0x513   : > { %v25869_v22 = vcombine.low %v7587_v6, %v7594_v17  ;;  %v25871_v34 = vcombine.high %v7587_v6, %v7594_v17  ;;  %v25875_v12 = vrot.slane %v6331_v37, %v23735_v28  ;;  %v7953_v32 = vor.u32 %v7952_v46, %v7949_v47  ;;  %v21801_v37 = vld [vmem:[%s30438_s3 + $0x1b8] ss:$12 sps:$4 sm:$0xff]  }
 0x514   : > { %v7958_v1 = vrot.slane %v7956_v59, 7  ;;  %v18953_v31 = vpack.c.bf16 %v6081_v26, %v6080_v51  ;;  %v18499_v44 = vrot.slane %v25795_v43, 9  ;;  %v18500_v15 = vrot.slane %v25737_v62, 9  ;;  %v21797_v43 = vld [vmem:[%s30438_s3 + $0x1a0] ss:$12 sps:$4 sm:$0xff]  }
 0x515   : > { %7930 = vmatprep.mubr.bf16.mxu1 %v25871_v34  ;;  %v25900_v60 = vcombine.low %v6338_v45, %v25875_v12  ;;  %v6347_v5 = vcombine.high %v6338_v45, %v25875_v12  ;;  %v7954_v39 = vrot.slane %v7953_v32, 2  ;;  %v25933_v10 = vrot.slane %v6690_v54, %v23735_v28  ;;  %v21799_v62 = vld [vmem:[%s30438_s3 + $0x278] ss:$12 sps:$4 sm:$0xff]   ;;  %v21803_v59 = vld [vmem:[%s30438_s3 + $0x290] ss:$12 sps:$4 sm:$0xff]  }
 0x516   : > { %7931 = vmatmul.mubr.bf16.vlgmr.msra.gmra.mrb[16].mxu1 %v25869_v22  ;;  %v25936_v49 = vrot.slane %v6691_v52, %v23735_v28  ;;  %v7059_v6 = vrot.slane %v25808_v4, 7  ;;  %v25949_v0 = vsel %vm25883_vm11, %v18500_v15, %v7063_v11  ;;  %v25952_v33 = vrot.slane %v18953_v31, %v23735_v28  ;;  %v21800_v4 = vld [vmem:[%s30438_s3 + $0x638] ss:$12 sps:$4 sm:$0xff]   ;;  %v21806_v26 = vld [vmem:[%s30438_s3 + $0x728] ss:$12 sps:$4 sm:$0xff]  }
 0x517   : > { %6638 = vmatprep.mubr.bf16.mxu0 %v6347_v5  ;;  %21080 = vmatpush3.bf16.msra.mxu1 %v21792_v56  ;;  %v25929_v24 = vsel %vm25822_vm0, %v7954_v39, %v7958_v1  ;;  %v25962_v7 = vrot.slane %v8025_v63, %v23735_v28  ;;  %v8393_v48 = vrot.slane %v25844_v55, 7  ;;  %v18840_v13 = vrot.slane %v25835_v20, 9  ;;  %v21804_v56 = vld [vmem:[%s30438_s3 + $0x650] ss:$12 sps:$4 sm:$0xff]   ;;  %v21807_v1 = vld [vmem:[%s30438_s3 + $0x2a8] ss:$12 sps:$4 sm:$0xff]  }
 0x518   : > { %6639 = vmatmul.mubr.bf16.vlgmr.msra.gmra.mrb[32].mxu0 %v25900_v60  ;;  %21081 = vmatprep.subr.bf16.mxu1 %v21794_v23  ;;  %v8026_v58 = vcombine.low %v25853_v36, %v25929_v24  ;;  %v25956_v38 = vcombine.low %v25933_v10, %v25936_v49  ;;  %v7060_v14 = vsel %vm25883_vm11, %v18499_v44, %v7059_v6  ;;  %v21802_v36 = vld [vmem:[%s30438_s3 + $0x710] ss:$12 sps:$4 sm:$0xff]   ;;  %v9261_v29 = vshrl.u32 %v25952_v33, 16  ;;  %v21809_v44 = vld [vmem:[%s30438_s3 + $0x1e8] ss:$12 sps:$4 sm:$0xff]  }
 0x519   : > { %20992 = vmatpush3.bf16.msra.mxu0 %v21793_v9  ;;  %6681 = vmatprep.mubr.bf16.mxu0 %v6347_v5  ;;  %v9259_v2 = vcombine.high %v25952_v33, %v25952_v33  ;;  %v9264_v17 = vshll.u32 %v25952_v33, 16  ;;  %v7153_v47 = vrot.slane %v7139_v30, %v23735_v28  ;;  %v19178_v21 = vrot.slane %v25952_v33, 9  ;;  %v21805_v11 = vld [vmem:[%s30438_s3 + $0x1d0] ss:$12 sps:$4 sm:$0xff]   ;;  %v21811_v15 = vld [vmem:[%s30438_s3 + $0x2c0] ss:$12 sps:$4 sm:$0xff]  }
 0x51a   : > { %20993 = vmatprep.subr.bf16.mxu0 %v21795_v42  ;;  %v25965_v57 = vrot.slane %v8026_v58, %v23735_v28  ;;  %v7138_v46 = vcombine.low %v7060_v14, %v25949_v0  ;;  %v9263_v19 = vrot.slane %v9261_v29, 6  ;;  %v8394_v23 = vsel %vm25883_vm11, %v18840_v13, %v8393_v48  ;;  %v21815_v14 = vld [vmem:[%s30438_s3 + $0x2d8] ss:$12 sps:$4 sm:$0xff]   ;;  %v21818_v13 = vld [vmem:[%s30438_s3 + $0x770] ss:$12 sps:$4 sm:$0xff]  }
 0x51b   : > { %21082 = vmatpush3.bf16.msra.mxu1 %v21796_v61  ;;  %v9266_v35 = vrot.slane %v9264_v17, 7  ;;  %v9270_v45 = vshll.u32 %v9259_v2, 16  ;;  %v9699_v32 = vrot.slane %v9259_v2, 7  ;;  %v21808_v61 = vld [vmem:[%s30438_s3 + $0x668] ss:$12 sps:$4 sm:$0xff]   ;;  %v8461_v2 = vcombine.low %v25896_v16, %v8394_v23 }
 0x51c   : > { %21083 = vmatprep.subr.bf16.mxu1 %v21798_v50  ;;  %v25980_v55 = vcombine.high %v25962_v7, %v25965_v57  ;;  %v7146_v51 = vrot.slane %v7138_v46, %v23735_v28  ;;  %v21819_v29 = vld [vmem:[%s30438_s3 + $0x2f0] ss:$12 sps:$4 sm:$0xff]   ;;  %vm10856_vm1 = vsmask.f32 256  ;;  %vm10857_vm9 = vsmask.f32 1284 }
 0x51d   : > { %20994 = vmatpush3.bf16.msra.mxu0 %v21797_v43  ;;  %v9267_v5 = vor.u32 %v9266_v35, %v9263_v19  ;;  %v9272_v9 = vrot.slane %v9270_v45, 7  ;;  %v9700_v30 = vsel %vm25883_vm11, %v19178_v21, %v9699_v32  ;;  %v21820_v17 = vld [vmem:[%s30438_s3 + $0x6b0] ss:$12 sps:$4 sm:$0xff]   ;;  %v26077_v21 = vrot.slane %v8461_v2, %v23735_v28  ;;  %v21827_v19 = vld [vmem:[%s30438_s3 + $0x860] ss:$12 sps:$4 sm:$0xff]  }
 0x51e   : > { %20995 = vmatprep.subr.bf16.mxu0 %v21799_v62  ;;  %8376 = vmatprep.mubr.bf16.mxu1 %v25980_v55  ;;  %v26006_v42 = vcombine.high %v7146_v51, %v7153_v47  ;;  %v26008_v39 = vcombine.low %v7146_v51, %v7153_v47  ;;  %v9766_v52 = vcombine.low %v8394_v23, %v9700_v30  ;;  %v21813_v62 = vld [vmem:[%s30438_s3 + $0x200] ss:$12 sps:$4 sm:$0xff]   ;;  %v21821_v16 = vld [vmem:[%s30438_s3 + $0x230] ss:$12 sps:$4 sm:$0xff]   ;;  %v21832_v23 = vld [vmem:[%s30438_s3 + $0x878] ss:$12 sps:$4 sm:$0xff]  }
 0x51f   : > { %21084 = vmatpush3.bf16.msra.mxu1 %v21800_v4  ;;  %v9268_v54 = vrot.slane %v9267_v5, 2  ;;  %v21825_v46 = vld [vmem:[%s30438_s3 + $0x4] ss:$12 sps:$4 sm:$0xff]   ;;  %v21823_v35 = vld [vmem:[%s30438_s3] ss:$12 sps:$4 sm:$0xff]  }
 0x520   : > { %21085 = vmatprep.subr.bf16.mxu1 %v21802_v36  ;;  %v9773_v31 = vrot.slane %v9766_v52, %v23735_v28  ;;  %v21816_v36 = vld [vmem:[%s30438_s3 + $0x698] ss:$12 sps:$4 sm:$0xff]   ;;  %v21837_v51 = vld [vmem:[%s30438_s3 + $0x890] ss:$12 sps:$4 sm:$0xff]   ;;  %v21838_v30 = vld [vmem:[%s30438_s3 + $0x48] ss:$12 sps:$4 sm:$0xff]  }
 0x521   : > { %20996 = vmatpush3.bf16.msra.mxu0 %v21801_v37  ;;  %v9273_v63 = vsel %vm25822_vm0, %v9268_v54, %v9272_v9  ;;  %v8460_v37 = vcombine.low %v25949_v0, %v25892_v41  ;;  %v21826_v41 = vld [vmem:[%s30438_s3 + $0x788] ss:$12 sps:$4 sm:$0xff]   ;;  %v21828_v32 = vld [vmem:[%s30438_s3 + $0x18] ss:$12 sps:$4 sm:$0xff]   ;;  %v21841_v9 = vld [vmem:[%s30438_s3 + $0x7d0] ss:$12 sps:$4 sm:$0xff]  }
 0x522   : > { %20997 = vmatprep.subr.bf16.mxu0 %v21803_v59  ;;  %v9339_v50 = vcombine.low %v25929_v24, %v9273_v63  ;;  %v26029_v43 = vcombine.high %v7153_v47, %v9773_v31  ;;  %v26031_v58 = vcombine.low %v7153_v47, %v9773_v31  ;;  %v21814_v24 = vld [vmem:[%s30438_s3 + $0x758] ss:$12 sps:$4 sm:$0xff]   ;;  %v21822_v47 = vld [vmem:[%s30438_s3 + $0x848] ss:$12 sps:$4 sm:$0xff]   ;;  %v26090_v59 = vcombine.low %v25962_v7, %v25965_v57  ;;  %v21847_v52 = vld [vmem:[%s30438_s3 + $0x8c0] ss:$12 sps:$4 sm:$0xff]  }
 0x523   : > { %21086 = vmatpush3.bf16.msra.mxu1 %v21804_v56  ;;  %v26086_v0 = vrot.slane %v8460_v37, %v23735_v28  ;;  %v21830_v7 = vld [vmem:[%s30438_s3 + $0x1c] ss:$12 sps:$4 sm:$0xff]   ;;  %v26109_v57 = vcombine.high %v25933_v10, %v25936_v49  ;;  %v21831_v56 = vld [vmem:[%s30438_s3 + $0x7a0] ss:$12 sps:$4 sm:$0xff]   ;;  %v21852_v31 = vld [vmem:[%s30438_s3 + $0x8d8] ss:$12 sps:$4 sm:$0xff]  }
 0x524   : > { %21087 = vmatprep.subr.bf16.mxu1 %v21806_v26  ;;  %v9346_v6 = vrot.slane %v9339_v50, %v23735_v28  ;;  %v21835_v10 = vld [vmem:[%s30438_s3 + $0x34] ss:$12 sps:$4 sm:$0xff]   ;;  %v21833_v26 = vld [vmem:[%s30438_s3 + $0x30] ss:$12 sps:$4 sm:$0xff]   ;;  %v21840_v5 = vld [vmem:[%s30438_s3 + $0x4c] ss:$12 sps:$4 sm:$0xff]  }
 0x525   : > { %20998 = vmatpush3.bf16.msra.mxu0 %v21805_v11  ;;  %v26100_v45 = vcombine.high %v26086_v0, %v26077_v21  ;;  %v21842_v11 = vld [vmem:[%s30438_s3 + $0x8a8] ss:$12 sps:$4 sm:$0xff]   ;;  %v21851_v63 = vld [vmem:[%s30438_s3 + $0x800] ss:$12 sps:$4 sm:$0xff]   ;;  %v26207_v2 = vcombine.low %v26086_v0, %v26077_v21  ;;  %v21872_v21 = vld [vmem:[%s30438_s3 + $0x9f8] ss:$12 sps:$4 sm:$0xff]  }
 0x526   : > { %20999 = vmatprep.subr.bf16.mxu0 %v21807_v1  ;;  %v26044_v4 = vcombine.high %v25875_v12, %v9346_v6  ;;  %v26047_v48 = vcombine.low %v25875_v12, %v9346_v6  ;;  %v21817_v12 = vld [vmem:[%s30438_s3 + $0x218] ss:$12 sps:$4 sm:$0xff]   ;;  %v21846_v54 = vld [vmem:[%s30438_s3 + $0x7e8] ss:$12 sps:$4 sm:$0xff]   ;;  %v21853_v6 = vld [vmem:[%s30438_s3 + $0x90] ss:$12 sps:$4 sm:$0xff]  }
 0x527   : > { %21088 = vmatpush3.bf16.msra.mxu1 %v21808_v61  ;;  %v21845_v1 = vld [vmem:[%s30438_s3 + $0x64] ss:$12 sps:$4 sm:$0xff]   ;;  %v21843_v61 = vld [vmem:[%s30438_s3 + $0x60] ss:$12 sps:$4 sm:$0xff]  }
 0x528   : > { %21089 = vmatprep.subr.bf16.mxu1 %v21810_v3  ;;  %v21850_v3 = vld [vmem:[%s30438_s3 + $0x7c] ss:$12 sps:$4 sm:$0xff]   ;;  %v21855_v50 = vld [vmem:[%s30438_s3 + $0x94] ss:$12 sps:$4 sm:$0xff]   ;;  %v21876_v0 = vld [vmem:[%s30438_s3 + $0x938] ss:$12 sps:$4 sm:$0xff]  }
 0x529   : > { %21000 = vmatpush3.bf16.msra.mxu0 %v21809_v44  ;;  %v21848_v44 = vld [vmem:[%s30438_s3 + $0x78] ss:$12 sps:$4 sm:$0xff]  }
 0x52a   : > { %21001 = vmatprep.subr.bf16.mxu0 %v21811_v15  ;;  %v21856_v15 = vld [vmem:[%s30438_s3 + $0x818] ss:$12 sps:$4 sm:$0xff]  }
 0x52b   : > { %21090 = vmatpush3.bf16.msra.mxu1 %v21812_v53  ;;  %v21857_v53 = vld [vmem:[%s30438_s3 + $0x8f0] ss:$12 sps:$4 sm:$0xff]  }
 0x52c   : > { %21091 = vmatprep.subr.bf16.mxu1 %v21814_v24  ;;  %v8901_v24 = vcombine.low %v25835_v20, %v25952_v33  ;;  %v21858_v20 = vld [vmem:[%s30438_s3 + $0xa8] ss:$12 sps:$4 sm:$0xff]  }
 0x52d   : > { %21002 = vmatpush3.bf16.msra.mxu0 %v21813_v62  ;;  %v21860_v62 = vld [vmem:[%s30438_s3 + $0xac] ss:$12 sps:$4 sm:$0xff]  }
 0x52e   : > { %21003 = vmatprep.subr.bf16.mxu0 %v21815_v14  ;;  %v21861_v14 = vld [vmem:[%s30438_s3 + $0x830] ss:$12 sps:$4 sm:$0xff]   ;;  %v26197_v33 = vrot.slane %v8901_v24, %v23735_v28  ;;  %v21905_v24 = vld [vmem:[%s30438_s3 + $0x8] ss:$12 sps:$4 sm:$0xff]  }
 0x52f   : > { %21092 = vmatpush3.bf16.msra.mxu1 %v21816_v36  ;;  %v21862_v36 = vld [vmem:[%s30438_s3 + $0x9c8] ss:$12 sps:$4 sm:$0xff]  }
 0x530   : > { %21093 = vmatprep.subr.bf16.mxu1 %v21818_v13  ;;  %v21865_v13 = vld [vmem:[%s30438_s3 + $0xc4] ss:$12 sps:$4 sm:$0xff]   ;;  %v26217_v37 = vcombine.high %v25936_v49, %v26197_v33 }
 0x531   : > { %21004 = vmatpush3.bf16.msra.mxu0 %v21817_v12  ;;  %v21866_v12 = vld [vmem:[%s30438_s3 + $0x908] ss:$12 sps:$4 sm:$0xff]  }
 0x532   : > { %21005 = vmatprep.subr.bf16.mxu0 %v21819_v29  ;;  %v21867_v29 = vld [vmem:[%s30438_s3 + $0x9e0] ss:$12 sps:$4 sm:$0xff]  }
 0x533   : > { %21094 = vmatpush3.bf16.msra.mxu1 %v21820_v17  ;;  %v21863_v17 = vld [vmem:[%s30438_s3 + $0xc0] ss:$12 sps:$4 sm:$0xff]  }
 0x534   : > { %21101 = vmatprep.subr.bf16.mxu1 %v21822_v47  ;;  %v21870_v47 = vld [vmem:[%s30438_s3 + $0xdc] ss:$12 sps:$4 sm:$0xff]  }
 0x535   : > { %21006 = vmatpush3.bf16.msra.mxu0 %v21821_v16  ;;  %v21871_v16 = vld [vmem:[%s30438_s3 + $0x920] ss:$12 sps:$4 sm:$0xff]  }
 0x536   : > { %8377 = vmatmul.mubr.bf16.vlgmr.msra.gmra.mrb[20].mxu1 %v26090_v59  ;;  %6966 = vmatprep.subr.bf16.mxu0 %v21825_v46  ;;  %v21868_v46 = vld [vmem:[%s30438_s3 + $0xd8] ss:$12 sps:$4 sm:$0xff]  }
 0x537   : > { %21102 = vmatpush3.bf16.msra.mxu1 %v21826_v41  ;;  %8811 = vmatprep.mubr.bf16.mxu1 %v26100_v45  ;;  %v21875_v41 = vld [vmem:[%s30438_s3 + $0xf4] ss:$12 sps:$4 sm:$0xff]  }
 0x538   : > { %6682 = vmatmul.mubr.bf16.vlgmr.msra.gmra.mrb[36].mxu0 %v25900_v60  ;;  %21103 = vmatprep.subr.bf16.mxu1 %v21827_v19  ;;  %v21836_v60 = vld [vmem:[%s30438_s3 + $0x7b8] ss:$12 sps:$4 sm:$0xff]   ;;  %v21877_v19 = vld [vmem:[%s30438_s3 + $0xa10] ss:$12 sps:$4 sm:$0xff]  }
 0x539   : > { %6967 = vmatpush1.bf16.msra.mxu0 %v21823_v35  ;;  %6998 = vmatprep.mubr.bf16.mxu0 %v26109_v57  ;;  %v21873_v35 = vld [vmem:[%s30438_s3 + $0xf0] ss:$12 sps:$4 sm:$0xff]  }
 0x53a   : > { %6968 = vmatprep.subr.bf16.mxu0 %v21830_v7  ;;  %v21880_v7 = vld [vmem:[%s30438_s3 + $0x10c] ss:$12 sps:$4 sm:$0xff]  }
 0x53b   : > { %21104 = vmatpush3.bf16.msra.mxu1 %v21831_v56  ;;  %v21881_v56 = vld [vmem:[%s30438_s3 + $0x950] ss:$12 sps:$4 sm:$0xff]  }
 0x53c   : > { %21105 = vmatprep.subr.bf16.mxu1 %v21832_v23  ;;  %v21882_v23 = vld [vmem:[%s30438_s3 + $0xa28] ss:$12 sps:$4 sm:$0xff]  }
 0x53d   : > { %6969 = vmatpush1.bf16.msra.mxu0 %v21828_v32  ;;  %v21878_v32 = vld [vmem:[%s30438_s3 + $0x108] ss:$12 sps:$4 sm:$0xff]  }
 0x53e   : > { %6970 = vmatprep.subr.bf16.mxu0 %v21835_v10  ;;  %v21885_v10 = vld [vmem:[%s30438_s3 + $0x124] ss:$12 sps:$4 sm:$0xff]  }
 0x53f   : > { %21106 = vmatpush3.bf16.msra.mxu1 %v21836_v60  ;;  %v21886_v60 = vld [vmem:[%s30438_s3 + $0x968] ss:$12 sps:$4 sm:$0xff]  }
 0x540   : > { %21107 = vmatprep.subr.bf16.mxu1 %v21837_v51  ;;  %v21887_v51 = vld [vmem:[%s30438_s3 + $0xa40] ss:$12 sps:$4 sm:$0xff]  }
 0x541   : > { %6971 = vmatpush1.bf16.msra.mxu0 %v21833_v26  ;;  %v21883_v26 = vld [vmem:[%s30438_s3 + $0x120] ss:$12 sps:$4 sm:$0xff]  }
 0x542   : > { %6972 = vmatprep.subr.bf16.mxu0 %v21840_v5  ;;  %v21890_v5 = vld [vmem:[%s30438_s3 + $0x13c] ss:$12 sps:$4 sm:$0xff]  }
 0x543   : > { %21108 = vmatpush3.bf16.msra.mxu1 %v21841_v9  ;;  %v21891_v9 = vld [vmem:[%s30438_s3 + $0x980] ss:$12 sps:$4 sm:$0xff]  }
 0x544   : > { %21109 = vmatprep.subr.bf16.mxu1 %v21842_v11  ;;  %v21892_v11 = vld [vmem:[%s30438_s3 + $0xa58] ss:$12 sps:$4 sm:$0xff]  }
 0x545   : > { %6973 = vmatpush1.bf16.msra.mxu0 %v21838_v30  ;;  %v21888_v30 = vld [vmem:[%s30438_s3 + $0x138] ss:$12 sps:$4 sm:$0xff]  }
 0x546   : > { %6974 = vmatprep.subr.bf16.mxu0 %v21845_v1  ;;  %v21895_v1 = vld [vmem:[%s30438_s3 + $0x154] ss:$12 sps:$4 sm:$0xff]  }
 0x547   : > { %21110 = vmatpush3.bf16.msra.mxu1 %v21846_v54  ;;  %v21896_v54 = vld [vmem:[%s30438_s3 + $0x998] ss:$12 sps:$4 sm:$0xff]  }
 0x548   : > { %21111 = vmatprep.subr.bf16.mxu1 %v21847_v52  ;;  %v21897_v52 = vld [vmem:[%s30438_s3 + $0xa70] ss:$12 sps:$4 sm:$0xff]  }
 0x549   : > { %6975 = vmatpush1.bf16.msra.mxu0 %v21843_v61  ;;  %v21893_v61 = vld [vmem:[%s30438_s3 + $0x150] ss:$12 sps:$4 sm:$0xff]  }
 0x54a   : > { %6976 = vmatprep.subr.bf16.mxu0 %v21850_v3  ;;  %v21900_v3 = vld [vmem:[%s30438_s3 + $0x16c] ss:$12 sps:$4 sm:$0xff]  }
 0x54b   : > { %21112 = vmatpush3.bf16.msra.mxu1 %v21851_v63  ;;  %v21901_v63 = vld [vmem:[%s30438_s3 + $0x9b0] ss:$12 sps:$4 sm:$0xff]  }
 0x54c   : > { %21113 = vmatprep.subr.bf16.mxu1 %v21852_v31  ;;  %v21902_v31 = vld [vmem:[%s30438_s3 + $0xb48] ss:$12 sps:$4 sm:$0xff]  }
 0x54d   : > { %6977 = vmatpush1.bf16.msra.mxu0 %v21848_v44  ;;  %v21898_v44 = vld [vmem:[%s30438_s3 + $0x168] ss:$12 sps:$4 sm:$0xff]  }
 0x54e   : > { %6978 = vmatprep.subr.bf16.mxu0 %v21855_v50  ;;  %v21903_v50 = vld [vmem:[%s30438_s3 + $0xc8] ss:$12 sps:$4 sm:$0xff]  }
 0x54f   : > { %21114 = vmatpush3.bf16.msra.mxu1 %v21856_v15  ;;  %v21904_v15 = vld [vmem:[%s30438_s3 + $0xa88] ss:$12 sps:$4 sm:$0xff]  }
 0x550   : > { %21115 = vmatprep.subr.bf16.mxu1 %v21857_v53  ;;  %v26313_v53 = vcombine.low %v25936_v49, %v26197_v33  ;;  %v21908_v49 = vld [vmem:[%s30438_s3 + $0xaa0] ss:$12 sps:$4 sm:$0xff]   ;;  %v21912_v33 = vld [vmem:[%s30438_s3 + $0xab8] ss:$12 sps:$4 sm:$0xff]  }
 0x551   : > { %6979 = vmatpush1.bf16.msra.mxu0 %v21853_v6  ;;  %v21906_v6 = vld [vmem:[%s30438_s3 + $0xb60] ss:$12 sps:$4 sm:$0xff]  }
 0x552   : > { %6980 = vmatprep.subr.bf16.mxu0 %v21860_v62  ;;  %v21907_v62 = vld [vmem:[%s30438_s3 + $0xe0] ss:$12 sps:$4 sm:$0xff]  }
 0x553   : > { %21116 = vmatpush3.bf16.msra.mxu1 %v21861_v14  ;;  %v21910_v14 = vld [vmem:[%s30438_s3 + $0xb78] ss:$12 sps:$4 sm:$0xff]  }
 0x554   : > { %21123 = vmatprep.subr.bf16.mxu1 %v21862_v36  ;;  %v21909_v36 = vld [vmem:[%s30438_s3 + $0x20] ss:$12 sps:$4 sm:$0xff]  }
 0x555   : > { %6981 = vmatpush1.bf16.msra.mxu0 %v21858_v20  ;;  %v21911_v20 = vld [vmem:[%s30438_s3 + $0xf8] ss:$12 sps:$4 sm:$0xff]  }
 0x556   : > { %8812 = vmatmul.mubr.bf16.vlgmr.msra.gmra.mrb[24].mxu1 %v26207_v2  ;;  %6982 = vmatprep.subr.bf16.mxu0 %v21865_v13  ;;  %v21914_v13 = vld [vmem:[%s30438_s3 + $0xb90] ss:$12 sps:$4 sm:$0xff]  }
 0x557   : > { %21124 = vmatpush3.bf16.msra.mxu1 %v21866_v12  ;;  %9244 = vmatprep.mubr.bf16.mxu1 %v26217_v37  ;;  %v21915_v12 = vld [vmem:[%s30438_s3 + $0x110] ss:$12 sps:$4 sm:$0xff]  }
 0x558   : > { %21125 = vmatprep.subr.bf16.mxu1 %v21867_v29  ;;  %v21916_v29 = vld [vmem:[%s30438_s3 + $0xad0] ss:$12 sps:$4 sm:$0xff]  }
 0x559   : > { %6983 = vmatpush1.bf16.msra.mxu0 %v21863_v17  ;;  %v21918_v17 = vld [vmem:[%s30438_s3 + $0xba8] ss:$12 sps:$4 sm:$0xff]  }
 0x55a   : > { %6984 = vmatprep.subr.bf16.mxu0 %v21870_v47  ;;  %v21917_v47 = vld [vmem:[%s30438_s3 + $0x50] ss:$12 sps:$4 sm:$0xff]  }
 0x55b   : > { %21126 = vmatpush3.bf16.msra.mxu1 %v21871_v16  ;;  %v21919_v16 = vld [vmem:[%s30438_s3 + $0x128] ss:$12 sps:$4 sm:$0xff]  }
 0x55c   : > { %21127 = vmatprep.subr.bf16.mxu1 %v21872_v21  ;;  %v21920_v21 = vld [vmem:[%s30438_s3 + $0xae8] ss:$12 sps:$4 sm:$0xff]  }
 0x55d   : > { %6985 = vmatpush1.bf16.msra.mxu0 %v21868_v46  ;;  %v21922_v46 = vld [vmem:[%s30438_s3 + $0xbc0] ss:$12 sps:$4 sm:$0xff]  }
 0x55e   : > { %6986 = vmatprep.subr.bf16.mxu0 %v21875_v41  ;;  %v21921_v41 = vld [vmem:[%s30438_s3 + $0x68] ss:$12 sps:$4 sm:$0xff]  }
 0x55f   : > { %21128 = vmatpush3.bf16.msra.mxu1 %v21876_v0  ;;  %v21923_v0 = vld [vmem:[%s30438_s3 + $0x140] ss:$12 sps:$4 sm:$0xff]  }
 0x560   : > { %21129 = vmatprep.subr.bf16.mxu1 %v21877_v19  ;;  %v21924_v19 = vld [vmem:[%s30438_s3 + $0xb00] ss:$12 sps:$4 sm:$0xff]  }
 0x561   : > { %6987 = vmatpush1.bf16.msra.mxu0 %v21873_v35  ;;  %v21926_v35 = vld [vmem:[%s30438_s3 + $0xbd8] ss:$12 sps:$4 sm:$0xff]  }
 0x562   : > { %6988 = vmatprep.subr.bf16.mxu0 %v21880_v7  ;;  %v21925_v7 = vld [vmem:[%s30438_s3 + $0x80] ss:$12 sps:$4 sm:$0xff]  }
 0x563   : > { %21130 = vmatpush3.bf16.msra.mxu1 %v21881_v56  ;;  %v21927_v56 = vld [vmem:[%s30438_s3 + $0x158] ss:$12 sps:$4 sm:$0xff]  }
 0x564   : > { %21131 = vmatprep.subr.bf16.mxu1 %v21882_v23  ;;  %v21928_v23 = vld [vmem:[%s30438_s3 + $0xb18] ss:$12 sps:$4 sm:$0xff]  }
 0x565   : > { %6989 = vmatpush1.bf16.msra.mxu0 %v21878_v32  ;;  %v21930_v32 = vld [vmem:[%s30438_s3 + $0xbf0] ss:$12 sps:$4 sm:$0xff]  }
 0x566   : > { %6990 = vmatprep.subr.bf16.mxu0 %v21885_v10  ;;  %v21929_v10 = vld [vmem:[%s30438_s3 + $0x98] ss:$12 sps:$4 sm:$0xff]  }
 0x567   : > { %21132 = vmatpush3.bf16.msra.mxu1 %v21886_v60  ;;  %v21931_v60 = vld [vmem:[%s30438_s3 + $0x170] ss:$12 sps:$4 sm:$0xff]  }
 0x568   : > { %21133 = vmatprep.subr.bf16.mxu1 %v21887_v51  ;;  %v21932_v51 = vld [vmem:[%s30438_s3 + $0xb30] ss:$12 sps:$4 sm:$0xff]  }
 0x569   : > { %6991 = vmatpush1.bf16.msra.mxu0 %v21883_v26  ;;  %v21934_v26 = vld [vmem:[%s30438_s3 + $0xcc8] ss:$12 sps:$4 sm:$0xff]  }
 0x56a   : > { %6992 = vmatprep.subr.bf16.mxu0 %v21890_v5  ;;  %v21933_v5 = vld [vmem:[%s30438_s3 + $0xb0] ss:$12 sps:$4 sm:$0xff]  }
 0x56b   : > { %21134 = vmatpush3.bf16.msra.mxu1 %v21891_v9  ;;  %v21937_v9 = vld [vmem:[%s30438_s3 + $0x304] ss:$12 sps:$4 sm:$0xff]  }
 0x56c   : > { %21135 = vmatprep.subr.bf16.mxu1 %v21892_v11  ;;  %v21938_v11 = vld [vmem:[%s30438_s3 + $0xc08] ss:$12 sps:$4 sm:$0xff]  }
 0x56d   : > { %6993 = vmatpush1.bf16.msra.mxu0 %v21888_v30  ;;  %v21939_v30 = vld [vmem:[%s30438_s3 + $0xce0] ss:$12 sps:$4 sm:$0xff]  }
 0x56e   : > { %6994 = vmatprep.subr.bf16.mxu0 %v21895_v1  ;;  %v21935_v1 = vld [vmem:[%s30438_s3 + $0x300] ss:$12 sps:$4 sm:$0xff]  }
 0x56f   : > { %21136 = vmatpush3.bf16.msra.mxu1 %v21896_v54  ;;  %v21942_v54 = vld [vmem:[%s30438_s3 + $0x31c] ss:$12 sps:$4 sm:$0xff]  }
 0x570   : > { %21137 = vmatprep.subr.bf16.mxu1 %v21897_v52  ;;  %v21943_v52 = vld [vmem:[%s30438_s3 + $0xc20] ss:$12 sps:$4 sm:$0xff]  }
 0x571   : > { %6995 = vmatpush1.bf16.msra.mxu0 %v21893_v61  ;;  %v21944_v61 = vld [vmem:[%s30438_s3 + $0xcf8] ss:$12 sps:$4 sm:$0xff]  }
 0x572   : > { %6996 = vmatprep.subr.bf16.mxu0 %v21900_v3  ;;  %v21940_v3 = vld [vmem:[%s30438_s3 + $0x318] ss:$12 sps:$4 sm:$0xff]  }
 0x573   : > { %21138 = vmatpush3.bf16.msra.mxu1 %v21901_v63  ;;  %v21947_v63 = vld [vmem:[%s30438_s3 + $0x334] ss:$12 sps:$4 sm:$0xff]  }
 0x574   : > { %21145 = vmatprep.subr.bf16.mxu1 %v21902_v31  ;;  %v21949_v31 = vld [vmem:[%s30438_s3 + $0xd10] ss:$12 sps:$4 sm:$0xff]  }
 0x575   : > { %6997 = vmatpush1.bf16.msra.mxu0 %v21898_v44  ;;  %v21945_v44 = vld [vmem:[%s30438_s3 + $0x330] ss:$12 sps:$4 sm:$0xff]  }
 0x576   : > { %9245 = vmatmul.mubr.bf16.vlgmr.msra.gmra.mrb[28].mxu1 %v26313_v53  ;;  %21013 = vmatprep.subr.bf16.mxu0 %v21903_v50  ;;  %v21952_v50 = vld [vmem:[%s30438_s3 + $0x34c] ss:$12 sps:$4 sm:$0xff]  }
 0x577   : > { %21146 = vmatpush3.bf16.msra.mxu1 %v21904_v15  ;;  %9682 = vmatprep.mubr.bf16.mxu1 %v26044_v4  ;;  %v21953_v15 = vld [vmem:[%s30438_s3 + $0xc50] ss:$12 sps:$4 sm:$0xff]  }
 0x578   : > { %6999 = vmatmul.mubr.bf16.vlgmr.msra.gmra.mrb[32].mxu0 %v25956_v38  ;;  %21147 = vmatprep.subr.bf16.mxu1 %v21906_v6  ;;  %v21954_v6 = vld [vmem:[%s30438_s3 + $0xd28] ss:$12 sps:$4 sm:$0xff]  }
 0x579   : > { %21014 = vmatpush3.bf16.msra.mxu0 %v21905_v24  ;;  %7041 = vmatprep.mubr.bf16.mxu0 %v26109_v57  ;;  %v21913_v57 = vld [vmem:[%s30438_s3 + $0x38] ss:$12 sps:$4 sm:$0xff]   ;;  %v21950_v24 = vld [vmem:[%s30438_s3 + $0x348] ss:$12 sps:$4 sm:$0xff]  }
 0x57a   : > { %21015 = vmatprep.subr.bf16.mxu0 %v21907_v62  ;;  %v21957_v62 = vld [vmem:[%s30438_s3 + $0x364] ss:$12 sps:$4 sm:$0xff]  }
 0x57b   : > { %21148 = vmatpush3.bf16.msra.mxu1 %v21908_v49  ;;  %v21958_v49 = vld [vmem:[%s30438_s3 + $0xc68] ss:$12 sps:$4 sm:$0xff]  }
 0x57c   : > { %21149 = vmatprep.subr.bf16.mxu1 %v21910_v14  ;;  %v21959_v14 = vld [vmem:[%s30438_s3 + $0xd40] ss:$12 sps:$4 sm:$0xff]  }
 0x57d   : > { %21016 = vmatpush3.bf16.msra.mxu0 %v21909_v36  ;;  %v21955_v36 = vld [vmem:[%s30438_s3 + $0x360] ss:$12 sps:$4 sm:$0xff]  }
 0x57e   : > { %21017 = vmatprep.subr.bf16.mxu0 %v21911_v20  ;;  %v21962_v20 = vld [vmem:[%s30438_s3 + $0x37c] ss:$12 sps:$4 sm:$0xff]  }
 0x57f   : > { %21150 = vmatpush3.bf16.msra.mxu1 %v21912_v33  ;;  %v21963_v33 = vld [vmem:[%s30438_s3 + $0xc80] ss:$12 sps:$4 sm:$0xff]  }
 0x580   : > { %21151 = vmatprep.subr.bf16.mxu1 %v21914_v13  ;;  %v21964_v13 = vld [vmem:[%s30438_s3 + $0xd58] ss:$12 sps:$4 sm:$0xff]  }
 0x581   : > { %21018 = vmatpush3.bf16.msra.mxu0 %v21913_v57  ;;  %v21960_v57 = vld [vmem:[%s30438_s3 + $0x378] ss:$12 sps:$4 sm:$0xff]  }
 0x582   : > { %21019 = vmatprep.subr.bf16.mxu0 %v21915_v12  ;;  %v21967_v12 = vld [vmem:[%s30438_s3 + $0x394] ss:$12 sps:$4 sm:$0xff]  }
 0x583   : > { %21152 = vmatpush3.bf16.msra.mxu1 %v21916_v29  ;;  %v21968_v29 = vld [vmem:[%s30438_s3 + $0xc98] ss:$12 sps:$4 sm:$0xff]  }
 0x584   : > { %21153 = vmatprep.subr.bf16.mxu1 %v21918_v17  ;;  %v21969_v17 = vld [vmem:[%s30438_s3 + $0xd70] ss:$12 sps:$4 sm:$0xff]  }
 0x585   : > { %21020 = vmatpush3.bf16.msra.mxu0 %v21917_v47  ;;  %v21965_v47 = vld [vmem:[%s30438_s3 + $0x390] ss:$12 sps:$4 sm:$0xff]  }
 0x586   : > { %21021 = vmatprep.subr.bf16.mxu0 %v21919_v16  ;;  %v21972_v16 = vld [vmem:[%s30438_s3 + $0x3ac] ss:$12 sps:$4 sm:$0xff]  }
 0x587   : > { %21154 = vmatpush3.bf16.msra.mxu1 %v21920_v21  ;;  %v21973_v21 = vld [vmem:[%s30438_s3 + $0xcb0] ss:$12 sps:$4 sm:$0xff]  }
 0x588   : > { %21155 = vmatprep.subr.bf16.mxu1 %v21922_v46  ;;  %v21970_v46 = vld [vmem:[%s30438_s3 + $0x3a8] ss:$12 sps:$4 sm:$0xff]  }
 0x589   : > { %21022 = vmatpush3.bf16.msra.mxu0 %v21921_v41  ;;  %v21976_v41 = vld [vmem:[%s30438_s3 + $0x3c4] ss:$12 sps:$4 sm:$0xff]  }
 0x58a   : > { %21023 = vmatprep.subr.bf16.mxu0 %v21923_v0  ;;  %v21974_v0 = vld [vmem:[%s30438_s3 + $0x3c0] ss:$12 sps:$4 sm:$0xff]  }
 0x58b   : > { %21156 = vmatpush3.bf16.msra.mxu1 %v21924_v19  ;;  %v21979_v19 = vld [vmem:[%s30438_s3 + $0x3dc] ss:$12 sps:$4 sm:$0xff]  }
 0x58c   : > { %21157 = vmatprep.subr.bf16.mxu1 %v21926_v35  ;;  %v21977_v35 = vld [vmem:[%s30438_s3 + $0x3d8] ss:$12 sps:$4 sm:$0xff]  }
 0x58d   : > { %21024 = vmatpush3.bf16.msra.mxu0 %v21925_v7  ;;  %v21982_v7 = vld [vmem:[%s30438_s3 + $0x3f4] ss:$12 sps:$4 sm:$0xff]  }
 0x58e   : > { %21025 = vmatprep.subr.bf16.mxu0 %v21927_v56  ;;  %v21980_v56 = vld [vmem:[%s30438_s3 + $0x3f0] ss:$12 sps:$4 sm:$0xff]  }
 0x58f   : > { %21158 = vmatpush3.bf16.msra.mxu1 %v21928_v23  ;;  %v21985_v23 = vld [vmem:[%s30438_s3 + $0x40c] ss:$12 sps:$4 sm:$0xff]  }
 0x590   : > { %21159 = vmatprep.subr.bf16.mxu1 %v21930_v32  ;;  %v21983_v32 = vld [vmem:[%s30438_s3 + $0x408] ss:$12 sps:$4 sm:$0xff]  }
 0x591   : > { %21026 = vmatpush3.bf16.msra.mxu0 %v21929_v10  ;;  %v21988_v10 = vld [vmem:[%s30438_s3 + $0x424] ss:$12 sps:$4 sm:$0xff]  }
 0x592   : > { %21027 = vmatprep.subr.bf16.mxu0 %v21931_v60  ;;  %v21986_v60 = vld [vmem:[%s30438_s3 + $0x420] ss:$12 sps:$4 sm:$0xff]  }
 0x593   : > { %21160 = vmatpush3.bf16.msra.mxu1 %v21932_v51  ;;  %v21991_v51 = vld [vmem:[%s30438_s3 + $0x43c] ss:$12 sps:$4 sm:$0xff]  }
 0x594   : > { %21167 = vmatprep.subr.bf16.mxu1 %v21934_v26  ;;  %v21989_v26 = vld [vmem:[%s30438_s3 + $0x438] ss:$12 sps:$4 sm:$0xff]  }
 0x595   : > { %21028 = vmatpush3.bf16.msra.mxu0 %v21933_v5  ;;  %v21994_v5 = vld [vmem:[%s30438_s3 + $0x454] ss:$12 sps:$4 sm:$0xff]  }
 0x596   : > { %9683 = vmatmul.mubr.bf16.vlgmr.msra.gmra.mrb[32].mxu1 %v26047_v48  ;;  %7414 = vmatprep.subr.bf16.mxu0 %v21937_v9  ;;  %v21992_v9 = vld [vmem:[%s30438_s3 + $0x450] ss:$12 sps:$4 sm:$0xff]  }
 0x597   : > { %21168 = vmatpush3.bf16.msra.mxu1 %v21938_v11  ;;  %10109 = vmatprep.mubr.bf16.mxu1 %v26029_v43  ;;  %v21997_v11 = vld [vmem:[%s30438_s3 + $0x46c] ss:$12 sps:$4 sm:$0xff]  }
 0x598   : > { %7042 = vmatmul.mubr.bf16.vlgmr.msra.gmra.mrb[40].mxu0 %v25956_v38  ;;  %21169 = vmatprep.subr.bf16.mxu1 %v21939_v30  ;;  %v21948_v38 = vld [vmem:[%s30438_s3 + $0xc38] ss:$12 sps:$4 sm:$0xff]   ;;  %v21995_v30 = vld [vmem:[%s30438_s3 + $0x468] ss:$12 sps:$4 sm:$0xff]  }
 0x599   : > { %7415 = vmatpush1.bf16.msra.mxu0 %v21935_v1  ;;  %7446 = vmatprep.mubr.bf16.mxu0 %v26006_v42  ;;  %v21998_v1 = vld [vmem:[%s30438_s3 + $0x3c8] ss:$12 sps:$4 sm:$0xff]  }
 0x59a   : > { %7416 = vmatprep.subr.bf16.mxu0 %v21942_v54  ;;  %v21999_v54 = vld [vmem:[%s30438_s3 + $0x308] ss:$12 sps:$4 sm:$0xff]  }
 0x59b   : > { %21170 = vmatpush3.bf16.msra.mxu1 %v21943_v52  ;;  %v22000_v52 = vld [vmem:[%s30438_s3 + $0x3e0] ss:$12 sps:$4 sm:$0xff]  }
 0x59c   : > { %21171 = vmatprep.subr.bf16.mxu1 %v21944_v61  ;;  %v22001_v61 = vld [vmem:[%s30438_s3 + $0x320] ss:$12 sps:$4 sm:$0xff]  }
 0x59d   : > { %7417 = vmatpush1.bf16.msra.mxu0 %v21940_v3  ;;  %v22002_v3 = vld [vmem:[%s30438_s3 + $0x3f8] ss:$12 sps:$4 sm:$0xff]  }
 0x59e   : > { %7418 = vmatprep.subr.bf16.mxu0 %v21947_v63  ;;  %v22003_v63 = vld [vmem:[%s30438_s3 + $0x338] ss:$12 sps:$4 sm:$0xff]  }
 0x59f   : > { %21172 = vmatpush3.bf16.msra.mxu1 %v21948_v38  ;;  %v22004_v38 = vld [vmem:[%s30438_s3 + $0x410] ss:$12 sps:$4 sm:$0xff]  }
 0x5a0   : > { %21173 = vmatprep.subr.bf16.mxu1 %v21949_v31  ;;  %v22006_v31 = vld [vmem:[%s30438_s3 + $0x428] ss:$12 sps:$4 sm:$0xff]  }
 0x5a1   : > { %7419 = vmatpush1.bf16.msra.mxu0 %v21945_v44  ;;  %v22007_v44 = vld [vmem:[%s30438_s3 + $0x368] ss:$12 sps:$4 sm:$0xff]  }
 0x5a2   : > { %7420 = vmatprep.subr.bf16.mxu0 %v21952_v50  ;;  %v22008_v50 = vld [vmem:[%s30438_s3 + $0x440] ss:$12 sps:$4 sm:$0xff]  }
 0x5a3   : > { %21174 = vmatpush3.bf16.msra.mxu1 %v21953_v15 }
 0x5a4   : > { %21175 = vmatprep.subr.bf16.mxu1 %v21954_v6  ;;  %v22009_v6 = vld [vmem:[%s30438_s3 + $0x380] ss:$12 sps:$4 sm:$0xff]  }
 0x5a5   : > { %7421 = vmatpush1.bf16.msra.mxu0 %v21950_v24 }
 0x5a6   : > { %7422 = vmatprep.subr.bf16.mxu0 %v21957_v62  ;;  %v22010_v62 = vld [vmem:[%s30438_s3 + $0x458] ss:$12 sps:$4 sm:$0xff]  }
 0x5a7   : > { %21176 = vmatpush3.bf16.msra.mxu1 %v21958_v49 }
 0x5a8   : > { %21177 = vmatprep.subr.bf16.mxu1 %v21959_v14 }
 0x5a9   : > { %7423 = vmatpush1.bf16.msra.mxu0 %v21955_v36 }
 0x5aa   : > { %7424 = vmatprep.subr.bf16.mxu0 %v21962_v20 }
 0x5ab   : > { %21178 = vmatpush3.bf16.msra.mxu1 %v21963_v33  ;;  %v22011_v33 = vld [vmem:[%s30438_s3 + $0x398] ss:$12 sps:$4 sm:$0xff]  }
 0x5ac   : > { %21179 = vmatprep.subr.bf16.mxu1 %v21964_v13  ;;  %v22012_v13 = vld [vmem:[%s30438_s3 + $0x470] ss:$12 sps:$4 sm:$0xff]  }
 0x5ad   : > { %7425 = vmatpush1.bf16.msra.mxu0 %v21960_v57  ;;  %v22013_v57 = vld [vmem:[%s30438_s3 + $0x3b0] ss:$12 sps:$4 sm:$0xff]  }
 0x5ae   : > { %7426 = vmatprep.subr.bf16.mxu0 %v21967_v12  ;;  %v22016_v12 = vld [vmem:[%s30438_s3 + $0x484] ss:$12 sps:$4 sm:$0xff]  }
 0x5af   : > { %21180 = vmatpush3.bf16.msra.mxu1 %v21968_v29  ;;  %v22014_v29 = vld [vmem:[%s30438_s3 + $0x480] ss:$12 sps:$4 sm:$0xff]  }
 0x5b0   : > { %21181 = vmatprep.subr.bf16.mxu1 %v21969_v17  ;;  %v22019_v17 = vld [vmem:[%s30438_s3 + $0x49c] ss:$12 sps:$4 sm:$0xff]  }
 0x5b1   : > { %7427 = vmatpush1.bf16.msra.mxu0 %v21965_v47  ;;  %v22017_v47 = vld [vmem:[%s30438_s3 + $0x498] ss:$12 sps:$4 sm:$0xff]  }
 0x5b2   : > { %7428 = vmatprep.subr.bf16.mxu0 %v21972_v16  ;;  %v22022_v16 = vld [vmem:[%s30438_s3 + $0x4b4] ss:$12 sps:$4 sm:$0xff]  }
 0x5b3   : > { %21182 = vmatpush3.bf16.msra.mxu1 %v21973_v21  ;;  %v22020_v21 = vld [vmem:[%s30438_s3 + $0x4b0] ss:$12 sps:$4 sm:$0xff]  }
 0x5b5   : > { %7429 = vmatpush1.bf16.msra.mxu0 %v21970_v46  ;;  %v22028_v46 = vld [vmem:[%s30438_s3 + $0x4e4] ss:$12 sps:$4 sm:$0xff]  }
 0x5b6   : > { %10110 = vmatmul.mubr.bf16.vlgmr.msra.gmra.mrb[36].mxu1 %v26031_v58  ;;  %7430 = vmatprep.subr.bf16.mxu0 %v21976_v41  ;;  %v22026_v41 = vld [vmem:[%s30438_s3 + $0x4e0] ss:$12 sps:$4 sm:$0xff]  }
 0x5b7   : > { %11566 = vmatprep.mubr.bf16.mxu1 %v23619_v8 }
 0x5b9   : > { %7431 = vmatpush1.bf16.msra.mxu0 %v21974_v0  ;;  %v22031_v0 = vld [vmem:[%s30438_s3 + $0x4fc] ss:$12 sps:$4 sm:$0xff]  }
 0x5ba   : > { %7432 = vmatprep.subr.bf16.mxu0 %v21979_v19 }
 0x5bd   : > { %7433 = vmatpush1.bf16.msra.mxu0 %v21977_v35  ;;  %v22029_v35 = vld [vmem:[%s30438_s3 + $0x4f8] ss:$12 sps:$4 sm:$0xff]  }
 0x5be   : > { %7434 = vmatprep.subr.bf16.mxu0 %v21982_v7 }
 0x5c1   : > { %7435 = vmatpush1.bf16.msra.mxu0 %v21980_v56  ;;  %v22034_v56 = vld [vmem:[%s30438_s3 + $0x514] ss:$12 sps:$4 sm:$0xff]  }
 0x5c2   : > { %7436 = vmatprep.subr.bf16.mxu0 %v21985_v23 }
 0x5c5   : > { %7437 = vmatpush1.bf16.msra.mxu0 %v21983_v32 }
 0x5c6   : > { %7438 = vmatprep.subr.bf16.mxu0 %v21988_v10 }
 0x5c9   : > { %7439 = vmatpush1.bf16.msra.mxu0 %v21986_v60 }
 0x5ca   : > { %7440 = vmatprep.subr.bf16.mxu0 %v21991_v51 }
 0x5cd   : > { %7441 = vmatpush1.bf16.msra.mxu0 %v21989_v26 }
 0x5ce   : > { %7442 = vmatprep.subr.bf16.mxu0 %v21994_v5 }
 0x5d1   : > { %7443 = vmatpush1.bf16.msra.mxu0 %v21992_v9 }
 0x5d2   : > { %7444 = vmatprep.subr.bf16.mxu0 %v21997_v11  ;;  %v22032_v11 = vld [vmem:[%s30438_s3 + $0x510] ss:$12 sps:$4 sm:$0xff]  }
 0x5d5   : > { %7445 = vmatpush1.bf16.msra.mxu0 %v21995_v30 }
 0x5d6   : > { %21035 = vmatprep.subr.bf16.mxu0 %v21998_v1  ;;  %v22037_v1 = vld [vmem:[%s30438_s3 + $0x52c] ss:$12 sps:$4 sm:$0xff]  }
 0x5d8   : > { %7447 = vmatmul.mubr.bf16.vlgmr.msra.gmra.mrb[32].mxu0 %v26008_v39 }
 0x5d9   : > { %21036 = vmatpush3.bf16.msra.mxu0 %v21999_v54  ;;  %7489 = vmatprep.mubr.bf16.mxu0 %v26006_v42  ;;  %v22005_v42 = vld [vmem:[%s30438_s3 + $0x350] ss:$12 sps:$4 sm:$0xff]  }
 0x5da   : > { %21037 = vmatprep.subr.bf16.mxu0 %v22000_v52  ;;  %v22035_v52 = vld [vmem:[%s30438_s3 + $0x528] ss:$12 sps:$4 sm:$0xff]  }
 0x5dd   : > { %21038 = vmatpush3.bf16.msra.mxu0 %v22001_v61  ;;  %v22040_v61 = vld [vmem:[%s30438_s3 + $0x544] ss:$12 sps:$4 sm:$0xff]  }
 0x5de   : > { %21039 = vmatprep.subr.bf16.mxu0 %v22002_v3  ;;  %v22038_v3 = vld [vmem:[%s30438_s3 + $0x540] ss:$12 sps:$4 sm:$0xff]  }
 0x5e1   : > { %21040 = vmatpush3.bf16.msra.mxu0 %v22003_v63  ;;  %v22043_v63 = vld [vmem:[%s30438_s3 + $0x55c] ss:$12 sps:$4 sm:$0xff]  }
 0x5e2   : > { %21041 = vmatprep.subr.bf16.mxu0 %v22004_v38  ;;  %v22041_v38 = vld [vmem:[%s30438_s3 + $0x558] ss:$12 sps:$4 sm:$0xff]  }
 0x5e5   : > { %21042 = vmatpush3.bf16.msra.mxu0 %v22005_v42  ;;  %v22046_v42 = vld [vmem:[%s30438_s3 + $0x574] ss:$12 sps:$4 sm:$0xff]  }
 0x5e6   : > { %21043 = vmatprep.subr.bf16.mxu0 %v22006_v31  ;;  %v22044_v31 = vld [vmem:[%s30438_s3 + $0x570] ss:$12 sps:$4 sm:$0xff]  }
 0x5e9   : > { %21044 = vmatpush3.bf16.msra.mxu0 %v22007_v44  ;;  %v21073_v15 = vpop.f32.mrb[16].mxu1  ;;  %v22049_v44 = vld [vmem:[%s30438_s3 + $0x58c] ss:$12 sps:$4 sm:$0xff]  }
 0x5ea   : > { %21045 = vmatprep.subr.bf16.mxu0 %v22008_v50  ;;  %v21074_v24 = vpop.f32.mrb[17].mxu1  ;;  %v22047_v50 = vld [vmem:[%s30438_s3 + $0x588] ss:$12 sps:$4 sm:$0xff]  }
 0x5eb   : > { %v26597_v49 = vadd.f32 %v21074_v24, %v21073_v15  ;;  %v21076_v14 = vpop.f32.mrb[18].mxu1  ;;  %v22052_v15 = vld [vmem:[%s30438_s3 + $0x5a4] ss:$12 sps:$4 sm:$0xff]   ;;  %v22055_v24 = vld [vmem:[%s30438_s3 + $0x5bc] ss:$12 sps:$4 sm:$0xff]  }
 0x5ec   : > { %v21077_v36 = vpop.f32.mrb[19].mxu1 }
 0x5ed   : > { %21046 = vmatpush3.bf16.msra.mxu0 %v22009_v6  ;;  %v26599_v20 = vadd.f32 %v21077_v36, %v21076_v14  ;;  %v22050_v6 = vld [vmem:[%s30438_s3 + $0x5a0] ss:$12 sps:$4 sm:$0xff]   ;;  %v22053_v14 = vld [vmem:[%s30438_s3 + $0x5b8] ss:$12 sps:$4 sm:$0xff]  }
 0x5ee   : > { %21047 = vmatprep.subr.bf16.mxu0 %v22010_v62 }
 0x5f1   : > { %21048 = vmatpush3.bf16.msra.mxu0 %v22011_v33  ;;  %v22058_v33 = vld [vmem:[%s30438_s3 + $0x5d4] ss:$12 sps:$4 sm:$0xff]  }
 0x5f2   : > { %21049 = vmatprep.subr.bf16.mxu0 %v22012_v13 }
 0x5f5   : > { %21050 = vmatpush3.bf16.msra.mxu0 %v22013_v57 }
 0x5f6   : > { %7855 = vmatprep.subr.bf16.mxu0 %v22016_v12 }
 0x5f8   : > { %7490 = vmatmul.mubr.bf16.vlgmr.msra.gmra.mrb[44].mxu0 %v26008_v39  ;;  %v22025_v39 = vld [vmem:[%s30438_s3 + $0x4cc] ss:$12 sps:$4 sm:$0xff]  }
 0x5f9   : > { %7856 = vmatpush1.bf16.msra.mxu0 %v22014_v29  ;;  %7887 = vmatprep.mubr.bf16.mxu0 %v25871_v34  ;;  %v22023_v34 = vld [vmem:[%s30438_s3 + $0x4c8] ss:$12 sps:$4 sm:$0xff]  }
 0x5fa   : > { %7857 = vmatprep.subr.bf16.mxu0 %v22019_v17  ;;  %v22056_v17 = vld [vmem:[%s30438_s3 + $0x5d0] ss:$12 sps:$4 sm:$0xff]  }
 0x5fd   : > { %7858 = vmatpush1.bf16.msra.mxu0 %v22017_v47  ;;  %v22061_v47 = vld [vmem:[%s30438_s3 + $0x5ec] ss:$12 sps:$4 sm:$0xff]  }
 0x5fe   : > { %7859 = vmatprep.subr.bf16.mxu0 %v22022_v16  ;;  %v22059_v16 = vld [vmem:[%s30438_s3 + $0x5e8] ss:$12 sps:$4 sm:$0xff]  }
 0x601   : > { %7860 = vmatpush1.bf16.msra.mxu0 %v22020_v21  ;;  %v22064_v21 = vld [vmem:[%s30438_s3 + $0x604] ss:$12 sps:$4 sm:$0xff]  }
 0x602   : > { %7861 = vmatprep.subr.bf16.mxu0 %v22025_v39  ;;  %v22062_v39 = vld [vmem:[%s30438_s3 + $0x600] ss:$12 sps:$4 sm:$0xff]  }
 0x605   : > { %7862 = vmatpush1.bf16.msra.mxu0 %v22023_v34  ;;  %v22067_v34 = vld [vmem:[%s30438_s3 + $0x61c] ss:$12 sps:$4 sm:$0xff]  }
 0x606   : > { %7863 = vmatprep.subr.bf16.mxu0 %v22028_v46  ;;  %v22065_v46 = vld [vmem:[%s30438_s3 + $0x618] ss:$12 sps:$4 sm:$0xff]  }
 0x609   : > { %7864 = vmatpush1.bf16.msra.mxu0 %v22026_v41  ;;  %v21095_v19 = vpop.f32.mrb[20].mxu1  ;;  %v22070_v41 = vld [vmem:[%s30438_s3 + $0x634] ss:$12 sps:$4 sm:$0xff]  }
 0x60a   : > { %v21096_v7 = vpop.f32.mrb[21].mxu1  ;;  %7865 = vmatprep.subr.bf16.mxu0 %v22031_v0  ;;  %v22068_v0 = vld [vmem:[%s30438_s3 + $0x630] ss:$12 sps:$4 sm:$0xff]  }
 0x60b   : > { %v21007_v23 = vpop.f32.mrb[36].mxu0  ;;  %v26651_v32 = vadd.f32 %v21096_v7, %v21095_v19  ;;  %v21098_v10 = vpop.f32.mrb[22].mxu1  ;;  %v22076_v19 = vld [vmem:[%s30438_s3 + $0x664] ss:$12 sps:$4 sm:$0xff]   ;;  %v22079_v7 = vld [vmem:[%s30438_s3 + $0x67c] ss:$12 sps:$4 sm:$0xff]  }
 0x60c   : > { %v21008_v60 = vpop.f32.mrb[37].mxu0  ;;  %v21099_v51 = vpop.f32.mrb[23].mxu1 }
 0x60d   : > { %v26653_v26 = vadd.f32 %v21008_v60, %v21007_v23  ;;  %v21010_v5 = vpop.f32.mrb[38].mxu0  ;;  %7866 = vmatpush1.bf16.msra.mxu0 %v22029_v35  ;;  %v26655_v9 = vadd.f32 %v21099_v51, %v21098_v10  ;;  %v22074_v35 = vld [vmem:[%s30438_s3 + $0x660] ss:$12 sps:$4 sm:$0xff]   ;;  %v22077_v23 = vld [vmem:[%s30438_s3 + $0x678] ss:$12 sps:$4 sm:$0xff]  }
 0x60e   : > { %v21011_v30 = vpop.f32.mrb[39].mxu0  ;;  %7867 = vmatprep.subr.bf16.mxu0 %v22034_v56  ;;  %v22082_v60 = vld [vmem:[%s30438_s3 + $0x694] ss:$12 sps:$4 sm:$0xff]  }
 0x60f   : > { %v26663_v54 = vadd.f32 %v21011_v30, %v21010_v5 }
 0x611   : > { %7868 = vmatpush1.bf16.msra.mxu0 %v22032_v11 }
 0x612   : > { %7869 = vmatprep.subr.bf16.mxu0 %v22037_v1  ;;  %v22080_v1 = vld [vmem:[%s30438_s3 + $0x690] ss:$12 sps:$4 sm:$0xff]  }
 0x615   : > { %7870 = vmatpush1.bf16.msra.mxu0 %v22035_v52  ;;  %v22085_v52 = vld [vmem:[%s30438_s3 + $0x6ac] ss:$12 sps:$4 sm:$0xff]  }
 0x616   : > { %7871 = vmatprep.subr.bf16.mxu0 %v22040_v61  ;;  %v22083_v61 = vld [vmem:[%s30438_s3 + $0x6a8] ss:$12 sps:$4 sm:$0xff]  }
 0x619   : > { %7872 = vmatpush1.bf16.msra.mxu0 %v22038_v3  ;;  %v22088_v3 = vld [vmem:[%s30438_s3 + $0x6c4] ss:$12 sps:$4 sm:$0xff]  }
 0x61a   : > { %7873 = vmatprep.subr.bf16.mxu0 %v22043_v63  ;;  %v22086_v63 = vld [vmem:[%s30438_s3 + $0x6c0] ss:$12 sps:$4 sm:$0xff]  }
 0x61d   : > { %7874 = vmatpush1.bf16.msra.mxu0 %v22041_v38  ;;  %v22091_v38 = vld [vmem:[%s30438_s3 + $0x6dc] ss:$12 sps:$4 sm:$0xff]  }
 0x61e   : > { %7875 = vmatprep.subr.bf16.mxu0 %v22046_v42  ;;  %v22089_v42 = vld [vmem:[%s30438_s3 + $0x6d8] ss:$12 sps:$4 sm:$0xff]  }
 0x621   : > { %7876 = vmatpush1.bf16.msra.mxu0 %v22044_v31  ;;  %v22094_v31 = vld [vmem:[%s30438_s3 + $0x6f4] ss:$12 sps:$4 sm:$0xff]  }
 0x622   : > { %7877 = vmatprep.subr.bf16.mxu0 %v22049_v44  ;;  %v22092_v44 = vld [vmem:[%s30438_s3 + $0x6f0] ss:$12 sps:$4 sm:$0xff]  }
 0x625   : > { %7878 = vmatpush1.bf16.msra.mxu0 %v22047_v50  ;;  %v22097_v50 = vld [vmem:[%s30438_s3 + $0x70c] ss:$12 sps:$4 sm:$0xff]  }
 0x626   : > { %7879 = vmatprep.subr.bf16.mxu0 %v22052_v15  ;;  %v22095_v15 = vld [vmem:[%s30438_s3 + $0x708] ss:$12 sps:$4 sm:$0xff]  }
 0x629   : > { %7880 = vmatpush1.bf16.msra.mxu0 %v22050_v6  ;;  %v21117_v62 = vpop.f32.mrb[24].mxu1  ;;  %v22100_v6 = vld [vmem:[%s30438_s3 + $0x724] ss:$12 sps:$4 sm:$0xff]  }
 0x62a   : > { %v21118_v36 = vpop.f32.mrb[25].mxu1  ;;  %7881 = vmatprep.subr.bf16.mxu0 %v22055_v24  ;;  %v22098_v24 = vld [vmem:[%s30438_s3 + $0x720] ss:$12 sps:$4 sm:$0xff]  }
 0x62b   : > { %v26707_v13 = vadd.f32 %v21118_v36, %v21117_v62  ;;  %v21120_v57 = vpop.f32.mrb[26].mxu1  ;;  %v22103_v62 = vld [vmem:[%s30438_s3 + $0x73c] ss:$12 sps:$4 sm:$0xff]   ;;  %v22101_v36 = vld [vmem:[%s30438_s3 + $0x738] ss:$12 sps:$4 sm:$0xff]  }
 0x62c   : > { %v21121_v12 = vpop.f32.mrb[27].mxu1 }
 0x62d   : > { %7882 = vmatpush1.bf16.msra.mxu0 %v22053_v14  ;;  %v26709_v29 = vadd.f32 %v21121_v12, %v21120_v57  ;;  %v22106_v57 = vld [vmem:[%s30438_s3 + $0x754] ss:$12 sps:$4 sm:$0xff]  }
 0x62e   : > { %7883 = vmatprep.subr.bf16.mxu0 %v22058_v33 }
 0x631   : > { %7884 = vmatpush1.bf16.msra.mxu0 %v22056_v17 }
 0x632   : > { %7885 = vmatprep.subr.bf16.mxu0 %v22061_v47 }
 0x635   : > { %7886 = vmatpush1.bf16.msra.mxu0 %v22059_v16 }
 0x636   : > { %8301 = vmatprep.subr.bf16.mxu0 %v22064_v21 }
 0x638   : > { %7888 = vmatmul.mubr.bf16.vlgmr.msra.gmra.mrb[32].mxu0 %v25869_v22  ;;  %v22073_v22 = vld [vmem:[%s30438_s3 + $0x64c] ss:$12 sps:$4 sm:$0xff]  }
 0x639   : > { %8302 = vmatpush1.bf16.msra.mxu0 %v22062_v39  ;;  %8333 = vmatprep.mubr.bf16.mxu0 %v25980_v55  ;;  %v22071_v55 = vld [vmem:[%s30438_s3 + $0x648] ss:$12 sps:$4 sm:$0xff]  }
 0x63a   : > { %8303 = vmatprep.subr.bf16.mxu0 %v22067_v34 }
 0x63d   : > { %8304 = vmatpush1.bf16.msra.mxu0 %v22065_v46 }
 0x63e   : > { %8305 = vmatprep.subr.bf16.mxu0 %v22070_v41  ;;  %v22104_v41 = vld [vmem:[%s30438_s3 + $0x750] ss:$12 sps:$4 sm:$0xff]  }
 0x641   : > { %8306 = vmatpush1.bf16.msra.mxu0 %v22068_v0 }
 0x642   : > { %8307 = vmatprep.subr.bf16.mxu0 %v22073_v22  ;;  %v22109_v22 = vld [vmem:[%s30438_s3 + $0x76c] ss:$12 sps:$4 sm:$0xff]  }
 0x645   : > { %8308 = vmatpush1.bf16.msra.mxu0 %v22071_v55 }
 0x646   : > { %8309 = vmatprep.subr.bf16.mxu0 %v22076_v19 }
 0x649   : > { %8310 = vmatpush1.bf16.msra.mxu0 %v22074_v35  ;;  %v21139_v56 = vpop.f32.mrb[28].mxu1 }
 0x64a   : > { %v21140_v10 = vpop.f32.mrb[29].mxu1  ;;  %8311 = vmatprep.subr.bf16.mxu0 %v22079_v7  ;;  %v22107_v7 = vld [vmem:[%s30438_s3 + $0x768] ss:$12 sps:$4 sm:$0xff]  }
 0x64b   : > { %v26761_v51 = vadd.f32 %v21140_v10, %v21139_v56  ;;  %v21142_v5 = vpop.f32.mrb[30].mxu1  ;;  %v22112_v56 = vld [vmem:[%s30438_s3 + $0x784] ss:$12 sps:$4 sm:$0xff]   ;;  %v22118_v10 = vld [vmem:[%s30438_s3 + $0x7b4] ss:$12 sps:$4 sm:$0xff]  }
 0x64c   : > { %v21143_v11 = vpop.f32.mrb[31].mxu1 }
 0x64d   : > { %8312 = vmatpush1.bf16.msra.mxu0 %v22077_v23  ;;  %v26763_v30 = vadd.f32 %v21143_v11, %v21142_v5  ;;  %v22113_v23 = vld [vmem:[%s30438_s3 + $0x798] ss:$12 sps:$4 sm:$0xff]   ;;  %v22122_v11 = vld [vmem:[%s30438_s3 + $0x7e0] ss:$12 sps:$4 sm:$0xff]  }
 0x64e   : > { %8313 = vmatprep.subr.bf16.mxu0 %v22082_v60  ;;  %v22116_v60 = vld [vmem:[%s30438_s3 + $0x7b0] ss:$12 sps:$4 sm:$0xff]  }
 0x64f   : > { %v22124_v5 = vld [vmem:[%s30438_s3 + $0x7e4] ss:$12 sps:$4 sm:$0xff]  }
 0x651   : > { %8314 = vmatpush1.bf16.msra.mxu0 %v22080_v1  ;;  %v22127_v1 = vld [vmem:[%s30438_s3 + $0x7fc] ss:$12 sps:$4 sm:$0xff]  }
 0x652   : > { %8315 = vmatprep.subr.bf16.mxu0 %v22085_v52 }
 0x655   : > { %8316 = vmatpush1.bf16.msra.mxu0 %v22083_v61  ;;  %v22125_v61 = vld [vmem:[%s30438_s3 + $0x7f8] ss:$12 sps:$4 sm:$0xff]  }
 0x656   : > { %8317 = vmatprep.subr.bf16.mxu0 %v22088_v3 }
 0x659   : > { %8318 = vmatpush1.bf16.msra.mxu0 %v22086_v63  ;;  %v22130_v63 = vld [vmem:[%s30438_s3 + $0x814] ss:$12 sps:$4 sm:$0xff]  }
 0x65a   : > { %8319 = vmatprep.subr.bf16.mxu0 %v22091_v38 }
 0x65d   : > { %8320 = vmatpush1.bf16.msra.mxu0 %v22089_v42 }
 0x65e   : > { %8321 = vmatprep.subr.bf16.mxu0 %v22094_v31 }
 0x661   : > { %8322 = vmatpush1.bf16.msra.mxu0 %v22092_v44 }
 0x662   : > { %8323 = vmatprep.subr.bf16.mxu0 %v22097_v50  ;;  %v22128_v50 = vld [vmem:[%s30438_s3 + $0x810] ss:$12 sps:$4 sm:$0xff]  }
 0x665   : > { %8324 = vmatpush1.bf16.msra.mxu0 %v22095_v15  ;;  %v22133_v15 = vld [vmem:[%s30438_s3 + $0x82c] ss:$12 sps:$4 sm:$0xff]  }
 0x666   : > { %8325 = vmatprep.subr.bf16.mxu0 %v22100_v6  ;;  %v22131_v6 = vld [vmem:[%s30438_s3 + $0x828] ss:$12 sps:$4 sm:$0xff]  }
 0x669   : > { %8326 = vmatpush1.bf16.msra.mxu0 %v22098_v24  ;;  %v21161_v14 = vpop.f32.mrb[32].mxu1  ;;  %v22136_v24 = vld [vmem:[%s30438_s3 + $0x844] ss:$12 sps:$4 sm:$0xff]  }
 0x66a   : > { %v21162_v33 = vpop.f32.mrb[33].mxu1  ;;  %8327 = vmatprep.subr.bf16.mxu0 %v22103_v62  ;;  %v22134_v62 = vld [vmem:[%s30438_s3 + $0x840] ss:$12 sps:$4 sm:$0xff]  }
 0x66b   : > { %v21029_v12 = vpop.f32.mrb[40].mxu0  ;;  %v26813_v17 = vadd.f32 %v21162_v33, %v21161_v14  ;;  %v21164_v47 = vpop.f32.mrb[34].mxu1  ;;  %v22139_v14 = vld [vmem:[%s30438_s3 + $0x85c] ss:$12 sps:$4 sm:$0xff]   ;;  %v22142_v33 = vld [vmem:[%s30438_s3 + $0x874] ss:$12 sps:$4 sm:$0xff]  }
 0x66c   : > { %v21030_v16 = vpop.f32.mrb[41].mxu0  ;;  %v21165_v21 = vpop.f32.mrb[35].mxu1 }
 0x66d   : > { %v21031_v39 = vadd.f32 %v21030_v16, %v21029_v12  ;;  %v21032_v34 = vpop.f32.mrb[42].mxu0  ;;  %8328 = vmatpush1.bf16.msra.mxu0 %v22101_v36  ;;  %v26815_v46 = vadd.f32 %v21165_v21, %v21164_v47  ;;  %v22137_v36 = vld [vmem:[%s30438_s3 + $0x858] ss:$12 sps:$4 sm:$0xff]   ;;  %v22143_v47 = vld [vmem:[%s30438_s3 + $0x888] ss:$12 sps:$4 sm:$0xff]  }
 0x66e   : > { %v21033_v0 = vpop.f32.mrb[43].mxu0  ;;  %8329 = vmatprep.subr.bf16.mxu0 %v22106_v57  ;;  %v22140_v57 = vld [vmem:[%s30438_s3 + $0x870] ss:$12 sps:$4 sm:$0xff]   ;;  %v22145_v12 = vld [vmem:[%s30438_s3 + $0x88c] ss:$12 sps:$4 sm:$0xff]  }
 0x66f   : > { %v26824_v55 = vadd.f32 %v21031_v39, %v26653_v26  ;;  %v21034_v19 = vadd.f32 %v21033_v0, %v21032_v34  ;;  %v22110_v26 = vld [vmem:[%s30438_s3 + $0x780] ss:$12 sps:$4 sm:$0xff]   ;;  %v22148_v16 = vld [vmem:[%s30438_s3 + $0x8a4] ss:$12 sps:$4 sm:$0xff]   ;;  %v22151_v39 = vld [vmem:[%s30438_s3 + $0x8bc] ss:$12 sps:$4 sm:$0xff]  }
 0x670   : > { %v22146_v21 = vld [vmem:[%s30438_s3 + $0x8a0] ss:$12 sps:$4 sm:$0xff]   ;;  %v22149_v34 = vld [vmem:[%s30438_s3 + $0x8b8] ss:$12 sps:$4 sm:$0xff]   ;;  %v22152_v0 = vld [vmem:[%s30438_s3 + $0x8d0] ss:$12 sps:$4 sm:$0xff]  }
 0x671   : > { %v26827_v35 = vadd.f32 %v21034_v19, %v26663_v54  ;;  %8330 = vmatpush1.bf16.msra.mxu0 %v22104_v41  ;;  %v22115_v54 = vld [vmem:[%s30438_s3 + $0x79c] ss:$12 sps:$4 sm:$0xff]   ;;  %v22154_v41 = vld [vmem:[%s30438_s3 + $0x8d4] ss:$12 sps:$4 sm:$0xff]  }
 0x672   : > { %8331 = vmatprep.subr.bf16.mxu0 %v22109_v22  ;;  %v22157_v22 = vld [vmem:[%s30438_s3 + $0x8ec] ss:$12 sps:$4 sm:$0xff]   ;;  %v22155_v19 = vld [vmem:[%s30438_s3 + $0x8e8] ss:$12 sps:$4 sm:$0xff]  }
 0x675   : > { %8332 = vmatpush1.bf16.msra.mxu0 %v22107_v7  ;;  %v22160_v7 = vld [vmem:[%s30438_s3 + $0x904] ss:$12 sps:$4 sm:$0xff]  }
 0x676   : > { %8736 = vmatprep.subr.bf16.mxu0 %v22112_v56  ;;  %v22158_v56 = vld [vmem:[%s30438_s3 + $0x900] ss:$12 sps:$4 sm:$0xff]  }
 0x678   : > { %8334 = vmatmul.mubr.bf16.vlgmr.msra.gmra.mrb[32].mxu0 %v26090_v59  ;;  %v22121_v59 = vld [vmem:[%s30438_s3 + $0x7cc] ss:$12 sps:$4 sm:$0xff]  }
 0x679   : > { %8737 = vmatpush1.bf16.msra.mxu0 %v22110_v26  ;;  %8768 = vmatprep.mubr.bf16.mxu0 %v26100_v45  ;;  %v22119_v45 = vld [vmem:[%s30438_s3 + $0x7c8] ss:$12 sps:$4 sm:$0xff]  }
 0x67a   : > { %8738 = vmatprep.subr.bf16.mxu0 %v22115_v54  ;;  %v22163_v26 = vld [vmem:[%s30438_s3 + $0x91c] ss:$12 sps:$4 sm:$0xff]   ;;  %v22161_v54 = vld [vmem:[%s30438_s3 + $0x918] ss:$12 sps:$4 sm:$0xff]  }
 0x67d   : > { %8739 = vmatpush1.bf16.msra.mxu0 %v22113_v23  ;;  %v22166_v23 = vld [vmem:[%s30438_s3 + $0x934] ss:$12 sps:$4 sm:$0xff]  }
 0x67e   : > { %8740 = vmatprep.subr.bf16.mxu0 %v22118_v10  ;;  %v22164_v10 = vld [vmem:[%s30438_s3 + $0x930] ss:$12 sps:$4 sm:$0xff]  }
 0x681   : > { %8741 = vmatpush1.bf16.msra.mxu0 %v22116_v60  ;;  %v22172_v60 = vld [vmem:[%s30438_s3 + $0x964] ss:$12 sps:$4 sm:$0xff]  }
 0x682   : > { %8742 = vmatprep.subr.bf16.mxu0 %v22121_v59  ;;  %v22170_v59 = vld [vmem:[%s30438_s3 + $0x960] ss:$12 sps:$4 sm:$0xff]  }
 0x685   : > { %8743 = vmatpush1.bf16.msra.mxu0 %v22119_v45  ;;  %v22175_v45 = vld [vmem:[%s30438_s3 + $0x97c] ss:$12 sps:$4 sm:$0xff]  }
 0x686   : > { %8744 = vmatprep.subr.bf16.mxu0 %v22124_v5  ;;  %v22173_v5 = vld [vmem:[%s30438_s3 + $0x978] ss:$12 sps:$4 sm:$0xff]  }
 0x689   : > { %8745 = vmatpush1.bf16.msra.mxu0 %v22122_v11  ;;  %v21183_v52 = vpop.f32.mrb[36].mxu1  ;;  %v22178_v11 = vld [vmem:[%s30438_s3 + $0x994] ss:$12 sps:$4 sm:$0xff]  }
 0x68a   : > { %v21184_v3 = vpop.f32.mrb[37].mxu1  ;;  %8746 = vmatprep.subr.bf16.mxu0 %v22127_v1 }
 0x68b   : > { %v26873_v38 = vadd.f32 %v21184_v3, %v21183_v52  ;;  %v21186_v42 = vpop.f32.mrb[38].mxu1 }
 0x68c   : > { %v21187_v31 = vpop.f32.mrb[39].mxu1 }
 0x68d   : > { %8747 = vmatpush1.bf16.msra.mxu0 %v22125_v61  ;;  %v26875_v44 = vadd.f32 %v21187_v31, %v21186_v42  ;;  %v22181_v31 = vld [vmem:[%s30438_s3 + $0x9ac] ss:$12 sps:$4 sm:$0xff]  }
 0x68e   : > { %8748 = vmatprep.subr.bf16.mxu0 %v22130_v63  ;;  %v22176_v63 = vld [vmem:[%s30438_s3 + $0x990] ss:$12 sps:$4 sm:$0xff]  }
 0x691   : > { %8749 = vmatpush1.bf16.msra.mxu0 %v22128_v50 }
 0x692   : > { %8750 = vmatprep.subr.bf16.mxu0 %v22133_v15 }
 0x695   : > { %8751 = vmatpush1.bf16.msra.mxu0 %v22131_v6 }
 0x696   : > { %8752 = vmatprep.subr.bf16.mxu0 %v22136_v24 }
 0x699   : > { %8753 = vmatpush1.bf16.msra.mxu0 %v22134_v62  ;;  %v22179_v62 = vld [vmem:[%s30438_s3 + $0x9a8] ss:$12 sps:$4 sm:$0xff]  }
 0x69a   : > { %8754 = vmatprep.subr.bf16.mxu0 %v22139_v14  ;;  %v22184_v14 = vld [vmem:[%s30438_s3 + $0x9c4] ss:$12 sps:$4 sm:$0xff]  }
 0x69d   : > { %8755 = vmatpush1.bf16.msra.mxu0 %v22137_v36 }
 0x69e   : > { %8756 = vmatprep.subr.bf16.mxu0 %v22142_v33 }
 0x6a1   : > { %8757 = vmatpush1.bf16.msra.mxu0 %v22140_v57  ;;  %v22187_v57 = vld [vmem:[%s30438_s3 + $0x9dc] ss:$12 sps:$4 sm:$0xff]  }
 0x6a2   : > { %8758 = vmatprep.subr.bf16.mxu0 %v22145_v12 }
 0x6a5   : > { %8759 = vmatpush1.bf16.msra.mxu0 %v22143_v47  ;;  %v22190_v47 = vld [vmem:[%s30438_s3 + $0x9f4] ss:$12 sps:$4 sm:$0xff]  }
 0x6a6   : > { %8760 = vmatprep.subr.bf16.mxu0 %v22148_v16 }
 0x6a9   : > { %8761 = vmatpush1.bf16.msra.mxu0 %v22146_v21 }
 0x6aa   : > { %8762 = vmatprep.subr.bf16.mxu0 %v22151_v39  ;;  %v22193_v39 = vld [vmem:[%s30438_s3 + $0xa0c] ss:$12 sps:$4 sm:$0xff]  }
 0x6ad   : > { %8763 = vmatpush1.bf16.msra.mxu0 %v22149_v34 }
 0x6ae   : > { %8764 = vmatprep.subr.bf16.mxu0 %v22154_v41 }
 0x6b1   : > { %8765 = vmatpush1.bf16.msra.mxu0 %v22152_v0  ;;  %v22191_v0 = vld [vmem:[%s30438_s3 + $0xa08] ss:$12 sps:$4 sm:$0xff]  }
 0x6b2   : > { %8766 = vmatprep.subr.bf16.mxu0 %v22157_v22 }
 0x6b5   : > { %8767 = vmatpush1.bf16.msra.mxu0 %v22155_v19 }
 0x6b6   : > { %9169 = vmatprep.subr.bf16.mxu0 %v22160_v7 }
 0x6b8   : > { %8769 = vmatmul.mubr.bf16.vlgmr.msra.gmra.mrb[32].mxu0 %v26207_v2  ;;  %v22169_v2 = vld [vmem:[%s30438_s3 + $0x94c] ss:$12 sps:$4 sm:$0xff]  }
 0x6b9   : > { %9170 = vmatpush1.bf16.msra.mxu0 %v22158_v56  ;;  %9201 = vmatprep.mubr.bf16.mxu0 %v26217_v37  ;;  %v22167_v37 = vld [vmem:[%s30438_s3 + $0x948] ss:$12 sps:$4 sm:$0xff]  }
 0x6ba   : > { %9171 = vmatprep.subr.bf16.mxu0 %v22163_v26  ;;  %v22196_v26 = vld [vmem:[%s30438_s3 + $0xa24] ss:$12 sps:$4 sm:$0xff]  }
 0x6bd   : > { %9172 = vmatpush1.bf16.msra.mxu0 %v22161_v54 }
 0x6be   : > { %9173 = vmatprep.subr.bf16.mxu0 %v22166_v23 }
 0x6c1   : > { %9174 = vmatpush1.bf16.msra.mxu0 %v22164_v10 }
 0x6c2   : > { %9175 = vmatprep.subr.bf16.mxu0 %v22169_v2 }
 0x6c5   : > { %9176 = vmatpush1.bf16.msra.mxu0 %v22167_v37 }
 0x6c6   : > { %9177 = vmatprep.subr.bf16.mxu0 %v22172_v60 }
 0x6c9   : > { %9178 = vmatpush1.bf16.msra.mxu0 %v22170_v59 }
 0x6ca   : > { %9179 = vmatprep.subr.bf16.mxu0 %v22175_v45 }
 0x6cb   : > { %v21051_v1 = vpop.f32.mrb[44].mxu0 }
 0x6cc   : > { %v21052_v52 = vpop.f32.mrb[45].mxu0 }
 0x6cd   : > { %v21053_v61 = vadd.f32 %v21052_v52, %v21051_v1  ;;  %v21054_v3 = vpop.f32.mrb[46].mxu0  ;;  %9180 = vmatpush1.bf16.msra.mxu0 %v22173_v5  ;;  %v22194_v52 = vld [vmem:[%s30438_s3 + $0xa20] ss:$12 sps:$4 sm:$0xff]  }
 0x6ce   : > { %v21055_v42 = vpop.f32.mrb[47].mxu0  ;;  %9181 = vmatprep.subr.bf16.mxu0 %v22178_v11 }
 0x6cf   : > { %v7500_v50 = vadd.f32 %v21053_v61, %v26824_v55  ;;  %v21056_v15 = vadd.f32 %v21055_v42, %v21054_v3 }
 0x6d1   : > { %v7941_v6 = vadd.f32 %v26597_v49, %v7500_v50  ;;  %v7503_v24 = vadd.f32 %v21056_v15, %v26827_v35  ;;  %9182 = vmatpush1.bf16.msra.mxu0 %v22176_v63  ;;  %v22182_v35 = vld [vmem:[%s30438_s3 + $0x9c0] ss:$12 sps:$4 sm:$0xff]  }
 0x6d2   : > { %9183 = vmatprep.subr.bf16.mxu0 %v22181_v31  ;;  %v22199_v31 = vld [vmem:[%s30438_s3 + $0xa3c] ss:$12 sps:$4 sm:$0xff]  }
 0x6d3   : > { %v8387_v36 = vadd.f32 %v26651_v32, %v7941_v6  ;;  %v7944_v33 = vadd.f32 %v26599_v20, %v7503_v24 }
 0x6d5   : > { %v8822_v55 = vadd.f32 %v26707_v13, %v8387_v36  ;;  %v8390_v49 = vadd.f32 %v26655_v9, %v7944_v33  ;;  %9184 = vmatpush1.bf16.msra.mxu0 %v22179_v62  ;;  %v22185_v9 = vld [vmem:[%s30438_s3 + $0x9d8] ss:$12 sps:$4 sm:$0xff]  }
 0x6d6   : > { %9185 = vmatprep.subr.bf16.mxu0 %v22184_v14 }
 0x6d7   : > { %v9255_v12 = vadd.f32 %v26761_v51, %v8822_v55  ;;  %v8825_v32 = vadd.f32 %v26709_v29, %v8390_v49 }
 0x6d9   : > { %v9693_v20 = vadd.f32 %v26813_v17, %v9255_v12  ;;  %v9258_v13 = vadd.f32 %v26763_v30, %v8825_v32  ;;  %9186 = vmatpush1.bf16.msra.mxu0 %v22182_v35  ;;  %v22188_v30 = vld [vmem:[%s30438_s3 + $0x9f0] ss:$12 sps:$4 sm:$0xff]   ;;  %v22197_v12 = vld [vmem:[%s30438_s3 + $0xa38] ss:$12 sps:$4 sm:$0xff]   ;;  %v10544_v32 = vsub.s32 2, %v23732_v27 }
 0x6da   : > { %9187 = vmatprep.subr.bf16.mxu0 %v22187_v57 }
 0x6db   : > { %v10120_v16 = vadd.f32 %v26873_v38, %v9693_v20  ;;  %v9696_v51 = vadd.f32 %v26815_v46, %v9258_v13 }
 0x6dd   : > { %v10123_v29 = vadd.f32 %v26875_v44, %v9696_v51  ;;  %9188 = vmatpush1.bf16.msra.mxu0 %v22185_v9  ;;  %v10132_v17 = vcombine.high %v10120_v16, %v10120_v16  ;;  %v27017_v21 = vrot.slane %v10120_v16, %v23735_v28  ;;  %v22202_v9 = vld [vmem:[%s30438_s3 + $0xa54] ss:$12 sps:$4 sm:$0xff]  }
 0x6de   : > { %9189 = vmatprep.subr.bf16.mxu0 %v22190_v47 }
 0x6df   : > { %v27023_v38 = vrot.slane %v10132_v17, %v23735_v28  ;;  %v19291_v46 = vcombine.low %v27017_v21, %v27017_v21  ;;  %v19292_v44 = vcombine.high %v27017_v21, %v27017_v21  ;;  %v10167_v34 = vcombine.high %v10123_v29, %v10123_v29 }
 0x6e0   : > { %v27030_v41 = vrot.slane %v10123_v29, %v23735_v28 }
 0x6e1   : > { %9190 = vmatpush1.bf16.msra.mxu0 %v22188_v30  ;;  %v10214_v22 = vrot.slane %v19291_v46, %v23735_v28  ;;  %v10230_v19 = vrot.slane %v19292_v44, %v23735_v28  ;;  %v19293_v7 = vcombine.low %v27023_v38, %v27023_v38  ;;  %v19294_v56 = vcombine.high %v27023_v38, %v27023_v38 }
 0x6e2   : > { %9191 = vmatprep.subr.bf16.mxu0 %v22193_v39  ;;  %v27045_v54 = vrot.slane %v10167_v34, %v23735_v28  ;;  %v19295_v23 = vcombine.low %v27030_v41, %v27030_v41  ;;  %v19296_v10 = vcombine.high %v27030_v41, %v27030_v41 }
 0x6e3   : > { %v10246_v2 = vrot.slane %v19293_v7, %v23735_v28  ;;  %v10262_v37 = vrot.slane %v19294_v56, %v23735_v28  ;;  %v10366_v60 = vsel %vm1460_vm3, %v10214_v22, -inf  ;;  %v10387_v59 = vsel %vm1460_vm3, %v10230_v19, -inf  ;;  %v27085_v19 = vld [vmem:[%s30442_s7] sm:$0x7]  ;;  %v22200_v7 = vld [vmem:[%s30438_s3 + $0xa50] ss:$12 sps:$4 sm:$0xff]  }
 0x6e4   : > { %v10367_v45 = vrot.slane %v10366_v60, 4  ;;  %v10388_v5 = vrot.slane %v10387_v59, 4  ;;  %v10278_v11 = vrot.slane %v19295_v23, %v23735_v28  ;;  %v10294_v1 = vrot.slane %v19296_v10, %v23735_v28  ;;  %v22205_v23 = vld [vmem:[%s30438_s3 + $0xa6c] ss:$12 sps:$4 sm:$0xff]  }
 0x6e5   : > { %9192 = vmatpush1.bf16.msra.mxu0 %v22191_v0  ;;  %v10408_v61 = vsel %vm1460_vm3, %v10246_v2, -inf  ;;  %v10429_v3 = vsel %vm1460_vm3, %v10262_v37, -inf  ;;  %v19297_v63 = vcombine.low %v27045_v54, %v27045_v54  ;;  %v19298_v42 = vcombine.high %v27045_v54, %v27045_v54 }
 0x6e6   : > { %9193 = vmatprep.subr.bf16.mxu0 %v22196_v26  ;;  %v10368_v50 = vmax.f32 %v10366_v60, %v10367_v45  ;;  %v10389_v15 = vmax.f32 %v10387_v59, %v10388_v5  ;;  %v10409_v6 = vrot.slane %v10408_v61, 4  ;;  %v10430_v24 = vrot.slane %v10429_v3, 4 }
 0x6e7   : > { %v10310_v62 = vrot.slane %v19297_v63, %v23735_v28  ;;  %v10326_v14 = vrot.slane %v19298_v42, %v23735_v28  ;;  %v10450_v36 = vsel %vm1460_vm3, %v10278_v11, -inf  ;;  %v10471_v33 = vsel %vm1460_vm3, %v10294_v1, -inf }
 0x6e8   : > { %v10369_v55 = vrot.slane %v10368_v50, 2  ;;  %v10390_v49 = vrot.slane %v10389_v15, 2  ;;  %v10410_v35 = vmax.f32 %v10408_v61, %v10409_v6  ;;  %v10431_v57 = vmax.f32 %v10429_v3, %v10430_v24 }
 0x6e9   : > { %9194 = vmatpush1.bf16.msra.mxu0 %v22194_v52  ;;  %v10451_v20 = vrot.slane %v10450_v36, 4  ;;  %v10472_v13 = vrot.slane %v10471_v33, 4  ;;  %v10492_v39 = vsel %vm1460_vm3, %v10310_v62, -inf  ;;  %v10513_v46 = vsel %vm1460_vm3, %v10326_v14, -inf  ;;  %v22203_v52 = vld [vmem:[%s30438_s3 + $0xa68] ss:$12 sps:$4 sm:$0xff]  }
 0x6ea   : > { %9195 = vmatprep.subr.bf16.mxu0 %v22199_v31  ;;  %v10370_v47 = vmax.f32 %v10368_v50, %v10369_v55  ;;  %v10391_v16 = vmax.f32 %v10389_v15, %v10390_v49  ;;  %v10411_v51 = vrot.slane %v10410_v35, 2  ;;  %v10432_v29 = vrot.slane %v10431_v57, 2  ;;  %v22208_v31 = vld [vmem:[%s30438_s3 + $0xa84] ss:$12 sps:$4 sm:$0xff]  }
 0x6eb   : > { %v10452_v30 = vmax.f32 %v10450_v36, %v10451_v20  ;;  %v10473_v17 = vmax.f32 %v10471_v33, %v10472_v13  ;;  %v10545_v37 = vrot.slane %v27085_v19, %v10544_v32  ;;  %v10493_v60 = vrot.slane %v10492_v39, 4  ;;  %v22206_v36 = vld [vmem:[%s30438_s3 + $0xa80] ss:$12 sps:$4 sm:$0xff]   ;;  %v22211_v33 = vld [vmem:[%s30438_s3 + $0xa9c] ss:$12 sps:$4 sm:$0xff]  }
 0x6ec   : > { %v10371_v44 = vrot.slane %v10370_v47, 1  ;;  %v10392_v34 = vrot.slane %v10391_v16, 1  ;;  %v10412_v0 = vmax.f32 %v10410_v35, %v10411_v51  ;;  %v10433_v22 = vmax.f32 %v10431_v57, %v10432_v29 }
 0x6ed   : > { %9196 = vmatpush1.bf16.msra.mxu0 %v22197_v12  ;;  %v10453_v56 = vrot.slane %v10452_v30, 2  ;;  %v10474_v26 = vrot.slane %v10473_v17, 2  ;;  %v10514_v59 = vrot.slane %v10513_v46, 4  ;;  %v10494_v63 = vmax.f32 %v10492_v39, %v10493_v60  ;;  %v22214_v39 = vld [vmem:[%s30438_s3 + $0xab4] ss:$12 sps:$4 sm:$0xff]  }
 0x6ee   : > { %9197 = vmatprep.subr.bf16.mxu0 %v22202_v9  ;;  %v10413_v10 = vrot.slane %v10412_v0, 1  ;;  %v10434_v2 = vrot.slane %v10433_v22, 1  ;;  %v10372_v45 = vmax.f32 %v10370_v47, %v10371_v44  ;;  %v10393_v5 = vmax.f32 %v10391_v16, %v10392_v34  ;;  %v22209_v16 = vld [vmem:[%s30438_s3 + $0xa98] ss:$12 sps:$4 sm:$0xff]  }
 0x6ef   : > { %v10454_v61 = vmax.f32 %v10452_v30, %v10453_v56  ;;  %v10475_v3 = vmax.f32 %v10473_v17, %v10474_v26  ;;  %v10515_v42 = vmax.f32 %v10513_v46, %v10514_v59  ;;  %v10495_v6 = vrot.slane %v10494_v63, 2  ;;  %v22217_v26 = vld [vmem:[%s30438_s3 + $0xacc] ss:$12 sps:$4 sm:$0xff]   ;;  %v22215_v59 = vld [vmem:[%s30438_s3 + $0xac8] ss:$12 sps:$4 sm:$0xff]  }
 0x6f0   : > { %v10414_v11 = vmax.f32 %v10412_v0, %v10413_v10  ;;  %v10435_v1 = vmax.f32 %v10433_v22, %v10434_v2 }
 0x6f1   : > { %9198 = vmatpush1.bf16.msra.mxu0 %v22200_v7  ;;  %v10516_v24 = vrot.slane %v10515_v42, 2  ;;  %v10455_v55 = vrot.slane %v10454_v61, 1  ;;  %v10476_v49 = vrot.slane %v10475_v3, 1  ;;  %v10496_v35 = vmax.f32 %v10494_v63, %v10495_v6  ;;  %v22212_v7 = vld [vmem:[%s30438_s3 + $0xab0] ss:$12 sps:$4 sm:$0xff]  }
 0x6f2   : > { %9199 = vmatprep.subr.bf16.mxu0 %v22205_v23  ;;  %v10522_v50 = vmax.f32 %v10372_v45, %v10414_v11  ;;  %v10525_v15 = vmax.f32 %v10393_v5, %v10435_v1  ;;  %v22220_v11 = vld [vmem:[%s30438_s3 + $0xae4] ss:$12 sps:$4 sm:$0xff]  }
 0x6f3   : > { %v10517_v57 = vmax.f32 %v10515_v42, %v10516_v24  ;;  %v10497_v20 = vrot.slane %v10496_v35, 1  ;;  %v10456_v30 = vmax.f32 %v10454_v61, %v10455_v55  ;;  %v22218_v42 = vld [vmem:[%s30438_s3 + $0xae0] ss:$12 sps:$4 sm:$0xff]  }
 0x6f4   : > { %v10551_v62 = vadd.f32 %v10545_v37, %v10522_v50  ;;  %v10554_v14 = vadd.f32 %v10545_v37, %v10525_v15  ;;  %v22223_v15 = vld [vmem:[%s30438_s3 + $0xafc] ss:$12 sps:$4 sm:$0xff]   ;;  %v22229_v55 = vld [vmem:[%s30438_s3 + $0xb2c] ss:$12 sps:$4 sm:$0xff]  }
 0x6f5   : > { %9200 = vmatpush1.bf16.msra.mxu0 %v22203_v52  ;;  %v10518_v13 = vrot.slane %v10517_v57, 1  ;;  %v10498_v17 = vmax.f32 %v10496_v35, %v10497_v20  ;;  %v22232_v35 = vld [vmem:[%s30438_s3 + $0xb44] ss:$12 sps:$4 sm:$0xff]   ;;  %v22238_v20 = vld [vmem:[%s30438_s3 + $0xb74] ss:$12 sps:$4 sm:$0xff]  }
 0x6f6   : > { %9607 = vmatprep.subr.bf16.mxu0 %v22208_v31  ;;  %vm10563_vm6 = vcmp.ge.f32.partialorder %v10551_v62, 0.0  ;;  %vm10566_vm8 = vcmp.ge.f32.partialorder %v10554_v14, 0.0  ;;  %v10575_v12 = vmul.f32 0.1, %v10551_v62  ;;  %v10578_v32 = vmul.f32 0.1, %v10554_v14 }
 0x6f7   : > { %v10519_v44 = vmax.f32 %v10517_v57, %v10518_v13  ;;  %v10528_v0 = vmax.f32 %v10456_v30, %v10498_v17  ;;  %v22230_v57 = vld [vmem:[%s30438_s3 + $0xb40] ss:$12 sps:$4 sm:$0xff]   ;;  %v22236_v13 = vld [vmem:[%s30438_s3 + $0xb70] ss:$12 sps:$4 sm:$0xff]   ;;  %v22245_v30 = vld [vmem:[%s30438_s3 + $0xbb8] ss:$12 sps:$4 sm:$0xff]  }
 0x6f8   : > { %9202 = vmatmul.mubr.bf16.vlgmr.msra.gmra.mrb[32].mxu0 %v26313_v53  ;;  %v10587_v9 = vsel %vm10563_vm6, %v10551_v62, %v10575_v12  ;;  %v10590_v47 = vsel %vm10566_vm8, %v10554_v14, %v10578_v32  ;;  %v10477_v53 = vmax.f32 %v10475_v3, %v10476_v49  ;;  %v22221_v14 = vld [vmem:[%s30438_s3 + $0xaf8] ss:$12 sps:$4 sm:$0xff]   ;;  %v22227_v49 = vld [vmem:[%s30438_s3 + $0xb28] ss:$12 sps:$4 sm:$0xff]   ;;  %vm10858_vm8 = vmor %vm10856_vm1, %vm10857_vm9  ;;  %vm10867_vm9 = vsmask.f32 6424 }
 0x6f9   : > { %9608 = vmatpush1.bf16.msra.mxu0 %v22206_v36  ;;  %9639 = vmatprep.mubr.bf16.mxu0 %v26044_v4  ;;  %v10639_v51 = vrot.slane %v10587_v9, 7  ;;  %v10640_v29 = vrot.slane %v10590_v47, 6  ;;  %v10622_v46 = vrot.slane %v10590_v47, 7  ;;  %v10557_v56 = vadd.f32 %v10545_v37, %v10528_v0  ;;  %v22226_v36 = vld [vmem:[%s30438_s3 + $0xb14] ss:$12 sps:$4 sm:$0xff]  }
 0x6fa   : > { %9609 = vmatprep.subr.bf16.mxu0 %v22211_v33  ;;  %v10531_v22 = vmax.f32 %v10477_v53, %v10519_v44  ;;  %v22224_v33 = vld [vmem:[%s30438_s3 + $0xb10] ss:$12 sps:$4 sm:$0xff]   ;;  %v22233_v32 = vld [vmem:[%s30438_s3 + $0xb58] ss:$12 sps:$4 sm:$0xff]   ;;  %v22239_v47 = vld [vmem:[%s30438_s3 + $0xb88] ss:$12 sps:$4 sm:$0xff]  }
 0x6fb   : > { %v10641_v34 = vsel %vm2752_vm5, %v10640_v29, %v10639_v51  ;;  %v10623_v23 = vsel %vm2749_vm4, %v10622_v46, %v10587_v9  ;;  %vm10569_vm10 = vcmp.ge.f32.partialorder %v10557_v56, 0.0  ;;  %v10581_v2 = vmul.f32 0.1, %v10557_v56  ;;  %v22235_v12 = vld [vmem:[%s30438_s3 + $0xb5c] ss:$12 sps:$4 sm:$0xff]  }
 0x6fc   : > { %v10642_v4 = vsel %vm2764_vm13, %v10640_v29, %v10641_v34  ;;  %v10560_v10 = vadd.f32 %v10545_v37, %v10531_v22  ;;  %v10624_v5 = vsel %vm2761_vm12, %v10622_v46, %v10623_v23  ;;  %v22241_v9 = vld [vmem:[%s30438_s3 + $0xb8c] ss:$12 sps:$4 sm:$0xff]   ;;  %v22247_v29 = vld [vmem:[%s30438_s3 + $0xbbc] ss:$12 sps:$4 sm:$0xff]   ;;  %v22250_v17 = vld [vmem:[%s30438_s3 + $0xbd4] ss:$12 sps:$4 sm:$0xff]  }
 0x6fd   : > { %9610 = vmatpush1.bf16.msra.mxu0 %v22209_v16  ;;  %10657 = vst [vmem:[#allocation4 + $0x14] sm:$0x6] %v10642_v4  ;;  %v10593_v45 = vsel %vm10569_vm10, %v10557_v56, %v10581_v2  ;;  %v22244_v16 = vld [vmem:[%s30438_s3 + $0xba4] ss:$12 sps:$4 sm:$0xff]   ;;  %v22242_v51 = vld [vmem:[%s30438_s3 + $0xba0] ss:$12 sps:$4 sm:$0xff]  }
 0x6fe   : > { %9611 = vmatprep.subr.bf16.mxu0 %v22214_v39  ;;  %vm10572_vm15 = vcmp.ge.f32.partialorder %v10560_v10, 0.0  ;;  %v10584_v60 = vmul.f32 0.1, %v10560_v10  ;;  %v10625_v37 = vrot.slane %v10593_v45, 6  ;;  %v10647_v52 = vrot.slane %v10593_v45, 7 }
 0x6ff   : > { %v22248_v39 = vld [vmem:[%s30438_s3 + $0xbd0] ss:$12 sps:$4 sm:$0xff]   ;;  %v22253_v46 = vld [vmem:[%s30438_s3 + $0xbec] ss:$12 sps:$4 sm:$0xff]   ;;  %v22251_v53 = vld [vmem:[%s30438_s3 + $0xbe8] ss:$12 sps:$4 sm:$0xff]  }
 0x700   : > { %v10596_v1 = vsel %vm10572_vm15, %v10560_v10, %v10584_v60  ;;  %v10626_v3 = vsel %vm2752_vm5, %v10625_v37, %v10624_v5  ;;  %v22256_v44 = vld [vmem:[%s30438_s3 + $0xc04] ss:$12 sps:$4 sm:$0xff]   ;;  %v22254_v34 = vld [vmem:[%s30438_s3 + $0xc00] ss:$12 sps:$4 sm:$0xff]   ;;  %v22259_v0 = vld [vmem:[%s30438_s3 + $0xc1c] ss:$12 sps:$4 sm:$0xff]  }
 0x701   : > { %9612 = vmatpush1.bf16.msra.mxu0 %v22212_v7  ;;  %v10648_v61 = vrot.slane %v10596_v1, 6  ;;  %v10628_v63 = vrot.slane %v10596_v1, 5  ;;  %v10627_v31 = vsel %vm2764_vm13, %v10625_v37, %v10626_v3  ;;  %v22257_v4 = vld [vmem:[%s30438_s3 + $0xc18] ss:$12 sps:$4 sm:$0xff]   ;;  %v22262_v22 = vld [vmem:[%s30438_s3 + $0xc34] ss:$12 sps:$4 sm:$0xff]  }
 0x702   : > { %9613 = vmatprep.subr.bf16.mxu0 %v22217_v26  ;;  %v22260_v7 = vld [vmem:[%s30438_s3 + $0xc30] ss:$12 sps:$4 sm:$0xff]   ;;  %v22266_v26 = vld [vmem:[%s30438_s3 + $0xc60] ss:$12 sps:$4 sm:$0xff]   ;;  %v22269_v10 = vld [vmem:[%s30438_s3 + $0xc78] ss:$12 sps:$4 sm:$0xff]  }
 0x703   : > { %v10649_v50 = vsel %vm2752_vm5, %v10648_v61, %v10647_v52  ;;  %v10629_v6 = vsel %vm2755_vm7, %v10628_v63, %v10627_v31  ;;  %v22268_v56 = vld [vmem:[%s30438_s3 + $0xc64] ss:$12 sps:$4 sm:$0xff]   ;;  %v22271_v23 = vld [vmem:[%s30438_s3 + $0xc7c] ss:$12 sps:$4 sm:$0xff]   ;;  %v22274_v2 = vld [vmem:[%s30438_s3 + $0xc94] ss:$12 sps:$4 sm:$0xff]  }
 0x704   : > { %v10650_v24 = vsel %vm2764_vm13, %v10648_v61, %v10649_v50  ;;  %v10630_v62 = vsel %vm2767_vm14, %v10628_v63, %v10629_v6  ;;  %v22272_v60 = vld [vmem:[%s30438_s3 + $0xc90] ss:$12 sps:$4 sm:$0xff]   ;;  %v22275_v45 = vld [vmem:[%s30438_s3 + $0xca8] ss:$12 sps:$4 sm:$0xff]   ;;  %v22281_v37 = vld [vmem:[%s30438_s3 + $0xcd8] ss:$12 sps:$4 sm:$0xff]  }
 0x705   : > { %9614 = vmatpush1.bf16.msra.mxu0 %v22215_v59  ;;  %10659 = vst [vmem:[#allocation4 + $0x20] sm:$0x6] %v10650_v24  ;;  %10634 = vst [vmem:[%s27138_s22 + $0x8] sm:$0xf] %v10630_v62  ;;  %v22277_v59 = vld [vmem:[%s30438_s3 + $0xcac] ss:$12 sps:$4 sm:$0xff]  }
 0x706   : > { %9615 = vmatprep.subr.bf16.mxu0 %v22220_v11  ;;  %v22280_v5 = vld [vmem:[%s30438_s3 + $0xcc4] ss:$12 sps:$4 sm:$0xff]   ;;  %v22278_v11 = vld [vmem:[%s30438_s3 + $0xcc0] ss:$12 sps:$4 sm:$0xff]   ;;  %v22283_v1 = vld [vmem:[%s30438_s3 + $0xcdc] ss:$12 sps:$4 sm:$0xff]  }
 0x707   : > { %v22286_v52 = vld [vmem:[%s30438_s3 + $0xcf4] ss:$12 sps:$4 sm:$0xff]   ;;  %v22284_v61 = vld [vmem:[%s30438_s3 + $0xcf0] ss:$12 sps:$4 sm:$0xff]   ;;  %v22289_v3 = vld [vmem:[%s30438_s3 + $0xd0c] ss:$12 sps:$4 sm:$0xff]  }
 0x708   : > { %v22287_v63 = vld [vmem:[%s30438_s3 + $0xd08] ss:$12 sps:$4 sm:$0xff]   ;;  %v22290_v31 = vld [vmem:[%s30438_s3 + $0xd20] ss:$12 sps:$4 sm:$0xff]   ;;  %v22296_v24 = vld [vmem:[%s30438_s3 + $0xd50] ss:$12 sps:$4 sm:$0xff]  }
 0x709   : > { %9616 = vmatpush1.bf16.msra.mxu0 %v22218_v42  ;;  %v22292_v42 = vld [vmem:[%s30438_s3 + $0xd24] ss:$12 sps:$4 sm:$0xff]   ;;  %v22295_v50 = vld [vmem:[%s30438_s3 + $0xd3c] ss:$12 sps:$4 sm:$0xff]   ;;  %v22298_v6 = vld [vmem:[%s30438_s3 + $0xd54] ss:$12 sps:$4 sm:$0xff]  }
 0x70a   : > { %9617 = vmatprep.subr.bf16.mxu0 %v22223_v15  ;;  %v22293_v15 = vld [vmem:[%s30438_s3 + $0xd38] ss:$12 sps:$4 sm:$0xff]   ;;  %vm10859_vm10 = vsmask.f32 2312  ;;  %vm10861_vm15 = vsmask.f32 3340 }
 0x70b   : > { %v22301_v62 = vld [vmem:[%s30438_s3 + $0xd6c] ss:$12 sps:$4 sm:$0xff]  }
 0x70d   : > { %9618 = vmatpush1.bf16.msra.mxu0 %v22221_v14  ;;  %v22299_v14 = vld [vmem:[%s30438_s3 + $0xd68] ss:$12 sps:$4 sm:$0xff]  }
 0x70e   : > { %9619 = vmatprep.subr.bf16.mxu0 %v22226_v36  ;;  %v22304_v36 = vld [vmem:[%s30439_s4 + $0x304] ss:$16 sps:$4 sm:$0xff]  }
 0x711   : > { %9620 = vmatpush1.bf16.msra.mxu0 %v22224_v33  ;;  %v22302_v33 = vld [vmem:[%s30439_s4 + $0x300] ss:$16 sps:$4 sm:$0xff]  }
 0x712   : > { %9621 = vmatprep.subr.bf16.mxu0 %v22229_v55  ;;  %v22307_v55 = vld [vmem:[%s30439_s4 + $0x324] ss:$16 sps:$4 sm:$0xff]  }
 0x715   : > { %9622 = vmatpush1.bf16.msra.mxu0 %v22227_v49  ;;  %v22305_v49 = vld [vmem:[%s30439_s4 + $0x320] ss:$16 sps:$4 sm:$0xff]  }
 0x716   : > { %9623 = vmatprep.subr.bf16.mxu0 %v22232_v35  ;;  %v22308_v35 = vld [vmem:[%s30439_s4 + $0x340] ss:$16 sps:$4 sm:$0xff]  }
 0x719   : > { %9624 = vmatpush1.bf16.msra.mxu0 %v22230_v57  ;;  %v22313_v57 = vld [vmem:[%s30439_s4 + $0x364] ss:$16 sps:$4 sm:$0xff]  }
 0x71a   : > { %9625 = vmatprep.subr.bf16.mxu0 %v22235_v12  ;;  %v22311_v12 = vld [vmem:[%s30439_s4 + $0x360] ss:$16 sps:$4 sm:$0xff]  }
 0x71d   : > { %9626 = vmatpush1.bf16.msra.mxu0 %v22233_v32  ;;  %v22316_v32 = vld [vmem:[%s30439_s4 + $0x384] ss:$16 sps:$4 sm:$0xff]  }
 0x71e   : > { %9627 = vmatprep.subr.bf16.mxu0 %v22238_v20  ;;  %v22314_v20 = vld [vmem:[%s30439_s4 + $0x380] ss:$16 sps:$4 sm:$0xff]  }
 0x721   : > { %9628 = vmatpush1.bf16.msra.mxu0 %v22236_v13  ;;  %v22319_v13 = vld [vmem:[%s30439_s4 + $0x3a4] ss:$16 sps:$4 sm:$0xff]  }
 0x722   : > { %9629 = vmatprep.subr.bf16.mxu0 %v22241_v9  ;;  %v22317_v9 = vld [vmem:[%s30439_s4 + $0x3a0] ss:$16 sps:$4 sm:$0xff]  }
 0x725   : > { %9630 = vmatpush1.bf16.msra.mxu0 %v22239_v47  ;;  %v22322_v47 = vld [vmem:[%s30439_s4 + $0x3c4] ss:$16 sps:$4 sm:$0xff]  }
 0x726   : > { %9631 = vmatprep.subr.bf16.mxu0 %v22244_v16  ;;  %v22320_v16 = vld [vmem:[%s30439_s4 + $0x3c0] ss:$16 sps:$4 sm:$0xff]  }
 0x729   : > { %9632 = vmatpush1.bf16.msra.mxu0 %v22242_v51  ;;  %v22325_v51 = vld [vmem:[%s30439_s4 + $0x3e4] ss:$16 sps:$4 sm:$0xff]  }
 0x72a   : > { %9633 = vmatprep.subr.bf16.mxu0 %v22247_v29  ;;  %v22323_v29 = vld [vmem:[%s30439_s4 + $0x3e0] ss:$16 sps:$4 sm:$0xff]  }
 0x72d   : > { %9634 = vmatpush1.bf16.msra.mxu0 %v22245_v30  ;;  %v22328_v30 = vld [vmem:[%s30439_s4 + $0x504] ss:$16 sps:$4 sm:$0xff]  }
 0x72e   : > { %9635 = vmatprep.subr.bf16.mxu0 %v22250_v17  ;;  %v22326_v17 = vld [vmem:[%s30439_s4 + $0x500] ss:$16 sps:$4 sm:$0xff]   ;;  %11534 = vmatprep.subr.bf16.mxu1 %v22328_v30 }
 0x72f   : > { %11535 = vmatpush1.bf16.msra.mxu1 %v22326_v17 }
 0x731   : > { %9636 = vmatpush1.bf16.msra.mxu0 %v22248_v39  ;;  %v22331_v39 = vld [vmem:[%s30439_s4 + $0x404] ss:$16 sps:$4 sm:$0xff]  }
 0x732   : > { %9637 = vmatprep.subr.bf16.mxu0 %v22253_v46  ;;  %v22329_v46 = vld [vmem:[%s30439_s4 + $0x400] ss:$16 sps:$4 sm:$0xff]  }
 0x735   : > { %9638 = vmatpush1.bf16.msra.mxu0 %v22251_v53  ;;  %v22334_v53 = vld [vmem:[%s30439_s4 + $0x524] ss:$16 sps:$4 sm:$0xff]  }
 0x736   : > { %10034 = vmatprep.subr.bf16.mxu0 %v22256_v44  ;;  %v22332_v44 = vld [vmem:[%s30439_s4 + $0x520] ss:$16 sps:$4 sm:$0xff]   ;;  %11536 = vmatprep.subr.bf16.mxu1 %v22334_v53 }
 0x737   : > { %11537 = vmatpush1.bf16.msra.mxu1 %v22332_v44 }
 0x738   : > { %9640 = vmatmul.mubr.bf16.vlgmr.msra.gmra.mrb[32].mxu0 %v26047_v48  ;;  %v22265_v48 = vld [vmem:[%s30438_s3 + $0xc4c] ss:$12 sps:$4 sm:$0xff]  }
 0x739   : > { %10035 = vmatpush1.bf16.msra.mxu0 %v22254_v34  ;;  %10066 = vmatprep.mubr.bf16.mxu0 %v26029_v43  ;;  %v22263_v43 = vld [vmem:[%s30438_s3 + $0xc48] ss:$12 sps:$4 sm:$0xff]  }
 0x73a   : > { %10036 = vmatprep.subr.bf16.mxu0 %v22259_v0  ;;  %v22337_v34 = vld [vmem:[%s30439_s4 + $0x424] ss:$16 sps:$4 sm:$0xff]   ;;  %v22335_v0 = vld [vmem:[%s30439_s4 + $0x420] ss:$16 sps:$4 sm:$0xff]  }
 0x73d   : > { %10037 = vmatpush1.bf16.msra.mxu0 %v22257_v4  ;;  %v22340_v4 = vld [vmem:[%s30439_s4 + $0x544] ss:$16 sps:$4 sm:$0xff]  }
 0x73e   : > { %10038 = vmatprep.subr.bf16.mxu0 %v22262_v22  ;;  %v22338_v22 = vld [vmem:[%s30439_s4 + $0x540] ss:$16 sps:$4 sm:$0xff]   ;;  %11538 = vmatprep.subr.bf16.mxu1 %v22340_v4  ;;  %v27486_v4 = vrot.slane %v27085_v19, %v5833_v40 }
 0x73f   : > { %11539 = vmatpush1.bf16.msra.mxu1 %v22338_v22 }
 0x741   : > { %10039 = vmatpush1.bf16.msra.mxu0 %v22260_v7  ;;  %v22343_v7 = vld [vmem:[%s30439_s4 + $0x444] ss:$16 sps:$4 sm:$0xff]  }
 0x742   : > { %10040 = vmatprep.subr.bf16.mxu0 %v22265_v48  ;;  %v22341_v48 = vld [vmem:[%s30439_s4 + $0x440] ss:$16 sps:$4 sm:$0xff]  }
 0x745   : > { %10041 = vmatpush1.bf16.msra.mxu0 %v22263_v43  ;;  %v22346_v43 = vld [vmem:[%s30439_s4 + $0x564] ss:$16 sps:$4 sm:$0xff]  }
 0x746   : > { %10042 = vmatprep.subr.bf16.mxu0 %v22268_v56  ;;  %v22349_v56 = vld [vmem:[%s30439_s4 + $0x464] ss:$16 sps:$4 sm:$0xff]   ;;  %11540 = vmatprep.subr.bf16.mxu1 %v22346_v43 }
 0x749   : > { %10043 = vmatpush1.bf16.msra.mxu0 %v22266_v26  ;;  %v22344_v26 = vld [vmem:[%s30439_s4 + $0x560] ss:$16 sps:$4 sm:$0xff]  }
 0x74a   : > { %10044 = vmatprep.subr.bf16.mxu0 %v22271_v23  ;;  %v23620_v23 = vmov 1966171168   ;;  %11541 = vmatpush1.bf16.msra.mxu1 %v22344_v26 }
 0x74d   : > { %10045 = vmatpush1.bf16.msra.mxu0 %v22269_v10  ;;  %v10700_v10 = vunpack.c.l.s4 %v23620_v23 }
 0x74e   : > { %10046 = vmatprep.subr.bf16.mxu0 %v22274_v2  ;;  %v22347_v2 = vld [vmem:[%s30439_s4 + $0x460] ss:$16 sps:$4 sm:$0xff]  }
 0x751   : > { %10047 = vmatpush1.bf16.msra.mxu0 %v22272_v60  ;;  %v22352_v60 = vld [vmem:[%s30439_s4 + $0x584] ss:$16 sps:$4 sm:$0xff]  }
 0x752   : > { %10048 = vmatprep.subr.bf16.mxu0 %v22277_v59  ;;  %v22355_v59 = vld [vmem:[%s30439_s4 + $0x484] ss:$16 sps:$4 sm:$0xff]   ;;  %11542 = vmatprep.subr.bf16.mxu1 %v22352_v60 }
 0x755   : > { %10049 = vmatpush1.bf16.msra.mxu0 %v22275_v45  ;;  %v22350_v45 = vld [vmem:[%s30439_s4 + $0x580] ss:$16 sps:$4 sm:$0xff]  }
 0x756   : > { %10050 = vmatprep.subr.bf16.mxu0 %v22280_v5  ;;  %v10701_v5 = vunpack.c.0.s8 %v10700_v10  ;;  %11543 = vmatpush1.bf16.msra.mxu1 %v22350_v45 }
 0x759   : > { %10051 = vmatpush1.bf16.msra.mxu0 %v22278_v11  ;;  %v22353_v11 = vld [vmem:[%s30439_s4 + $0x480] ss:$16 sps:$4 sm:$0xff]  }
 0x75a   : > { %10052 = vmatprep.subr.bf16.mxu0 %v22283_v1  ;;  %v22358_v1 = vld [vmem:[%s30439_s4 + $0x5a4] ss:$16 sps:$4 sm:$0xff]  }
 0x75b   : > { %11544 = vmatprep.subr.bf16.mxu1 %v22358_v1 }
 0x75d   : > { %10053 = vmatpush1.bf16.msra.mxu0 %v22281_v37  ;;  %v22361_v37 = vld [vmem:[%s30439_s4 + $0x4a4] ss:$16 sps:$4 sm:$0xff]  }
 0x75e   : > { %10054 = vmatprep.subr.bf16.mxu0 %v22286_v52  ;;  %v10667_v52 = vld [vmem:[#allocation4 + $0x2c] sm:$0xf] }
 0x761   : > { %10055 = vmatpush1.bf16.msra.mxu0 %v22284_v61  ;;  %v23607_v61 = vld [vmem:[#allocation2] sm:$0xff] }
 0x762   : > { %10056 = vmatprep.subr.bf16.mxu0 %v22289_v3  ;;  %v10675_v3 = vcombine.high %v23607_v61, %v23607_v61 }
 0x765   : > { %10057 = vmatpush1.bf16.msra.mxu0 %v22287_v63  ;;  %v22356_v63 = vld [vmem:[%s30439_s4 + $0x5a0] ss:$16 sps:$4 sm:$0xff]  }
 0x766   : > { %10058 = vmatprep.subr.bf16.mxu0 %v22292_v42  ;;  %v27429_v42 = vsub.s32 %v10701_v5, %v23732_v27  ;;  %11545 = vmatpush1.bf16.msra.mxu1 %v22356_v63 }
 0x769   : > { %10059 = vmatpush1.bf16.msra.mxu0 %v22290_v31  ;;  %v10691_v31 = vpack.c.bf16 %v10667_v52, %v10667_v52 }
 0x76a   : > { %10060 = vmatprep.subr.bf16.mxu0 %v22295_v50  ;;  %v22359_v50 = vld [vmem:[%s30439_s4 + $0x4a0] ss:$16 sps:$4 sm:$0xff]  }
 0x76d   : > { %10061 = vmatpush1.bf16.msra.mxu0 %v22293_v15  ;;  %v22364_v15 = vld [vmem:[%s30439_s4 + $0x5c4] ss:$16 sps:$4 sm:$0xff]  }
 0x76e   : > { %10062 = vmatprep.subr.bf16.mxu0 %v22298_v6  ;;  %v20361_v6 = vpack.c.bf16 %v10675_v3, %v23607_v61  ;;  %11546 = vmatprep.subr.bf16.mxu1 %v22364_v15 }
 0x771   : > { %10063 = vmatpush1.bf16.msra.mxu0 %v22296_v24  ;;  %v22367_v24 = vld [vmem:[%s30439_s4 + $0x4c4] ss:$16 sps:$4 sm:$0xff]  }
 0x772   : > { %10064 = vmatprep.subr.bf16.mxu0 %v22301_v62  ;;  %v27441_v62 = vrot.slane %v10691_v31, %v27429_v42 }
 0x775   : > { %10065 = vmatpush1.bf16.msra.mxu0 %v22299_v14  ;;  %v27444_v14 = vrot.slane %v20361_v6, %v27429_v42 }
 0x776   : > { %11493 = vmatprep.subr.bf16.mxu0 %v22304_v36  ;;  %v22362_v36 = vld [vmem:[%s30439_s4 + $0x5c0] ss:$16 sps:$4 sm:$0xff]  }
 0x777   : > { %11547 = vmatpush1.bf16.msra.mxu1 %v22362_v36 }
 0x778   : > { %10067 = vmatmul.mubr.bf16.vlgmr.msra.gmra.mrb[32].mxu0 %v26031_v58  ;;  %v22310_v58 = vld [vmem:[%s30439_s4 + $0x344] ss:$16 sps:$4 sm:$0xff]  }
 0x779   : > { %11494 = vmatpush1.bf16.msra.mxu0 %v22302_v33  ;;  %v22365_v33 = vld [vmem:[%s30439_s4 + $0x4c0] ss:$16 sps:$4 sm:$0xff]  }
 0x77a   : > { %11495 = vmatprep.subr.bf16.mxu0 %v22307_v55  ;;  %v22370_v55 = vld [vmem:[%s30439_s4 + $0x5e4] ss:$16 sps:$4 sm:$0xff]  }
 0x77b   : > { %11548 = vmatprep.subr.bf16.mxu1 %v22370_v55 }
 0x77d   : > { %11496 = vmatpush1.bf16.msra.mxu0 %v22305_v49  ;;  %v16257_v49 = vcombine.high %v27444_v14, %v27441_v62 }
 0x77e   : > { %11497 = vmatprep.subr.bf16.mxu0 %v22310_v58  ;;  %v22373_v58 = vld [vmem:[%s30439_s4 + $0x4e4] ss:$16 sps:$4 sm:$0xff]  }
 0x781   : > { %11498 = vmatpush1.bf16.msra.mxu0 %v22308_v35  ;;  %v22368_v35 = vld [vmem:[%s30439_s4 + $0x5e0] ss:$16 sps:$4 sm:$0xff]  }
 0x782   : > { %11499 = vmatprep.subr.bf16.mxu0 %v22313_v57  ;;  %v22371_v57 = vld [vmem:[%s30439_s4 + $0x4e0] ss:$16 sps:$4 sm:$0xff]   ;;  %11549 = vmatpush1.bf16.msra.mxu1 %v22368_v35 }
 0x785   : > { %11500 = vmatpush1.bf16.msra.mxu0 %v22311_v12  ;;  %v22376_v12 = vld [vmem:[%s30439_s4 + $0x50c] ss:$16 sps:$4 sm:$0xff]  }
 0x786   : > { %11501 = vmatprep.subr.bf16.mxu0 %v22316_v32  ;;  %v22381_v32 = vld [vmem:[%s30439_s4 + $0x30c] ss:$16 sps:$4 sm:$0xff]   ;;  %11616 = vmatprep.subr.bf16.mxu1 %v22376_v12 }
 0x789   : > { %11502 = vmatpush1.bf16.msra.mxu0 %v22314_v20 }
 0x78a   : > { %11503 = vmatprep.subr.bf16.mxu0 %v22319_v13 }
 0x78d   : > { %11504 = vmatpush1.bf16.msra.mxu0 %v22317_v9 }
 0x78e   : > { %11505 = vmatprep.subr.bf16.mxu0 %v22322_v47 }
 0x791   : > { %11506 = vmatpush1.bf16.msra.mxu0 %v22320_v16 }
 0x792   : > { %11507 = vmatprep.subr.bf16.mxu0 %v22325_v51 }
 0x795   : > { %11508 = vmatpush1.bf16.msra.mxu0 %v22323_v29 }
 0x796   : > { %11509 = vmatprep.subr.bf16.mxu0 %v22331_v39 }
 0x799   : > { %11510 = vmatpush1.bf16.msra.mxu0 %v22329_v46  ;;  %v27477_v46 = vrot.slane %v27085_v19, %v5829_v18 }
 0x79a   : > { %11511 = vmatprep.subr.bf16.mxu0 %v22337_v34 }
 0x79d   : > { %11512 = vmatpush1.bf16.msra.mxu0 %v22335_v0 }
 0x79e   : > { %11513 = vmatprep.subr.bf16.mxu0 %v22343_v7 }
 0x7a1   : > { %11514 = vmatpush1.bf16.msra.mxu0 %v22341_v48 }
 0x7a2   : > { %11515 = vmatprep.subr.bf16.mxu0 %v22349_v56 }
 0x7a5   : > { %11516 = vmatpush1.bf16.msra.mxu0 %v22347_v2 }
 0x7a6   : > { %11517 = vmatprep.subr.bf16.mxu0 %v22355_v59 }
 0x7a9   : > { %11518 = vmatpush1.bf16.msra.mxu0 %v22353_v11 }
 0x7aa   : > { %11519 = vmatprep.subr.bf16.mxu0 %v22361_v37 }
 0x7ad   : > { %11520 = vmatpush1.bf16.msra.mxu0 %v22359_v50 }
 0x7ae   : > { %11521 = vmatprep.subr.bf16.mxu0 %v22367_v24 }
 0x7b1   : > { %11522 = vmatpush1.bf16.msra.mxu0 %v22365_v33 }
 0x7b2   : > { %11523 = vmatprep.subr.bf16.mxu0 %v22373_v58 }
 0x7b5   : > { %11524 = vmatpush1.bf16.msra.mxu0 %v22371_v57 }
 0x7b6   : > { %11575 = vmatprep.subr.bf16.mxu0 %v22381_v32 }
 0x84b   : > { %v10068_v20 = vpop.f32.mrb[32].mxu0 }
 0x84c   : > { %v10070_v13 = vpop.f32.mrb[33].mxu0 }
 0x84d   : > { %v10130_v9 = vcombine.low %v10068_v20, %v10070_v13  ;;  %v10131_v47 = vcombine.high %v10068_v20, %v10070_v13  ;;  %v10072_v16 = vpop.f32.mrb[34].mxu0 }
 0x84e   : > { %v10074_v51 = vpop.f32.mrb[35].mxu0 }
 0x84f   : > { %v10139_v29 = vrot.slane %v10130_v9, %v23735_v28  ;;  %v10146_v30 = vrot.slane %v10131_v47, %v23735_v28  ;;  %v10165_v17 = vcombine.low %v10072_v16, %v10074_v51  ;;  %v10166_v39 = vcombine.high %v10072_v16, %v10074_v51 }
 0x851   : > { %v10161_v53 = vcombine.low %v10139_v29, %v27017_v21  ;;  %v10162_v44 = vcombine.high %v10139_v29, %v27017_v21  ;;  %v10163_v34 = vcombine.low %v10146_v30, %v27023_v38  ;;  %v10164_v0 = vcombine.high %v10146_v30, %v27023_v38 }
 0x852   : > { %v27489_v22 = vrot.slane %v10165_v17, %v23735_v28  ;;  %v27492_v7 = vrot.slane %v10166_v39, %v23735_v28 }
 0x853   : > { %v10207_v18 = vrot.slane %v10161_v53, %v23735_v28  ;;  %v10223_v48 = vrot.slane %v10162_v44, %v23735_v28  ;;  %v10239_v21 = vrot.slane %v10163_v34, %v23735_v28  ;;  %v10255_v43 = vrot.slane %v10164_v0, %v23735_v28 }
 0x854   : > { %v10196_v38 = vcombine.low %v27489_v22, %v27030_v41  ;;  %v10197_v40 = vcombine.high %v27489_v22, %v27030_v41  ;;  %v10198_v19 = vcombine.low %v27492_v7, %v27045_v54  ;;  %v10199_v56 = vcombine.high %v27492_v7, %v27045_v54 }
 0x855   : > { %v10215_v26 = vcombine.high %v10207_v18, %v10207_v18  ;;  %v10231_v23 = vcombine.high %v10223_v48, %v10223_v48  ;;  %v10247_v10 = vcombine.high %v10239_v21, %v10239_v21  ;;  %v10263_v2 = vcombine.high %v10255_v43, %v10255_v43 }
 0x856   : > { %v10352_v60 = vsel %vm1460_vm3, %v10207_v18, -inf  ;;  %v10373_v59 = vsel %vm1460_vm3, %v10223_v48, -inf  ;;  %v10394_v45 = vsel %vm1460_vm3, %v10239_v21, -inf  ;;  %v10415_v5 = vsel %vm1460_vm3, %v10255_v43, -inf }
 0x857   : > { %v10353_v11 = vrot.slane %v10352_v60, 4  ;;  %v10359_v41 = vsel %vm1460_vm3, %v10215_v26, -inf  ;;  %v10374_v1 = vrot.slane %v10373_v59, 4  ;;  %v10380_v37 = vsel %vm1460_vm3, %v10231_v23, -inf }
 0x858   : > { %v10360_v52 = vrot.slane %v10359_v41, 4  ;;  %v10381_v61 = vrot.slane %v10380_v37, 4  ;;  %v10395_v3 = vrot.slane %v10394_v45, 4  ;;  %v10401_v63 = vsel %vm1460_vm3, %v10247_v10, -inf }
 0x859   : > { %v10354_v31 = vmax.f32 %v10352_v60, %v10353_v11  ;;  %v10375_v50 = vmax.f32 %v10373_v59, %v10374_v1  ;;  %v10402_v15 = vrot.slane %v10401_v63, 4  ;;  %v10416_v6 = vrot.slane %v10415_v5, 4 }
 0x85a   : > { %v10361_v24 = vmax.f32 %v10359_v41, %v10360_v52  ;;  %v10382_v36 = vmax.f32 %v10380_v37, %v10381_v61  ;;  %v10396_v33 = vmax.f32 %v10394_v45, %v10395_v3  ;;  %v10422_v55 = vsel %vm1460_vm3, %v10263_v2, -inf }
 0x85b   : > { %v10355_v58 = vrot.slane %v10354_v31, 2  ;;  %v10376_v35 = vrot.slane %v10375_v50, 2  ;;  %v10403_v57 = vmax.f32 %v10401_v63, %v10402_v15  ;;  %v10417_v12 = vmax.f32 %v10415_v5, %v10416_v6 }
 0x85c   : > { %v10362_v32 = vrot.slane %v10361_v24, 2  ;;  %v10383_v20 = vrot.slane %v10382_v36, 2  ;;  %v10397_v13 = vrot.slane %v10396_v33, 2  ;;  %v10423_v9 = vrot.slane %v10422_v55, 4 }
 0x85d   : > { %v10356_v47 = vmax.f32 %v10354_v31, %v10355_v58  ;;  %v10377_v16 = vmax.f32 %v10375_v50, %v10376_v35  ;;  %v10404_v51 = vrot.slane %v10403_v57, 2  ;;  %v10418_v29 = vrot.slane %v10417_v12, 2 }
 0x85e   : > { %v10363_v30 = vmax.f32 %v10361_v24, %v10362_v32  ;;  %v10384_v17 = vmax.f32 %v10382_v36, %v10383_v20  ;;  %v10398_v39 = vmax.f32 %v10396_v33, %v10397_v13  ;;  %v10424_v53 = vmax.f32 %v10422_v55, %v10423_v9 }
 0x85f   : > { %v10357_v44 = vrot.slane %v10356_v47, 1  ;;  %v10378_v34 = vrot.slane %v10377_v16, 1  ;;  %v10405_v0 = vmax.f32 %v10403_v57, %v10404_v51  ;;  %v10419_v22 = vmax.f32 %v10417_v12, %v10418_v29 }
 0x860   : > { %v10364_v18 = vrot.slane %v10363_v30, 1  ;;  %v10385_v48 = vrot.slane %v10384_v17, 1  ;;  %v10399_v21 = vrot.slane %v10398_v39, 1  ;;  %v10425_v43 = vrot.slane %v10424_v53, 2 }
 0x861   : > { %v10358_v26 = vmax.f32 %v10356_v47, %v10357_v44  ;;  %v10379_v23 = vmax.f32 %v10377_v16, %v10378_v34  ;;  %v10406_v10 = vrot.slane %v10405_v0, 1  ;;  %v10420_v2 = vrot.slane %v10419_v22, 1  ;;  %v10661_v34 = vld [vmem:[#allocation4 + $0x8] sm:$0xf] }
 0x862   : > { %v10365_v60 = vmax.f32 %v10363_v30, %v10364_v18  ;;  %v10400_v59 = vmax.f32 %v10398_v39, %v10399_v21  ;;  %v10426_v45 = vmax.f32 %v10424_v53, %v10425_v43  ;;  %v10271_v41 = vrot.slane %v10196_v38, %v23735_v28 }
 0x863   : > { %v10407_v5 = vmax.f32 %v10405_v0, %v10406_v10  ;;  %v10421_v11 = vmax.f32 %v10419_v22, %v10420_v2  ;;  %v10287_v1 = vrot.slane %v10197_v40, %v23735_v28  ;;  %v10386_v37 = vmax.f32 %v10384_v17, %v10385_v48 }
 0x864   : > { %v10427_v52 = vrot.slane %v10426_v45, 1  ;;  %v10520_v61 = vmax.f32 %v10358_v26, %v10400_v59  ;;  %v10303_v3 = vrot.slane %v10198_v19, %v23735_v28  ;;  %v10279_v50 = vcombine.high %v10271_v41, %v10271_v41 }
 0x865   : > { %v10521_v63 = vmax.f32 %v10365_v60, %v10407_v5  ;;  %v10523_v31 = vmax.f32 %v10379_v23, %v10421_v11  ;;  %v27524_v15 = vrot.slane %v10199_v56, %v23735_v28  ;;  %v10295_v6 = vcombine.high %v10287_v1, %v10287_v1 }
 0x866   : > { %v10428_v38 = vmax.f32 %v10426_v45, %v10427_v52  ;;  %v10549_v40 = vadd.f32 %v27477_v46, %v10520_v61  ;;  %v10311_v24 = vcombine.high %v10303_v3, %v10303_v3  ;;  %v10436_v19 = vsel %vm1460_vm3, %v10271_v41, -inf }
 0x867   : > { %v10550_v36 = vadd.f32 %v27486_v4, %v10521_v63  ;;  %v10552_v33 = vadd.f32 %v27477_v46, %v10523_v31  ;;  %v10443_v55 = vsel %vm1460_vm3, %v10279_v50, -inf  ;;  %v10437_v57 = vrot.slane %v10436_v19, 4 }
 0x868   : > { %v10524_v58 = vmax.f32 %v10386_v37, %v10428_v38  ;;  %vm10561_vm0 = vcmp.ge.f32.partialorder %v10549_v40, 0.0  ;;  %v10573_v35 = vmul.f32 0.1, %v10549_v40  ;;  %v10444_v20 = vrot.slane %v10443_v55, 4 }
 0x869   : > { %vm10562_vm2 = vcmp.ge.f32.partialorder %v10550_v36, 0.0  ;;  %vm10564_vm11 = vcmp.ge.f32.partialorder %v10552_v33, 0.0  ;;  %v10574_v54 = vmul.f32 0.1, %v10550_v36  ;;  %v10576_v7 = vmul.f32 0.1, %v10552_v33 }
 0x86a   : > { %v10553_v56 = vadd.f32 %v27486_v4, %v10524_v58  ;;  %v10585_v12 = vsel %vm10561_vm0, %v10549_v40, %v10573_v35  ;;  %v10438_v32 = vmax.f32 %v10436_v19, %v10437_v57  ;;  %v10457_v47 = vsel %vm1460_vm3, %v10287_v1, -inf }
 0x86b   : > { %v10586_v13 = vsel %vm10562_vm2, %v10550_v36, %v10574_v54  ;;  %v10588_v9 = vsel %vm10564_vm11, %v10552_v33, %v10576_v7  ;;  %v10464_v16 = vsel %vm1460_vm3, %v10295_v6, -inf  ;;  %v10445_v17 = vmax.f32 %v10443_v55, %v10444_v20 }
 0x86c   : > { %vm10565_vm6 = vcmp.ge.f32.partialorder %v10553_v56, 0.0  ;;  %v10577_v51 = vmul.f32 0.1, %v10553_v56  ;;  %v10609_v29 = vcombine.low %v10585_v12, %v10586_v13  ;;  %v10439_v30 = vrot.slane %v10438_v32, 2 }
 0x86d   : > { %v10458_v39 = vrot.slane %v10457_v47, 4  ;;  %v10465_v53 = vrot.slane %v10464_v16, 4  ;;  %v10478_v44 = vsel %vm1460_vm3, %v10303_v3, -inf  ;;  %v10446_v43 = vrot.slane %v10445_v17, 2 }
 0x86e   : > { %v10589_v0 = vsel %vm10565_vm6, %v10553_v56, %v10577_v51  ;;  %v10635_v22 = vrot.slane %v10609_v29, 7  ;;  %v10440_v18 = vmax.f32 %v10438_v32, %v10439_v30  ;;  %v10479_v48 = vrot.slane %v10478_v44, 4 }
 0x86f   : > { %v10610_v21 = vcombine.low %v10588_v9, %v10589_v0  ;;  %v10459_v26 = vmax.f32 %v10457_v47, %v10458_v39  ;;  %v10466_v23 = vmax.f32 %v10464_v16, %v10465_v53  ;;  %v10327_v10 = vcombine.high %v27524_v15, %v27524_v15  ;;  %v10663_v39 = vld [vmem:[#allocation4 + $0x14] sm:$0xf] }
 0x870   : > { %v10480_v2 = vmax.f32 %v10478_v44, %v10479_v48  ;;  %v10485_v60 = vsel %vm1460_vm3, %v10311_v24, -inf  ;;  %v10682_v59 = vpack.c.bf16 %v10661_v34, %v10661_v34  ;;  %v10441_v11 = vrot.slane %v10440_v18, 1 }
 0x871   : > { %v10613_v45 = vrot.slane %v10610_v21, 7  ;;  %v10636_v5 = vrot.slane %v10610_v21, 6  ;;  %v10460_v41 = vrot.slane %v10459_v26, 2  ;;  %v10467_v1 = vrot.slane %v10466_v23, 2 }
 0x872   : > { %v10481_v37 = vrot.slane %v10480_v2, 2  ;;  %v10486_v52 = vrot.slane %v10485_v60, 4  ;;  %v10499_v61 = vsel %vm1460_vm3, %v27524_v15, -inf  ;;  %v10447_v31 = vmax.f32 %v10445_v17, %v10446_v43 }
 0x873   : > { %v10614_v3 = vsel %vm2749_vm4, %v10613_v45, %v10609_v29  ;;  %v10637_v63 = vsel %vm2752_vm5, %v10636_v5, %v10635_v22  ;;  %v10461_v40 = vmax.f32 %v10459_v26, %v10460_v41  ;;  %v10500_v36 = vrot.slane %v10499_v61, 4  ;;  %vm10860_vm4 = vmor %vm10858_vm8, %vm10859_vm10 }
 0x874   : > { %v27545_v50 = vsel %vm2761_vm12, %v10613_v45, %v10614_v3  ;;  %v10638_v38 = vsel %vm2764_vm13, %v10636_v5, %v10637_v63  ;;  %v10482_v6 = vmax.f32 %v10480_v2, %v10481_v37  ;;  %v10487_v24 = vmax.f32 %v10485_v60, %v10486_v52  ;;  %vm27551_vm12 = vmor %vm10860_vm4, %vm10861_vm15 }
 0x875   : > { %10656 = vst [vmem:[#allocation4 + $0xc] sm:$0x66] %v10638_v38  ;;  %v10442_v15 = vmax.f32 %v10440_v18, %v10441_v11  ;;  %v10468_v33 = vmax.f32 %v10466_v23, %v10467_v1  ;;  %v10506_v55 = vsel %vm1460_vm3, %v10327_v10, -inf  ;;  %v10448_v58 = vrot.slane %v10447_v31, 1 }
 0x876   : > { %v10483_v19 = vrot.slane %v10482_v6, 1  ;;  %v10488_v35 = vrot.slane %v10487_v24, 2  ;;  %v10501_v57 = vmax.f32 %v10499_v61, %v10500_v36  ;;  %v10507_v54 = vrot.slane %v10506_v55, 4 }
 0x877   : > { %v10462_v7 = vrot.slane %v10461_v40, 1  ;;  %v10712_v12 = vrot.slane %v10682_v59, %v27429_v42  ;;  %vm10863_vm0 = vsmask.f32 4368  ;;  %v10469_v47 = vrot.slane %v10468_v33, 1 }
 0x878   : > { %v10484_v56 = vmax.f32 %v10482_v6, %v10483_v19  ;;  %v10489_v32 = vmax.f32 %v10487_v24, %v10488_v35  ;;  %v10502_v20 = vrot.slane %v10501_v57, 2  ;;  %v10508_v13 = vmax.f32 %v10506_v55, %v10507_v54  ;;  %vm10864_vm1 = vmor %vm27551_vm12, %vm10863_vm0  ;;  %v23185_v55 = vld [vmem:[%s30439_s4 + $0xccc] ss:$16 sps:$4 sm:$0xff]  }
 0x879   : > { %vm10865_vm3 = vsmask.f32 5396  ;;  %v10449_v51 = vmax.f32 %v10447_v31, %v10448_v58  ;;  %v10463_v53 = vmax.f32 %v10461_v40, %v10462_v7  ;;  %v10713_v0 = vcombine.low %v27444_v14, %v10712_v12 }
 0x87a   : > { %v10526_v16 = vmax.f32 %v10442_v15, %v10484_v56  ;;  %v10490_v29 = vrot.slane %v10489_v32, 1  ;;  %v10503_v30 = vmax.f32 %v10501_v57, %v10502_v20  ;;  %v10509_v17 = vrot.slane %v10508_v13, 2  ;;  %vm10866_vm2 = vmor %vm10864_vm1, %vm10865_vm3 }
 0x87b   : > { %v10840_v22 = vcombine.high %v27444_v14, %v10712_v12  ;;  %v10470_v26 = vmax.f32 %v10468_v33, %v10469_v47  ;;  %v10685_v23 = vpack.c.bf16 %v10663_v39, %v10663_v39  ;;  %v27562_v5 = vrot.slane %v10713_v0, %v27429_v42  ;;  %vm10868_vm6 = vmor %vm10866_vm2, %vm10867_vm9 }
 0x87c   : > { %v10555_v44 = vadd.f32 %v27477_v46, %v10526_v16  ;;  %v10662_v34 = vld [vmem:[#allocation4 + $0xc] sm:$0xff]  ;;  %v10491_v18 = vmax.f32 %v10489_v32, %v10490_v29  ;;  %v10504_v48 = vrot.slane %v10503_v30, 1  ;;  %v10510_v21 = vmax.f32 %v10508_v13, %v10509_v17 }
 0x87d   : > { %v10673_v43 = vcombine.high %v10662_v34, %v10662_v34  ;;  %v27565_v11 = vrot.slane %v10840_v22, %v27429_v42  ;;  %v10735_v61 = vrot.slane %v10685_v23, %v27429_v42  ;;  %vm10869_vm8 = vsmask.f32 7452  ;;  %v22374_v22 = vld [vmem:[%s30439_s4 + $0x508] ss:$16 sps:$4 sm:$0xff]  }
 0x87e   : > { %v10505_v10 = vmax.f32 %v10503_v30, %v10504_v48  ;;  %v10511_v2 = vrot.slane %v10510_v21, 1  ;;  %v10527_v60 = vmax.f32 %v10449_v51, %v10491_v18  ;;  %v10579_v45 = vmul.f32 0.1, %v10555_v44  ;;  %vm27575_vm15 = vmor %vm10868_vm6, %vm10869_vm8  ;;  %v22382_v23 = vld [vmem:[%s30439_s4 + $0x528] ss:$16 sps:$4 sm:$0xff]  }
 0x87f   : > { %v19300_v59 = vpack.c.bf16 %v10673_v43, %v10662_v34  ;;  %vm10567_vm11 = vcmp.ge.f32.partialorder %v10555_v44, 0.0  ;;  %v10872_v6 = vshrl.u32 %v27562_v5, 16  ;;  %v10877_v24 = vshll.u32 %v27565_v11, 16  ;;  %v22384_v43 = vld [vmem:[%s30439_s4 + $0x52c] ss:$16 sps:$4 sm:$0xff]  }
 0x880   : > { %v10512_v41 = vmax.f32 %v10510_v21, %v10511_v2  ;;  %v10529_v1 = vmax.f32 %v10463_v53, %v10505_v10  ;;  %v10556_v37 = vadd.f32 %v27486_v4, %v10527_v60  ;;  %v10591_v33 = vsel %vm10567_vm11, %v10555_v44, %v10579_v45  ;;  %v22379_v21 = vld [vmem:[%s30439_s4 + $0x308] ss:$16 sps:$4 sm:$0xff]   ;;  %v10665_v10 = vld [vmem:[#allocation4 + $0x20] sm:$0xf]  ;;  %v22390_v60 = vld [vmem:[%s30439_s4 + $0x54c] ss:$16 sps:$4 sm:$0xff]  }
 0x881   : > { %v10728_v52 = vrot.slane %v19300_v59, %v27429_v42  ;;  %v22385_v2 = vld [vmem:[%s30439_s4 + $0x328] ss:$16 sps:$4 sm:$0xff]   ;;  %v22393_v59 = vld [vmem:[%s30439_s4 + $0x34c] ss:$16 sps:$4 sm:$0xff]  }
 0x882   : > { %v10530_v3 = vmax.f32 %v10470_v26, %v10512_v41  ;;  %v10558_v63 = vadd.f32 %v27477_v46, %v10529_v1  ;;  %vm10568_vm10 = vcmp.ge.f32.partialorder %v10556_v37, 0.0  ;;  %v10580_v31 = vmul.f32 0.1, %v10556_v37  ;;  %v22387_v26 = vld [vmem:[%s30439_s4 + $0x32c] ss:$16 sps:$4 sm:$0xff]  }
 0x883   : > { %v10736_v38 = vcombine.low %v10728_v52, %v10735_v61  ;;  %v10848_v40 = vcombine.high %v10728_v52, %v10735_v61  ;;  %v10688_v1 = vpack.c.bf16 %v10665_v10, %v10665_v10  ;;  %v22391_v52 = vld [vmem:[%s30439_s4 + $0x348] ss:$16 sps:$4 sm:$0xff]   ;;  %v22396_v61 = vld [vmem:[%s30439_s4 + $0x56c] ss:$16 sps:$4 sm:$0xff]   ;;  %v22442_v10 = vld [vmem:[%s30439_s4 + $0x260] ss:$16 sps:$4 sm:$0xff]  }
 0x884   : > { %v10559_v36 = vadd.f32 %v27486_v4, %v10530_v3  ;;  %v10582_v15 = vmul.f32 0.1, %v10558_v63  ;;  %v10592_v19 = vsel %vm10568_vm10, %v10556_v37, %v10580_v31  ;;  %vm10570_vm4 = vcmp.ge.f32.partialorder %v10558_v63, 0.0  ;;  %v22388_v37 = vld [vmem:[%s30439_s4 + $0x548] ss:$16 sps:$4 sm:$0xff]  }
 0x885   : > { %v10611_v58 = vcombine.low %v10591_v33, %v10592_v19  ;;  %v27580_v46 = vrot.slane %v10736_v38, %v27429_v42  ;;  %v27583_v35 = vrot.slane %v10848_v40, %v27429_v42  ;;  %v10879_v4 = vsel %vm27575_vm15, %v10872_v6, %v10877_v24  ;;  %v22394_v40 = vld [vmem:[%s30439_s4 + $0x568] ss:$16 sps:$4 sm:$0xff]   ;;  %v22402_v24 = vld [vmem:[%s30439_s4 + $0x58c] ss:$16 sps:$4 sm:$0xff]  }
 0x886   : > { %vm10571_vm12 = vcmp.ge.f32.partialorder %v10559_v36, 0.0  ;;  %v10583_v57 = vmul.f32 0.1, %v10559_v36  ;;  %v10594_v12 = vsel %vm10570_vm4, %v10558_v63, %v10582_v15  ;;  %v22399_v63 = vld [vmem:[%s30439_s4 + $0x36c] ss:$16 sps:$4 sm:$0xff]   ;;  %v27654_v38 = vrot.slane %v10688_v1, %v27429_v42 }
 0x887   : > { %v10616_v54 = vrot.slane %v10611_v58, 6  ;;  %v10881_v7 = vshrl.u32 %v27580_v46, 16  ;;  %v10886_v56 = vshll.u32 %v27583_v35, 16  ;;  %v10643_v9 = vrot.slane %v10611_v58, 7  ;;  %v22397_v6 = vld [vmem:[%s30439_s4 + $0x368] ss:$16 sps:$4 sm:$0xff]  }
 0x888   : > { %v10595_v32 = vsel %vm10571_vm12, %v10559_v36, %v10583_v57  ;;  %v22405_v15 = vld [vmem:[%s30439_s4 + $0x38c] ss:$16 sps:$4 sm:$0xff]   ;;  %v22400_v19 = vld [vmem:[%s30439_s4 + $0x588] ss:$16 sps:$4 sm:$0xff]   ;;  %v22456_v1 = vld [vmem:[%s30439_s4 + $0x2a4] ss:$16 sps:$4 sm:$0xff]  }
 0x889   : > { %v10612_v20 = vcombine.low %v10594_v12, %v10595_v32  ;;  %v10617_v13 = vsel %vm2752_vm5, %v10616_v54, %v27545_v50  ;;  %v27593_v47 = vsel %vm27575_vm15, %v10881_v7, %v10886_v56  ;;  %v22403_v58 = vld [vmem:[%s30439_s4 + $0x388] ss:$16 sps:$4 sm:$0xff]   ;;  %v22408_v57 = vld [vmem:[%s30439_s4 + $0x5ac] ss:$16 sps:$4 sm:$0xff]  }
 0x88a   : > { %v10618_v16 = vsel %vm2764_vm13, %v10616_v54, %v10617_v13  ;;  %v10986_v51 = vcombine.low %v10879_v4, %v27593_v47  ;;  %v22411_v54 = vld [vmem:[%s30439_s4 + $0x3ac] ss:$16 sps:$4 sm:$0xff]   ;;  %v22406_v7 = vld [vmem:[%s30439_s4 + $0x5a8] ss:$16 sps:$4 sm:$0xff]  }
 0x88b   : > { %v10619_v29 = vrot.slane %v10612_v20, 5  ;;  %v10644_v30 = vrot.slane %v10612_v20, 6  ;;  %v22409_v56 = vld [vmem:[%s30439_s4 + $0x3a8] ss:$16 sps:$4 sm:$0xff]   ;;  %v22414_v12 = vld [vmem:[%s30439_s4 + $0x5cc] ss:$16 sps:$4 sm:$0xff]  }
 0x88c   : > { %v10993_v17 = vrot.slane %v10986_v51, %v27429_v42  ;;  %v22417_v32 = vld [vmem:[%s30439_s4 + $0x3cc] ss:$16 sps:$4 sm:$0xff]   ;;  %v22412_v20 = vld [vmem:[%s30439_s4 + $0x5c8] ss:$16 sps:$4 sm:$0xff]  }
 0x88d   : > { %v10620_v39 = vsel %vm2755_vm7, %v10619_v29, %v10618_v16  ;;  %v10645_v53 = vsel %vm2752_vm5, %v10644_v30, %v10643_v9  ;;  %v22415_v13 = vld [vmem:[%s30439_s4 + $0x3c8] ss:$16 sps:$4 sm:$0xff]   ;;  %v22420_v9 = vld [vmem:[%s30439_s4 + $0x5ec] ss:$16 sps:$4 sm:$0xff]   ;;  %vm17873_vm5 = vcmp.lt.s32.totalorder %v792_v25, 512 }
 0x88e   : > { %v10621_v44 = vsel %vm2767_vm14, %v10619_v29, %v10620_v39  ;;  %v10646_v50 = vsel %vm2764_vm13, %v10644_v30, %v10645_v53  ;;  %v10994_v34 = vcombine.high %v10993_v17, %v10993_v17  ;;  %v27603_v0 = vrot.slane %v10993_v17, %v27429_v42  ;;  %v22423_v16 = vld [vmem:[%s30439_s4 + $0x3ec] ss:$16 sps:$4 sm:$0xff]   ;;  %v22418_v51 = vld [vmem:[%s30439_s4 + $0x5e8] ss:$16 sps:$4 sm:$0xff]   ;;  %v22426_v30 = vld [vmem:[%s30439_s4 + $0x204] ss:$16 sps:$4 sm:$0xff]  }
 0x88f   : > { %10633 = vst [vmem:[%s27138_s22] sm:$0xff] %v10621_v44  ;;  %10658 = vst [vmem:[#allocation4 + $0x18] sm:$0x66] %v10646_v50  ;;  %v22421_v29 = vld [vmem:[%s30439_s4 + $0x3e8] ss:$16 sps:$4 sm:$0xff]   ;;  %v22429_v17 = vld [vmem:[%s30439_s4 + $0x40c] ss:$16 sps:$4 sm:$0xff]  }
 0x890   : > { %v11008_v18 = vrot.slane %v10994_v34, %v27429_v42  ;;  %v27612_v48 = vcombine.high %v27603_v0, %v27603_v0  ;;  %v22424_v39 = vld [vmem:[%s30439_s4 + $0x200] ss:$16 sps:$4 sm:$0xff]   ;;  %v22427_v53 = vld [vmem:[%s30439_s4 + $0x408] ss:$16 sps:$4 sm:$0xff]   ;;  %v22432_v44 = vld [vmem:[%s30439_s4 + $0x224] ss:$16 sps:$4 sm:$0xff]  }
 0x891   : > { %v22435_v50 = vld [vmem:[%s30439_s4 + $0x42c] ss:$16 sps:$4 sm:$0xff]   ;;  %v22430_v34 = vld [vmem:[%s30439_s4 + $0x220] ss:$16 sps:$4 sm:$0xff]  }
 0x892   : > { %11525 = vmatprep.mubr.bf16.mxu0 %v11008_v18  ;;  %11567 = vmatmul.mubr.bf16.vlgmr.msra.gmra.mrb[40].mxu1 %v27612_v48 }
 0x893   : > { %11617 = vmatpush1.bf16.msra.mxu1 %v22374_v22  ;;  %11526 = vmatmul.mubr.bf16.vlgmr.msra.gmra.mrb[48].mxu0 %v27603_v0  ;;  %v22433_v22 = vld [vmem:[%s30439_s4 + $0x428] ss:$16 sps:$4 sm:$0xff]  }
 0x894   : > { %11576 = vmatpush1.bf16.msra.mxu0 %v22379_v21  ;;  %11607 = vmatprep.mubr.bf16.mxu0 %v11008_v18  ;;  %v22438_v18 = vld [vmem:[%s30439_s4 + $0x244] ss:$16 sps:$4 sm:$0xff]   ;;  %v22436_v21 = vld [vmem:[%s30439_s4 + $0x240] ss:$16 sps:$4 sm:$0xff]  }
 0x895   : > { %11618 = vmatprep.subr.bf16.mxu1 %v22384_v43  ;;  %11577 = vmatprep.subr.bf16.mxu0 %v22387_v26  ;;  %v22439_v43 = vld [vmem:[%s30439_s4 + $0x448] ss:$16 sps:$4 sm:$0xff]   ;;  %v22444_v26 = vld [vmem:[%s30439_s4 + $0x264] ss:$16 sps:$4 sm:$0xff]  }
 0x896   : > { %v10664_v45 = vld [vmem:[#allocation4 + $0x18] sm:$0xff]  ;;  %11648 = vmatprep.mubr.bf16.mxu1 %v23619_v8 }
 0x897   : > { %v10674_v41 = vcombine.high %v10664_v45, %v10664_v45  ;;  %11619 = vmatpush1.bf16.msra.mxu1 %v22382_v23  ;;  %v22447_v23 = vld [vmem:[%s30439_s4 + $0x46c] ss:$16 sps:$4 sm:$0xff]  }
 0x898   : > { %11578 = vmatpush1.bf16.msra.mxu0 %v22385_v2  ;;  %11620 = vmatprep.subr.bf16.mxu1 %v22390_v60  ;;  %v22445_v2 = vld [vmem:[%s30439_s4 + $0x468] ss:$16 sps:$4 sm:$0xff]   ;;  %v22450_v60 = vld [vmem:[%s30439_s4 + $0x284] ss:$16 sps:$4 sm:$0xff]  }
 0x899   : > { %v19783_v3 = vpack.c.bf16 %v10674_v41, %v10664_v45  ;;  %11579 = vmatprep.subr.bf16.mxu0 %v22393_v59  ;;  %v22453_v59 = vld [vmem:[%s30439_s4 + $0x48c] ss:$16 sps:$4 sm:$0xff]   ;;  %v22448_v45 = vld [vmem:[%s30439_s4 + $0x280] ss:$16 sps:$4 sm:$0xff]   ;;  %v22451_v41 = vld [vmem:[%s30439_s4 + $0x488] ss:$16 sps:$4 sm:$0xff]  }
 0x89b   : > { %v27651_v31 = vrot.slane %v19783_v3, %v27429_v42  ;;  %11621 = vmatpush1.bf16.msra.mxu1 %v22388_v37  ;;  %v22459_v37 = vld [vmem:[%s30439_s4 + $0x4ac] ss:$16 sps:$4 sm:$0xff]   ;;  %v22462_v3 = vld [vmem:[%s30439_s4 + $0x2c4] ss:$16 sps:$4 sm:$0xff]  }
 0x89c   : > { %11580 = vmatpush1.bf16.msra.mxu0 %v22391_v52  ;;  %11622 = vmatprep.subr.bf16.mxu1 %v22396_v61  ;;  %v22454_v52 = vld [vmem:[%s30439_s4 + $0x2a0] ss:$16 sps:$4 sm:$0xff]   ;;  %v22457_v61 = vld [vmem:[%s30439_s4 + $0x4a8] ss:$16 sps:$4 sm:$0xff]  }
 0x89d   : > { %v13898_v36 = vcombine.high %v27651_v31, %v27654_v38  ;;  %11581 = vmatprep.subr.bf16.mxu0 %v22399_v63  ;;  %v11657_v63 = vcombine.low %v27562_v5, %v27580_v46  ;;  %v22468_v5 = vld [vmem:[%s30439_s4 + $0x2e4] ss:$16 sps:$4 sm:$0xff]  }
 0x89f   : > { %v27671_v33 = vrot.slane %v13898_v36, %v27429_v42  ;;  %11623 = vmatpush1.bf16.msra.mxu1 %v22394_v40  ;;  %v22465_v40 = vld [vmem:[%s30439_s4 + $0x4cc] ss:$16 sps:$4 sm:$0xff]   ;;  %v11664_v36 = vrot.slane %v11657_v63, %v27429_v42  ;;  %v22520_v63 = vld [vmem:[%s30439_s4 + $0x800] ss:$16 sps:$4 sm:$0xff]  }
 0x8a0   : > { %11582 = vmatpush1.bf16.msra.mxu0 %v22397_v6  ;;  %11624 = vmatprep.subr.bf16.mxu1 %v22402_v24  ;;  %v22460_v6 = vld [vmem:[%s30439_s4 + $0x2c0] ss:$16 sps:$4 sm:$0xff]   ;;  %v22463_v24 = vld [vmem:[%s30439_s4 + $0x4c8] ss:$16 sps:$4 sm:$0xff]  }
 0x8a1   : > { %11583 = vmatprep.subr.bf16.mxu0 %v22405_v15  ;;  %v14784_v4 = vcombine.low %v27583_v35, %v27671_v33  ;;  %v22471_v15 = vld [vmem:[%s30439_s4 + $0x4ec] ss:$16 sps:$4 sm:$0xff]  }
 0x8a3   : > { %11625 = vmatpush1.bf16.msra.mxu1 %v22400_v19  ;;  %v22466_v19 = vld [vmem:[%s30439_s4 + $0x2e0] ss:$16 sps:$4 sm:$0xff]  }
 0x8a4   : > { %11584 = vmatpush1.bf16.msra.mxu0 %v22403_v58  ;;  %11626 = vmatprep.subr.bf16.mxu1 %v22408_v57  ;;  %v22469_v58 = vld [vmem:[%s30439_s4 + $0x4e8] ss:$16 sps:$4 sm:$0xff]   ;;  %v27819_v57 = vrot.slane %v11664_v36, %v27429_v42 }
 0x8a5   : > { %11585 = vmatprep.subr.bf16.mxu0 %v22411_v54  ;;  %v22474_v54 = vld [vmem:[%s30439_s4 + $0x20c] ss:$16 sps:$4 sm:$0xff]  }
 0x8a7   : > { %11627 = vmatpush1.bf16.msra.mxu1 %v22406_v7  ;;  %v22477_v7 = vld [vmem:[%s30439_s4 + $0x4] ss:$16 sps:$4 sm:$0xff]  }
 0x8a8   : > { %11586 = vmatpush1.bf16.msra.mxu0 %v22409_v56  ;;  %11628 = vmatprep.subr.bf16.mxu1 %v22414_v12  ;;  %v11665_v56 = vcombine.high %v11664_v36, %v11664_v36  ;;  %v22472_v12 = vld [vmem:[%s30439_s4 + $0x208] ss:$16 sps:$4 sm:$0xff]   ;;  %v22529_v36 = vld [vmem:[%s30439_s4 + $0x120] ss:$16 sps:$4 sm:$0xff]  }
 0x8a9   : > { %11587 = vmatprep.subr.bf16.mxu0 %v22417_v32  ;;  %v27832_v32 = vcombine.high %v27819_v57, %v27819_v57 }
 0x8ab   : > { %11629 = vmatpush1.bf16.msra.mxu1 %v22412_v20  ;;  %v22475_v20 = vld [vmem:[%s30439_s4] ss:$16 sps:$4 sm:$0xff]  }
 0x8ac   : > { %11588 = vmatpush1.bf16.msra.mxu0 %v22415_v13  ;;  %11630 = vmatprep.subr.bf16.mxu1 %v22420_v9  ;;  %v22480_v13 = vld [vmem:[%s30439_s4 + $0x22c] ss:$16 sps:$4 sm:$0xff]   ;;  %v22483_v9 = vld [vmem:[%s30439_s4 + $0x24] ss:$16 sps:$4 sm:$0xff]  }
 0x8ad   : > { %11589 = vmatprep.subr.bf16.mxu0 %v22423_v16  ;;  %v27845_v16 = vrot.slane %v11665_v56, %v27429_v42  ;;  %v22543_v56 = vld [vmem:[%s30439_s4 + $0x164] ss:$16 sps:$4 sm:$0xff]  }
 0x8af   : > { %11631 = vmatpush1.bf16.msra.mxu1 %v22418_v51  ;;  %v22478_v51 = vld [vmem:[%s30439_s4 + $0x228] ss:$16 sps:$4 sm:$0xff]  }
 0x8b0   : > { %11590 = vmatpush1.bf16.msra.mxu0 %v22421_v29  ;;  %12205 = vmatprep.subr.bf16.mxu1 %v22426_v30  ;;  %v22481_v29 = vld [vmem:[%s30439_s4 + $0x20] ss:$16 sps:$4 sm:$0xff]   ;;  %v22486_v30 = vld [vmem:[%s30439_s4 + $0x24c] ss:$16 sps:$4 sm:$0xff]  }
 0x8b1   : > { %11591 = vmatprep.subr.bf16.mxu0 %v22429_v17  ;;  %v22484_v17 = vld [vmem:[%s30439_s4 + $0x248] ss:$16 sps:$4 sm:$0xff]  }
 0x8b2   : > { %11649 = vmatmul.mubr.bf16.vlgmr.msra.gmra.mrb[44].mxu1 %v27612_v48  ;;  %v22441_v48 = vld [vmem:[%s30439_s4 + $0x44c] ss:$16 sps:$4 sm:$0xff]  }
 0x8b3   : > { %12206 = vmatpush1.bf16.msra.mxu1 %v22424_v39  ;;  %12237 = vmatprep.mubr.bf16.mxu1 %v23619_v8  ;;  %v22487_v39 = vld [vmem:[%s30439_s4 + $0x40] ss:$16 sps:$4 sm:$0xff]  }
 0x8b4   : > { %11592 = vmatpush1.bf16.msra.mxu0 %v22427_v53  ;;  %12207 = vmatprep.subr.bf16.mxu1 %v22432_v44  ;;  %v22492_v53 = vld [vmem:[%s30439_s4 + $0x26c] ss:$16 sps:$4 sm:$0xff]   ;;  %v22495_v44 = vld [vmem:[%s30439_s4 + $0x64] ss:$16 sps:$4 sm:$0xff]  }
 0x8b5   : > { %11593 = vmatprep.subr.bf16.mxu0 %v22435_v50  ;;  %v22490_v50 = vld [vmem:[%s30439_s4 + $0x268] ss:$16 sps:$4 sm:$0xff]  }
 0x8b7   : > { %12208 = vmatpush1.bf16.msra.mxu1 %v22430_v34  ;;  %v22493_v34 = vld [vmem:[%s30439_s4 + $0x60] ss:$16 sps:$4 sm:$0xff]  }
 0x8b8   : > { %11594 = vmatpush1.bf16.msra.mxu0 %v22433_v22  ;;  %12209 = vmatprep.subr.bf16.mxu1 %v22438_v18  ;;  %v22498_v22 = vld [vmem:[%s30439_s4 + $0x28c] ss:$16 sps:$4 sm:$0xff]   ;;  %v22501_v18 = vld [vmem:[%s30439_s4 + $0x84] ss:$16 sps:$4 sm:$0xff]  }
 0x8b9   : > { %11595 = vmatprep.subr.bf16.mxu0 %v22441_v48  ;;  %v22496_v48 = vld [vmem:[%s30439_s4 + $0x288] ss:$16 sps:$4 sm:$0xff]  }
 0x8bb   : > { %12210 = vmatpush1.bf16.msra.mxu1 %v22436_v21  ;;  %v22499_v21 = vld [vmem:[%s30439_s4 + $0x80] ss:$16 sps:$4 sm:$0xff]  }
 0x8bc   : > { %11596 = vmatpush1.bf16.msra.mxu0 %v22439_v43  ;;  %12211 = vmatprep.subr.bf16.mxu1 %v22444_v26  ;;  %v22504_v43 = vld [vmem:[%s30439_s4 + $0x2ac] ss:$16 sps:$4 sm:$0xff]   ;;  %v22507_v26 = vld [vmem:[%s30439_s4 + $0xa4] ss:$16 sps:$4 sm:$0xff]  }
 0x8bd   : > { %11597 = vmatprep.subr.bf16.mxu0 %v22447_v23  ;;  %v22502_v23 = vld [vmem:[%s30439_s4 + $0x2a8] ss:$16 sps:$4 sm:$0xff]  }
 0x8bf   : > { %12212 = vmatpush1.bf16.msra.mxu1 %v22442_v10  ;;  %v22505_v10 = vld [vmem:[%s30439_s4 + $0xa0] ss:$16 sps:$4 sm:$0xff]  }
 0x8c0   : > { %11598 = vmatpush1.bf16.msra.mxu0 %v22445_v2  ;;  %12213 = vmatprep.subr.bf16.mxu1 %v22450_v60  ;;  %v22510_v2 = vld [vmem:[%s30439_s4 + $0x2cc] ss:$16 sps:$4 sm:$0xff]   ;;  %v22513_v60 = vld [vmem:[%s30439_s4 + $0xc4] ss:$16 sps:$4 sm:$0xff]  }
 0x8c1   : > { %11599 = vmatprep.subr.bf16.mxu0 %v22453_v59  ;;  %v22508_v59 = vld [vmem:[%s30439_s4 + $0x2c8] ss:$16 sps:$4 sm:$0xff]  }
 0x8c3   : > { %12214 = vmatpush1.bf16.msra.mxu1 %v22448_v45  ;;  %v22511_v45 = vld [vmem:[%s30439_s4 + $0xc0] ss:$16 sps:$4 sm:$0xff]  }
 0x8c4   : > { %11600 = vmatpush1.bf16.msra.mxu0 %v22451_v41  ;;  %12215 = vmatprep.subr.bf16.mxu1 %v22456_v1  ;;  %v22516_v41 = vld [vmem:[%s30439_s4 + $0x2ec] ss:$16 sps:$4 sm:$0xff]   ;;  %v22519_v1 = vld [vmem:[%s30439_s4 + $0xe4] ss:$16 sps:$4 sm:$0xff]  }
 0x8c5   : > { %11601 = vmatprep.subr.bf16.mxu0 %v22459_v37  ;;  %v22514_v37 = vld [vmem:[%s30439_s4 + $0x2e8] ss:$16 sps:$4 sm:$0xff]  }
 0x8c7   : > { %12216 = vmatpush1.bf16.msra.mxu1 %v22454_v52  ;;  %v22517_v52 = vld [vmem:[%s30439_s4 + $0xe0] ss:$16 sps:$4 sm:$0xff]  }
 0x8c8   : > { %11602 = vmatpush1.bf16.msra.mxu0 %v22457_v61  ;;  %12217 = vmatprep.subr.bf16.mxu1 %v22462_v3  ;;  %v22522_v61 = vld [vmem:[%s30439_s4 + $0x804] ss:$16 sps:$4 sm:$0xff]  }
 0x8c9   : > { %11603 = vmatprep.subr.bf16.mxu0 %v22465_v40  ;;  %v22525_v3 = vld [vmem:[%s30439_s4 + $0x104] ss:$16 sps:$4 sm:$0xff]   ;;  %v22523_v40 = vld [vmem:[%s30439_s4 + $0x100] ss:$16 sps:$4 sm:$0xff]  }
 0x8cb   : > { %12218 = vmatpush1.bf16.msra.mxu1 %v22460_v6  ;;  %v22528_v6 = vld [vmem:[%s30439_s4 + $0x824] ss:$16 sps:$4 sm:$0xff]  }
 0x8cc   : > { %11604 = vmatpush1.bf16.msra.mxu0 %v22463_v24  ;;  %12219 = vmatprep.subr.bf16.mxu1 %v22468_v5  ;;  %v22531_v24 = vld [vmem:[%s30439_s4 + $0x124] ss:$16 sps:$4 sm:$0xff]   ;;  %v22526_v5 = vld [vmem:[%s30439_s4 + $0x820] ss:$16 sps:$4 sm:$0xff]  }
 0x8cd   : > { %11605 = vmatprep.subr.bf16.mxu0 %v22471_v15  ;;  %v22534_v15 = vld [vmem:[%s30439_s4 + $0x844] ss:$16 sps:$4 sm:$0xff]  }
 0x8cf   : > { %12220 = vmatpush1.bf16.msra.mxu1 %v22466_v19  ;;  %v22537_v19 = vld [vmem:[%s30439_s4 + $0x144] ss:$16 sps:$4 sm:$0xff]  }
 0x8d0   : > { %11606 = vmatpush1.bf16.msra.mxu0 %v22469_v58  ;;  %12287 = vmatprep.subr.bf16.mxu1 %v22474_v54  ;;  %v22532_v58 = vld [vmem:[%s30439_s4 + $0x840] ss:$16 sps:$4 sm:$0xff]  }
 0x8d1   : > { %12164 = vmatprep.subr.bf16.mxu0 %v22477_v7  ;;  %v22535_v54 = vld [vmem:[%s30439_s4 + $0x140] ss:$16 sps:$4 sm:$0xff]   ;;  %v22540_v7 = vld [vmem:[%s30439_s4 + $0x864] ss:$16 sps:$4 sm:$0xff]  }
 0x8d2   : > { %12238 = vmatmul.mubr.bf16.vlgmr.msra.gmra.mrb[48].mxu1 %v27832_v32 }
 0x8d3   : > { %11608 = vmatmul.mubr.bf16.vlgmr.msra.gmra.mrb[52].mxu0 %v27603_v0  ;;  %12288 = vmatpush1.bf16.msra.mxu1 %v22472_v12  ;;  %v22489_v0 = vld [vmem:[%s30439_s4 + $0x44] ss:$16 sps:$4 sm:$0xff]   ;;  %v22538_v12 = vld [vmem:[%s30439_s4 + $0x860] ss:$16 sps:$4 sm:$0xff]  }
 0x8d4   : > { %12165 = vmatpush1.bf16.msra.mxu0 %v22475_v20  ;;  %12196 = vmatprep.mubr.bf16.mxu0 %v27845_v16  ;;  %v22546_v20 = vld [vmem:[%s30439_s4 + $0x884] ss:$16 sps:$4 sm:$0xff]  }
 0x8d5   : > { %12289 = vmatprep.subr.bf16.mxu1 %v22480_v13  ;;  %12166 = vmatprep.subr.bf16.mxu0 %v22483_v9  ;;  %v22549_v13 = vld [vmem:[%s30439_s4 + $0x184] ss:$16 sps:$4 sm:$0xff]   ;;  %v22544_v9 = vld [vmem:[%s30439_s4 + $0x880] ss:$16 sps:$4 sm:$0xff]  }
 0x8d6   : > { %12319 = vmatprep.mubr.bf16.mxu1 %v23619_v8 }
 0x8d7   : > { %12290 = vmatpush1.bf16.msra.mxu1 %v22478_v51  ;;  %v22547_v51 = vld [vmem:[%s30439_s4 + $0x180] ss:$16 sps:$4 sm:$0xff]  }
 0x8d8   : > { %12167 = vmatpush1.bf16.msra.mxu0 %v22481_v29  ;;  %12291 = vmatprep.subr.bf16.mxu1 %v22486_v30  ;;  %v22552_v29 = vld [vmem:[%s30439_s4 + $0x8a4] ss:$16 sps:$4 sm:$0xff]  }
 0x8d9   : > { %12168 = vmatprep.subr.bf16.mxu0 %v22489_v0  ;;  %v22555_v30 = vld [vmem:[%s30439_s4 + $0x1a4] ss:$16 sps:$4 sm:$0xff]   ;;  %v22550_v0 = vld [vmem:[%s30439_s4 + $0x8a0] ss:$16 sps:$4 sm:$0xff]  }
 0x8db   : > { %12292 = vmatpush1.bf16.msra.mxu1 %v22484_v17  ;;  %v22553_v17 = vld [vmem:[%s30439_s4 + $0x1a0] ss:$16 sps:$4 sm:$0xff]  }
 0x8dc   : > { %12169 = vmatpush1.bf16.msra.mxu0 %v22487_v39  ;;  %12293 = vmatprep.subr.bf16.mxu1 %v22492_v53  ;;  %v22558_v39 = vld [vmem:[%s30439_s4 + $0x8c4] ss:$16 sps:$4 sm:$0xff]   ;;  %v12425_v53 = vcombine.low %v27565_v11, %v27583_v35 }
 0x8dd   : > { %12170 = vmatprep.subr.bf16.mxu0 %v22495_v44  ;;  %v22561_v44 = vld [vmem:[%s30439_s4 + $0x1c4] ss:$16 sps:$4 sm:$0xff]  }
 0x8de   : > { %v22564_v11 = vld [vmem:[%s30439_s4 + $0x8e4] ss:$16 sps:$4 sm:$0xff]  }
 0x8df   : > { %12294 = vmatpush1.bf16.msra.mxu1 %v22490_v50  ;;  %v22556_v50 = vld [vmem:[%s30439_s4 + $0x8c0] ss:$16 sps:$4 sm:$0xff]  }
 0x8e0   : > { %12171 = vmatpush1.bf16.msra.mxu0 %v22493_v34  ;;  %12295 = vmatprep.subr.bf16.mxu1 %v22498_v22  ;;  %v22559_v34 = vld [vmem:[%s30439_s4 + $0x1c0] ss:$16 sps:$4 sm:$0xff]   ;;  %v28020_v22 = vrot.slane %v12425_v53, %v27429_v42  ;;  %v22624_v53 = vld [vmem:[%s30439_s4 + $0xb24] ss:$16 sps:$4 sm:$0xff]  }
 0x8e1   : > { %12172 = vmatprep.subr.bf16.mxu0 %v22501_v18  ;;  %v22567_v18 = vld [vmem:[%s30439_s4 + $0x1e4] ss:$16 sps:$4 sm:$0xff]  }
 0x8e3   : > { %12296 = vmatpush1.bf16.msra.mxu1 %v22496_v48  ;;  %v22562_v48 = vld [vmem:[%s30439_s4 + $0x8e0] ss:$16 sps:$4 sm:$0xff]  }
 0x8e4   : > { %12173 = vmatpush1.bf16.msra.mxu0 %v22499_v21  ;;  %12297 = vmatprep.subr.bf16.mxu1 %v22504_v43  ;;  %v22565_v21 = vld [vmem:[%s30439_s4 + $0x1e0] ss:$16 sps:$4 sm:$0xff]   ;;  %v28033_v43 = vrot.slane %v28020_v22, %v27429_v42 }
 0x8e5   : > { %12174 = vmatprep.subr.bf16.mxu0 %v22507_v26  ;;  %v22570_v26 = vld [vmem:[%s30439_s4 + $0x80c] ss:$16 sps:$4 sm:$0xff]  }
 0x8e7   : > { %12298 = vmatpush1.bf16.msra.mxu1 %v22502_v23  ;;  %v22573_v23 = vld [vmem:[%s30439_s4 + $0xc] ss:$16 sps:$4 sm:$0xff]  }
 0x8e8   : > { %12175 = vmatpush1.bf16.msra.mxu0 %v22505_v10  ;;  %12299 = vmatprep.subr.bf16.mxu1 %v22510_v2  ;;  %v22568_v10 = vld [vmem:[%s30439_s4 + $0x808] ss:$16 sps:$4 sm:$0xff]   ;;  %v28046_v2 = vcombine.high %v28033_v43, %v28033_v43 }
 0x8e9   : > { %12176 = vmatprep.subr.bf16.mxu0 %v22513_v60  ;;  %v22571_v60 = vld [vmem:[%s30439_s4 + $0x8] ss:$16 sps:$4 sm:$0xff]  }
 0x8eb   : > { %12300 = vmatpush1.bf16.msra.mxu1 %v22508_v59  ;;  %v22576_v59 = vld [vmem:[%s30439_s4 + $0x82c] ss:$16 sps:$4 sm:$0xff]  }
 0x8ec   : > { %12177 = vmatpush1.bf16.msra.mxu0 %v22511_v45  ;;  %12301 = vmatprep.subr.bf16.mxu1 %v22516_v41  ;;  %v22579_v45 = vld [vmem:[%s30439_s4 + $0x2c] ss:$16 sps:$4 sm:$0xff]   ;;  %v22574_v41 = vld [vmem:[%s30439_s4 + $0x828] ss:$16 sps:$4 sm:$0xff]  }
 0x8ed   : > { %12178 = vmatprep.subr.bf16.mxu0 %v22519_v1  ;;  %v22577_v1 = vld [vmem:[%s30439_s4 + $0x28] ss:$16 sps:$4 sm:$0xff]  }
 0x8ef   : > { %12302 = vmatpush1.bf16.msra.mxu1 %v22514_v37  ;;  %v22582_v37 = vld [vmem:[%s30439_s4 + $0x84c] ss:$16 sps:$4 sm:$0xff]  }
 0x8f0   : > { %12179 = vmatpush1.bf16.msra.mxu0 %v22517_v52  ;;  %12973 = vmatprep.subr.bf16.mxu1 %v22522_v61  ;;  %v22585_v52 = vld [vmem:[%s30439_s4 + $0x4c] ss:$16 sps:$4 sm:$0xff]   ;;  %v22583_v61 = vld [vmem:[%s30439_s4 + $0x48] ss:$16 sps:$4 sm:$0xff]  }
 0x8f1   : > { %12180 = vmatprep.subr.bf16.mxu0 %v22525_v3  ;;  %v22588_v3 = vld [vmem:[%s30439_s4 + $0x86c] ss:$16 sps:$4 sm:$0xff]  }
 0x8f2   : > { %12320 = vmatmul.mubr.bf16.vlgmr.msra.gmra.mrb[52].mxu1 %v27832_v32  ;;  %v22541_v32 = vld [vmem:[%s30439_s4 + $0x160] ss:$16 sps:$4 sm:$0xff]  }
 0x8f3   : > { %12974 = vmatpush1.bf16.msra.mxu1 %v22520_v63  ;;  %13005 = vmatprep.mubr.bf16.mxu1 %v23619_v8  ;;  %v22591_v63 = vld [vmem:[%s30439_s4 + $0x6c] ss:$16 sps:$4 sm:$0xff]  }
 0x8f4   : > { %12181 = vmatpush1.bf16.msra.mxu0 %v22523_v40  ;;  %12975 = vmatprep.subr.bf16.mxu1 %v22528_v6  ;;  %v22586_v40 = vld [vmem:[%s30439_s4 + $0x868] ss:$16 sps:$4 sm:$0xff]  }
 0x8f5   : > { %12182 = vmatprep.subr.bf16.mxu0 %v22531_v24  ;;  %v22589_v6 = vld [vmem:[%s30439_s4 + $0x68] ss:$16 sps:$4 sm:$0xff]   ;;  %v22594_v24 = vld [vmem:[%s30439_s4 + $0x88c] ss:$16 sps:$4 sm:$0xff]  }
 0x8f7   : > { %12976 = vmatpush1.bf16.msra.mxu1 %v22526_v5  ;;  %v22597_v5 = vld [vmem:[%s30439_s4 + $0x8c] ss:$16 sps:$4 sm:$0xff]  }
 0x8f8   : > { %12183 = vmatpush1.bf16.msra.mxu0 %v22529_v36  ;;  %12977 = vmatprep.subr.bf16.mxu1 %v22534_v15  ;;  %v22592_v36 = vld [vmem:[%s30439_s4 + $0x888] ss:$16 sps:$4 sm:$0xff]  }
 0x8f9   : > { %12184 = vmatprep.subr.bf16.mxu0 %v22537_v19  ;;  %v22595_v15 = vld [vmem:[%s30439_s4 + $0x88] ss:$16 sps:$4 sm:$0xff]   ;;  %v22600_v19 = vld [vmem:[%s30439_s4 + $0x8ac] ss:$16 sps:$4 sm:$0xff]  }
 0x8fb   : > { %12978 = vmatpush1.bf16.msra.mxu1 %v22532_v58  ;;  %v22603_v58 = vld [vmem:[%s30439_s4 + $0xac] ss:$16 sps:$4 sm:$0xff]  }
 0x8fc   : > { %12185 = vmatpush1.bf16.msra.mxu0 %v22535_v54  ;;  %12979 = vmatprep.subr.bf16.mxu1 %v22540_v7  ;;  %v22598_v54 = vld [vmem:[%s30439_s4 + $0x8a8] ss:$16 sps:$4 sm:$0xff]  }
 0x8fd   : > { %12186 = vmatprep.subr.bf16.mxu0 %v22543_v56  ;;  %v22601_v7 = vld [vmem:[%s30439_s4 + $0xa8] ss:$16 sps:$4 sm:$0xff]   ;;  %v22606_v56 = vld [vmem:[%s30439_s4 + $0x8cc] ss:$16 sps:$4 sm:$0xff]  }
 0x8ff   : > { %12980 = vmatpush1.bf16.msra.mxu1 %v22538_v12  ;;  %v22609_v12 = vld [vmem:[%s30439_s4 + $0xcc] ss:$16 sps:$4 sm:$0xff]  }
 0x900   : > { %12187 = vmatpush1.bf16.msra.mxu0 %v22541_v32  ;;  %12981 = vmatprep.subr.bf16.mxu1 %v22546_v20  ;;  %v22604_v32 = vld [vmem:[%s30439_s4 + $0x8c8] ss:$16 sps:$4 sm:$0xff]  }
 0x901   : > { %12188 = vmatprep.subr.bf16.mxu0 %v22549_v13  ;;  %v22607_v20 = vld [vmem:[%s30439_s4 + $0xc8] ss:$16 sps:$4 sm:$0xff]   ;;  %v22612_v13 = vld [vmem:[%s30439_s4 + $0x8ec] ss:$16 sps:$4 sm:$0xff]  }
 0x903   : > { %12982 = vmatpush1.bf16.msra.mxu1 %v22544_v9  ;;  %v22615_v9 = vld [vmem:[%s30439_s4 + $0xec] ss:$16 sps:$4 sm:$0xff]  }
 0x904   : > { %12189 = vmatpush1.bf16.msra.mxu0 %v22547_v51  ;;  %12983 = vmatprep.subr.bf16.mxu1 %v22552_v29  ;;  %v22610_v51 = vld [vmem:[%s30439_s4 + $0x8e8] ss:$16 sps:$4 sm:$0xff]  }
 0x905   : > { %12190 = vmatprep.subr.bf16.mxu0 %v22555_v30  ;;  %v22613_v29 = vld [vmem:[%s30439_s4 + $0xe8] ss:$16 sps:$4 sm:$0xff]   ;;  %v22618_v30 = vld [vmem:[%s30439_s4 + $0xb04] ss:$16 sps:$4 sm:$0xff]  }
 0x907   : > { %12984 = vmatpush1.bf16.msra.mxu1 %v22550_v0  ;;  %v22621_v0 = vld [vmem:[%s30439_s4 + $0x10c] ss:$16 sps:$4 sm:$0xff]  }
 0x908   : > { %12191 = vmatpush1.bf16.msra.mxu0 %v22553_v17  ;;  %12985 = vmatprep.subr.bf16.mxu1 %v22558_v39  ;;  %v22616_v17 = vld [vmem:[%s30439_s4 + $0xb00] ss:$16 sps:$4 sm:$0xff]   ;;  %v22619_v39 = vld [vmem:[%s30439_s4 + $0x108] ss:$16 sps:$4 sm:$0xff]  }
 0x909   : > { %12192 = vmatprep.subr.bf16.mxu0 %v22561_v44  ;;  %v22627_v44 = vld [vmem:[%s30439_s4 + $0x12c] ss:$16 sps:$4 sm:$0xff]  }
 0x90b   : > { %12986 = vmatpush1.bf16.msra.mxu1 %v22556_v50  ;;  %v22622_v50 = vld [vmem:[%s30439_s4 + $0xb20] ss:$16 sps:$4 sm:$0xff]  }
 0x90c   : > { %12193 = vmatpush1.bf16.msra.mxu0 %v22559_v34  ;;  %12987 = vmatprep.subr.bf16.mxu1 %v22564_v11  ;;  %v22625_v34 = vld [vmem:[%s30439_s4 + $0x128] ss:$16 sps:$4 sm:$0xff]   ;;  %v22630_v11 = vld [vmem:[%s30439_s4 + $0xb44] ss:$16 sps:$4 sm:$0xff]  }
 0x90d   : > { %12194 = vmatprep.subr.bf16.mxu0 %v22567_v18  ;;  %v22633_v18 = vld [vmem:[%s30439_s4 + $0x14c] ss:$16 sps:$4 sm:$0xff]  }
 0x90f   : > { %12988 = vmatpush1.bf16.msra.mxu1 %v22562_v48  ;;  %v22628_v48 = vld [vmem:[%s30439_s4 + $0xb40] ss:$16 sps:$4 sm:$0xff]  }
 0x910   : > { %12195 = vmatpush1.bf16.msra.mxu0 %v22565_v21  ;;  %13055 = vmatprep.subr.bf16.mxu1 %v22570_v26  ;;  %v22631_v21 = vld [vmem:[%s30439_s4 + $0x148] ss:$16 sps:$4 sm:$0xff]   ;;  %v22636_v26 = vld [vmem:[%s30439_s4 + $0xb64] ss:$16 sps:$4 sm:$0xff]  }
 0x911   : > { %12246 = vmatprep.subr.bf16.mxu0 %v22573_v23  ;;  %v22639_v23 = vld [vmem:[%s30439_s4 + $0x16c] ss:$16 sps:$4 sm:$0xff]  }
 0x912   : > { %13006 = vmatmul.mubr.bf16.vlgmr.msra.gmra.mrb[56].mxu1 %v28046_v2 }
 0x913   : > { %12197 = vmatmul.mubr.bf16.vlgmr.msra.gmra.mrb[56].mxu0 %v27819_v57  ;;  %13056 = vmatpush1.bf16.msra.mxu1 %v22568_v10  ;;  %v22634_v10 = vld [vmem:[%s30439_s4 + $0xb60] ss:$16 sps:$4 sm:$0xff]  }
 0x914   : > { %12247 = vmatpush1.bf16.msra.mxu0 %v22571_v60  ;;  %12278 = vmatprep.mubr.bf16.mxu0 %v27845_v16  ;;  %v22580_v16 = vld [vmem:[%s30439_s4 + $0x848] ss:$16 sps:$4 sm:$0xff]  }
 0x915   : > { %13057 = vmatprep.subr.bf16.mxu1 %v22576_v59  ;;  %12248 = vmatprep.subr.bf16.mxu0 %v22579_v45  ;;  %v22637_v60 = vld [vmem:[%s30439_s4 + $0x168] ss:$16 sps:$4 sm:$0xff]   ;;  %v22642_v59 = vld [vmem:[%s30439_s4 + $0xb84] ss:$16 sps:$4 sm:$0xff]   ;;  %v22645_v45 = vld [vmem:[%s30439_s4 + $0x18c] ss:$16 sps:$4 sm:$0xff]  }
 0x916   : > { %13087 = vmatprep.mubr.bf16.mxu1 %v23619_v8 }
 0x917   : > { %13058 = vmatpush1.bf16.msra.mxu1 %v22574_v41  ;;  %v22643_v41 = vld [vmem:[%s30439_s4 + $0x188] ss:$16 sps:$4 sm:$0xff]  }
 0x918   : > { %12249 = vmatpush1.bf16.msra.mxu0 %v22577_v1  ;;  %13059 = vmatprep.subr.bf16.mxu1 %v22582_v37  ;;  %v22648_v1 = vld [vmem:[%s30439_s4 + $0xba4] ss:$16 sps:$4 sm:$0xff]   ;;  %v22651_v37 = vld [vmem:[%s30439_s4 + $0x1ac] ss:$16 sps:$4 sm:$0xff]  }
 0x919   : > { %12250 = vmatprep.subr.bf16.mxu0 %v22585_v52  ;;  %v22646_v52 = vld [vmem:[%s30439_s4 + $0xba0] ss:$16 sps:$4 sm:$0xff]  }
 0x91b   : > { %13060 = vmatpush1.bf16.msra.mxu1 %v22580_v16  ;;  %v22649_v16 = vld [vmem:[%s30439_s4 + $0x1a8] ss:$16 sps:$4 sm:$0xff]  }
 0x91c   : > { %12251 = vmatpush1.bf16.msra.mxu0 %v22583_v61  ;;  %13061 = vmatprep.subr.bf16.mxu1 %v22588_v3  ;;  %v22654_v61 = vld [vmem:[%s30439_s4 + $0xbc4] ss:$16 sps:$4 sm:$0xff]  }
 0x91d   : > { %12252 = vmatprep.subr.bf16.mxu0 %v22591_v63  ;;  %v22657_v63 = vld [vmem:[%s30439_s4 + $0x1cc] ss:$16 sps:$4 sm:$0xff]  }
 0x91f   : > { %13062 = vmatpush1.bf16.msra.mxu1 %v22586_v40  ;;  %v22652_v40 = vld [vmem:[%s30439_s4 + $0xbc0] ss:$16 sps:$4 sm:$0xff]  }
 0x920   : > { %12253 = vmatpush1.bf16.msra.mxu0 %v22589_v6  ;;  %13063 = vmatprep.subr.bf16.mxu1 %v22594_v24  ;;  %v22655_v6 = vld [vmem:[%s30439_s4 + $0x1c8] ss:$16 sps:$4 sm:$0xff]  }
 0x921   : > { %12254 = vmatprep.subr.bf16.mxu0 %v22597_v5  ;;  %v22663_v5 = vld [vmem:[%s30439_s4 + $0x1ec] ss:$16 sps:$4 sm:$0xff]  }
 0x923   : > { %13064 = vmatpush1.bf16.msra.mxu1 %v22592_v36  ;;  %v22658_v36 = vld [vmem:[%s30439_s4 + $0xbe0] ss:$16 sps:$4 sm:$0xff]  }
 0x924   : > { %12255 = vmatpush1.bf16.msra.mxu0 %v22595_v15  ;;  %13065 = vmatprep.subr.bf16.mxu1 %v22600_v19  ;;  %v22661_v15 = vld [vmem:[%s30439_s4 + $0x1e8] ss:$16 sps:$4 sm:$0xff]  }
 0x925   : > { %12256 = vmatprep.subr.bf16.mxu0 %v22603_v58  ;;  %v22666_v58 = vld [vmem:[%s30439_s4 + $0xb0c] ss:$16 sps:$4 sm:$0xff]  }
 0x927   : > { %13066 = vmatpush1.bf16.msra.mxu1 %v22598_v54  ;;  %v22669_v54 = vld [vmem:[%s30439_s4 + $0x604] ss:$16 sps:$4 sm:$0xff]  }
 0x928   : > { %12257 = vmatpush1.bf16.msra.mxu0 %v22601_v7  ;;  %13067 = vmatprep.subr.bf16.mxu1 %v22606_v56  ;;  %v12433_v7 = vcombine.high %v28020_v22, %v28020_v22  ;;  %v22664_v56 = vld [vmem:[%s30439_s4 + $0xb08] ss:$16 sps:$4 sm:$0xff]   ;;  %v22672_v22 = vld [vmem:[%s30439_s4 + $0xb2c] ss:$16 sps:$4 sm:$0xff]  }
 0x929   : > { %12258 = vmatprep.subr.bf16.mxu0 %v22609_v12 }
 0x92b   : > { %13068 = vmatpush1.bf16.msra.mxu1 %v22604_v32  ;;  %v22667_v32 = vld [vmem:[%s30439_s4 + $0x600] ss:$16 sps:$4 sm:$0xff]  }
 0x92c   : > { %12259 = vmatpush1.bf16.msra.mxu0 %v22607_v20  ;;  %13069 = vmatprep.subr.bf16.mxu1 %v22612_v13  ;;  %v22675_v20 = vld [vmem:[%s30439_s4 + $0x624] ss:$16 sps:$4 sm:$0xff]   ;;  %v28277_v13 = vrot.slane %v12433_v7, %v27429_v42 }
 0x92d   : > { %12260 = vmatprep.subr.bf16.mxu0 %v22615_v9  ;;  %v22670_v9 = vld [vmem:[%s30439_s4 + $0xb28] ss:$16 sps:$4 sm:$0xff]   ;;  %v22720_v7 = vld [vmem:[%s30439_s4 + $0xe24] ss:$16 sps:$4 sm:$0xff]  }
 0x92f   : > { %13070 = vmatpush1.bf16.msra.mxu1 %v22610_v51  ;;  %v22673_v51 = vld [vmem:[%s30439_s4 + $0x620] ss:$16 sps:$4 sm:$0xff]  }
 0x930   : > { %12261 = vmatpush1.bf16.msra.mxu0 %v22613_v29  ;;  %13771 = vmatprep.subr.bf16.mxu1 %v22618_v30  ;;  %v22678_v29 = vld [vmem:[%s30439_s4 + $0xb4c] ss:$16 sps:$4 sm:$0xff]   ;;  %v22676_v30 = vld [vmem:[%s30439_s4 + $0xb48] ss:$16 sps:$4 sm:$0xff]  }
 0x931   : > { %12262 = vmatprep.subr.bf16.mxu0 %v22621_v0  ;;  %v22679_v0 = vld [vmem:[%s30439_s4 + $0x640] ss:$16 sps:$4 sm:$0xff]  }
 0x932   : > { %13088 = vmatmul.mubr.bf16.vlgmr.msra.gmra.mrb[60].mxu1 %v28046_v2  ;;  %v13118_v2 = vcombine.low %v27651_v31, %v27654_v38  ;;  %v22640_v31 = vld [vmem:[%s30439_s4 + $0xb80] ss:$16 sps:$4 sm:$0xff]  }
 0x933   : > { %13772 = vmatpush1.bf16.msra.mxu1 %v22616_v17  ;;  %13803 = vmatprep.mubr.bf16.mxu1 %v23619_v8  ;;  %v22684_v17 = vld [vmem:[%s30439_s4 + $0xb6c] ss:$16 sps:$4 sm:$0xff]  }
 0x934   : > { %12263 = vmatpush1.bf16.msra.mxu0 %v22619_v39  ;;  %13773 = vmatprep.subr.bf16.mxu1 %v22624_v53  ;;  %v28201_v38 = vrot.slane %v13118_v2, %v27429_v42  ;;  %v22687_v39 = vld [vmem:[%s30439_s4 + $0x664] ss:$16 sps:$4 sm:$0xff]   ;;  %v22682_v53 = vld [vmem:[%s30439_s4 + $0xb68] ss:$16 sps:$4 sm:$0xff]  }
 0x935   : > { %12264 = vmatprep.subr.bf16.mxu0 %v22627_v44  ;;  %v22685_v44 = vld [vmem:[%s30439_s4 + $0x660] ss:$16 sps:$4 sm:$0xff]  }
 0x936   : > { %v13223_v3 = vcombine.low %v27580_v46, %v28201_v38  ;;  %v22660_v46 = vld [vmem:[%s30439_s4 + $0xbe4] ss:$16 sps:$4 sm:$0xff]  }
 0x937   : > { %13774 = vmatpush1.bf16.msra.mxu1 %v22622_v50  ;;  %v22690_v50 = vld [vmem:[%s30439_s4 + $0xb8c] ss:$16 sps:$4 sm:$0xff]  }
 0x938   : > { %12265 = vmatpush1.bf16.msra.mxu0 %v22625_v34  ;;  %13775 = vmatprep.subr.bf16.mxu1 %v22630_v11  ;;  %v28236_v24 = vrot.slane %v13223_v3, %v27429_v42  ;;  %v22693_v34 = vld [vmem:[%s30439_s4 + $0x684] ss:$16 sps:$4 sm:$0xff]   ;;  %v22688_v11 = vld [vmem:[%s30439_s4 + $0xb88] ss:$16 sps:$4 sm:$0xff]   ;;  %v22703_v3 = vld [vmem:[%s30439_s4 + $0x6c0] ss:$16 sps:$4 sm:$0xff]  }
 0x939   : > { %12266 = vmatprep.subr.bf16.mxu0 %v22633_v18  ;;  %v22691_v18 = vld [vmem:[%s30439_s4 + $0x680] ss:$16 sps:$4 sm:$0xff]  }
 0x93a   : > { %v28249_v19 = vrot.slane %v28236_v24, %v27429_v42 }
 0x93b   : > { %13776 = vmatpush1.bf16.msra.mxu1 %v22628_v48  ;;  %v22696_v48 = vld [vmem:[%s30439_s4 + $0xbac] ss:$16 sps:$4 sm:$0xff]  }
 0x93c   : > { %12267 = vmatpush1.bf16.msra.mxu0 %v22631_v21  ;;  %13777 = vmatprep.subr.bf16.mxu1 %v22636_v26  ;;  %v28264_v12 = vcombine.high %v28249_v19, %v28249_v19  ;;  %v22699_v21 = vld [vmem:[%s30439_s4 + $0x6a4] ss:$16 sps:$4 sm:$0xff]   ;;  %v22694_v26 = vld [vmem:[%s30439_s4 + $0xba8] ss:$16 sps:$4 sm:$0xff]  }
 0x93d   : > { %12268 = vmatprep.subr.bf16.mxu0 %v22639_v23  ;;  %v22697_v23 = vld [vmem:[%s30439_s4 + $0x6a0] ss:$16 sps:$4 sm:$0xff]  }
 0x93f   : > { %13778 = vmatpush1.bf16.msra.mxu1 %v22634_v10  ;;  %v22702_v10 = vld [vmem:[%s30439_s4 + $0xbcc] ss:$16 sps:$4 sm:$0xff]  }
 0x940   : > { %12269 = vmatpush1.bf16.msra.mxu0 %v22637_v60  ;;  %13779 = vmatprep.subr.bf16.mxu1 %v22642_v59  ;;  %v22705_v60 = vld [vmem:[%s30439_s4 + $0x6c4] ss:$16 sps:$4 sm:$0xff]  }
 0x941   : > { %12270 = vmatprep.subr.bf16.mxu0 %v22645_v45 }
 0x943   : > { %13780 = vmatpush1.bf16.msra.mxu1 %v22640_v31 }
 0x944   : > { %12271 = vmatpush1.bf16.msra.mxu0 %v22643_v41  ;;  %13781 = vmatprep.subr.bf16.mxu1 %v22648_v1 }
 0x945   : > { %12272 = vmatprep.subr.bf16.mxu0 %v22651_v37  ;;  %v22700_v37 = vld [vmem:[%s30439_s4 + $0xbc8] ss:$16 sps:$4 sm:$0xff]  }
 0x947   : > { %13782 = vmatpush1.bf16.msra.mxu1 %v22646_v52 }
 0x948   : > { %12273 = vmatpush1.bf16.msra.mxu0 %v22649_v16  ;;  %13783 = vmatprep.subr.bf16.mxu1 %v22654_v61 }
 0x949   : > { %12274 = vmatprep.subr.bf16.mxu0 %v22657_v63  ;;  %v22708_v63 = vld [vmem:[%s30439_s4 + $0xbec] ss:$16 sps:$4 sm:$0xff]  }
 0x94b   : > { %13784 = vmatpush1.bf16.msra.mxu1 %v22652_v40 }
 0x94c   : > { %12275 = vmatpush1.bf16.msra.mxu0 %v22655_v6  ;;  %13785 = vmatprep.subr.bf16.mxu1 %v22660_v46  ;;  %v22711_v6 = vld [vmem:[%s30439_s4 + $0x6e4] ss:$16 sps:$4 sm:$0xff]   ;;  %v22706_v46 = vld [vmem:[%s30439_s4 + $0xbe8] ss:$16 sps:$4 sm:$0xff]  }
 0x94d   : > { %12276 = vmatprep.subr.bf16.mxu0 %v22663_v5  ;;  %v22709_v5 = vld [vmem:[%s30439_s4 + $0x6e0] ss:$16 sps:$4 sm:$0xff]  }
 0x94f   : > { %13786 = vmatpush1.bf16.msra.mxu1 %v22658_v36  ;;  %v22714_v36 = vld [vmem:[%s30439_s4 + $0xe04] ss:$16 sps:$4 sm:$0xff]  }
 0x950   : > { %12277 = vmatpush1.bf16.msra.mxu0 %v22661_v15  ;;  %13853 = vmatprep.subr.bf16.mxu1 %v22666_v58  ;;  %v22717_v15 = vld [vmem:[%s30439_s4 + $0x704] ss:$16 sps:$4 sm:$0xff]   ;;  %v22712_v58 = vld [vmem:[%s30439_s4 + $0xe00] ss:$16 sps:$4 sm:$0xff]  }
 0x951   : > { %12932 = vmatprep.subr.bf16.mxu0 %v22669_v54  ;;  %v22715_v54 = vld [vmem:[%s30439_s4 + $0x700] ss:$16 sps:$4 sm:$0xff]  }
 0x952   : > { %13804 = vmatmul.mubr.bf16.vlgmr.msra.gmra.mrb[64].mxu1 %v28264_v12 }
 0x953   : > { %12279 = vmatmul.mubr.bf16.vlgmr.msra.gmra.mrb[60].mxu0 %v27819_v57  ;;  %13854 = vmatpush1.bf16.msra.mxu1 %v22664_v56  ;;  %v22681_v57 = vld [vmem:[%s30439_s4 + $0x644] ss:$16 sps:$4 sm:$0xff]  }
 0x954   : > { %12933 = vmatpush1.bf16.msra.mxu0 %v22667_v32  ;;  %12964 = vmatprep.mubr.bf16.mxu0 %v28277_v13  ;;  %v22723_v56 = vld [vmem:[%s30439_s4 + $0x724] ss:$16 sps:$4 sm:$0xff]   ;;  %v22718_v32 = vld [vmem:[%s30439_s4 + $0xe20] ss:$16 sps:$4 sm:$0xff]  }
 0x955   : > { %13855 = vmatprep.subr.bf16.mxu1 %v22672_v22  ;;  %12934 = vmatprep.subr.bf16.mxu0 %v22675_v20  ;;  %v22721_v22 = vld [vmem:[%s30439_s4 + $0x720] ss:$16 sps:$4 sm:$0xff]   ;;  %v22726_v20 = vld [vmem:[%s30439_s4 + $0xe44] ss:$16 sps:$4 sm:$0xff]  }
 0x956   : > { %13885 = vmatprep.mubr.bf16.mxu1 %v23619_v8 }
 0x957   : > { %13856 = vmatpush1.bf16.msra.mxu1 %v22670_v9  ;;  %v22724_v9 = vld [vmem:[%s30439_s4 + $0xe40] ss:$16 sps:$4 sm:$0xff]  }
 0x958   : > { %12935 = vmatpush1.bf16.msra.mxu0 %v22673_v51  ;;  %13857 = vmatprep.subr.bf16.mxu1 %v22678_v29  ;;  %v22727_v51 = vld [vmem:[%s30439_s4 + $0x740] ss:$16 sps:$4 sm:$0xff]   ;;  %v22732_v29 = vld [vmem:[%s30439_s4 + $0xe64] ss:$16 sps:$4 sm:$0xff]  }
 0x959   : > { %12936 = vmatprep.subr.bf16.mxu0 %v22681_v57  ;;  %v22735_v57 = vld [vmem:[%s30439_s4 + $0x764] ss:$16 sps:$4 sm:$0xff]  }
 0x95b   : > { %13858 = vmatpush1.bf16.msra.mxu1 %v22676_v30  ;;  %v22730_v30 = vld [vmem:[%s30439_s4 + $0xe60] ss:$16 sps:$4 sm:$0xff]  }
 0x95c   : > { %12937 = vmatpush1.bf16.msra.mxu0 %v22679_v0  ;;  %13859 = vmatprep.subr.bf16.mxu1 %v22684_v17  ;;  %v22733_v0 = vld [vmem:[%s30439_s4 + $0x760] ss:$16 sps:$4 sm:$0xff]   ;;  %v22738_v17 = vld [vmem:[%s30439_s4 + $0xe84] ss:$16 sps:$4 sm:$0xff]  }
 0x95d   : > { %12938 = vmatprep.subr.bf16.mxu0 %v22687_v39  ;;  %v13907_v39 = vshrl.u32 %v28201_v38, 16 }
 0x95f   : > { %13860 = vmatpush1.bf16.msra.mxu1 %v22682_v53  ;;  %v13912_v53 = vshll.u32 %v27671_v33, 16 }
 0x960   : > { %12939 = vmatpush1.bf16.msra.mxu0 %v22685_v44  ;;  %13861 = vmatprep.subr.bf16.mxu1 %v22690_v50  ;;  %v22741_v44 = vld [vmem:[%s30439_s4 + $0x784] ss:$16 sps:$4 sm:$0xff]   ;;  %v22736_v50 = vld [vmem:[%s30439_s4 + $0xe80] ss:$16 sps:$4 sm:$0xff]  }
 0x961   : > { %12940 = vmatprep.subr.bf16.mxu0 %v22693_v34  ;;  %v22739_v34 = vld [vmem:[%s30439_s4 + $0x780] ss:$16 sps:$4 sm:$0xff]  }
 0x963   : > { %13862 = vmatpush1.bf16.msra.mxu1 %v22688_v11  ;;  %v22744_v11 = vld [vmem:[%s30439_s4 + $0xea4] ss:$16 sps:$4 sm:$0xff]  }
 0x964   : > { %12941 = vmatpush1.bf16.msra.mxu0 %v22691_v18  ;;  %13863 = vmatprep.subr.bf16.mxu1 %v22696_v48  ;;  %v28433_v18 = vsel %vm27575_vm15, %v13907_v39, %v13912_v53  ;;  %v22747_v48 = vld [vmem:[%s30439_s4 + $0x7a4] ss:$16 sps:$4 sm:$0xff]   ;;  %v22792_v39 = vld [vmem:[%s30439_s4 + $0xeac] ss:$16 sps:$4 sm:$0xff]  }
 0x965   : > { %v11568_v2 = vpop.f32.mrb[40].mxu1  ;;  %12942 = vmatprep.subr.bf16.mxu0 %v22699_v21  ;;  %v22742_v21 = vld [vmem:[%s30439_s4 + $0xea0] ss:$16 sps:$4 sm:$0xff]   ;;  %v22795_v53 = vld [vmem:[%s30439_s4 + $0x6ac] ss:$16 sps:$4 sm:$0xff]  }
 0x966   : > { %v11527_v59 = vpop.f32.mrb[48].mxu0  ;;  %v11570_v45 = vpop.f32.mrb[41].mxu1 }
 0x967   : > { %v28342_v31 = vadd.f32 %v11568_v2, %v11527_v59  ;;  %13864 = vmatpush1.bf16.msra.mxu1 %v22694_v26  ;;  %v11529_v41 = vpop.f32.mrb[49].mxu0  ;;  %v11572_v1 = vpop.f32.mrb[42].mxu1  ;;  %v14012_v26 = vcombine.low %v27593_v47, %v28433_v18 }
 0x968   : > { %v28347_v52 = vadd.f32 %v11570_v45, %v11529_v41  ;;  %12943 = vmatpush1.bf16.msra.mxu0 %v22697_v23  ;;  %v11531_v16 = vpop.f32.mrb[50].mxu0  ;;  %v11573_v61 = vpop.f32.mrb[43].mxu1  ;;  %13865 = vmatprep.subr.bf16.mxu1 %v22702_v10  ;;  %v22745_v23 = vld [vmem:[%s30439_s4 + $0x7a0] ss:$16 sps:$4 sm:$0xff]   ;;  %v22750_v10 = vld [vmem:[%s30439_s4 + $0xec4] ss:$16 sps:$4 sm:$0xff]  }
 0x969   : > { %v11532_v40 = vpop.f32.mrb[51].mxu0  ;;  %12944 = vmatprep.subr.bf16.mxu0 %v22705_v60  ;;  %v22753_v60 = vld [vmem:[%s30439_s4 + $0x7c4] ss:$16 sps:$4 sm:$0xff]   ;;  %v22748_v45 = vld [vmem:[%s30439_s4 + $0xec0] ss:$16 sps:$4 sm:$0xff]   ;;  %v28466_v16 = vrot.slane %v14012_v26, %v27429_v42 }
 0x96a   : > { %v22751_v1 = vld [vmem:[%s30439_s4 + $0x7c0] ss:$16 sps:$4 sm:$0xff]   ;;  %v22759_v61 = vld [vmem:[%s30439_s4 + $0x7e4] ss:$16 sps:$4 sm:$0xff]  }
 0x96b   : > { %13866 = vmatpush1.bf16.msra.mxu1 %v22700_v37  ;;  %v22756_v37 = vld [vmem:[%s30439_s4 + $0xee4] ss:$16 sps:$4 sm:$0xff]   ;;  %v28479_v40 = vrot.slane %v28466_v16, %v27429_v42 }
 0x96c   : > { %12945 = vmatpush1.bf16.msra.mxu0 %v22703_v3  ;;  %13867 = vmatprep.subr.bf16.mxu1 %v22708_v63  ;;  %v22754_v3 = vld [vmem:[%s30439_s4 + $0xee0] ss:$16 sps:$4 sm:$0xff]  }
 0x96d   : > { %12946 = vmatprep.subr.bf16.mxu0 %v22711_v6  ;;  %v22757_v63 = vld [vmem:[%s30439_s4 + $0x7e0] ss:$16 sps:$4 sm:$0xff]   ;;  %v22762_v6 = vld [vmem:[%s30439_s4 + $0xe0c] ss:$16 sps:$4 sm:$0xff]  }
 0x96f   : > { %13868 = vmatpush1.bf16.msra.mxu1 %v22706_v46  ;;  %v22765_v46 = vld [vmem:[%s30439_s4 + $0x60c] ss:$16 sps:$4 sm:$0xff]  }
 0x970   : > { %12947 = vmatpush1.bf16.msra.mxu0 %v22709_v5  ;;  %14560 = vmatprep.subr.bf16.mxu1 %v22714_v36  ;;  %v22760_v5 = vld [vmem:[%s30439_s4 + $0xe08] ss:$16 sps:$4 sm:$0xff]   ;;  %v28492_v36 = vcombine.high %v28479_v40, %v28479_v40 }
 0x971   : > { %12948 = vmatprep.subr.bf16.mxu0 %v22717_v15  ;;  %v22763_v15 = vld [vmem:[%s30439_s4 + $0x608] ss:$16 sps:$4 sm:$0xff]  }
 0x972   : > { %13886 = vmatmul.mubr.bf16.vlgmr.msra.gmra.mrb[68].mxu1 %v28264_v12  ;;  %v22729_v12 = vld [vmem:[%s30439_s4 + $0x744] ss:$16 sps:$4 sm:$0xff]  }
 0x973   : > { %14561 = vmatpush1.bf16.msra.mxu1 %v22712_v58  ;;  %14592 = vmatprep.mubr.bf16.mxu1 %v23619_v8  ;;  %v22768_v58 = vld [vmem:[%s30439_s4 + $0xe2c] ss:$16 sps:$4 sm:$0xff]  }
 0x974   : > { %12949 = vmatpush1.bf16.msra.mxu0 %v22715_v54  ;;  %14562 = vmatprep.subr.bf16.mxu1 %v22720_v7  ;;  %v22771_v54 = vld [vmem:[%s30439_s4 + $0x62c] ss:$16 sps:$4 sm:$0xff]   ;;  %v22766_v7 = vld [vmem:[%s30439_s4 + $0xe28] ss:$16 sps:$4 sm:$0xff]  }
 0x975   : > { %12950 = vmatprep.subr.bf16.mxu0 %v22723_v56  ;;  %v22769_v56 = vld [vmem:[%s30439_s4 + $0x628] ss:$16 sps:$4 sm:$0xff]  }
 0x977   : > { %14563 = vmatpush1.bf16.msra.mxu1 %v22718_v32  ;;  %v22774_v32 = vld [vmem:[%s30439_s4 + $0xe4c] ss:$16 sps:$4 sm:$0xff]  }
 0x978   : > { %12951 = vmatpush1.bf16.msra.mxu0 %v22721_v22  ;;  %14564 = vmatprep.subr.bf16.mxu1 %v22726_v20  ;;  %v22777_v22 = vld [vmem:[%s30439_s4 + $0x64c] ss:$16 sps:$4 sm:$0xff]   ;;  %v22775_v20 = vld [vmem:[%s30439_s4 + $0x648] ss:$16 sps:$4 sm:$0xff]  }
 0x979   : > { %12952 = vmatprep.subr.bf16.mxu0 %v22729_v12  ;;  %v22780_v12 = vld [vmem:[%s30439_s4 + $0xe6c] ss:$16 sps:$4 sm:$0xff]  }
 0x97b   : > { %14565 = vmatpush1.bf16.msra.mxu1 %v22724_v9  ;;  %v22783_v9 = vld [vmem:[%s30439_s4 + $0x66c] ss:$16 sps:$4 sm:$0xff]  }
 0x97c   : > { %12953 = vmatpush1.bf16.msra.mxu0 %v22727_v51  ;;  %14566 = vmatprep.subr.bf16.mxu1 %v22732_v29  ;;  %v22778_v51 = vld [vmem:[%s30439_s4 + $0xe68] ss:$16 sps:$4 sm:$0xff]  }
 0x97d   : > { %12954 = vmatprep.subr.bf16.mxu0 %v22735_v57  ;;  %v22781_v29 = vld [vmem:[%s30439_s4 + $0x668] ss:$16 sps:$4 sm:$0xff]   ;;  %v22786_v57 = vld [vmem:[%s30439_s4 + $0xe8c] ss:$16 sps:$4 sm:$0xff]  }
 0x97f   : > { %14567 = vmatpush1.bf16.msra.mxu1 %v22730_v30  ;;  %v22789_v30 = vld [vmem:[%s30439_s4 + $0x68c] ss:$16 sps:$4 sm:$0xff]  }
 0x980   : > { %12955 = vmatpush1.bf16.msra.mxu0 %v22733_v0  ;;  %14568 = vmatprep.subr.bf16.mxu1 %v22738_v17  ;;  %v22784_v0 = vld [vmem:[%s30439_s4 + $0xe88] ss:$16 sps:$4 sm:$0xff]  }
 0x981   : > { %12956 = vmatprep.subr.bf16.mxu0 %v22741_v44  ;;  %v22787_v17 = vld [vmem:[%s30439_s4 + $0x688] ss:$16 sps:$4 sm:$0xff]  }
 0x982   : > { %v22790_v44 = vld [vmem:[%s30439_s4 + $0xea8] ss:$16 sps:$4 sm:$0xff]  }
 0x983   : > { %14569 = vmatpush1.bf16.msra.mxu1 %v22736_v50  ;;  %v22793_v50 = vld [vmem:[%s30439_s4 + $0x6a8] ss:$16 sps:$4 sm:$0xff]  }
 0x984   : > { %12957 = vmatpush1.bf16.msra.mxu0 %v22739_v34  ;;  %14570 = vmatprep.subr.bf16.mxu1 %v22744_v11  ;;  %v22798_v34 = vld [vmem:[%s30439_s4 + $0xecc] ss:$16 sps:$4 sm:$0xff]  }
 0x985   : > { %v28449_v2 = vpop.f32.mrb[44].mxu1  ;;  %12958 = vmatprep.subr.bf16.mxu0 %v22747_v48  ;;  %v22801_v48 = vld [vmem:[%s30439_s4 + $0x6cc] ss:$16 sps:$4 sm:$0xff]  }
 0x986   : > { %v28454_v59 = vpop.f32.mrb[45].mxu1 }
 0x987   : > { %v11654_v47 = vpop.f32.mrb[46].mxu1  ;;  %14571 = vmatpush1.bf16.msra.mxu1 %v22742_v21 }
 0x988   : > { %v11655_v41 = vpop.f32.mrb[47].mxu1  ;;  %12959 = vmatpush1.bf16.msra.mxu0 %v22745_v23  ;;  %14572 = vmatprep.subr.bf16.mxu1 %v22750_v10  ;;  %v22796_v47 = vld [vmem:[%s30439_s4 + $0xec8] ss:$16 sps:$4 sm:$0xff]  }
 0x989   : > { %12960 = vmatprep.subr.bf16.mxu0 %v22753_v60 }
 0x98b   : > { %14573 = vmatpush1.bf16.msra.mxu1 %v22748_v45 }
 0x98c   : > { %12961 = vmatpush1.bf16.msra.mxu0 %v22751_v1  ;;  %14574 = vmatprep.subr.bf16.mxu1 %v22756_v37  ;;  %v22799_v37 = vld [vmem:[%s30439_s4 + $0x6c8] ss:$16 sps:$4 sm:$0xff]  }
 0x98d   : > { %12962 = vmatprep.subr.bf16.mxu0 %v22759_v61 }
 0x98f   : > { %14575 = vmatpush1.bf16.msra.mxu1 %v22754_v3  ;;  %v22807_v3 = vld [vmem:[%s30439_s4 + $0x6ec] ss:$16 sps:$4 sm:$0xff]  }
 0x990   : > { %12963 = vmatpush1.bf16.msra.mxu0 %v22757_v63  ;;  %14642 = vmatprep.subr.bf16.mxu1 %v22762_v6  ;;  %v22805_v63 = vld [vmem:[%s30439_s4 + $0x6e8] ss:$16 sps:$4 sm:$0xff]   ;;  %v22810_v6 = vld [vmem:[%s30439_s4 + $0x1104] ss:$16 sps:$4 sm:$0xff]  }
 0x991   : > { %13014 = vmatprep.subr.bf16.mxu0 %v22765_v46  ;;  %v22813_v46 = vld [vmem:[%s30439_s4 + $0x70c] ss:$16 sps:$4 sm:$0xff]  }
 0x992   : > { %14593 = vmatmul.mubr.bf16.vlgmr.msra.gmra.mrb[72].mxu1 %v28492_v36 }
 0x993   : > { %12965 = vmatmul.mubr.bf16.vlgmr.msra.gmra.mrb[64].mxu0 %v28033_v43  ;;  %14643 = vmatpush1.bf16.msra.mxu1 %v22760_v5  ;;  %v22808_v5 = vld [vmem:[%s30439_s4 + $0x1100] ss:$16 sps:$4 sm:$0xff]  }
 0x994   : > { %13015 = vmatpush1.bf16.msra.mxu0 %v22763_v15  ;;  %13046 = vmatprep.mubr.bf16.mxu0 %v28277_v13  ;;  %v22772_v13 = vld [vmem:[%s30439_s4 + $0xe48] ss:$16 sps:$4 sm:$0xff]  }
 0x995   : > { %14644 = vmatprep.subr.bf16.mxu1 %v22768_v58  ;;  %13016 = vmatprep.subr.bf16.mxu0 %v22771_v54  ;;  %v22811_v15 = vld [vmem:[%s30439_s4 + $0x708] ss:$16 sps:$4 sm:$0xff]   ;;  %v22816_v58 = vld [vmem:[%s30439_s4 + $0x1124] ss:$16 sps:$4 sm:$0xff]   ;;  %v22819_v54 = vld [vmem:[%s30439_s4 + $0x72c] ss:$16 sps:$4 sm:$0xff]  }
 0x996   : > { %14674 = vmatprep.mubr.bf16.mxu1 %v23619_v8 }
 0x997   : > { %14645 = vmatpush1.bf16.msra.mxu1 %v22766_v7  ;;  %v22814_v7 = vld [vmem:[%s30439_s4 + $0x1120] ss:$16 sps:$4 sm:$0xff]  }
 0x998   : > { %13017 = vmatpush1.bf16.msra.mxu0 %v22769_v56  ;;  %14646 = vmatprep.subr.bf16.mxu1 %v22774_v32  ;;  %v22817_v56 = vld [vmem:[%s30439_s4 + $0x728] ss:$16 sps:$4 sm:$0xff]   ;;  %v22822_v32 = vld [vmem:[%s30439_s4 + $0x1144] ss:$16 sps:$4 sm:$0xff]  }
 0x999   : > { %13018 = vmatprep.subr.bf16.mxu0 %v22777_v22  ;;  %v22820_v22 = vld [vmem:[%s30439_s4 + $0x1140] ss:$16 sps:$4 sm:$0xff]  }
 0x99b   : > { %14647 = vmatpush1.bf16.msra.mxu1 %v22772_v13  ;;  %v22823_v13 = vld [vmem:[%s30439_s4 + $0x748] ss:$16 sps:$4 sm:$0xff]  }
 0x99c   : > { %13019 = vmatpush1.bf16.msra.mxu0 %v22775_v20  ;;  %14648 = vmatprep.subr.bf16.mxu1 %v22780_v12  ;;  %v22828_v20 = vld [vmem:[%s30439_s4 + $0x1164] ss:$16 sps:$4 sm:$0xff]   ;;  %v22831_v12 = vld [vmem:[%s30439_s4 + $0x76c] ss:$16 sps:$4 sm:$0xff]  }
 0x99d   : > { %13020 = vmatprep.subr.bf16.mxu0 %v22783_v9  ;;  %v22826_v9 = vld [vmem:[%s30439_s4 + $0x1160] ss:$16 sps:$4 sm:$0xff]  }
 0x99f   : > { %14649 = vmatpush1.bf16.msra.mxu1 %v22778_v51  ;;  %v22829_v51 = vld [vmem:[%s30439_s4 + $0x768] ss:$16 sps:$4 sm:$0xff]  }
 0x9a0   : > { %13021 = vmatpush1.bf16.msra.mxu0 %v22781_v29  ;;  %14650 = vmatprep.subr.bf16.mxu1 %v22786_v57  ;;  %v22834_v29 = vld [vmem:[%s30439_s4 + $0x1184] ss:$16 sps:$4 sm:$0xff]   ;;  %v22837_v57 = vld [vmem:[%s30439_s4 + $0x78c] ss:$16 sps:$4 sm:$0xff]  }
 0x9a1   : > { %13022 = vmatprep.subr.bf16.mxu0 %v22789_v30  ;;  %v22832_v30 = vld [vmem:[%s30439_s4 + $0x1180] ss:$16 sps:$4 sm:$0xff]  }
 0x9a3   : > { %14651 = vmatpush1.bf16.msra.mxu1 %v22784_v0  ;;  %v22835_v0 = vld [vmem:[%s30439_s4 + $0x788] ss:$16 sps:$4 sm:$0xff]  }
 0x9a4   : > { %13023 = vmatpush1.bf16.msra.mxu0 %v22787_v17  ;;  %14652 = vmatprep.subr.bf16.mxu1 %v22792_v39  ;;  %v22840_v17 = vld [vmem:[%s30439_s4 + $0x11a4] ss:$16 sps:$4 sm:$0xff]   ;;  %v22843_v39 = vld [vmem:[%s30439_s4 + $0x7ac] ss:$16 sps:$4 sm:$0xff]  }
 0x9a5   : > { %v28564_v11 = vpop.f32.mrb[48].mxu1  ;;  %13024 = vmatprep.subr.bf16.mxu0 %v22795_v53  ;;  %v22838_v53 = vld [vmem:[%s30439_s4 + $0x11a0] ss:$16 sps:$4 sm:$0xff]  }
 0x9a6   : > { %v11609_v21 = vpop.f32.mrb[52].mxu0  ;;  %v28569_v26 = vpop.f32.mrb[49].mxu1 }
 0x9a7   : > { %v28572_v23 = vadd.f32 %v28449_v2, %v11609_v21  ;;  %v11611_v10 = vpop.f32.mrb[53].mxu0  ;;  %v12243_v60 = vpop.f32.mrb[50].mxu1  ;;  %14653 = vmatpush1.bf16.msra.mxu1 %v22790_v44  ;;  %v22804_v2 = vld [vmem:[%s30439_s4 + $0xeec] ss:$16 sps:$4 sm:$0xff]   ;;  %v22841_v44 = vld [vmem:[%s30439_s4 + $0x7a8] ss:$16 sps:$4 sm:$0xff]  }
 0x9a8   : > { %v28578_v45 = vadd.f32 %v28454_v59, %v11611_v10  ;;  %v11613_v41 = vpop.f32.mrb[54].mxu0  ;;  %v12244_v1 = vpop.f32.mrb[51].mxu1  ;;  %13025 = vmatpush1.bf16.msra.mxu0 %v22793_v50  ;;  %14654 = vmatprep.subr.bf16.mxu1 %v22798_v34  ;;  %v22802_v59 = vld [vmem:[%s30439_s4 + $0xee8] ss:$16 sps:$4 sm:$0xff]   ;;  %v22846_v50 = vld [vmem:[%s30439_s4 + $0x11c4] ss:$16 sps:$4 sm:$0xff]  }
 0x9a9   : > { %v11614_v61 = vpop.f32.mrb[55].mxu0  ;;  %13026 = vmatprep.subr.bf16.mxu0 %v22801_v48  ;;  %v22849_v48 = vld [vmem:[%s30439_s4 + $0x7cc] ss:$16 sps:$4 sm:$0xff]   ;;  %v22844_v60 = vld [vmem:[%s30439_s4 + $0x11c0] ss:$16 sps:$4 sm:$0xff]  }
 0x9aa   : > { %v22847_v41 = vld [vmem:[%s30439_s4 + $0x7c8] ss:$16 sps:$4 sm:$0xff]   ;;  %v22852_v1 = vld [vmem:[%s30439_s4 + $0x11e4] ss:$16 sps:$4 sm:$0xff]   ;;  %v22850_v61 = vld [vmem:[%s30439_s4 + $0x11e0] ss:$16 sps:$4 sm:$0xff]  }
 0x9ab   : > { %14655 = vmatpush1.bf16.msra.mxu1 %v22796_v47 }
 0x9ac   : > { %13027 = vmatpush1.bf16.msra.mxu0 %v22799_v37  ;;  %14656 = vmatprep.subr.bf16.mxu1 %v22804_v2  ;;  %v28692_v37 = vrot.slane %v14784_v4, %v27429_v42  ;;  %v22855_v2 = vld [vmem:[%s30439_s4 + $0x7ec] ss:$16 sps:$4 sm:$0xff]  }
 0x9ad   : > { %13028 = vmatprep.subr.bf16.mxu0 %v22807_v3  ;;  %v22853_v3 = vld [vmem:[%s30439_s4 + $0x7e8] ss:$16 sps:$4 sm:$0xff]   ;;  %v22858_v4 = vld [vmem:[%s30439_s4 + $0x110c] ss:$16 sps:$4 sm:$0xff]  }
 0x9ae   : > { %v28705_v35 = vrot.slane %v28692_v37, %v27429_v42 }
 0x9af   : > { %14657 = vmatpush1.bf16.msra.mxu1 %v22802_v59  ;;  %v22861_v59 = vld [vmem:[%s30439_s4 + $0x904] ss:$16 sps:$4 sm:$0xff]  }
 0x9b0   : > { %13029 = vmatpush1.bf16.msra.mxu0 %v22805_v63  ;;  %15332 = vmatprep.subr.bf16.mxu1 %v22810_v6  ;;  %v13231_v63 = vcombine.high %v28236_v24, %v28236_v24  ;;  %v22856_v6 = vld [vmem:[%s30439_s4 + $0x1108] ss:$16 sps:$4 sm:$0xff]   ;;  %v22864_v24 = vld [vmem:[%s30439_s4 + $0x112c] ss:$16 sps:$4 sm:$0xff]  }
 0x9b1   : > { %13030 = vmatprep.subr.bf16.mxu0 %v22813_v46  ;;  %v28720_v46 = vcombine.high %v28705_v35, %v28705_v35 }
 0x9b2   : > { %14675 = vmatmul.mubr.bf16.vlgmr.msra.gmra.mrb[76].mxu1 %v28492_v36  ;;  %v22825_v36 = vld [vmem:[%s30439_s4 + $0x74c] ss:$16 sps:$4 sm:$0xff]  }
 0x9b3   : > { %15333 = vmatpush1.bf16.msra.mxu1 %v22808_v5  ;;  %15364 = vmatprep.mubr.bf16.mxu1 %v23619_v8  ;;  %v22859_v5 = vld [vmem:[%s30439_s4 + $0x900] ss:$16 sps:$4 sm:$0xff]  }
 0x9b4   : > { %13031 = vmatpush1.bf16.msra.mxu0 %v22811_v15  ;;  %15334 = vmatprep.subr.bf16.mxu1 %v22816_v58  ;;  %v22867_v15 = vld [vmem:[%s30439_s4 + $0x924] ss:$16 sps:$4 sm:$0xff]   ;;  %v28733_v58 = vrot.slane %v13231_v63, %v27429_v42 }
 0x9b5   : > { %13032 = vmatprep.subr.bf16.mxu0 %v22819_v54  ;;  %v22862_v54 = vld [vmem:[%s30439_s4 + $0x1128] ss:$16 sps:$4 sm:$0xff]  }
 0x9b7   : > { %15335 = vmatpush1.bf16.msra.mxu1 %v22814_v7  ;;  %v22865_v7 = vld [vmem:[%s30439_s4 + $0x920] ss:$16 sps:$4 sm:$0xff]  }
 0x9b8   : > { %13033 = vmatpush1.bf16.msra.mxu0 %v22817_v56  ;;  %15336 = vmatprep.subr.bf16.mxu1 %v22822_v32  ;;  %v22870_v56 = vld [vmem:[%s30439_s4 + $0x114c] ss:$16 sps:$4 sm:$0xff]   ;;  %v22868_v32 = vld [vmem:[%s30439_s4 + $0x1148] ss:$16 sps:$4 sm:$0xff]  }
 0x9b9   : > { %13034 = vmatprep.subr.bf16.mxu0 %v22825_v36  ;;  %v22871_v36 = vld [vmem:[%s30439_s4 + $0x940] ss:$16 sps:$4 sm:$0xff]  }
 0x9bb   : > { %15337 = vmatpush1.bf16.msra.mxu1 %v22820_v22  ;;  %v22876_v22 = vld [vmem:[%s30439_s4 + $0x116c] ss:$16 sps:$4 sm:$0xff]  }
 0x9bc   : > { %13035 = vmatpush1.bf16.msra.mxu0 %v22823_v13  ;;  %15338 = vmatprep.subr.bf16.mxu1 %v22828_v20  ;;  %v22879_v13 = vld [vmem:[%s30439_s4 + $0x964] ss:$16 sps:$4 sm:$0xff]   ;;  %v22874_v20 = vld [vmem:[%s30439_s4 + $0x1168] ss:$16 sps:$4 sm:$0xff]  }
 0x9bd   : > { %13036 = vmatprep.subr.bf16.mxu0 %v22831_v12  ;;  %v22877_v12 = vld [vmem:[%s30439_s4 + $0x960] ss:$16 sps:$4 sm:$0xff]  }
 0x9bf   : > { %15339 = vmatpush1.bf16.msra.mxu1 %v22826_v9  ;;  %v22882_v9 = vld [vmem:[%s30439_s4 + $0x118c] ss:$16 sps:$4 sm:$0xff]  }
 0x9c0   : > { %13037 = vmatpush1.bf16.msra.mxu0 %v22829_v51  ;;  %15340 = vmatprep.subr.bf16.mxu1 %v22834_v29  ;;  %v22885_v51 = vld [vmem:[%s30439_s4 + $0x984] ss:$16 sps:$4 sm:$0xff]   ;;  %v15477_v29 = vcombine.low %v27444_v14, %v27441_v62  ;;  %v23173_v62 = vld [vmem:[%s30439_s4 + $0xc8c] ss:$16 sps:$4 sm:$0xff]  }
 0x9c1   : > { %13038 = vmatprep.subr.bf16.mxu0 %v22837_v57  ;;  %v22880_v57 = vld [vmem:[%s30439_s4 + $0x1188] ss:$16 sps:$4 sm:$0xff]  }
 0x9c3   : > { %15341 = vmatpush1.bf16.msra.mxu1 %v22832_v30  ;;  %v22883_v30 = vld [vmem:[%s30439_s4 + $0x980] ss:$16 sps:$4 sm:$0xff]  }
 0x9c4   : > { %13039 = vmatpush1.bf16.msra.mxu0 %v22835_v0  ;;  %15342 = vmatprep.subr.bf16.mxu1 %v22840_v17  ;;  %v22888_v0 = vld [vmem:[%s30439_s4 + $0x11ac] ss:$16 sps:$4 sm:$0xff]   ;;  %v22891_v17 = vld [vmem:[%s30439_s4 + $0x9a4] ss:$16 sps:$4 sm:$0xff]  }
 0x9c5   : > { %v28672_v34 = vpop.f32.mrb[52].mxu1  ;;  %13040 = vmatprep.subr.bf16.mxu0 %v22843_v39  ;;  %v28789_v39 = vrot.slane %v15477_v29, %v27429_v42  ;;  %v22919_v29 = vld [vmem:[%s30439_s4 + $0xa40] ss:$16 sps:$4 sm:$0xff]  }
 0x9c6   : > { %v28677_v21 = vpop.f32.mrb[53].mxu1 }
 0x9c7   : > { %v12325_v10 = vpop.f32.mrb[54].mxu1  ;;  %15343 = vmatpush1.bf16.msra.mxu1 %v22838_v53  ;;  %v22886_v53 = vld [vmem:[%s30439_s4 + $0x11a8] ss:$16 sps:$4 sm:$0xff]   ;;  %v16266_v14 = vshrl.u32 %v28789_v39, 16 }
 0x9c8   : > { %v12326_v47 = vpop.f32.mrb[55].mxu1  ;;  %13041 = vmatpush1.bf16.msra.mxu0 %v22841_v44  ;;  %15344 = vmatprep.subr.bf16.mxu1 %v22846_v50  ;;  %v22889_v44 = vld [vmem:[%s30439_s4 + $0x9a0] ss:$16 sps:$4 sm:$0xff]   ;;  %v22894_v50 = vld [vmem:[%s30439_s4 + $0x11cc] ss:$16 sps:$4 sm:$0xff]  }
 0x9c9   : > { %13042 = vmatprep.subr.bf16.mxu0 %v22849_v48  ;;  %v22897_v10 = vld [vmem:[%s30439_s4 + $0x9c4] ss:$16 sps:$4 sm:$0xff]  }
 0x9cb   : > { %15345 = vmatpush1.bf16.msra.mxu1 %v22844_v60  ;;  %v15582_v60 = vcombine.low %v28201_v38, %v28789_v39  ;;  %v22895_v38 = vld [vmem:[%s30439_s4 + $0x9c0] ss:$16 sps:$4 sm:$0xff]   ;;  %v23179_v39 = vld [vmem:[%s30439_s4 + $0xcac] ss:$16 sps:$4 sm:$0xff]  }
 0x9cc   : > { %13043 = vmatpush1.bf16.msra.mxu0 %v22847_v41  ;;  %15346 = vmatprep.subr.bf16.mxu1 %v22852_v1 }
 0x9cd   : > { %13044 = vmatprep.subr.bf16.mxu0 %v22855_v2 }
 0x9cf   : > { %15347 = vmatpush1.bf16.msra.mxu1 %v22850_v61 }
 0x9d0   : > { %13045 = vmatpush1.bf16.msra.mxu0 %v22853_v3  ;;  %15414 = vmatprep.subr.bf16.mxu1 %v22858_v4  ;;  %v22892_v3 = vld [vmem:[%s30439_s4 + $0x11c8] ss:$16 sps:$4 sm:$0xff]  }
 0x9d1   : > { %13730 = vmatprep.subr.bf16.mxu0 %v22861_v59 }
 0x9d2   : > { %15365 = vmatmul.mubr.bf16.vlgmr.msra.gmra.mrb[80].mxu1 %v28720_v46 }
 0x9d3   : > { %13047 = vmatmul.mubr.bf16.vlgmr.msra.gmra.mrb[68].mxu0 %v28033_v43  ;;  %15415 = vmatpush1.bf16.msra.mxu1 %v22856_v6  ;;  %v22873_v43 = vld [vmem:[%s30439_s4 + $0x944] ss:$16 sps:$4 sm:$0xff]  }
 0x9d4   : > { %13731 = vmatpush1.bf16.msra.mxu0 %v22859_v5  ;;  %13762 = vmatprep.mubr.bf16.mxu0 %v28733_v58  ;;  %v22903_v5 = vld [vmem:[%s30439_s4 + $0x9e4] ss:$16 sps:$4 sm:$0xff]  }
 0x9d5   : > { %15416 = vmatprep.subr.bf16.mxu1 %v22864_v24  ;;  %13732 = vmatprep.subr.bf16.mxu0 %v22867_v15 }
 0x9d6   : > { %15446 = vmatprep.mubr.bf16.mxu1 %v23619_v8 }
 0x9d7   : > { %15417 = vmatpush1.bf16.msra.mxu1 %v22862_v54  ;;  %v22898_v54 = vld [vmem:[%s30439_s4 + $0x11e8] ss:$16 sps:$4 sm:$0xff]  }
 0x9d8   : > { %13733 = vmatpush1.bf16.msra.mxu0 %v22865_v7  ;;  %15418 = vmatprep.subr.bf16.mxu1 %v22870_v56  ;;  %v22901_v7 = vld [vmem:[%s30439_s4 + $0x9e0] ss:$16 sps:$4 sm:$0xff]   ;;  %v22906_v56 = vld [vmem:[%s30439_s4 + $0x1204] ss:$16 sps:$4 sm:$0xff]  }
 0x9d9   : > { %13734 = vmatprep.subr.bf16.mxu0 %v22873_v43  ;;  %v22904_v43 = vld [vmem:[%s30439_s4 + $0x1200] ss:$16 sps:$4 sm:$0xff]  }
 0x9db   : > { %15419 = vmatpush1.bf16.msra.mxu1 %v22868_v32  ;;  %v22907_v32 = vld [vmem:[%s30439_s4 + $0xa00] ss:$16 sps:$4 sm:$0xff]  }
 0x9dc   : > { %13735 = vmatpush1.bf16.msra.mxu0 %v22871_v36  ;;  %15420 = vmatprep.subr.bf16.mxu1 %v22876_v22  ;;  %v22912_v36 = vld [vmem:[%s30439_s4 + $0x1224] ss:$16 sps:$4 sm:$0xff]  }
 0x9dd   : > { %13736 = vmatprep.subr.bf16.mxu0 %v22879_v13  ;;  %v22915_v13 = vld [vmem:[%s30439_s4 + $0xa24] ss:$16 sps:$4 sm:$0xff]  }
 0x9df   : > { %15421 = vmatpush1.bf16.msra.mxu1 %v22874_v20  ;;  %v22910_v20 = vld [vmem:[%s30439_s4 + $0x1220] ss:$16 sps:$4 sm:$0xff]  }
 0x9e0   : > { %13737 = vmatpush1.bf16.msra.mxu0 %v22877_v12  ;;  %15422 = vmatprep.subr.bf16.mxu1 %v22882_v9  ;;  %v22913_v12 = vld [vmem:[%s30439_s4 + $0xa20] ss:$16 sps:$4 sm:$0xff]   ;;  %v22918_v9 = vld [vmem:[%s30439_s4 + $0x1244] ss:$16 sps:$4 sm:$0xff]  }
 0x9e1   : > { %13738 = vmatprep.subr.bf16.mxu0 %v22885_v51  ;;  %v22916_v51 = vld [vmem:[%s30439_s4 + $0x1240] ss:$16 sps:$4 sm:$0xff]  }
 0x9e3   : > { %15423 = vmatpush1.bf16.msra.mxu1 %v22880_v57  ;;  %v22924_v57 = vld [vmem:[%s30439_s4 + $0x1264] ss:$16 sps:$4 sm:$0xff]  }
 0x9e4   : > { %13739 = vmatpush1.bf16.msra.mxu0 %v22883_v30  ;;  %15424 = vmatprep.subr.bf16.mxu1 %v22888_v0  ;;  %v22927_v30 = vld [vmem:[%s30439_s4 + $0xa64] ss:$16 sps:$4 sm:$0xff]   ;;  %v22922_v0 = vld [vmem:[%s30439_s4 + $0x1260] ss:$16 sps:$4 sm:$0xff]  }
 0x9e5   : > { %v28800_v48 = vpop.f32.mrb[56].mxu1  ;;  %13740 = vmatprep.subr.bf16.mxu0 %v22891_v17  ;;  %v22925_v17 = vld [vmem:[%s30439_s4 + $0xa60] ss:$16 sps:$4 sm:$0xff]  }
 0x9e6   : > { %v12198_v47 = vpop.f32.mrb[56].mxu0  ;;  %v28807_v41 = vpop.f32.mrb[57].mxu1 }
 0x9e7   : > { %v12199_v1 = vadd.f32 %v12198_v47, %v28342_v31  ;;  %v12200_v2 = vpop.f32.mrb[57].mxu0  ;;  %v13011_v61 = vpop.f32.mrb[58].mxu1  ;;  %15425 = vmatpush1.bf16.msra.mxu1 %v22886_v53  ;;  %v22900_v31 = vld [vmem:[%s30439_s4 + $0x11ec] ss:$16 sps:$4 sm:$0xff]   ;;  %v22930_v53 = vld [vmem:[%s30439_s4 + $0x1284] ss:$16 sps:$4 sm:$0xff]  }
 0x9e8   : > { %v12201_v4 = vadd.f32 %v12200_v2, %v28347_v52  ;;  %v12202_v59 = vpop.f32.mrb[58].mxu0  ;;  %v13012_v63 = vpop.f32.mrb[59].mxu1  ;;  %13741 = vmatpush1.bf16.msra.mxu0 %v22889_v44  ;;  %15426 = vmatprep.subr.bf16.mxu1 %v22894_v50  ;;  %v28824_v52 = vrot.slane %v15582_v60, %v27429_v42  ;;  %v22933_v44 = vld [vmem:[%s30439_s4 + $0xa84] ss:$16 sps:$4 sm:$0xff]   ;;  %v22928_v50 = vld [vmem:[%s30439_s4 + $0x1280] ss:$16 sps:$4 sm:$0xff]  }
 0x9e9   : > { %v12203_v6 = vpop.f32.mrb[59].mxu0  ;;  %13742 = vmatprep.subr.bf16.mxu0 %v22897_v10  ;;  %v28827_v24 = vadd.f32 %v28564_v11, %v12199_v1  ;;  %v22909_v11 = vld [vmem:[%s30439_s4 + $0xa04] ss:$16 sps:$4 sm:$0xff]   ;;  %v22931_v10 = vld [vmem:[%s30439_s4 + $0xa80] ss:$16 sps:$4 sm:$0xff]  }
 0x9ea   : > { %v28830_v15 = vadd.f32 %v28569_v26, %v12201_v4  ;;  %v15590_v26 = vcombine.high %v28824_v52, %v28824_v52  ;;  %v22936_v60 = vld [vmem:[%s30439_s4 + $0x12a4] ss:$16 sps:$4 sm:$0xff]   ;;  %v22934_v1 = vld [vmem:[%s30439_s4 + $0x12a0] ss:$16 sps:$4 sm:$0xff]  }
 0x9eb   : > { %15427 = vmatpush1.bf16.msra.mxu1 %v22892_v3  ;;  %v22939_v47 = vld [vmem:[%s30439_s4 + $0xaa4] ss:$16 sps:$4 sm:$0xff]   ;;  %v22937_v2 = vld [vmem:[%s30439_s4 + $0xaa0] ss:$16 sps:$4 sm:$0xff]  }
 0x9ec   : > { %13743 = vmatpush1.bf16.msra.mxu0 %v22895_v38  ;;  %15428 = vmatprep.subr.bf16.mxu1 %v22900_v31  ;;  %v28856_v22 = vrot.slane %v15590_v26, %v27429_v42  ;;  %v22942_v61 = vld [vmem:[%s30439_s4 + $0x12c4] ss:$16 sps:$4 sm:$0xff]   ;;  %v22940_v38 = vld [vmem:[%s30439_s4 + $0x12c0] ss:$16 sps:$4 sm:$0xff]   ;;  %v22957_v26 = vld [vmem:[%s30439_s4 + $0x90c] ss:$16 sps:$4 sm:$0xff]  }
 0x9ed   : > { %13744 = vmatprep.subr.bf16.mxu0 %v22903_v5  ;;  %v22945_v4 = vld [vmem:[%s30439_s4 + $0xac4] ss:$16 sps:$4 sm:$0xff]   ;;  %v22943_v6 = vld [vmem:[%s30439_s4 + $0xac0] ss:$16 sps:$4 sm:$0xff]  }
 0x9ee   : > { %v22948_v5 = vld [vmem:[%s30439_s4 + $0x12e4] ss:$16 sps:$4 sm:$0xff]  }
 0x9ef   : > { %15429 = vmatpush1.bf16.msra.mxu1 %v22898_v54  ;;  %v22951_v54 = vld [vmem:[%s30439_s4 + $0xae4] ss:$16 sps:$4 sm:$0xff]  }
 0x9f0   : > { %13745 = vmatpush1.bf16.msra.mxu0 %v22901_v7  ;;  %16089 = vmatprep.subr.bf16.mxu1 %v22906_v56  ;;  %v22946_v7 = vld [vmem:[%s30439_s4 + $0x12e0] ss:$16 sps:$4 sm:$0xff]  }
 0x9f1   : > { %13746 = vmatprep.subr.bf16.mxu0 %v22909_v11  ;;  %v22949_v56 = vld [vmem:[%s30439_s4 + $0xae0] ss:$16 sps:$4 sm:$0xff]   ;;  %v22954_v11 = vld [vmem:[%s30439_s4 + $0x1304] ss:$16 sps:$4 sm:$0xff]  }
 0x9f2   : > { %15447 = vmatmul.mubr.bf16.vlgmr.msra.gmra.mrb[84].mxu1 %v28720_v46  ;;  %v22921_v46 = vld [vmem:[%s30439_s4 + $0xa44] ss:$16 sps:$4 sm:$0xff]  }
 0x9f3   : > { %16090 = vmatpush1.bf16.msra.mxu1 %v22904_v43  ;;  %16121 = vmatprep.mubr.bf16.mxu1 %v28856_v22  ;;  %v22952_v43 = vld [vmem:[%s30439_s4 + $0x1300] ss:$16 sps:$4 sm:$0xff]  }
 0x9f4   : > { %13747 = vmatpush1.bf16.msra.mxu0 %v22907_v32  ;;  %16091 = vmatprep.subr.bf16.mxu1 %v22912_v36  ;;  %v22955_v32 = vld [vmem:[%s30439_s4 + $0x908] ss:$16 sps:$4 sm:$0xff]   ;;  %v22960_v36 = vld [vmem:[%s30439_s4 + $0x1324] ss:$16 sps:$4 sm:$0xff]  }
 0x9f5   : > { %13748 = vmatprep.subr.bf16.mxu0 %v22915_v13  ;;  %v22963_v13 = vld [vmem:[%s30439_s4 + $0x92c] ss:$16 sps:$4 sm:$0xff]  }
 0x9f7   : > { %16092 = vmatpush1.bf16.msra.mxu1 %v22910_v20  ;;  %v22958_v20 = vld [vmem:[%s30439_s4 + $0x1320] ss:$16 sps:$4 sm:$0xff]  }
 0x9f8   : > { %13749 = vmatpush1.bf16.msra.mxu0 %v22913_v12  ;;  %16093 = vmatprep.subr.bf16.mxu1 %v22918_v9  ;;  %v22961_v12 = vld [vmem:[%s30439_s4 + $0x928] ss:$16 sps:$4 sm:$0xff]   ;;  %v22966_v9 = vld [vmem:[%s30439_s4 + $0x1344] ss:$16 sps:$4 sm:$0xff]  }
 0x9f9   : > { %13750 = vmatprep.subr.bf16.mxu0 %v22921_v46  ;;  %v22969_v46 = vld [vmem:[%s30439_s4 + $0x94c] ss:$16 sps:$4 sm:$0xff]  }
 0x9fb   : > { %16094 = vmatpush1.bf16.msra.mxu1 %v22916_v51  ;;  %v22964_v51 = vld [vmem:[%s30439_s4 + $0x1340] ss:$16 sps:$4 sm:$0xff]  }
 0x9fc   : > { %13751 = vmatpush1.bf16.msra.mxu0 %v22919_v29  ;;  %16095 = vmatprep.subr.bf16.mxu1 %v22924_v57  ;;  %v22972_v29 = vld [vmem:[%s30439_s4 + $0x1364] ss:$16 sps:$4 sm:$0xff]   ;;  %v22975_v57 = vld [vmem:[%s30439_s4 + $0x96c] ss:$16 sps:$4 sm:$0xff]  }
 0x9fd   : > { %13752 = vmatprep.subr.bf16.mxu0 %v22927_v30  ;;  %v22970_v30 = vld [vmem:[%s30439_s4 + $0x1360] ss:$16 sps:$4 sm:$0xff]  }
 0x9ff   : > { %16096 = vmatpush1.bf16.msra.mxu1 %v22922_v0  ;;  %v22973_v0 = vld [vmem:[%s30439_s4 + $0x968] ss:$16 sps:$4 sm:$0xff]  }
 0xa00   : > { %13753 = vmatpush1.bf16.msra.mxu0 %v22925_v17  ;;  %16097 = vmatprep.subr.bf16.mxu1 %v22930_v53  ;;  %v22978_v17 = vld [vmem:[%s30439_s4 + $0x1384] ss:$16 sps:$4 sm:$0xff]   ;;  %v22981_v53 = vld [vmem:[%s30439_s4 + $0x98c] ss:$16 sps:$4 sm:$0xff]  }
 0xa01   : > { %13754 = vmatprep.subr.bf16.mxu0 %v22933_v44  ;;  %v22976_v44 = vld [vmem:[%s30439_s4 + $0x1380] ss:$16 sps:$4 sm:$0xff]  }
 0xa03   : > { %16098 = vmatpush1.bf16.msra.mxu1 %v22928_v50  ;;  %v22979_v50 = vld [vmem:[%s30439_s4 + $0x988] ss:$16 sps:$4 sm:$0xff]  }
 0xa04   : > { %13755 = vmatpush1.bf16.msra.mxu0 %v22931_v10  ;;  %16099 = vmatprep.subr.bf16.mxu1 %v22936_v60  ;;  %v22984_v10 = vld [vmem:[%s30439_s4 + $0x13a4] ss:$16 sps:$4 sm:$0xff]   ;;  %v22987_v60 = vld [vmem:[%s30439_s4 + $0x9ac] ss:$16 sps:$4 sm:$0xff]  }
 0xa05   : > { %v28920_v3 = vpop.f32.mrb[60].mxu1  ;;  %13756 = vmatprep.subr.bf16.mxu0 %v22939_v47  ;;  %v22982_v47 = vld [vmem:[%s30439_s4 + $0x13a0] ss:$16 sps:$4 sm:$0xff]  }
 0xa06   : > { %v28925_v59 = vpop.f32.mrb[61].mxu1 }
 0xa07   : > { %v13093_v63 = vpop.f32.mrb[62].mxu1  ;;  %16100 = vmatpush1.bf16.msra.mxu1 %v22934_v1  ;;  %v22985_v1 = vld [vmem:[%s30439_s4 + $0x9a8] ss:$16 sps:$4 sm:$0xff]  }
 0xa08   : > { %v13094_v31 = vpop.f32.mrb[63].mxu1  ;;  %13757 = vmatpush1.bf16.msra.mxu0 %v22937_v2  ;;  %16101 = vmatprep.subr.bf16.mxu1 %v22942_v61  ;;  %v22990_v2 = vld [vmem:[%s30439_s4 + $0x13c4] ss:$16 sps:$4 sm:$0xff]  }
 0xa09   : > { %13758 = vmatprep.subr.bf16.mxu0 %v22945_v4  ;;  %v22993_v4 = vld [vmem:[%s30439_s4 + $0x9cc] ss:$16 sps:$4 sm:$0xff]  }
 0xa0b   : > { %16102 = vmatpush1.bf16.msra.mxu1 %v22940_v38 }
 0xa0c   : > { %13759 = vmatpush1.bf16.msra.mxu0 %v22943_v6  ;;  %16103 = vmatprep.subr.bf16.mxu1 %v22948_v5 }
 0xa0d   : > { %13760 = vmatprep.subr.bf16.mxu0 %v22951_v54  ;;  %v22988_v54 = vld [vmem:[%s30439_s4 + $0x13c0] ss:$16 sps:$4 sm:$0xff]  }
 0xa0f   : > { %16104 = vmatpush1.bf16.msra.mxu1 %v22946_v7 }
 0xa10   : > { %13761 = vmatpush1.bf16.msra.mxu0 %v22949_v56  ;;  %16105 = vmatprep.subr.bf16.mxu1 %v22954_v11 }
 0xa11   : > { %13812 = vmatprep.subr.bf16.mxu0 %v22957_v26  ;;  %v22991_v26 = vld [vmem:[%s30439_s4 + $0x9c8] ss:$16 sps:$4 sm:$0xff]  }
 0xa13   : > { %13763 = vmatmul.mubr.bf16.vlgmr.msra.gmra.mrb[72].mxu0 %v28249_v19  ;;  %16106 = vmatpush1.bf16.msra.mxu1 %v22952_v43 }
 0xa14   : > { %13813 = vmatpush1.bf16.msra.mxu0 %v22955_v32  ;;  %13844 = vmatprep.mubr.bf16.mxu0 %v28733_v58  ;;  %v22967_v58 = vld [vmem:[%s30439_s4 + $0x948] ss:$16 sps:$4 sm:$0xff]   ;;  %v22999_v32 = vld [vmem:[%s30439_s4 + $0x9ec] ss:$16 sps:$4 sm:$0xff]  }
 0xa15   : > { %16107 = vmatprep.subr.bf16.mxu1 %v22960_v36  ;;  %13814 = vmatprep.subr.bf16.mxu0 %v22963_v13  ;;  %v22994_v13 = vld [vmem:[%s30439_s4 + $0x13e0] ss:$16 sps:$4 sm:$0xff]  }
 0xa17   : > { %16108 = vmatpush1.bf16.msra.mxu1 %v22958_v20  ;;  %v22997_v20 = vld [vmem:[%s30439_s4 + $0x9e8] ss:$16 sps:$4 sm:$0xff]  }
 0xa18   : > { %13815 = vmatpush1.bf16.msra.mxu0 %v22961_v12  ;;  %16109 = vmatprep.subr.bf16.mxu1 %v22966_v9  ;;  %v23002_v12 = vld [vmem:[%s30439_s4 + $0x1404] ss:$16 sps:$4 sm:$0xff]   ;;  %v29066_v9 = vrot.slane %v28824_v52, %v27429_v42  ;;  %v23006_v52 = vld [vmem:[%s30439_s4 + $0x1420] ss:$16 sps:$4 sm:$0xff]  }
 0xa19   : > { %13816 = vmatprep.subr.bf16.mxu0 %v22969_v46  ;;  %v23003_v46 = vld [vmem:[%s30439_s4 + $0xa08] ss:$16 sps:$4 sm:$0xff]  }
 0xa1b   : > { %16110 = vmatpush1.bf16.msra.mxu1 %v22964_v51  ;;  %v23008_v51 = vld [vmem:[%s30439_s4 + $0x1424] ss:$16 sps:$4 sm:$0xff]  }
 0xa1c   : > { %13817 = vmatpush1.bf16.msra.mxu0 %v22967_v58  ;;  %16111 = vmatprep.subr.bf16.mxu1 %v22972_v29  ;;  %v23011_v58 = vld [vmem:[%s30439_s4 + $0xa2c] ss:$16 sps:$4 sm:$0xff]   ;;  %v23009_v29 = vld [vmem:[%s30439_s4 + $0xa28] ss:$16 sps:$4 sm:$0xff]  }
 0xa1d   : > { %13818 = vmatprep.subr.bf16.mxu0 %v22975_v57  ;;  %v23014_v57 = vld [vmem:[%s30439_s4 + $0x1444] ss:$16 sps:$4 sm:$0xff]  }
 0xa1f   : > { %16112 = vmatpush1.bf16.msra.mxu1 %v22970_v30  ;;  %v23017_v30 = vld [vmem:[%s30439_s4 + $0xa4c] ss:$16 sps:$4 sm:$0xff]  }
 0xa20   : > { %13819 = vmatpush1.bf16.msra.mxu0 %v22973_v0  ;;  %16113 = vmatprep.subr.bf16.mxu1 %v22978_v17  ;;  %v23012_v0 = vld [vmem:[%s30439_s4 + $0x1440] ss:$16 sps:$4 sm:$0xff]   ;;  %v23015_v17 = vld [vmem:[%s30439_s4 + $0xa48] ss:$16 sps:$4 sm:$0xff]  }
 0xa21   : > { %13820 = vmatprep.subr.bf16.mxu0 %v22981_v53  ;;  %v23020_v53 = vld [vmem:[%s30439_s4 + $0x1464] ss:$16 sps:$4 sm:$0xff]  }
 0xa23   : > { %16114 = vmatpush1.bf16.msra.mxu1 %v22976_v44  ;;  %v23023_v44 = vld [vmem:[%s30439_s4 + $0xa6c] ss:$16 sps:$4 sm:$0xff]  }
 0xa24   : > { %13821 = vmatpush1.bf16.msra.mxu0 %v22979_v50  ;;  %16115 = vmatprep.subr.bf16.mxu1 %v22984_v10  ;;  %v23018_v50 = vld [vmem:[%s30439_s4 + $0x1460] ss:$16 sps:$4 sm:$0xff]   ;;  %v23021_v10 = vld [vmem:[%s30439_s4 + $0xa68] ss:$16 sps:$4 sm:$0xff]  }
 0xa25   : > { %v29022_v61 = vpop.f32.mrb[64].mxu1  ;;  %13822 = vmatprep.subr.bf16.mxu0 %v22987_v60  ;;  %v23026_v60 = vld [vmem:[%s30439_s4 + $0x1484] ss:$16 sps:$4 sm:$0xff]  }
 0xa26   : > { %v12280_v63 = vpop.f32.mrb[60].mxu0  ;;  %v29027_v38 = vpop.f32.mrb[65].mxu1 }
 0xa27   : > { %v12281_v31 = vadd.f32 %v12280_v63, %v28572_v23  ;;  %v12282_v6 = vpop.f32.mrb[61].mxu0  ;;  %v13809_v5 = vpop.f32.mrb[66].mxu1  ;;  %16116 = vmatpush1.bf16.msra.mxu1 %v22982_v47  ;;  %v22996_v23 = vld [vmem:[%s30439_s4 + $0x13e4] ss:$16 sps:$4 sm:$0xff]   ;;  %v23029_v47 = vld [vmem:[%s30439_s4 + $0xa8c] ss:$16 sps:$4 sm:$0xff]  }
 0xa28   : > { %v12283_v7 = vadd.f32 %v12282_v6, %v28578_v45  ;;  %v12284_v56 = vpop.f32.mrb[62].mxu0  ;;  %v13810_v11 = vpop.f32.mrb[67].mxu1  ;;  %13823 = vmatpush1.bf16.msra.mxu0 %v22985_v1  ;;  %16117 = vmatprep.subr.bf16.mxu1 %v22990_v2  ;;  %v23024_v1 = vld [vmem:[%s30439_s4 + $0x1480] ss:$16 sps:$4 sm:$0xff]   ;;  %v23027_v2 = vld [vmem:[%s30439_s4 + $0xa88] ss:$16 sps:$4 sm:$0xff]  }
 0xa29   : > { %v12285_v43 = vpop.f32.mrb[63].mxu0  ;;  %13824 = vmatprep.subr.bf16.mxu0 %v22993_v4  ;;  %v29044_v45 = vadd.f32 %v28672_v34, %v12281_v31  ;;  %v23005_v34 = vld [vmem:[%s30439_s4 + $0xa0c] ss:$16 sps:$4 sm:$0xff]   ;;  %v23032_v4 = vld [vmem:[%s30439_s4 + $0x14a4] ss:$16 sps:$4 sm:$0xff]  }
 0xa2a   : > { %v29047_v36 = vadd.f32 %v28677_v21, %v12283_v7  ;;  %v23000_v21 = vld [vmem:[%s30439_s4 + $0x1400] ss:$16 sps:$4 sm:$0xff]   ;;  %v23035_v63 = vld [vmem:[%s30439_s4 + $0xaac] ss:$16 sps:$4 sm:$0xff]   ;;  %v23033_v6 = vld [vmem:[%s30439_s4 + $0xaa8] ss:$16 sps:$4 sm:$0xff]  }
 0xa2b   : > { %16118 = vmatpush1.bf16.msra.mxu1 %v22988_v54  ;;  %v23030_v31 = vld [vmem:[%s30439_s4 + $0x14a0] ss:$16 sps:$4 sm:$0xff]   ;;  %v23038_v5 = vld [vmem:[%s30439_s4 + $0x14c4] ss:$16 sps:$4 sm:$0xff]   ;;  %v23041_v7 = vld [vmem:[%s30439_s4 + $0xacc] ss:$16 sps:$4 sm:$0xff]  }
 0xa2c   : > { %13825 = vmatpush1.bf16.msra.mxu0 %v22991_v26  ;;  %16119 = vmatprep.subr.bf16.mxu1 %v22996_v23  ;;  %v23036_v26 = vld [vmem:[%s30439_s4 + $0x14c0] ss:$16 sps:$4 sm:$0xff]   ;;  %v23039_v43 = vld [vmem:[%s30439_s4 + $0xac8] ss:$16 sps:$4 sm:$0xff]  }
 0xa2d   : > { %13826 = vmatprep.subr.bf16.mxu0 %v22999_v32  ;;  %v23044_v32 = vld [vmem:[%s30439_s4 + $0x14e4] ss:$16 sps:$4 sm:$0xff]  }
 0xa2f   : > { %16120 = vmatpush1.bf16.msra.mxu1 %v22994_v13  ;;  %v23047_v13 = vld [vmem:[%s30439_s4 + $0xaec] ss:$16 sps:$4 sm:$0xff]  }
 0xa30   : > { %13827 = vmatpush1.bf16.msra.mxu0 %v22997_v20  ;;  %16130 = vmatprep.subr.bf16.mxu1 %v23002_v12  ;;  %v23042_v20 = vld [vmem:[%s30439_s4 + $0x14e0] ss:$16 sps:$4 sm:$0xff]   ;;  %v23045_v12 = vld [vmem:[%s30439_s4 + $0xae8] ss:$16 sps:$4 sm:$0xff]  }
 0xa31   : > { %13828 = vmatprep.subr.bf16.mxu0 %v23005_v34  ;;  %v23050_v34 = vld [vmem:[%s30439_s4 + $0x120c] ss:$16 sps:$4 sm:$0xff]  }
 0xa32   : > { %16122 = vmatmul.mubr.bf16.vlgmr.msra.gmra.mrb[80].mxu1 %v29066_v9 }
 0xa33   : > { %16131 = vmatpush1.bf16.msra.mxu1 %v23000_v21  ;;  %16162 = vmatprep.mubr.bf16.mxu1 %v23619_v8  ;;  %v23053_v21 = vld [vmem:[%s30439_s4 + $0xc04] ss:$16 sps:$4 sm:$0xff]  }
 0xa34   : > { %13829 = vmatpush1.bf16.msra.mxu0 %v23003_v46  ;;  %16132 = vmatprep.subr.bf16.mxu1 %v23008_v51  ;;  %v23048_v46 = vld [vmem:[%s30439_s4 + $0x1208] ss:$16 sps:$4 sm:$0xff]   ;;  %v14020_v51 = vcombine.high %v28466_v16, %v28466_v16  ;;  %v23059_v16 = vld [vmem:[%s30439_s4 + $0xc24] ss:$16 sps:$4 sm:$0xff]  }
 0xa35   : > { %13830 = vmatprep.subr.bf16.mxu0 %v23011_v58  ;;  %v29174_v58 = vcombine.high %v29066_v9, %v29066_v9 }
 0xa37   : > { %16133 = vmatpush1.bf16.msra.mxu1 %v23006_v52  ;;  %v23051_v52 = vld [vmem:[%s30439_s4 + $0xc00] ss:$16 sps:$4 sm:$0xff]  }
 0xa38   : > { %13831 = vmatpush1.bf16.msra.mxu0 %v23009_v29  ;;  %16134 = vmatprep.subr.bf16.mxu1 %v23014_v57  ;;  %v23056_v29 = vld [vmem:[%s30439_s4 + $0x122c] ss:$16 sps:$4 sm:$0xff]   ;;  %v29188_v57 = vrot.slane %v14020_v51, %v27429_v42  ;;  %v23087_v51 = vld [vmem:[%s30439_s4 + $0xcc0] ss:$16 sps:$4 sm:$0xff]  }
 0xa39   : > { %13832 = vmatprep.subr.bf16.mxu0 %v23017_v30  ;;  %v23054_v30 = vld [vmem:[%s30439_s4 + $0x1228] ss:$16 sps:$4 sm:$0xff]  }
 0xa3b   : > { %16135 = vmatpush1.bf16.msra.mxu1 %v23012_v0  ;;  %v23057_v0 = vld [vmem:[%s30439_s4 + $0xc20] ss:$16 sps:$4 sm:$0xff]  }
 0xa3c   : > { %13833 = vmatpush1.bf16.msra.mxu0 %v23015_v17  ;;  %16136 = vmatprep.subr.bf16.mxu1 %v23020_v53  ;;  %v23062_v17 = vld [vmem:[%s30439_s4 + $0x124c] ss:$16 sps:$4 sm:$0xff]   ;;  %v23063_v53 = vld [vmem:[%s30439_s4 + $0xc40] ss:$16 sps:$4 sm:$0xff]  }
 0xa3d   : > { %13834 = vmatprep.subr.bf16.mxu0 %v23023_v44  ;;  %v23068_v44 = vld [vmem:[%s30439_s4 + $0x126c] ss:$16 sps:$4 sm:$0xff]  }
 0xa3f   : > { %16137 = vmatpush1.bf16.msra.mxu1 %v23018_v50  ;;  %v23071_v50 = vld [vmem:[%s30439_s4 + $0xc64] ss:$16 sps:$4 sm:$0xff]  }
 0xa40   : > { %13835 = vmatpush1.bf16.msra.mxu0 %v23021_v10  ;;  %16138 = vmatprep.subr.bf16.mxu1 %v23026_v60  ;;  %v23066_v10 = vld [vmem:[%s30439_s4 + $0x1268] ss:$16 sps:$4 sm:$0xff]   ;;  %v23069_v60 = vld [vmem:[%s30439_s4 + $0xc60] ss:$16 sps:$4 sm:$0xff]  }
 0xa41   : > { %13836 = vmatprep.subr.bf16.mxu0 %v23029_v47  ;;  %v23074_v47 = vld [vmem:[%s30439_s4 + $0x128c] ss:$16 sps:$4 sm:$0xff]  }
 0xa43   : > { %16139 = vmatpush1.bf16.msra.mxu1 %v23024_v1  ;;  %v23077_v1 = vld [vmem:[%s30439_s4 + $0xc84] ss:$16 sps:$4 sm:$0xff]  }
 0xa44   : > { %13837 = vmatpush1.bf16.msra.mxu0 %v23027_v2  ;;  %16140 = vmatprep.subr.bf16.mxu1 %v23032_v4  ;;  %v23072_v2 = vld [vmem:[%s30439_s4 + $0x1288] ss:$16 sps:$4 sm:$0xff]   ;;  %v23075_v4 = vld [vmem:[%s30439_s4 + $0xc80] ss:$16 sps:$4 sm:$0xff]  }
 0xa45   : > { %v29136_v54 = vpop.f32.mrb[68].mxu1  ;;  %13838 = vmatprep.subr.bf16.mxu0 %v23035_v63  ;;  %v23080_v63 = vld [vmem:[%s30439_s4 + $0x12ac] ss:$16 sps:$4 sm:$0xff]  }
 0xa46   : > { %v29141_v56 = vpop.f32.mrb[69].mxu1 }
 0xa47   : > { %v13891_v11 = vpop.f32.mrb[70].mxu1  ;;  %16141 = vmatpush1.bf16.msra.mxu1 %v23030_v31  ;;  %v23083_v31 = vld [vmem:[%s30439_s4 + $0xca4] ss:$16 sps:$4 sm:$0xff]  }
 0xa48   : > { %13839 = vmatpush1.bf16.msra.mxu0 %v23033_v6  ;;  %v13892_v23 = vpop.f32.mrb[71].mxu1  ;;  %16142 = vmatprep.subr.bf16.mxu1 %v23038_v5  ;;  %v23078_v6 = vld [vmem:[%s30439_s4 + $0x12a8] ss:$16 sps:$4 sm:$0xff]   ;;  %v23081_v5 = vld [vmem:[%s30439_s4 + $0xca0] ss:$16 sps:$4 sm:$0xff]  }
 0xa49   : > { %13840 = vmatprep.subr.bf16.mxu0 %v23041_v7  ;;  %v23086_v7 = vld [vmem:[%s30439_s4 + $0x12cc] ss:$16 sps:$4 sm:$0xff]  }
 0xa4b   : > { %16143 = vmatpush1.bf16.msra.mxu1 %v23036_v26  ;;  %v23089_v26 = vld [vmem:[%s30439_s4 + $0xcc4] ss:$16 sps:$4 sm:$0xff]  }
 0xa4c   : > { %13841 = vmatpush1.bf16.msra.mxu0 %v23039_v43  ;;  %16144 = vmatprep.subr.bf16.mxu1 %v23044_v32 }
 0xa4d   : > { %13842 = vmatprep.subr.bf16.mxu0 %v23047_v13 }
 0xa4f   : > { %16145 = vmatpush1.bf16.msra.mxu1 %v23042_v20 }
 0xa50   : > { %13843 = vmatpush1.bf16.msra.mxu0 %v23045_v12  ;;  %16171 = vmatprep.subr.bf16.mxu1 %v23050_v34  ;;  %v23084_v12 = vld [vmem:[%s30439_s4 + $0x12c8] ss:$16 sps:$4 sm:$0xff]  }
 0xa51   : > { %14519 = vmatprep.subr.bf16.mxu0 %v23053_v21 }
 0xa52   : > { %16163 = vmatmul.mubr.bf16.vlgmr.msra.gmra.mrb[80].mxu1 %v29174_v58 }
 0xa53   : > { %13845 = vmatmul.mubr.bf16.vlgmr.msra.gmra.mrb[76].mxu0 %v28249_v19  ;;  %16172 = vmatpush1.bf16.msra.mxu1 %v23048_v46  ;;  %v23065_v19 = vld [vmem:[%s30439_s4 + $0xc44] ss:$16 sps:$4 sm:$0xff]  }
 0xa54   : > { %16203 = vmatprep.mubr.bf16.mxu1 %v28856_v22  ;;  %14520 = vmatpush1.bf16.msra.mxu0 %v23051_v52  ;;  %v23060_v22 = vld [vmem:[%s30439_s4 + $0x1248] ss:$16 sps:$4 sm:$0xff]  }
 0xa55   : > { %14551 = vmatprep.mubr.bf16.mxu0 %v29188_v57  ;;  %16173 = vmatprep.subr.bf16.mxu1 %v23056_v29  ;;  %v23095_v29 = vld [vmem:[%s30439_s4 + $0xce4] ss:$16 sps:$4 sm:$0xff]  }
 0xa56   : > { %14521 = vmatprep.subr.bf16.mxu0 %v23059_v16 }
 0xa57   : > { %16174 = vmatpush1.bf16.msra.mxu1 %v23054_v30  ;;  %v23090_v30 = vld [vmem:[%s30439_s4 + $0x12e8] ss:$16 sps:$4 sm:$0xff]  }
 0xa58   : > { %14522 = vmatpush1.bf16.msra.mxu0 %v23057_v0  ;;  %16175 = vmatprep.subr.bf16.mxu1 %v23062_v17  ;;  %v23093_v0 = vld [vmem:[%s30439_s4 + $0xce0] ss:$16 sps:$4 sm:$0xff]   ;;  %v23098_v17 = vld [vmem:[%s30439_s4 + $0x130c] ss:$16 sps:$4 sm:$0xff]  }
 0xa59   : > { %14523 = vmatprep.subr.bf16.mxu0 %v23065_v19  ;;  %v23099_v19 = vld [vmem:[%s30439_s4 + $0xd00] ss:$16 sps:$4 sm:$0xff]  }
 0xa5b   : > { %16176 = vmatpush1.bf16.msra.mxu1 %v23060_v22  ;;  %v23104_v22 = vld [vmem:[%s30439_s4 + $0x132c] ss:$16 sps:$4 sm:$0xff]  }
 0xa5c   : > { %14524 = vmatpush1.bf16.msra.mxu0 %v23063_v53  ;;  %16177 = vmatprep.subr.bf16.mxu1 %v23068_v44  ;;  %v23107_v53 = vld [vmem:[%s30439_s4 + $0xd24] ss:$16 sps:$4 sm:$0xff]   ;;  %v23102_v44 = vld [vmem:[%s30439_s4 + $0x1328] ss:$16 sps:$4 sm:$0xff]  }
 0xa5d   : > { %14525 = vmatprep.subr.bf16.mxu0 %v23071_v50  ;;  %v23105_v50 = vld [vmem:[%s30439_s4 + $0xd20] ss:$16 sps:$4 sm:$0xff]  }
 0xa5f   : > { %16178 = vmatpush1.bf16.msra.mxu1 %v23066_v10  ;;  %v23110_v10 = vld [vmem:[%s30439_s4 + $0x134c] ss:$16 sps:$4 sm:$0xff]  }
 0xa60   : > { %14526 = vmatpush1.bf16.msra.mxu0 %v23069_v60  ;;  %16179 = vmatprep.subr.bf16.mxu1 %v23074_v47  ;;  %v23113_v60 = vld [vmem:[%s30439_s4 + $0xd44] ss:$16 sps:$4 sm:$0xff]   ;;  %v23108_v47 = vld [vmem:[%s30439_s4 + $0x1348] ss:$16 sps:$4 sm:$0xff]  }
 0xa61   : > { %14527 = vmatprep.subr.bf16.mxu0 %v23077_v1  ;;  %v23111_v1 = vld [vmem:[%s30439_s4 + $0xd40] ss:$16 sps:$4 sm:$0xff]  }
 0xa63   : > { %16180 = vmatpush1.bf16.msra.mxu1 %v23072_v2  ;;  %v23116_v2 = vld [vmem:[%s30439_s4 + $0x136c] ss:$16 sps:$4 sm:$0xff]  }
 0xa64   : > { %14528 = vmatpush1.bf16.msra.mxu0 %v23075_v4  ;;  %16181 = vmatprep.subr.bf16.mxu1 %v23080_v63  ;;  %v23119_v4 = vld [vmem:[%s30439_s4 + $0xd64] ss:$16 sps:$4 sm:$0xff]   ;;  %v23114_v63 = vld [vmem:[%s30439_s4 + $0x1368] ss:$16 sps:$4 sm:$0xff]  }
 0xa65   : > { %v29249_v11 = vpop.f32.mrb[72].mxu1  ;;  %14529 = vmatprep.subr.bf16.mxu0 %v23083_v31  ;;  %v23117_v31 = vld [vmem:[%s30439_s4 + $0xd60] ss:$16 sps:$4 sm:$0xff]  }
 0xa66   : > { %v12966_v23 = vpop.f32.mrb[64].mxu0  ;;  %v29254_v43 = vpop.f32.mrb[73].mxu1 }
 0xa67   : > { %v21228_v32 = vadd.f32 %v12966_v23, %v28827_v24  ;;  %v12968_v13 = vpop.f32.mrb[65].mxu0  ;;  %v14598_v20 = vpop.f32.mrb[74].mxu1  ;;  %16182 = vmatpush1.bf16.msra.mxu1 %v23078_v6  ;;  %v23092_v24 = vld [vmem:[%s30439_s4 + $0x12ec] ss:$16 sps:$4 sm:$0xff]  }
 0xa68   : > { %v21239_v34 = vadd.f32 %v12968_v13, %v28830_v15  ;;  %v12970_v21 = vpop.f32.mrb[66].mxu0  ;;  %14530 = vmatpush1.bf16.msra.mxu0 %v23081_v5  ;;  %v14599_v46 = vpop.f32.mrb[75].mxu1  ;;  %16183 = vmatprep.subr.bf16.mxu1 %v23086_v7  ;;  %v23122_v6 = vld [vmem:[%s30439_s4 + $0x138c] ss:$16 sps:$4 sm:$0xff]   ;;  %v23125_v5 = vld [vmem:[%s30439_s4 + $0xd84] ss:$16 sps:$4 sm:$0xff]  }
 0xa69   : > { %v12971_v52 = vpop.f32.mrb[67].mxu0  ;;  %14531 = vmatprep.subr.bf16.mxu0 %v23089_v26  ;;  %v29271_v15 = vadd.f32 %v21228_v32, %v28800_v48  ;;  %v23101_v48 = vld [vmem:[%s30439_s4 + $0xd04] ss:$16 sps:$4 sm:$0xff]   ;;  %v23120_v7 = vld [vmem:[%s30439_s4 + $0x1388] ss:$16 sps:$4 sm:$0xff]  }
 0xa6a   : > { %v29274_v16 = vadd.f32 %v21239_v34, %v28807_v41  ;;  %v23096_v41 = vld [vmem:[%s30439_s4 + $0x1308] ss:$16 sps:$4 sm:$0xff]   ;;  %v23123_v26 = vld [vmem:[%s30439_s4 + $0xd80] ss:$16 sps:$4 sm:$0xff]   ;;  %v23128_v23 = vld [vmem:[%s30439_s4 + $0x13ac] ss:$16 sps:$4 sm:$0xff]  }
 0xa6b   : > { %16184 = vmatpush1.bf16.msra.mxu1 %v23084_v12  ;;  %v23131_v32 = vld [vmem:[%s30439_s4 + $0xda4] ss:$16 sps:$4 sm:$0xff]   ;;  %v23126_v13 = vld [vmem:[%s30439_s4 + $0x13a8] ss:$16 sps:$4 sm:$0xff]   ;;  %v23129_v20 = vld [vmem:[%s30439_s4 + $0xda0] ss:$16 sps:$4 sm:$0xff]  }
 0xa6c   : > { %14532 = vmatpush1.bf16.msra.mxu0 %v23087_v51  ;;  %16185 = vmatprep.subr.bf16.mxu1 %v23092_v24  ;;  %v23134_v12 = vld [vmem:[%s30439_s4 + $0x13cc] ss:$16 sps:$4 sm:$0xff]   ;;  %v23137_v21 = vld [vmem:[%s30439_s4 + $0xdc4] ss:$16 sps:$4 sm:$0xff]   ;;  %v23132_v24 = vld [vmem:[%s30439_s4 + $0x13c8] ss:$16 sps:$4 sm:$0xff]  }
 0xa6d   : > { %14533 = vmatprep.subr.bf16.mxu0 %v23095_v29  ;;  %v23135_v29 = vld [vmem:[%s30439_s4 + $0xdc0] ss:$16 sps:$4 sm:$0xff]  }
 0xa6f   : > { %16186 = vmatpush1.bf16.msra.mxu1 %v23090_v30  ;;  %v23140_v30 = vld [vmem:[%s30439_s4 + $0x13ec] ss:$16 sps:$4 sm:$0xff]  }
 0xa70   : > { %14534 = vmatpush1.bf16.msra.mxu0 %v23093_v0  ;;  %16187 = vmatprep.subr.bf16.mxu1 %v23098_v17  ;;  %v23143_v0 = vld [vmem:[%s30439_s4 + $0xde4] ss:$16 sps:$4 sm:$0xff]   ;;  %v23138_v17 = vld [vmem:[%s30439_s4 + $0x13e8] ss:$16 sps:$4 sm:$0xff]  }
 0xa71   : > { %14535 = vmatprep.subr.bf16.mxu0 %v23101_v48  ;;  %v23141_v48 = vld [vmem:[%s30439_s4 + $0xde0] ss:$16 sps:$4 sm:$0xff]  }
 0xa73   : > { %16188 = vmatpush1.bf16.msra.mxu1 %v23096_v41  ;;  %v23146_v41 = vld [vmem:[%s30439_s4 + $0x140c] ss:$16 sps:$4 sm:$0xff]  }
 0xa74   : > { %14536 = vmatpush1.bf16.msra.mxu0 %v23099_v19  ;;  %16189 = vmatprep.subr.bf16.mxu1 %v23104_v22  ;;  %v23149_v19 = vld [vmem:[%s30439_s4 + $0xc0c] ss:$16 sps:$4 sm:$0xff]   ;;  %v23144_v22 = vld [vmem:[%s30439_s4 + $0x1408] ss:$16 sps:$4 sm:$0xff]  }
 0xa75   : > { %14537 = vmatprep.subr.bf16.mxu0 %v23107_v53  ;;  %v23147_v53 = vld [vmem:[%s30439_s4 + $0xc08] ss:$16 sps:$4 sm:$0xff]  }
 0xa77   : > { %16190 = vmatpush1.bf16.msra.mxu1 %v23102_v44  ;;  %v23152_v44 = vld [vmem:[%s30439_s4 + $0x142c] ss:$16 sps:$4 sm:$0xff]  }
 0xa78   : > { %14538 = vmatpush1.bf16.msra.mxu0 %v23105_v50  ;;  %16191 = vmatprep.subr.bf16.mxu1 %v23110_v10  ;;  %v23155_v50 = vld [vmem:[%s30439_s4 + $0xc2c] ss:$16 sps:$4 sm:$0xff]   ;;  %v23150_v10 = vld [vmem:[%s30439_s4 + $0x1428] ss:$16 sps:$4 sm:$0xff]  }
 0xa79   : > { %14539 = vmatprep.subr.bf16.mxu0 %v23113_v60  ;;  %v23153_v60 = vld [vmem:[%s30439_s4 + $0xc28] ss:$16 sps:$4 sm:$0xff]  }
 0xa7b   : > { %16192 = vmatpush1.bf16.msra.mxu1 %v23108_v47  ;;  %v23158_v47 = vld [vmem:[%s30439_s4 + $0x144c] ss:$16 sps:$4 sm:$0xff]  }
 0xa7c   : > { %14540 = vmatpush1.bf16.msra.mxu0 %v23111_v1  ;;  %16193 = vmatprep.subr.bf16.mxu1 %v23116_v2  ;;  %v23159_v1 = vld [vmem:[%s30439_s4 + $0xc48] ss:$16 sps:$4 sm:$0xff]   ;;  %v23164_v2 = vld [vmem:[%s30439_s4 + $0x146c] ss:$16 sps:$4 sm:$0xff]  }
 0xa7d   : > { %14541 = vmatprep.subr.bf16.mxu0 %v23119_v4  ;;  %v23167_v4 = vld [vmem:[%s30439_s4 + $0xc6c] ss:$16 sps:$4 sm:$0xff]  }
 0xa7f   : > { %16194 = vmatpush1.bf16.msra.mxu1 %v23114_v63  ;;  %v29432_v63 = vrot.slane %v16257_v49, %v27429_v42 }
 0xa80   : > { %14542 = vmatpush1.bf16.msra.mxu0 %v23117_v31  ;;  %16195 = vmatprep.subr.bf16.mxu1 %v23122_v6  ;;  %v23162_v31 = vld [vmem:[%s30439_s4 + $0x1468] ss:$16 sps:$4 sm:$0xff]  }
 0xa81   : > { %14543 = vmatprep.subr.bf16.mxu0 %v23125_v5  ;;  %v23165_v6 = vld [vmem:[%s30439_s4 + $0xc68] ss:$16 sps:$4 sm:$0xff]   ;;  %v23170_v5 = vld [vmem:[%s30439_s4 + $0x148c] ss:$16 sps:$4 sm:$0xff]   ;;  %v16271_v49 = vshll.u32 %v29432_v63, 16 }
 0xa83   : > { %16196 = vmatpush1.bf16.msra.mxu1 %v23120_v7  ;;  %v23168_v7 = vld [vmem:[%s30439_s4 + $0x1488] ss:$16 sps:$4 sm:$0xff]  }
 0xa84   : > { %14544 = vmatpush1.bf16.msra.mxu0 %v23123_v26  ;;  %16197 = vmatprep.subr.bf16.mxu1 %v23128_v23  ;;  %v23171_v26 = vld [vmem:[%s30439_s4 + $0xc88] ss:$16 sps:$4 sm:$0xff]   ;;  %v23176_v23 = vld [vmem:[%s30439_s4 + $0x14ac] ss:$16 sps:$4 sm:$0xff]  }
 0xa85   : > { %v29357_v34 = vpop.f32.mrb[76].mxu1  ;;  %14545 = vmatprep.subr.bf16.mxu0 %v23131_v32  ;;  %v16273_v32 = vsel %vm27575_vm15, %v16266_v14, %v16271_v49  ;;  %v23213_v14 = vld [vmem:[%s30439_s4 + $0xd68] ss:$16 sps:$4 sm:$0xff]   ;;  %v23218_v49 = vld [vmem:[%s30439_s4 + $0x1584] ss:$16 sps:$4 sm:$0xff]  }
 0xa86   : > { %v29362_v46 = vpop.f32.mrb[77].mxu1 }
 0xa87   : > { %v14680_v51 = vpop.f32.mrb[78].mxu1  ;;  %16198 = vmatpush1.bf16.msra.mxu1 %v23126_v13  ;;  %v23174_v13 = vld [vmem:[%s30439_s4 + $0x14a8] ss:$16 sps:$4 sm:$0xff]  }
 0xa88   : > { %14546 = vmatpush1.bf16.msra.mxu0 %v23129_v20  ;;  %v14681_v52 = vpop.f32.mrb[79].mxu1  ;;  %16199 = vmatprep.subr.bf16.mxu1 %v23134_v12  ;;  %v23177_v20 = vld [vmem:[%s30439_s4 + $0xca8] ss:$16 sps:$4 sm:$0xff]   ;;  %v23182_v12 = vld [vmem:[%s30439_s4 + $0x14cc] ss:$16 sps:$4 sm:$0xff]  }
 0xa89   : > { %14547 = vmatprep.subr.bf16.mxu0 %v23137_v21  ;;  %v16371_v21 = vcombine.low %v28433_v18, %v16273_v32  ;;  %v23188_v18 = vld [vmem:[%s30439_s4 + $0x14ec] ss:$16 sps:$4 sm:$0xff]  }
 0xa8a   : > { %v23227_v32 = vld [vmem:[%s30439_s4 + $0xdac] ss:$16 sps:$4 sm:$0xff]  }
 0xa8b   : > { %16200 = vmatpush1.bf16.msra.mxu1 %v23132_v24 }
 0xa8c   : > { %14548 = vmatpush1.bf16.msra.mxu0 %v23135_v29  ;;  %16201 = vmatprep.subr.bf16.mxu1 %v23140_v30  ;;  %v23180_v29 = vld [vmem:[%s30439_s4 + $0x14c8] ss:$16 sps:$4 sm:$0xff]  }
 0xa8d   : > { %14549 = vmatprep.subr.bf16.mxu0 %v23143_v0 }
 0xa8f   : > { %16202 = vmatpush1.bf16.msra.mxu1 %v23138_v17  ;;  %v23183_v17 = vld [vmem:[%s30439_s4 + $0xcc8] ss:$16 sps:$4 sm:$0xff]  }
 0xa90   : > { %14550 = vmatpush1.bf16.msra.mxu0 %v23141_v48  ;;  %16212 = vmatprep.subr.bf16.mxu1 %v23146_v41  ;;  %v23191_v48 = vld [vmem:[%s30439_s4 + $0xcec] ss:$16 sps:$4 sm:$0xff]   ;;  %v29490_v41 = vrot.slane %v16371_v21, %v27429_v42  ;;  %v23228_v21 = vld [vmem:[%s30439_s4 + $0x15c0] ss:$16 sps:$4 sm:$0xff]  }
 0xa91   : > { %14601 = vmatprep.subr.bf16.mxu0 %v23149_v19 }
 0xa92   : > { %16204 = vmatmul.mubr.bf16.vlgmr.msra.gmra.mrb[84].mxu1 %v29066_v9  ;;  %v23161_v9 = vld [vmem:[%s30439_s4 + $0xc4c] ss:$16 sps:$4 sm:$0xff]  }
 0xa93   : > { %14552 = vmatmul.mubr.bf16.vlgmr.msra.gmra.mrb[80].mxu0 %v28479_v40  ;;  %16213 = vmatpush1.bf16.msra.mxu1 %v23144_v22  ;;  %v23186_v22 = vld [vmem:[%s30439_s4 + $0x14e8] ss:$16 sps:$4 sm:$0xff]  }
 0xa94   : > { %14602 = vmatpush1.bf16.msra.mxu0 %v23147_v53  ;;  %14633 = vmatprep.mubr.bf16.mxu0 %v29188_v57  ;;  %v23156_v57 = vld [vmem:[%s30439_s4 + $0x1448] ss:$16 sps:$4 sm:$0xff]  }
 0xa95   : > { %16214 = vmatprep.subr.bf16.mxu1 %v23152_v44  ;;  %14603 = vmatprep.subr.bf16.mxu0 %v23155_v50  ;;  %v23189_v53 = vld [vmem:[%s30439_s4 + $0xce8] ss:$16 sps:$4 sm:$0xff]   ;;  %v23194_v44 = vld [vmem:[%s30439_s4 + $0x1504] ss:$16 sps:$4 sm:$0xff]   ;;  %v23192_v50 = vld [vmem:[%s30439_s4 + $0x1500] ss:$16 sps:$4 sm:$0xff]  }
 0xa96   : > { %16244 = vmatprep.mubr.bf16.mxu1 %v23619_v8 }
 0xa97   : > { %16215 = vmatpush1.bf16.msra.mxu1 %v23150_v10  ;;  %v23195_v10 = vld [vmem:[%s30439_s4 + $0xd08] ss:$16 sps:$4 sm:$0xff]  }
 0xa98   : > { %14604 = vmatpush1.bf16.msra.mxu0 %v23153_v60  ;;  %16216 = vmatprep.subr.bf16.mxu1 %v23158_v47  ;;  %v23200_v60 = vld [vmem:[%s30439_s4 + $0x1524] ss:$16 sps:$4 sm:$0xff]  }
 0xa99   : > { %14605 = vmatprep.subr.bf16.mxu0 %v23161_v9  ;;  %v23203_v9 = vld [vmem:[%s30439_s4 + $0xd2c] ss:$16 sps:$4 sm:$0xff]  }
 0xa9b   : > { %16217 = vmatpush1.bf16.msra.mxu1 %v23156_v57  ;;  %v23198_v57 = vld [vmem:[%s30439_s4 + $0x1520] ss:$16 sps:$4 sm:$0xff]  }
 0xa9c   : > { %14606 = vmatpush1.bf16.msra.mxu0 %v23159_v1  ;;  %16218 = vmatprep.subr.bf16.mxu1 %v23164_v2  ;;  %v23201_v1 = vld [vmem:[%s30439_s4 + $0xd28] ss:$16 sps:$4 sm:$0xff]   ;;  %v23206_v2 = vld [vmem:[%s30439_s4 + $0x1544] ss:$16 sps:$4 sm:$0xff]  }
 0xa9d   : > { %14607 = vmatprep.subr.bf16.mxu0 %v23167_v4  ;;  %v23204_v4 = vld [vmem:[%s30439_s4 + $0x1540] ss:$16 sps:$4 sm:$0xff]  }
 0xa9f   : > { %16219 = vmatpush1.bf16.msra.mxu1 %v23162_v31  ;;  %v23207_v31 = vld [vmem:[%s30439_s4 + $0xd48] ss:$16 sps:$4 sm:$0xff]  }
 0xaa0   : > { %14608 = vmatpush1.bf16.msra.mxu0 %v23165_v6  ;;  %16220 = vmatprep.subr.bf16.mxu1 %v23170_v5  ;;  %v23212_v6 = vld [vmem:[%s30439_s4 + $0x1564] ss:$16 sps:$4 sm:$0xff]   ;;  %v23215_v5 = vld [vmem:[%s30439_s4 + $0xd6c] ss:$16 sps:$4 sm:$0xff]  }
 0xaa1   : > { %14609 = vmatprep.subr.bf16.mxu0 %v23173_v62  ;;  %v23210_v62 = vld [vmem:[%s30439_s4 + $0x1560] ss:$16 sps:$4 sm:$0xff]  }
 0xaa3   : > { %16221 = vmatpush1.bf16.msra.mxu1 %v23168_v7  ;;  %v23221_v7 = vld [vmem:[%s30439_s4 + $0xd8c] ss:$16 sps:$4 sm:$0xff]  }
 0xaa4   : > { %14610 = vmatpush1.bf16.msra.mxu0 %v23171_v26  ;;  %16222 = vmatprep.subr.bf16.mxu1 %v23176_v23  ;;  %v23216_v26 = vld [vmem:[%s30439_s4 + $0x1580] ss:$16 sps:$4 sm:$0xff]   ;;  %v23219_v23 = vld [vmem:[%s30439_s4 + $0xd88] ss:$16 sps:$4 sm:$0xff]  }
 0xaa5   : > { %14611 = vmatprep.subr.bf16.mxu0 %v23179_v39  ;;  %v23224_v39 = vld [vmem:[%s30439_s4 + $0x15a4] ss:$16 sps:$4 sm:$0xff]  }
 0xaa6   : > { %v13048_v51 = vpop.f32.mrb[68].mxu0 }
 0xaa7   : > { %v21250_v24 = vadd.f32 %v13048_v51, %v29044_v45  ;;  %v13050_v52 = vpop.f32.mrb[69].mxu0  ;;  %16223 = vmatpush1.bf16.msra.mxu1 %v23174_v13  ;;  %v23222_v13 = vld [vmem:[%s30439_s4 + $0x15a0] ss:$16 sps:$4 sm:$0xff]   ;;  %v23231_v51 = vld [vmem:[%s30439_s4 + $0xdc8] ss:$16 sps:$4 sm:$0xff]  }
 0xaa8   : > { %v21261_v30 = vadd.f32 %v13050_v52, %v29047_v36  ;;  %v13052_v0 = vpop.f32.mrb[70].mxu0  ;;  %14612 = vmatpush1.bf16.msra.mxu0 %v23177_v20  ;;  %16224 = vmatprep.subr.bf16.mxu1 %v23182_v12  ;;  %v23225_v20 = vld [vmem:[%s30439_s4 + $0xda8] ss:$16 sps:$4 sm:$0xff]   ;;  %v23230_v12 = vld [vmem:[%s30439_s4 + $0x15c4] ss:$16 sps:$4 sm:$0xff]  }
 0xaa9   : > { %v13053_v45 = vpop.f32.mrb[71].mxu0  ;;  %14613 = vmatprep.subr.bf16.mxu0 %v23185_v55  ;;  %v29493_v36 = vadd.f32 %v21250_v24, %v28920_v3  ;;  %v23197_v3 = vld [vmem:[%s30439_s4 + $0xd0c] ss:$16 sps:$4 sm:$0xff]   ;;  %v23236_v24 = vld [vmem:[%s30439_s4 + $0x15e4] ss:$16 sps:$4 sm:$0xff]  }
 0xaaa   : > { %v29496_v19 = vadd.f32 %v21261_v30, %v28925_v59  ;;  %v16379_v59 = vcombine.high %v29490_v41, %v29490_v41  ;;  %v23233_v55 = vld [vmem:[%s30439_s4 + $0xdcc] ss:$16 sps:$4 sm:$0xff]   ;;  %v23237_v30 = vld [vmem:[%s30439_s4 + $0xde8] ss:$16 sps:$4 sm:$0xff]   ;;  %v23242_v0 = vld [vmem:[%s30439_s4 + $0x1604] ss:$16 sps:$4 sm:$0xff]  }
 0xaab   : > { %16225 = vmatpush1.bf16.msra.mxu1 %v23180_v29  ;;  %v23239_v52 = vld [vmem:[%s30439_s4 + $0xdec] ss:$16 sps:$4 sm:$0xff]   ;;  %v23234_v29 = vld [vmem:[%s30439_s4 + $0x15e0] ss:$16 sps:$4 sm:$0xff]  }
 0xaac   : > { %14614 = vmatpush1.bf16.msra.mxu0 %v23183_v17  ;;  %16226 = vmatprep.subr.bf16.mxu1 %v23188_v18  ;;  %v29522_v47 = vrot.slane %v16379_v59, %v27429_v42  ;;  %v23245_v17 = vld [vmem:[%s30439_s4 + $0xf04] ss:$16 sps:$4 sm:$0xff]   ;;  %v14792_v18 = vcombine.high %v28692_v37, %v28692_v37  ;;  %v23240_v45 = vld [vmem:[%s30439_s4 + $0x1600] ss:$16 sps:$4 sm:$0xff]  }
 0xaad   : > { %14615 = vmatprep.subr.bf16.mxu0 %v23191_v48  ;;  %v23243_v48 = vld [vmem:[%s30439_s4 + $0xf00] ss:$16 sps:$4 sm:$0xff]   ;;  %v23251_v37 = vld [vmem:[%s30439_s4 + $0xf24] ss:$16 sps:$4 sm:$0xff]  }
 0xaae   : > { %v23254_v59 = vld [vmem:[%s30439_s4 + $0x1644] ss:$16 sps:$4 sm:$0xff]  }
 0xaaf   : > { %16227 = vmatpush1.bf16.msra.mxu1 %v23186_v22  ;;  %v23248_v22 = vld [vmem:[%s30439_s4 + $0x1624] ss:$16 sps:$4 sm:$0xff]  }
 0xab0   : > { %14616 = vmatpush1.bf16.msra.mxu0 %v23189_v53  ;;  %16878 = vmatprep.subr.bf16.mxu1 %v23194_v44  ;;  %v29628_v53 = vrot.slane %v14792_v18, %v27429_v42  ;;  %v23246_v44 = vld [vmem:[%s30439_s4 + $0x1620] ss:$16 sps:$4 sm:$0xff]   ;;  %v23299_v18 = vld [vmem:[%s30439_s4 + $0x1024] ss:$16 sps:$4 sm:$0xff]  }
 0xab1   : > { %14617 = vmatprep.subr.bf16.mxu0 %v23197_v3  ;;  %v23249_v3 = vld [vmem:[%s30439_s4 + $0xf20] ss:$16 sps:$4 sm:$0xff]  }
 0xab2   : > { %16245 = vmatmul.mubr.bf16.vlgmr.msra.gmra.mrb[84].mxu1 %v29174_v58  ;;  %v23209_v58 = vld [vmem:[%s30439_s4 + $0xd4c] ss:$16 sps:$4 sm:$0xff]  }
 0xab3   : > { %16879 = vmatpush1.bf16.msra.mxu1 %v23192_v50  ;;  %16910 = vmatprep.mubr.bf16.mxu1 %v29522_v47  ;;  %v23252_v50 = vld [vmem:[%s30439_s4 + $0x1640] ss:$16 sps:$4 sm:$0xff]  }
 0xab4   : > { %14618 = vmatpush1.bf16.msra.mxu0 %v23195_v10  ;;  %16880 = vmatprep.subr.bf16.mxu1 %v23200_v60  ;;  %v23255_v10 = vld [vmem:[%s30439_s4 + $0xf40] ss:$16 sps:$4 sm:$0xff]   ;;  %v23260_v60 = vld [vmem:[%s30439_s4 + $0x1664] ss:$16 sps:$4 sm:$0xff]  }
 0xab5   : > { %14619 = vmatprep.subr.bf16.mxu0 %v23203_v9  ;;  %v23263_v9 = vld [vmem:[%s30439_s4 + $0xf64] ss:$16 sps:$4 sm:$0xff]  }
 0xab7   : > { %16881 = vmatpush1.bf16.msra.mxu1 %v23198_v57  ;;  %v23258_v57 = vld [vmem:[%s30439_s4 + $0x1660] ss:$16 sps:$4 sm:$0xff]  }
 0xab8   : > { %14620 = vmatpush1.bf16.msra.mxu0 %v23201_v1  ;;  %16882 = vmatprep.subr.bf16.mxu1 %v23206_v2  ;;  %v23261_v1 = vld [vmem:[%s30439_s4 + $0xf60] ss:$16 sps:$4 sm:$0xff]   ;;  %v23266_v2 = vld [vmem:[%s30439_s4 + $0x1684] ss:$16 sps:$4 sm:$0xff]  }
 0xab9   : > { %14621 = vmatprep.subr.bf16.mxu0 %v23209_v58  ;;  %v23269_v58 = vld [vmem:[%s30439_s4 + $0xf84] ss:$16 sps:$4 sm:$0xff]  }
 0xabb   : > { %16883 = vmatpush1.bf16.msra.mxu1 %v23204_v4  ;;  %v23264_v4 = vld [vmem:[%s30439_s4 + $0x1680] ss:$16 sps:$4 sm:$0xff]  }
 0xabc   : > { %14622 = vmatpush1.bf16.msra.mxu0 %v23207_v31  ;;  %16884 = vmatprep.subr.bf16.mxu1 %v23212_v6  ;;  %v23267_v31 = vld [vmem:[%s30439_s4 + $0xf80] ss:$16 sps:$4 sm:$0xff]   ;;  %v23272_v6 = vld [vmem:[%s30439_s4 + $0x16a4] ss:$16 sps:$4 sm:$0xff]  }
 0xabd   : > { %14623 = vmatprep.subr.bf16.mxu0 %v23215_v5  ;;  %v23275_v5 = vld [vmem:[%s30439_s4 + $0xfa4] ss:$16 sps:$4 sm:$0xff]  }
 0xabf   : > { %16885 = vmatpush1.bf16.msra.mxu1 %v23210_v62  ;;  %v23270_v62 = vld [vmem:[%s30439_s4 + $0x16a0] ss:$16 sps:$4 sm:$0xff]  }
 0xac0   : > { %14624 = vmatpush1.bf16.msra.mxu0 %v23213_v14  ;;  %16886 = vmatprep.subr.bf16.mxu1 %v23218_v49  ;;  %v23273_v14 = vld [vmem:[%s30439_s4 + $0xfa0] ss:$16 sps:$4 sm:$0xff]   ;;  %v23278_v49 = vld [vmem:[%s30439_s4 + $0x16c4] ss:$16 sps:$4 sm:$0xff]  }
 0xac1   : > { %14625 = vmatprep.subr.bf16.mxu0 %v23221_v7  ;;  %v23281_v7 = vld [vmem:[%s30439_s4 + $0xfc4] ss:$16 sps:$4 sm:$0xff]  }
 0xac3   : > { %16887 = vmatpush1.bf16.msra.mxu1 %v23216_v26 }
 0xac4   : > { %14626 = vmatpush1.bf16.msra.mxu0 %v23219_v23  ;;  %16888 = vmatprep.subr.bf16.mxu1 %v23224_v39 }
 0xac5   : > { %14627 = vmatprep.subr.bf16.mxu0 %v23227_v32  ;;  %v23276_v32 = vld [vmem:[%s30439_s4 + $0x16c0] ss:$16 sps:$4 sm:$0xff]  }
 0xac7   : > { %16889 = vmatpush1.bf16.msra.mxu1 %v23222_v13 }
 0xac8   : > { %14628 = vmatpush1.bf16.msra.mxu0 %v23225_v20  ;;  %16890 = vmatprep.subr.bf16.mxu1 %v23230_v12  ;;  %v23279_v12 = vld [vmem:[%s30439_s4 + $0xfc0] ss:$16 sps:$4 sm:$0xff]  }
 0xac9   : > { %14629 = vmatprep.subr.bf16.mxu0 %v23233_v55  ;;  %v23284_v55 = vld [vmem:[%s30439_s4 + $0x16e4] ss:$16 sps:$4 sm:$0xff]  }
 0xacb   : > { %16891 = vmatpush1.bf16.msra.mxu1 %v23228_v21  ;;  %v23287_v21 = vld [vmem:[%s30439_s4 + $0xfe4] ss:$16 sps:$4 sm:$0xff]  }
 0xacc   : > { %14630 = vmatpush1.bf16.msra.mxu0 %v23231_v51  ;;  %16892 = vmatprep.subr.bf16.mxu1 %v23236_v24  ;;  %v23282_v24 = vld [vmem:[%s30439_s4 + $0x16e0] ss:$16 sps:$4 sm:$0xff]  }
 0xacd   : > { %14631 = vmatprep.subr.bf16.mxu0 %v23239_v52  ;;  %v23285_v52 = vld [vmem:[%s30439_s4 + $0xfe0] ss:$16 sps:$4 sm:$0xff]  }
 0xacf   : > { %16893 = vmatpush1.bf16.msra.mxu1 %v23234_v29  ;;  %v23290_v29 = vld [vmem:[%s30439_s4 + $0x1704] ss:$16 sps:$4 sm:$0xff]  }
 0xad0   : > { %14632 = vmatpush1.bf16.msra.mxu0 %v23237_v30  ;;  %16894 = vmatprep.subr.bf16.mxu1 %v23242_v0  ;;  %v29729_v30 = vrot.slane %v29490_v41, %v27429_v42  ;;  %v23291_v0 = vld [vmem:[%s30439_s4 + $0x1000] ss:$16 sps:$4 sm:$0xff]  }
 0xad1   : > { %15291 = vmatprep.subr.bf16.mxu0 %v23245_v17  ;;  %v23296_v17 = vld [vmem:[%s30439_s4 + $0x1724] ss:$16 sps:$4 sm:$0xff]   ;;  %v23294_v41 = vld [vmem:[%s30439_s4 + $0x1720] ss:$16 sps:$4 sm:$0xff]  }
 0xad3   : > { %14634 = vmatmul.mubr.bf16.vlgmr.msra.gmra.mrb[84].mxu0 %v28479_v40  ;;  %16895 = vmatpush1.bf16.msra.mxu1 %v23240_v45  ;;  %v23257_v40 = vld [vmem:[%s30439_s4 + $0xf44] ss:$16 sps:$4 sm:$0xff]   ;;  %v23297_v45 = vld [vmem:[%s30439_s4 + $0x1020] ss:$16 sps:$4 sm:$0xff]  }
 0xad4   : > { %15292 = vmatpush1.bf16.msra.mxu0 %v23243_v48  ;;  %15323 = vmatprep.mubr.bf16.mxu0 %v29628_v53  ;;  %v23302_v48 = vld [vmem:[%s30439_s4 + $0x1744] ss:$16 sps:$4 sm:$0xff]  }
 0xad5   : > { %16896 = vmatprep.subr.bf16.mxu1 %v23248_v22  ;;  %15293 = vmatprep.subr.bf16.mxu0 %v23251_v37  ;;  %v23305_v22 = vld [vmem:[%s30439_s4 + $0x1044] ss:$16 sps:$4 sm:$0xff]   ;;  %v23300_v37 = vld [vmem:[%s30439_s4 + $0x1740] ss:$16 sps:$4 sm:$0xff]  }
 0xad7   : > { %16897 = vmatpush1.bf16.msra.mxu1 %v23246_v44  ;;  %v23303_v44 = vld [vmem:[%s30439_s4 + $0x1040] ss:$16 sps:$4 sm:$0xff]  }
 0xad8   : > { %15294 = vmatpush1.bf16.msra.mxu0 %v23249_v3  ;;  %16898 = vmatprep.subr.bf16.mxu1 %v23254_v59  ;;  %v23308_v3 = vld [vmem:[%s30439_s4 + $0x1764] ss:$16 sps:$4 sm:$0xff]  }
 0xad9   : > { %15295 = vmatprep.subr.bf16.mxu0 %v23257_v40  ;;  %v23311_v59 = vld [vmem:[%s30439_s4 + $0x1064] ss:$16 sps:$4 sm:$0xff]   ;;  %v23306_v40 = vld [vmem:[%s30439_s4 + $0x1760] ss:$16 sps:$4 sm:$0xff]  }
 0xadb   : > { %16899 = vmatpush1.bf16.msra.mxu1 %v23252_v50  ;;  %v23309_v50 = vld [vmem:[%s30439_s4 + $0x1060] ss:$16 sps:$4 sm:$0xff]  }
 0xadc   : > { %15296 = vmatpush1.bf16.msra.mxu0 %v23255_v10  ;;  %16900 = vmatprep.subr.bf16.mxu1 %v23260_v60  ;;  %v23314_v10 = vld [vmem:[%s30439_s4 + $0x1784] ss:$16 sps:$4 sm:$0xff]  }
 0xadd   : > { %15297 = vmatprep.subr.bf16.mxu0 %v23263_v9  ;;  %v23317_v60 = vld [vmem:[%s30439_s4 + $0x1084] ss:$16 sps:$4 sm:$0xff]   ;;  %v23312_v9 = vld [vmem:[%s30439_s4 + $0x1780] ss:$16 sps:$4 sm:$0xff]  }
 0xadf   : > { %16901 = vmatpush1.bf16.msra.mxu1 %v23258_v57  ;;  %v23315_v57 = vld [vmem:[%s30439_s4 + $0x1080] ss:$16 sps:$4 sm:$0xff]  }
 0xae0   : > { %15298 = vmatpush1.bf16.msra.mxu0 %v23261_v1  ;;  %16902 = vmatprep.subr.bf16.mxu1 %v23266_v2  ;;  %v23320_v1 = vld [vmem:[%s30439_s4 + $0x17a4] ss:$16 sps:$4 sm:$0xff]  }
 0xae1   : > { %15299 = vmatprep.subr.bf16.mxu0 %v23269_v58  ;;  %v23323_v2 = vld [vmem:[%s30439_s4 + $0x10a4] ss:$16 sps:$4 sm:$0xff]   ;;  %v23318_v58 = vld [vmem:[%s30439_s4 + $0x17a0] ss:$16 sps:$4 sm:$0xff]  }
 0xae3   : > { %16903 = vmatpush1.bf16.msra.mxu1 %v23264_v4  ;;  %v23321_v4 = vld [vmem:[%s30439_s4 + $0x10a0] ss:$16 sps:$4 sm:$0xff]  }
 0xae4   : > { %15300 = vmatpush1.bf16.msra.mxu0 %v23267_v31  ;;  %16904 = vmatprep.subr.bf16.mxu1 %v23272_v6  ;;  %v23326_v31 = vld [vmem:[%s30439_s4 + $0x17c4] ss:$16 sps:$4 sm:$0xff]  }
 0xae5   : > { %15301 = vmatprep.subr.bf16.mxu0 %v23275_v5  ;;  %v23329_v6 = vld [vmem:[%s30439_s4 + $0x10c4] ss:$16 sps:$4 sm:$0xff]   ;;  %v23324_v5 = vld [vmem:[%s30439_s4 + $0x17c0] ss:$16 sps:$4 sm:$0xff]  }
 0xae6   : > { %v13764_v26 = vpop.f32.mrb[72].mxu0 }
 0xae7   : > { %v21230_v23 = vadd.f32 %v29271_v15, %v13764_v26  ;;  %v13766_v39 = vpop.f32.mrb[73].mxu0  ;;  %16905 = vmatpush1.bf16.msra.mxu1 %v23270_v62  ;;  %v23327_v62 = vld [vmem:[%s30439_s4 + $0x10c0] ss:$16 sps:$4 sm:$0xff]  }
 0xae8   : > { %v21241_v13 = vadd.f32 %v29274_v16, %v13766_v39  ;;  %v13768_v20 = vpop.f32.mrb[74].mxu0  ;;  %15302 = vmatpush1.bf16.msra.mxu0 %v23273_v14  ;;  %16906 = vmatprep.subr.bf16.mxu1 %v23278_v49  ;;  %v23332_v14 = vld [vmem:[%s30439_s4 + $0x17e4] ss:$16 sps:$4 sm:$0xff]   ;;  %v23333_v26 = vld [vmem:[%s30439_s4 + $0x10e0] ss:$16 sps:$4 sm:$0xff]  }
 0xae9   : > { %v13769_v15 = vpop.f32.mrb[75].mxu0  ;;  %15303 = vmatprep.subr.bf16.mxu0 %v23281_v7  ;;  %v29707_v51 = vadd.f32 %v21230_v23, %v29022_v61  ;;  %v23293_v61 = vld [vmem:[%s30439_s4 + $0x1004] ss:$16 sps:$4 sm:$0xff]   ;;  %v23330_v7 = vld [vmem:[%s30439_s4 + $0x17e0] ss:$16 sps:$4 sm:$0xff]  }
 0xaea   : > { %v29710_v16 = vadd.f32 %v21241_v13, %v29027_v38  ;;  %v23288_v38 = vld [vmem:[%s30439_s4 + $0x1700] ss:$16 sps:$4 sm:$0xff]   ;;  %v23335_v49 = vld [vmem:[%s30439_s4 + $0x10e4] ss:$16 sps:$4 sm:$0xff]   ;;  %v23338_v23 = vld [vmem:[%s30439_s4 + $0x150c] ss:$16 sps:$4 sm:$0xff]   ;;  %v29831_v13 = vcombine.high %v29729_v30, %v29729_v30 }
 0xaeb   : > { %16907 = vmatpush1.bf16.msra.mxu1 %v23276_v32  ;;  %v23341_v39 = vld [vmem:[%s30439_s4 + $0xf0c] ss:$16 sps:$4 sm:$0xff]   ;;  %v23336_v32 = vld [vmem:[%s30439_s4 + $0x1508] ss:$16 sps:$4 sm:$0xff]  }
 0xaec   : > { %15304 = vmatpush1.bf16.msra.mxu0 %v23279_v12  ;;  %16908 = vmatprep.subr.bf16.mxu1 %v23284_v55  ;;  %v23339_v20 = vld [vmem:[%s30439_s4 + $0xf08] ss:$16 sps:$4 sm:$0xff]   ;;  %v23344_v12 = vld [vmem:[%s30439_s4 + $0x152c] ss:$16 sps:$4 sm:$0xff]  }
 0xaed   : > { %15305 = vmatprep.subr.bf16.mxu0 %v23287_v21  ;;  %v23347_v55 = vld [vmem:[%s30439_s4 + $0xf2c] ss:$16 sps:$4 sm:$0xff]   ;;  %v23342_v15 = vld [vmem:[%s30439_s4 + $0x1528] ss:$16 sps:$4 sm:$0xff]  }
 0xaee   : > { %v23345_v21 = vld [vmem:[%s30439_s4 + $0xf28] ss:$16 sps:$4 sm:$0xff]  }
 0xaef   : > { %16909 = vmatpush1.bf16.msra.mxu1 %v23282_v24  ;;  %v23350_v24 = vld [vmem:[%s30439_s4 + $0x154c] ss:$16 sps:$4 sm:$0xff]  }
 0xaf0   : > { %15306 = vmatpush1.bf16.msra.mxu0 %v23285_v52  ;;  %16919 = vmatprep.subr.bf16.mxu1 %v23290_v29  ;;  %v23353_v52 = vld [vmem:[%s30439_s4 + $0xf4c] ss:$16 sps:$4 sm:$0xff]   ;;  %v23351_v29 = vld [vmem:[%s30439_s4 + $0xf48] ss:$16 sps:$4 sm:$0xff]  }
 0xaf1   : > { %15307 = vmatprep.subr.bf16.mxu0 %v23293_v61  ;;  %v23359_v61 = vld [vmem:[%s30439_s4 + $0xf6c] ss:$16 sps:$4 sm:$0xff]  }
 0xaf2   : > { %16911 = vmatmul.mubr.bf16.vlgmr.msra.gmra.mrb[80].mxu1 %v29729_v30 }
 0xaf3   : > { %16920 = vmatpush1.bf16.msra.mxu1 %v23288_v38  ;;  %16951 = vmatprep.mubr.bf16.mxu1 %v23619_v8  ;;  %v23354_v38 = vld [vmem:[%s30439_s4 + $0x1568] ss:$16 sps:$4 sm:$0xff]  }
 0xaf4   : > { %15308 = vmatpush1.bf16.msra.mxu0 %v23291_v0  ;;  %16921 = vmatprep.subr.bf16.mxu1 %v23296_v17  ;;  %v23357_v0 = vld [vmem:[%s30439_s4 + $0xf68] ss:$16 sps:$4 sm:$0xff]   ;;  %v23362_v17 = vld [vmem:[%s30439_s4 + $0x158c] ss:$16 sps:$4 sm:$0xff]  }
 0xaf5   : > { %15309 = vmatprep.subr.bf16.mxu0 %v23299_v18  ;;  %v23365_v18 = vld [vmem:[%s30439_s4 + $0xf8c] ss:$16 sps:$4 sm:$0xff]  }
 0xaf7   : > { %16922 = vmatpush1.bf16.msra.mxu1 %v23294_v41  ;;  %v23360_v41 = vld [vmem:[%s30439_s4 + $0x1588] ss:$16 sps:$4 sm:$0xff]  }
 0xaf8   : > { %15310 = vmatpush1.bf16.msra.mxu0 %v23297_v45  ;;  %16923 = vmatprep.subr.bf16.mxu1 %v23302_v48  ;;  %v23363_v45 = vld [vmem:[%s30439_s4 + $0xf88] ss:$16 sps:$4 sm:$0xff]   ;;  %v23368_v48 = vld [vmem:[%s30439_s4 + $0x15ac] ss:$16 sps:$4 sm:$0xff]  }
 0xaf9   : > { %15311 = vmatprep.subr.bf16.mxu0 %v23305_v22  ;;  %v23371_v22 = vld [vmem:[%s30439_s4 + $0xfac] ss:$16 sps:$4 sm:$0xff]  }
 0xafb   : > { %16924 = vmatpush1.bf16.msra.mxu1 %v23300_v37  ;;  %v23366_v37 = vld [vmem:[%s30439_s4 + $0x15a8] ss:$16 sps:$4 sm:$0xff]  }
 0xafc   : > { %15312 = vmatpush1.bf16.msra.mxu0 %v23303_v44  ;;  %16925 = vmatprep.subr.bf16.mxu1 %v23308_v3  ;;  %v23369_v44 = vld [vmem:[%s30439_s4 + $0xfa8] ss:$16 sps:$4 sm:$0xff]   ;;  %v23374_v3 = vld [vmem:[%s30439_s4 + $0x15cc] ss:$16 sps:$4 sm:$0xff]  }
 0xafd   : > { %15313 = vmatprep.subr.bf16.mxu0 %v23311_v59  ;;  %v23377_v59 = vld [vmem:[%s30439_s4 + $0xfcc] ss:$16 sps:$4 sm:$0xff]  }
 0xaff   : > { %16926 = vmatpush1.bf16.msra.mxu1 %v23306_v40 }
 0xb00   : > { %15314 = vmatpush1.bf16.msra.mxu0 %v23309_v50  ;;  %16927 = vmatprep.subr.bf16.mxu1 %v23314_v10 }
 0xb01   : > { %15315 = vmatprep.subr.bf16.mxu0 %v23317_v60  ;;  %v23372_v60 = vld [vmem:[%s30439_s4 + $0x15c8] ss:$16 sps:$4 sm:$0xff]  }
 0xb03   : > { %16928 = vmatpush1.bf16.msra.mxu1 %v23312_v9 }
 0xb04   : > { %15316 = vmatpush1.bf16.msra.mxu0 %v23315_v57  ;;  %16929 = vmatprep.subr.bf16.mxu1 %v23320_v1  ;;  %v23375_v1 = vld [vmem:[%s30439_s4 + $0xfc8] ss:$16 sps:$4 sm:$0xff]  }
 0xb05   : > { %15317 = vmatprep.subr.bf16.mxu0 %v23323_v2  ;;  %v23380_v2 = vld [vmem:[%s30439_s4 + $0x15ec] ss:$16 sps:$4 sm:$0xff]  }
 0xb07   : > { %16930 = vmatpush1.bf16.msra.mxu1 %v23318_v58  ;;  %v23383_v58 = vld [vmem:[%s30439_s4 + $0xfec] ss:$16 sps:$4 sm:$0xff]  }
 0xb08   : > { %15318 = vmatpush1.bf16.msra.mxu0 %v23321_v4  ;;  %16931 = vmatprep.subr.bf16.mxu1 %v23326_v31  ;;  %v23378_v31 = vld [vmem:[%s30439_s4 + $0x15e8] ss:$16 sps:$4 sm:$0xff]  }
 0xb09   : > { %15319 = vmatprep.subr.bf16.mxu0 %v23329_v6  ;;  %v23381_v6 = vld [vmem:[%s30439_s4 + $0xfe8] ss:$16 sps:$4 sm:$0xff]  }
 0xb0b   : > { %16932 = vmatpush1.bf16.msra.mxu1 %v23324_v5  ;;  %v23386_v5 = vld [vmem:[%s30439_s4 + $0x160c] ss:$16 sps:$4 sm:$0xff]  }
 0xb0c   : > { %15320 = vmatpush1.bf16.msra.mxu0 %v23327_v62  ;;  %16933 = vmatprep.subr.bf16.mxu1 %v23332_v14  ;;  %v23387_v62 = vld [vmem:[%s30439_s4 + $0x1008] ss:$16 sps:$4 sm:$0xff]   ;;  %v23392_v14 = vld [vmem:[%s30439_s4 + $0x162c] ss:$16 sps:$4 sm:$0xff]  }
 0xb0d   : > { %15321 = vmatprep.subr.bf16.mxu0 %v23335_v49  ;;  %v23395_v49 = vld [vmem:[%s30439_s4 + $0x102c] ss:$16 sps:$4 sm:$0xff]  }
 0xb0f   : > { %16934 = vmatpush1.bf16.msra.mxu1 %v23330_v7  ;;  %v23390_v7 = vld [vmem:[%s30439_s4 + $0x1628] ss:$16 sps:$4 sm:$0xff]  }
 0xb10   : > { %15322 = vmatpush1.bf16.msra.mxu0 %v23333_v26  ;;  %16960 = vmatprep.subr.bf16.mxu1 %v23338_v23  ;;  %v23393_v26 = vld [vmem:[%s30439_s4 + $0x1028] ss:$16 sps:$4 sm:$0xff]   ;;  %v23398_v23 = vld [vmem:[%s30439_s4 + $0x164c] ss:$16 sps:$4 sm:$0xff]  }
 0xb11   : > { %15373 = vmatprep.subr.bf16.mxu0 %v23341_v39  ;;  %v23401_v39 = vld [vmem:[%s30439_s4 + $0x104c] ss:$16 sps:$4 sm:$0xff]  }
 0xb12   : > { %16952 = vmatmul.mubr.bf16.vlgmr.msra.gmra.mrb[80].mxu1 %v29831_v13 }
 0xb13   : > { %15324 = vmatmul.mubr.bf16.vlgmr.msra.gmra.mrb[88].mxu0 %v28705_v35  ;;  %16961 = vmatpush1.bf16.msra.mxu1 %v23336_v32  ;;  %v23396_v32 = vld [vmem:[%s30439_s4 + $0x1648] ss:$16 sps:$4 sm:$0xff]  }
 0xb14   : > { %16992 = vmatprep.mubr.bf16.mxu1 %v29522_v47  ;;  %15374 = vmatpush1.bf16.msra.mxu0 %v23339_v20  ;;  %v23348_v47 = vld [vmem:[%s30439_s4 + $0x1548] ss:$16 sps:$4 sm:$0xff]  }
 0xb15   : > { %15405 = vmatprep.mubr.bf16.mxu0 %v29628_v53  ;;  %16962 = vmatprep.subr.bf16.mxu1 %v23344_v12  ;;  %v23356_v53 = vld [vmem:[%s30439_s4 + $0x156c] ss:$16 sps:$4 sm:$0xff]   ;;  %v23399_v20 = vld [vmem:[%s30439_s4 + $0x1048] ss:$16 sps:$4 sm:$0xff]  }
 0xb16   : > { %15375 = vmatprep.subr.bf16.mxu0 %v23347_v55  ;;  %v23404_v12 = vld [vmem:[%s30439_s4 + $0x166c] ss:$16 sps:$4 sm:$0xff]  }
 0xb17   : > { %16963 = vmatpush1.bf16.msra.mxu1 %v23342_v15  ;;  %v23407_v55 = vld [vmem:[%s30439_s4 + $0x106c] ss:$16 sps:$4 sm:$0xff]   ;;  %v23402_v15 = vld [vmem:[%s30439_s4 + $0x1668] ss:$16 sps:$4 sm:$0xff]  }
 0xb18   : > { %15376 = vmatpush1.bf16.msra.mxu0 %v23345_v21  ;;  %16964 = vmatprep.subr.bf16.mxu1 %v23350_v24  ;;  %v23405_v21 = vld [vmem:[%s30439_s4 + $0x1068] ss:$16 sps:$4 sm:$0xff]   ;;  %v23410_v24 = vld [vmem:[%s30439_s4 + $0x168c] ss:$16 sps:$4 sm:$0xff]  }
 0xb19   : > { %15377 = vmatprep.subr.bf16.mxu0 %v23353_v52  ;;  %v23413_v52 = vld [vmem:[%s30439_s4 + $0x108c] ss:$16 sps:$4 sm:$0xff]  }
 0xb1b   : > { %16965 = vmatpush1.bf16.msra.mxu1 %v23348_v47  ;;  %v23408_v47 = vld [vmem:[%s30439_s4 + $0x1688] ss:$16 sps:$4 sm:$0xff]  }
 0xb1c   : > { %15378 = vmatpush1.bf16.msra.mxu0 %v23351_v29  ;;  %16966 = vmatprep.subr.bf16.mxu1 %v23356_v53  ;;  %v23411_v29 = vld [vmem:[%s30439_s4 + $0x1088] ss:$16 sps:$4 sm:$0xff]   ;;  %v23416_v53 = vld [vmem:[%s30439_s4 + $0x16ac] ss:$16 sps:$4 sm:$0xff]  }
 0xb1d   : > { %15379 = vmatprep.subr.bf16.mxu0 %v23359_v61  ;;  %v23419_v61 = vld [vmem:[%s30439_s4 + $0x10ac] ss:$16 sps:$4 sm:$0xff]  }
 0xb1f   : > { %16967 = vmatpush1.bf16.msra.mxu1 %v23354_v38  ;;  %v23414_v38 = vld [vmem:[%s30439_s4 + $0x16a8] ss:$16 sps:$4 sm:$0xff]  }
 0xb20   : > { %15380 = vmatpush1.bf16.msra.mxu0 %v23357_v0  ;;  %16968 = vmatprep.subr.bf16.mxu1 %v23362_v17  ;;  %v23417_v0 = vld [vmem:[%s30439_s4 + $0x10a8] ss:$16 sps:$4 sm:$0xff]   ;;  %v23422_v17 = vld [vmem:[%s30439_s4 + $0x16cc] ss:$16 sps:$4 sm:$0xff]  }
 0xb21   : > { %15381 = vmatprep.subr.bf16.mxu0 %v23365_v18  ;;  %v23425_v18 = vld [vmem:[%s30439_s4 + $0x10cc] ss:$16 sps:$4 sm:$0xff]  }
 0xb23   : > { %16969 = vmatpush1.bf16.msra.mxu1 %v23360_v41  ;;  %v23420_v41 = vld [vmem:[%s30439_s4 + $0x16c8] ss:$16 sps:$4 sm:$0xff]  }
 0xb24   : > { %15382 = vmatpush1.bf16.msra.mxu0 %v23363_v45  ;;  %16970 = vmatprep.subr.bf16.mxu1 %v23368_v48  ;;  %v23423_v45 = vld [vmem:[%s30439_s4 + $0x10c8] ss:$16 sps:$4 sm:$0xff]   ;;  %v23428_v48 = vld [vmem:[%s30439_s4 + $0x16ec] ss:$16 sps:$4 sm:$0xff]  }
 0xb25   : > { %15383 = vmatprep.subr.bf16.mxu0 %v23371_v22  ;;  %v23431_v22 = vld [vmem:[%s30439_s4 + $0x10ec] ss:$16 sps:$4 sm:$0xff]  }
 0xb26   : > { %v13846_v40 = vpop.f32.mrb[76].mxu0 }
 0xb27   : > { %v21252_v50 = vadd.f32 %v29493_v36, %v13846_v40  ;;  %v13848_v10 = vpop.f32.mrb[77].mxu0  ;;  %16971 = vmatpush1.bf16.msra.mxu1 %v23366_v37  ;;  %v23426_v37 = vld [vmem:[%s30439_s4 + $0x16e8] ss:$16 sps:$4 sm:$0xff]   ;;  %v23437_v40 = vld [vmem:[%s30439_s4 + $0x172c] ss:$16 sps:$4 sm:$0xff]  }
 0xb28   : > { %v21263_v9 = vadd.f32 %v29496_v19, %v13848_v10  ;;  %v13850_v57 = vpop.f32.mrb[78].mxu0  ;;  %15384 = vmatpush1.bf16.msra.mxu0 %v23369_v44  ;;  %16972 = vmatprep.subr.bf16.mxu1 %v23374_v3  ;;  %v23429_v44 = vld [vmem:[%s30439_s4 + $0x10e8] ss:$16 sps:$4 sm:$0xff]   ;;  %v23434_v3 = vld [vmem:[%s30439_s4 + $0x170c] ss:$16 sps:$4 sm:$0xff]  }
 0xb29   : > { %v13851_v36 = vpop.f32.mrb[79].mxu0  ;;  %15385 = vmatprep.subr.bf16.mxu0 %v23377_v59  ;;  %v29921_v4 = vadd.f32 %v21252_v50, %v29136_v54  ;;  %v23389_v54 = vld [vmem:[%s30439_s4 + $0x100c] ss:$16 sps:$4 sm:$0xff]   ;;  %v23432_v59 = vld [vmem:[%s30439_s4 + $0x1708] ss:$16 sps:$4 sm:$0xff]  }
 0xb2a   : > { %v29924_v19 = vadd.f32 %v21263_v9, %v29141_v56  ;;  %v23384_v56 = vld [vmem:[%s30439_s4 + $0x1608] ss:$16 sps:$4 sm:$0xff]   ;;  %v23440_v10 = vld [vmem:[%s30439_s4 + $0x174c] ss:$16 sps:$4 sm:$0xff]  }
 0xb2b   : > { %16973 = vmatpush1.bf16.msra.mxu1 %v23372_v60  ;;  %v23435_v50 = vld [vmem:[%s30439_s4 + $0x1728] ss:$16 sps:$4 sm:$0xff]   ;;  %v23446_v9 = vld [vmem:[%s30439_s4 + $0x178c] ss:$16 sps:$4 sm:$0xff]  }
 0xb2c   : > { %15386 = vmatpush1.bf16.msra.mxu0 %v23375_v1  ;;  %16974 = vmatprep.subr.bf16.mxu1 %v23380_v2  ;;  %v23438_v60 = vld [vmem:[%s30439_s4 + $0x1748] ss:$16 sps:$4 sm:$0xff]   ;;  %v23449_v1 = vld [vmem:[%s30439_s4 + $0x17ac] ss:$16 sps:$4 sm:$0xff]  }
 0xb2d   : > { %15387 = vmatprep.subr.bf16.mxu0 %v23383_v58  ;;  %v23444_v57 = vld [vmem:[%s30439_s4 + $0x1788] ss:$16 sps:$4 sm:$0xff]   ;;  %v23452_v36 = vld [vmem:[%s30439_s4 + $0x17cc] ss:$16 sps:$4 sm:$0xff]   ;;  %v17143_v58 = vcombine.low %v27671_v33, %v29432_v63 }
 0xb2e   : > { %v23447_v2 = vld [vmem:[%s30439_s4 + $0x17a8] ss:$16 sps:$4 sm:$0xff]  }
 0xb2f   : > { %16975 = vmatpush1.bf16.msra.mxu1 %v23378_v31  ;;  %v30081_v33 = vrot.slane %v17143_v58, %v27429_v42  ;;  %v23507_v58 = vld [vmem:[%s30439_s4 + $0x1a20] ss:$16 sps:$4 sm:$0xff]  }
 0xb30   : > { %15388 = vmatpush1.bf16.msra.mxu0 %v23381_v6  ;;  %16976 = vmatprep.subr.bf16.mxu1 %v23386_v5 }
 0xb31   : > { %15389 = vmatprep.subr.bf16.mxu0 %v23389_v54  ;;  %v23450_v54 = vld [vmem:[%s30439_s4 + $0x17c8] ss:$16 sps:$4 sm:$0xff]  }
 0xb33   : > { %16977 = vmatpush1.bf16.msra.mxu1 %v23384_v56 }
 0xb34   : > { %15390 = vmatpush1.bf16.msra.mxu0 %v23387_v62  ;;  %16978 = vmatprep.subr.bf16.mxu1 %v23392_v14  ;;  %v23455_v14 = vld [vmem:[%s30439_s4 + $0x17ec] ss:$16 sps:$4 sm:$0xff]  }
 0xb35   : > { %15391 = vmatprep.subr.bf16.mxu0 %v23395_v49 }
 0xb37   : > { %16979 = vmatpush1.bf16.msra.mxu1 %v23390_v7  ;;  %v23458_v7 = vld [vmem:[%s30439_s4 + $0x1804] ss:$16 sps:$4 sm:$0xff]  }
 0xb38   : > { %15392 = vmatpush1.bf16.msra.mxu0 %v23393_v26  ;;  %16980 = vmatprep.subr.bf16.mxu1 %v23398_v23  ;;  %v17151_v26 = vcombine.high %v30081_v33, %v30081_v33 }
 0xb39   : > { %15393 = vmatprep.subr.bf16.mxu0 %v23401_v39  ;;  %v23459_v39 = vld [vmem:[%s30439_s4 + $0x1820] ss:$16 sps:$4 sm:$0xff]  }
 0xb3a   : > { %v30104_v23 = vrot.slane %v17151_v26, %v27429_v42  ;;  %v23525_v26 = vld [vmem:[%s30439_s4 + $0x1ae0] ss:$16 sps:$4 sm:$0xff]  }
 0xb3b   : > { %16981 = vmatpush1.bf16.msra.mxu1 %v23396_v32  ;;  %v23464_v32 = vld [vmem:[%s30439_s4 + $0x1844] ss:$16 sps:$4 sm:$0xff]  }
 0xb3c   : > { %15394 = vmatpush1.bf16.msra.mxu0 %v23399_v20  ;;  %16982 = vmatprep.subr.bf16.mxu1 %v23404_v12  ;;  %v23462_v20 = vld [vmem:[%s30439_s4 + $0x1840] ss:$16 sps:$4 sm:$0xff]  }
 0xb3d   : > { %15395 = vmatprep.subr.bf16.mxu0 %v23407_v55  ;;  %v23465_v12 = vld [vmem:[%s30439_s4 + $0x1860] ss:$16 sps:$4 sm:$0xff]   ;;  %v23470_v55 = vld [vmem:[%s30439_s4 + $0x1884] ss:$16 sps:$4 sm:$0xff]  }
 0xb3f   : > { %16983 = vmatpush1.bf16.msra.mxu1 %v23402_v15  ;;  %v23468_v15 = vld [vmem:[%s30439_s4 + $0x1880] ss:$16 sps:$4 sm:$0xff]  }
 0xb40   : > { %15396 = vmatpush1.bf16.msra.mxu0 %v23405_v21  ;;  %16984 = vmatprep.subr.bf16.mxu1 %v23410_v24  ;;  %v23473_v21 = vld [vmem:[%s30439_s4 + $0x18a4] ss:$16 sps:$4 sm:$0xff]   ;;  %v23471_v24 = vld [vmem:[%s30439_s4 + $0x18a0] ss:$16 sps:$4 sm:$0xff]  }
 0xb41   : > { %15397 = vmatprep.subr.bf16.mxu0 %v23413_v52  ;;  %v23476_v52 = vld [vmem:[%s30439_s4 + $0x18c4] ss:$16 sps:$4 sm:$0xff]  }
 0xb43   : > { %16985 = vmatpush1.bf16.msra.mxu1 %v23408_v47  ;;  %v23474_v47 = vld [vmem:[%s30439_s4 + $0x18c0] ss:$16 sps:$4 sm:$0xff]  }
 0xb44   : > { %15398 = vmatpush1.bf16.msra.mxu0 %v23411_v29  ;;  %16986 = vmatprep.subr.bf16.mxu1 %v23416_v53  ;;  %v23479_v29 = vld [vmem:[%s30439_s4 + $0x18e4] ss:$16 sps:$4 sm:$0xff]   ;;  %v23477_v53 = vld [vmem:[%s30439_s4 + $0x18e0] ss:$16 sps:$4 sm:$0xff]  }
 0xb45   : > { %15399 = vmatprep.subr.bf16.mxu0 %v23419_v61  ;;  %v23482_v61 = vld [vmem:[%s30439_s4 + $0x1904] ss:$16 sps:$4 sm:$0xff]  }
 0xb47   : > { %16987 = vmatpush1.bf16.msra.mxu1 %v23414_v38  ;;  %v23480_v38 = vld [vmem:[%s30439_s4 + $0x1900] ss:$16 sps:$4 sm:$0xff]  }
 0xb48   : > { %15400 = vmatpush1.bf16.msra.mxu0 %v23417_v0  ;;  %16988 = vmatprep.subr.bf16.mxu1 %v23422_v17  ;;  %v23485_v0 = vld [vmem:[%s30439_s4 + $0x1924] ss:$16 sps:$4 sm:$0xff]   ;;  %v23483_v17 = vld [vmem:[%s30439_s4 + $0x1920] ss:$16 sps:$4 sm:$0xff]  }
 0xb49   : > { %15401 = vmatprep.subr.bf16.mxu0 %v23425_v18  ;;  %v23488_v18 = vld [vmem:[%s30439_s4 + $0x1944] ss:$16 sps:$4 sm:$0xff]  }
 0xb4b   : > { %16989 = vmatpush1.bf16.msra.mxu1 %v23420_v41  ;;  %v23486_v41 = vld [vmem:[%s30439_s4 + $0x1940] ss:$16 sps:$4 sm:$0xff]  }
 0xb4c   : > { %15402 = vmatpush1.bf16.msra.mxu0 %v23423_v45  ;;  %16990 = vmatprep.subr.bf16.mxu1 %v23428_v48  ;;  %v23491_v45 = vld [vmem:[%s30439_s4 + $0x1964] ss:$16 sps:$4 sm:$0xff]   ;;  %v23489_v48 = vld [vmem:[%s30439_s4 + $0x1960] ss:$16 sps:$4 sm:$0xff]  }
 0xb4d   : > { %15403 = vmatprep.subr.bf16.mxu0 %v23431_v22  ;;  %v23494_v22 = vld [vmem:[%s30439_s4 + $0x1984] ss:$16 sps:$4 sm:$0xff]  }
 0xb4f   : > { %16991 = vmatpush1.bf16.msra.mxu1 %v23426_v37  ;;  %v23492_v37 = vld [vmem:[%s30439_s4 + $0x1980] ss:$16 sps:$4 sm:$0xff]  }
 0xb50   : > { %15404 = vmatpush1.bf16.msra.mxu0 %v23429_v44  ;;  %17001 = vmatprep.subr.bf16.mxu1 %v23434_v3  ;;  %v23497_v44 = vld [vmem:[%s30439_s4 + $0x19a4] ss:$16 sps:$4 sm:$0xff]   ;;  %v23495_v3 = vld [vmem:[%s30439_s4 + $0x19a0] ss:$16 sps:$4 sm:$0xff]  }
 0xb52   : > { %16993 = vmatmul.mubr.bf16.vlgmr.msra.gmra.mrb[84].mxu1 %v29729_v30  ;;  %v23441_v30 = vld [vmem:[%s30439_s4 + $0x1768] ss:$16 sps:$4 sm:$0xff]  }
 0xb53   : > { %15406 = vmatmul.mubr.bf16.vlgmr.msra.gmra.mrb[92].mxu0 %v28705_v35  ;;  %17002 = vmatpush1.bf16.msra.mxu1 %v23432_v59  ;;  %v23443_v35 = vld [vmem:[%s30439_s4 + $0x176c] ss:$16 sps:$4 sm:$0xff]   ;;  %v23500_v59 = vld [vmem:[%s30439_s4 + $0x19c4] ss:$16 sps:$4 sm:$0xff]  }
 0xb54   : > { %17003 = vmatprep.subr.bf16.mxu1 %v23437_v40  ;;  %17033 = vmatprep.mubr.bf16.mxu1 %v23619_v8 }
 0xb57   : > { %17004 = vmatpush1.bf16.msra.mxu1 %v23435_v50 }
 0xb58   : > { %17005 = vmatprep.subr.bf16.mxu1 %v23440_v10 }
 0xb5b   : > { %17006 = vmatpush1.bf16.msra.mxu1 %v23438_v60  ;;  %v23498_v60 = vld [vmem:[%s30439_s4 + $0x19c0] ss:$16 sps:$4 sm:$0xff]  }
 0xb5c   : > { %17007 = vmatprep.subr.bf16.mxu1 %v23443_v35 }
 0xb5f   : > { %17008 = vmatpush1.bf16.msra.mxu1 %v23441_v30 }
 0xb60   : > { %17009 = vmatprep.subr.bf16.mxu1 %v23446_v9  ;;  %v23503_v9 = vld [vmem:[%s30439_s4 + $0x19e4] ss:$16 sps:$4 sm:$0xff]  }
 0xb63   : > { %17010 = vmatpush1.bf16.msra.mxu1 %v23444_v57 }
 0xb64   : > { %17011 = vmatprep.subr.bf16.mxu1 %v23449_v1 }
 0xb66   : > { %v14553_v31 = vpop.f32.mrb[80].mxu0 }
 0xb67   : > { %v21232_v6 = vadd.f32 %v29707_v51, %v14553_v31  ;;  %v14555_v5 = vpop.f32.mrb[81].mxu0  ;;  %17012 = vmatpush1.bf16.msra.mxu1 %v23447_v2  ;;  %v23501_v2 = vld [vmem:[%s30439_s4 + $0x19e0] ss:$16 sps:$4 sm:$0xff]   ;;  %v23512_v31 = vld [vmem:[%s30439_s4 + $0x1a44] ss:$16 sps:$4 sm:$0xff]  }
 0xb68   : > { %v21243_v56 = vadd.f32 %v29710_v16, %v14555_v5  ;;  %v14557_v62 = vpop.f32.mrb[82].mxu0  ;;  %17013 = vmatprep.subr.bf16.mxu1 %v23452_v36  ;;  %v23453_v16 = vld [vmem:[%s30439_s4 + $0x17e8] ss:$16 sps:$4 sm:$0xff]   ;;  %v23504_v36 = vld [vmem:[%s30439_s4 + $0x1a00] ss:$16 sps:$4 sm:$0xff]  }
 0xb69   : > { %v14558_v49 = vpop.f32.mrb[83].mxu0  ;;  %v30084_v63 = vadd.f32 %v21232_v6, %v29249_v11  ;;  %v23456_v11 = vld [vmem:[%s30439_s4 + $0x1800] ss:$16 sps:$4 sm:$0xff]   ;;  %v23515_v5 = vld [vmem:[%s30439_s4 + $0x1a64] ss:$16 sps:$4 sm:$0xff]  }
 0xb6a   : > { %v30087_v51 = vadd.f32 %v21243_v56, %v29254_v43  ;;  %v23461_v43 = vld [vmem:[%s30439_s4 + $0x1824] ss:$16 sps:$4 sm:$0xff]   ;;  %v23510_v6 = vld [vmem:[%s30439_s4 + $0x1a40] ss:$16 sps:$4 sm:$0xff]  }
 0xb6b   : > { %17014 = vmatpush1.bf16.msra.mxu1 %v23450_v54  ;;  %v23513_v54 = vld [vmem:[%s30439_s4 + $0x1a60] ss:$16 sps:$4 sm:$0xff]   ;;  %v23518_v56 = vld [vmem:[%s30439_s4 + $0x1a84] ss:$16 sps:$4 sm:$0xff]  }
 0xb6c   : > { %17015 = vmatprep.subr.bf16.mxu1 %v23455_v14  ;;  %v23516_v62 = vld [vmem:[%s30439_s4 + $0x1a80] ss:$16 sps:$4 sm:$0xff]   ;;  %v23521_v14 = vld [vmem:[%s30439_s4 + $0x1aa4] ss:$16 sps:$4 sm:$0xff]  }
 0xb6d   : > { %v23519_v49 = vld [vmem:[%s30439_s4 + $0x1aa0] ss:$16 sps:$4 sm:$0xff]  }
 0xb6f   : > { %17016 = vmatpush1.bf16.msra.mxu1 %v23453_v16  ;;  %v23522_v16 = vld [vmem:[%s30439_s4 + $0x1ac0] ss:$16 sps:$4 sm:$0xff]  }
 0xb70   : > { %17650 = vmatprep.subr.bf16.mxu1 %v23458_v7  ;;  %v23527_v7 = vld [vmem:[%s30439_s4 + $0x1ae4] ss:$16 sps:$4 sm:$0xff]  }
 0xb72   : > { %17034 = vmatmul.mubr.bf16.vlgmr.msra.gmra.mrb[84].mxu1 %v29831_v13  ;;  %v23467_v13 = vld [vmem:[%s30439_s4 + $0x1864] ss:$16 sps:$4 sm:$0xff]  }
 0xb73   : > { %17651 = vmatpush1.bf16.msra.mxu1 %v23456_v11  ;;  %17682 = vmatprep.mubr.bf16.mxu1 %v30104_v23  ;;  %v23530_v11 = vld [vmem:[%s30439_s4 + $0x180c] ss:$16 sps:$4 sm:$0xff]  }
 0xb74   : > { %17652 = vmatprep.subr.bf16.mxu1 %v23461_v43  ;;  %v23528_v43 = vld [vmem:[%s30439_s4 + $0x1808] ss:$16 sps:$4 sm:$0xff]  }
 0xb77   : > { %17653 = vmatpush1.bf16.msra.mxu1 %v23459_v39 }
 0xb78   : > { %17654 = vmatprep.subr.bf16.mxu1 %v23464_v32  ;;  %v23533_v32 = vld [vmem:[%s30439_s4 + $0x182c] ss:$16 sps:$4 sm:$0xff]  }
 0xb7b   : > { %17655 = vmatpush1.bf16.msra.mxu1 %v23462_v20  ;;  %v23531_v20 = vld [vmem:[%s30439_s4 + $0x1828] ss:$16 sps:$4 sm:$0xff]  }
 0xb7c   : > { %17656 = vmatprep.subr.bf16.mxu1 %v23467_v13  ;;  %v23536_v13 = vld [vmem:[%s30439_s4 + $0x184c] ss:$16 sps:$4 sm:$0xff]  }
 0xb7f   : > { %17657 = vmatpush1.bf16.msra.mxu1 %v23465_v12  ;;  %v23534_v12 = vld [vmem:[%s30439_s4 + $0x1848] ss:$16 sps:$4 sm:$0xff]  }
 0xb80   : > { %17658 = vmatprep.subr.bf16.mxu1 %v23470_v55  ;;  %v23539_v55 = vld [vmem:[%s30439_s4 + $0x186c] ss:$16 sps:$4 sm:$0xff]  }
 0xb83   : > { %17659 = vmatpush1.bf16.msra.mxu1 %v23468_v15  ;;  %v23542_v15 = vld [vmem:[%s30439_s4 + $0x188c] ss:$16 sps:$4 sm:$0xff]  }
 0xb84   : > { %17660 = vmatprep.subr.bf16.mxu1 %v23473_v21  ;;  %v23540_v21 = vld [vmem:[%s30439_s4 + $0x1888] ss:$16 sps:$4 sm:$0xff]  }
 0xb87   : > { %17661 = vmatpush1.bf16.msra.mxu1 %v23471_v24  ;;  %v23545_v24 = vld [vmem:[%s30439_s4 + $0x18ac] ss:$16 sps:$4 sm:$0xff]  }
 0xb88   : > { %17662 = vmatprep.subr.bf16.mxu1 %v23476_v52  ;;  %v23543_v52 = vld [vmem:[%s30439_s4 + $0x18a8] ss:$16 sps:$4 sm:$0xff]  }
 0xb8b   : > { %17663 = vmatpush1.bf16.msra.mxu1 %v23474_v47  ;;  %v23548_v47 = vld [vmem:[%s30439_s4 + $0x18cc] ss:$16 sps:$4 sm:$0xff]  }
 0xb8c   : > { %17664 = vmatprep.subr.bf16.mxu1 %v23479_v29 }
 0xb8f   : > { %17665 = vmatpush1.bf16.msra.mxu1 %v23477_v53 }
 0xb90   : > { %17666 = vmatprep.subr.bf16.mxu1 %v23482_v61 }
 0xb93   : > { %17667 = vmatpush1.bf16.msra.mxu1 %v23480_v38  ;;  %v23546_v38 = vld [vmem:[%s30439_s4 + $0x18c8] ss:$16 sps:$4 sm:$0xff]  }
 0xb94   : > { %17668 = vmatprep.subr.bf16.mxu1 %v23485_v0 }
 0xb97   : > { %17669 = vmatpush1.bf16.msra.mxu1 %v23483_v17 }
 0xb98   : > { %17670 = vmatprep.subr.bf16.mxu1 %v23488_v18  ;;  %v23551_v18 = vld [vmem:[%s30439_s4 + $0x18ec] ss:$16 sps:$4 sm:$0xff]  }
 0xb9b   : > { %17671 = vmatpush1.bf16.msra.mxu1 %v23486_v41 }
 0xb9c   : > { %17672 = vmatprep.subr.bf16.mxu1 %v23491_v45  ;;  %v23554_v45 = vld [vmem:[%s30439_s4 + $0x190c] ss:$16 sps:$4 sm:$0xff]  }
 0xb9f   : > { %17673 = vmatpush1.bf16.msra.mxu1 %v23489_v48  ;;  %v23557_v48 = vld [vmem:[%s30439_s4 + $0x192c] ss:$16 sps:$4 sm:$0xff]  }
 0xba0   : > { %17674 = vmatprep.subr.bf16.mxu1 %v23494_v22  ;;  %v23555_v22 = vld [vmem:[%s30439_s4 + $0x1928] ss:$16 sps:$4 sm:$0xff]  }
 0xba3   : > { %17675 = vmatpush1.bf16.msra.mxu1 %v23492_v37  ;;  %v23560_v37 = vld [vmem:[%s30439_s4 + $0x194c] ss:$16 sps:$4 sm:$0xff]  }
 0xba4   : > { %17676 = vmatprep.subr.bf16.mxu1 %v23497_v44  ;;  %v23558_v44 = vld [vmem:[%s30439_s4 + $0x1948] ss:$16 sps:$4 sm:$0xff]  }
 0xba6   : > { %v14635_v40 = vpop.f32.mrb[84].mxu0 }
 0xba7   : > { %v21254_v50 = vadd.f32 %v29921_v4, %v14635_v40  ;;  %v14637_v10 = vpop.f32.mrb[85].mxu0  ;;  %17677 = vmatpush1.bf16.msra.mxu1 %v23495_v3  ;;  %v23563_v3 = vld [vmem:[%s30439_s4 + $0x196c] ss:$16 sps:$4 sm:$0xff]  }
 0xba8   : > { %v21265_v35 = vadd.f32 %v29924_v19, %v14637_v10  ;;  %v14639_v30 = vpop.f32.mrb[86].mxu0  ;;  %17678 = vmatprep.subr.bf16.mxu1 %v23500_v59  ;;  %v23506_v19 = vld [vmem:[%s30439_s4 + $0x1a04] ss:$16 sps:$4 sm:$0xff]   ;;  %v23561_v59 = vld [vmem:[%s30439_s4 + $0x1968] ss:$16 sps:$4 sm:$0xff]  }
 0xba9   : > { %v14640_v57 = vpop.f32.mrb[87].mxu0  ;;  %v30195_v1 = vadd.f32 %v21254_v50, %v29357_v34  ;;  %v30211_v34 = vrot.slane %v30081_v33, %v27429_v42  ;;  %v23524_v33 = vld [vmem:[%s30439_s4 + $0x1ac4] ss:$16 sps:$4 sm:$0xff]   ;;  %v23566_v40 = vld [vmem:[%s30439_s4 + $0x198c] ss:$16 sps:$4 sm:$0xff]  }
 0xbaa   : > { %v30198_v4 = vadd.f32 %v21265_v35, %v29362_v46  ;;  %v23509_v46 = vld [vmem:[%s30439_s4 + $0x1a24] ss:$16 sps:$4 sm:$0xff]   ;;  %v23564_v50 = vld [vmem:[%s30439_s4 + $0x1988] ss:$16 sps:$4 sm:$0xff]   ;;  %v23569_v10 = vld [vmem:[%s30439_s4 + $0x19ac] ss:$16 sps:$4 sm:$0xff]  }
 0xbab   : > { %17679 = vmatpush1.bf16.msra.mxu1 %v23498_v60  ;;  %v30265_v39 = vcombine.high %v30211_v34, %v30211_v34  ;;  %v23567_v60 = vld [vmem:[%s30439_s4 + $0x19a8] ss:$16 sps:$4 sm:$0xff]   ;;  %v23572_v35 = vld [vmem:[%s30439_s4 + $0x19cc] ss:$16 sps:$4 sm:$0xff]  }
 0xbac   : > { %17680 = vmatprep.subr.bf16.mxu1 %v23503_v9  ;;  %v23570_v30 = vld [vmem:[%s30439_s4 + $0x19c8] ss:$16 sps:$4 sm:$0xff]   ;;  %v23575_v9 = vld [vmem:[%s30439_s4 + $0x19ec] ss:$16 sps:$4 sm:$0xff]  }
 0xbad   : > { %v23573_v57 = vld [vmem:[%s30439_s4 + $0x19e8] ss:$16 sps:$4 sm:$0xff]  }
 0xbaf   : > { %17681 = vmatpush1.bf16.msra.mxu1 %v23501_v2  ;;  %v23578_v2 = vld [vmem:[%s30439_s4 + $0x1a0c] ss:$16 sps:$4 sm:$0xff]  }
 0xbb0   : > { %17691 = vmatprep.subr.bf16.mxu1 %v23506_v19  ;;  %v23576_v19 = vld [vmem:[%s30439_s4 + $0x1a08] ss:$16 sps:$4 sm:$0xff]  }
 0xbb2   : > { %17683 = vmatmul.mubr.bf16.vlgmr.msra.gmra.mrb[80].mxu1 %v30211_v34 }
 0xbb3   : > { %17692 = vmatpush1.bf16.msra.mxu1 %v23504_v36  ;;  %17723 = vmatprep.mubr.bf16.mxu1 %v23619_v8  ;;  %v23581_v36 = vld [vmem:[%s30439_s4 + $0x1a2c] ss:$16 sps:$4 sm:$0xff]  }
 0xbb4   : > { %17693 = vmatprep.subr.bf16.mxu1 %v23509_v46  ;;  %v23579_v46 = vld [vmem:[%s30439_s4 + $0x1a28] ss:$16 sps:$4 sm:$0xff]  }
 0xbb7   : > { %17694 = vmatpush1.bf16.msra.mxu1 %v23507_v58  ;;  %v23584_v58 = vld [vmem:[%s30439_s4 + $0x1a4c] ss:$16 sps:$4 sm:$0xff]  }
 0xbb8   : > { %17695 = vmatprep.subr.bf16.mxu1 %v23512_v31  ;;  %v23582_v31 = vld [vmem:[%s30439_s4 + $0x1a48] ss:$16 sps:$4 sm:$0xff]  }
 0xbbb   : > { %17696 = vmatpush1.bf16.msra.mxu1 %v23510_v6  ;;  %v23590_v6 = vld [vmem:[%s30439_s4 + $0x1a8c] ss:$16 sps:$4 sm:$0xff]  }
 0xbbc   : > { %17697 = vmatprep.subr.bf16.mxu1 %v23515_v5  ;;  %v23588_v5 = vld [vmem:[%s30439_s4 + $0x1a88] ss:$16 sps:$4 sm:$0xff]  }
 0xbbf   : > { %17698 = vmatpush1.bf16.msra.mxu1 %v23513_v54  ;;  %v23593_v54 = vld [vmem:[%s30439_s4 + $0x1aac] ss:$16 sps:$4 sm:$0xff]  }
 0xbc0   : > { %17699 = vmatprep.subr.bf16.mxu1 %v23518_v56  ;;  %v23591_v56 = vld [vmem:[%s30439_s4 + $0x1aa8] ss:$16 sps:$4 sm:$0xff]  }
 0xbc3   : > { %17700 = vmatpush1.bf16.msra.mxu1 %v23516_v62  ;;  %v23596_v62 = vld [vmem:[%s30439_s4 + $0x1acc] ss:$16 sps:$4 sm:$0xff]  }
 0xbc4   : > { %17701 = vmatprep.subr.bf16.mxu1 %v23521_v14 }
 0xbc7   : > { %17702 = vmatpush1.bf16.msra.mxu1 %v23519_v49 }
 0xbc8   : > { %17703 = vmatprep.subr.bf16.mxu1 %v23524_v33 }
 0xbcb   : > { %17704 = vmatpush1.bf16.msra.mxu1 %v23522_v16  ;;  %v23594_v16 = vld [vmem:[%s30439_s4 + $0x1ac8] ss:$16 sps:$4 sm:$0xff]  }
 0xbcc   : > { %17705 = vmatprep.subr.bf16.mxu1 %v23527_v7 }
 0xbcf   : > { %17706 = vmatpush1.bf16.msra.mxu1 %v23525_v26 }
 0xbd0   : > { %17732 = vmatprep.subr.bf16.mxu1 %v23530_v11  ;;  %v23599_v11 = vld [vmem:[%s30439_s4 + $0x1aec] ss:$16 sps:$4 sm:$0xff]  }
 0xbd2   : > { %17724 = vmatmul.mubr.bf16.vlgmr.msra.gmra.mrb[80].mxu1 %v30265_v39 }
 0xbd3   : > { %17733 = vmatpush1.bf16.msra.mxu1 %v23528_v43  ;;  %17764 = vmatprep.mubr.bf16.mxu1 %v30104_v23  ;;  %v23537_v23 = vld [vmem:[%s30439_s4 + $0x1868] ss:$16 sps:$4 sm:$0xff]  }
 0xbd4   : > { %17734 = vmatprep.subr.bf16.mxu1 %v23533_v32 }
 0xbd7   : > { %17735 = vmatpush1.bf16.msra.mxu1 %v23531_v20 }
 0xbd8   : > { %17736 = vmatprep.subr.bf16.mxu1 %v23536_v13 }
 0xbdb   : > { %17737 = vmatpush1.bf16.msra.mxu1 %v23534_v12 }
 0xbdc   : > { %17738 = vmatprep.subr.bf16.mxu1 %v23539_v55 }
 0xbdf   : > { %17739 = vmatpush1.bf16.msra.mxu1 %v23537_v23 }
 0xbe0   : > { %17740 = vmatprep.subr.bf16.mxu1 %v23542_v15 }
 0xbe3   : > { %17741 = vmatpush1.bf16.msra.mxu1 %v23540_v21  ;;  %v23621_v21 = vmov 857870592  }
 0xbe4   : > { %17742 = vmatprep.subr.bf16.mxu1 %v23545_v24  ;;  %v17854_v24 = vunpack.c.l.s4 %v23621_v21 }
 0xbe6   : > { %v15325_v29 = vpop.f32.mrb[88].mxu0 }
 0xbe7   : > { %v30303_v53 = vadd.f32 %v30084_v63, %v15325_v29  ;;  %v15327_v61 = vpop.f32.mrb[89].mxu0  ;;  %17743 = vmatpush1.bf16.msra.mxu1 %v23543_v52  ;;  %v23549_v63 = vld [vmem:[%s30439_s4 + $0x18e8] ss:$16 sps:$4 sm:$0xff]  }
 0xbe8   : > { %v30309_v0 = vadd.f32 %v30087_v51, %v15327_v61  ;;  %v15329_v17 = vpop.f32.mrb[90].mxu0  ;;  %17744 = vmatprep.subr.bf16.mxu1 %v23548_v47  ;;  %v23552_v51 = vld [vmem:[%s30439_s4 + $0x1908] ss:$16 sps:$4 sm:$0xff]  }
 0xbe9   : > { %v15330_v41 = vpop.f32.mrb[91].mxu0 }
 0xbeb   : > { %17745 = vmatpush1.bf16.msra.mxu1 %v23546_v38 }
 0xbec   : > { %17746 = vmatprep.subr.bf16.mxu1 %v23551_v18 }
 0xbef   : > { %17747 = vmatpush1.bf16.msra.mxu1 %v23549_v63 }
 0xbf0   : > { %17748 = vmatprep.subr.bf16.mxu1 %v23554_v45  ;;  %v17851_v45 = vld [vmem:[%s30443_s8] sm:$0xf] }
 0xbf3   : > { %17749 = vmatpush1.bf16.msra.mxu1 %v23552_v51 }
 0xbf4   : > { %17750 = vmatprep.subr.bf16.mxu1 %v23557_v48 }
 0xbf7   : > { %17751 = vmatpush1.bf16.msra.mxu1 %v23555_v22 }
 0xbf8   : > { %17752 = vmatprep.subr.bf16.mxu1 %v23560_v37 }
 0xbfb   : > { %17753 = vmatpush1.bf16.msra.mxu1 %v23558_v44 }
 0xbfc   : > { %17754 = vmatprep.subr.bf16.mxu1 %v23563_v3 }
 0xbff   : > { %17755 = vmatpush1.bf16.msra.mxu1 %v23561_v59 }
 0xc00   : > { %17756 = vmatprep.subr.bf16.mxu1 %v23566_v40 }
 0xc03   : > { %17757 = vmatpush1.bf16.msra.mxu1 %v23564_v50 }
 0xc04   : > { %17758 = vmatprep.subr.bf16.mxu1 %v23569_v10 }
 0xc07   : > { %17759 = vmatpush1.bf16.msra.mxu1 %v23567_v60 }
 0xc08   : > { %17760 = vmatprep.subr.bf16.mxu1 %v23572_v35 }
 0xc0b   : > { %17761 = vmatpush1.bf16.msra.mxu1 %v23570_v30 }
 0xc0c   : > { %17762 = vmatprep.subr.bf16.mxu1 %v23575_v9 }
 0xc0f   : > { %17763 = vmatpush1.bf16.msra.mxu1 %v23573_v57 }
 0xc10   : > { %17773 = vmatprep.subr.bf16.mxu1 %v23578_v2 }
 0xc12   : > { %17765 = vmatmul.mubr.bf16.vlgmr.msra.gmra.mrb[84].mxu1 %v30211_v34  ;;  %v23587_v34 = vld [vmem:[%s30439_s4 + $0x1a6c] ss:$16 sps:$4 sm:$0xff]  }
 0xc13   : > { %17774 = vmatpush1.bf16.msra.mxu1 %v23576_v19  ;;  %17805 = vmatprep.mubr.bf16.mxu1 %v23619_v8  ;;  %v23585_v8 = vld [vmem:[%s30439_s4 + $0x1a68] ss:$16 sps:$4 sm:$0xff]  }
 0xc14   : > { %17775 = vmatprep.subr.bf16.mxu1 %v23581_v36 }
 0xc17   : > { %17776 = vmatpush1.bf16.msra.mxu1 %v23579_v46 }
 0xc18   : > { %17777 = vmatprep.subr.bf16.mxu1 %v23584_v58 }
 0xc1b   : > { %17778 = vmatpush1.bf16.msra.mxu1 %v23582_v31 }
 0xc1c   : > { %17779 = vmatprep.subr.bf16.mxu1 %v23587_v34 }
 0xc1f   : > { %17780 = vmatpush1.bf16.msra.mxu1 %v23585_v8 }
 0xc20   : > { %17781 = vmatprep.subr.bf16.mxu1 %v23590_v6 }
 0xc23   : > { %17782 = vmatpush1.bf16.msra.mxu1 %v23588_v5 }
 0xc24   : > { %17783 = vmatprep.subr.bf16.mxu1 %v23593_v54 }
 0xc26   : > { %v15407_v14 = vpop.f32.mrb[92].mxu0 }
 0xc27   : > { %v21256_v49 = vadd.f32 %v30195_v1, %v15407_v14  ;;  %v15409_v33 = vpop.f32.mrb[93].mxu0  ;;  %17784 = vmatpush1.bf16.msra.mxu1 %v23591_v56  ;;  %v23597_v1 = vld [vmem:[%s30439_s4 + $0x1ae8] ss:$16 sps:$4 sm:$0xff]  }
 0xc28   : > { %v21267_v7 = vadd.f32 %v30198_v4, %v15409_v33  ;;  %v15411_v26 = vpop.f32.mrb[94].mxu0  ;;  %17785 = vmatprep.subr.bf16.mxu1 %v23596_v62 }
 0xc29   : > { %v15412_v43 = vpop.f32.mrb[95].mxu0 }
 0xc2b   : > { %17786 = vmatpush1.bf16.msra.mxu1 %v23594_v16 }
 0xc2c   : > { %17787 = vmatprep.subr.bf16.mxu1 %v23599_v11 }
 0xc2f   : > { %17788 = vmatpush1.bf16.msra.mxu1 %v23597_v1 }
 0xc32   : > { %17806 = vmatmul.mubr.bf16.vlgmr.msra.gmra.mrb[84].mxu1 %v30265_v39  ;;  %v17855_v39 = vunpack.c.0.s8 %v17854_v24 }
 0xc34   : > { %v17858_v63 = vsub.s32 %v17855_v39, %v23732_v27 }
 0xc36   : > { %v17859_v44 = vrot.slane %v17851_v45, %v17858_v63 }
 0xca5   : > { %v17725_v32 = vpop.f32.mrb[80].mxu1 }
 0xca6   : > { %v21235_v20 = vadd.f32 %v30303_v53, %v17725_v32  ;;  %v17727_v4 = vpop.f32.mrb[81].mxu1 }
 0xca7   : > { %v21246_v13 = vadd.f32 %v30309_v0, %v17727_v4  ;;  %v17729_v12 = vpop.f32.mrb[82].mxu1 }
 0xca8   : > { %v17730_v55 = vpop.f32.mrb[83].mxu1 }
 0xca9   : > { %v17822_v23 = vcombine.low %v21235_v20, %v21246_v13 }
 0xcab   : > { %v17830_v18 = vrot.slane %v17822_v23, %v23735_v28 }
 0xd05   : > { %v17807_v15 = vpop.f32.mrb[84].mxu1 }
 0xd06   : > { %v21257_v52 = vadd.f32 %v21256_v49, %v17807_v15  ;;  %v17809_v47 = vpop.f32.mrb[85].mxu1 }
 0xd07   : > { %v21268_v29 = vadd.f32 %v21267_v7, %v17809_v47  ;;  %v17811_v61 = vpop.f32.mrb[86].mxu1 }
 0xd08   : > { %v17812_v38 = vpop.f32.mrb[87].mxu1 }
 0xd09   : > { %v17823_v17 = vcombine.low %v21257_v52, %v21268_v29 }
 0xd0b   : > { %v17837_v53 = vrot.slane %v17823_v17, %v23735_v28 }
 0xd0d   : > { %v17838_v41 = vcombine.low %v17830_v18, %v17837_v53  ;;  %v17839_v0 = vcombine.high %v17830_v18, %v17837_v53 }
 0xd0f   : > { %v20939_v51 = vrot.slane %v17838_v41, 9  ;;  %v20940_v48 = vrot.slane %v17839_v0, 9 }
 0xd11   : > { %v17848_v22 = vmax.f32 %v17838_v41, %v20939_v51  ;;  %v17849_v37 = vmax.f32 %v17839_v0, %v20940_v48 }
 0xd13   : > { %v17850_v3 = vmax.f32 %v17848_v22, %v17849_v37 }
 0xd15   : > { %v17861_v59 = vadd.f32 %v17859_v44, %v17850_v3 }
 0xd17   : > { %v17869_v27 = vrot.slane %v17861_v59, %v27429_v42 }
 0xd19   : > { %17875 = vst.msk [vmem:[%s370_s21] sm:$0xf] %vm17873_vm5, %v17869_v27 }
 0xd1a PF: > { %s21_s13 = sadd.s32 1, %s23614_s13  }
 0xd1b   : > { %p18_p4 = scmp.ge.s32.totalorder %s21_s13, 4  }
 0xd1d   :  { %20 = sbr.rel (!%p18_p4) target bundleno = 1 (0x1), region = 125 }

</bundles_post_ra>
